<compile_context>
chip_gen: v6e
topology: v6e:2x2x1
jax: 0.10.0
libtpu: 0.0.40
codegen_flags: <defaults>
</compile_context>

<pallas_src>
import jax
import jax.numpy as jnp
import numpy as np
from jax.experimental import pallas as pl
from jax.experimental.pallas import tpu as pltpu


def _round_up(x, m):
    return (x + m - 1) // m * m


def _make_basic_block_kernel(H, W, C, p2_rows, lead):
    """Kernel closed over static spatial/channel sizes.

    Flat layout: padded image (H+2, W+2, C) is stored row-major as
    ((H+2)*(W+2), C).  Accumulators cover H*(W+2) rows: row q -> (y, xx) with
    y = q // (W+2), xx = q % (W+2); rows with xx >= W are discarded.
    Tap (ky, kx) of output row q reads flat index q + ky*(W+2) + kx.
    """
    Wp = W + 2
    HW2 = H * Wp
    store_off = lead + Wp + 1          # multiple of 16 by construction of `lead`

    def kernel(x_ref, w1_ref, w2_ref, b1_ref, b2_ref, out_ref, p2_ref):
        # ---- conv1 (3x3, pad=1, no bias, BN scale pre-folded) ------------
        # BN1 bias folded into the accumulator init (one pass saved).
        acc1 = jnp.broadcast_to(b1_ref[...], (HW2, C)).astype(jnp.float32)
        for t in range(9):
            ky, kx = t // 3, t % 3
            off = ky * Wp + kx
            patch = x_ref[pl.ds(off, HW2), :].astype(jnp.bfloat16)
            acc1 = acc1 + jnp.dot(patch, w1_ref[t],
                                  preferred_element_type=jnp.float32)
        y1 = jnp.maximum(acc1, 0.0)                      # ReLU (f32)

        # Zero the wrap columns (xx >= W): they land exactly on the zero-padding
        # positions of the conv2 buffer, so no extra interior padding is needed.
        col = jax.lax.broadcasted_iota(jnp.int32, (H, Wp, 1), 1).reshape(HW2, 1)
        y1 = jnp.where(col < W, y1, 0.0)

        # Zero only the head / tail padding rows of the conv2 buffer (edges),
        # then one tile-aligned bulk store of the bf16 activation.
        p2_ref[0:store_off, :] = jnp.zeros((store_off, C), jnp.bfloat16)
        p2_ref[store_off + HW2:, :] = jnp.zeros(
            (p2_rows - store_off - HW2, C), jnp.bfloat16)
        p2_ref[pl.ds(store_off, HW2), :] = y1.astype(jnp.bfloat16)

        # ---- conv2 (3x3, pad=1, no bias, BN scale pre-folded) ------------
        # Init = BN2 bias + residual (center tap of the padded input, f32),
        # so the epilogue is a single ReLU over the accumulator.
        res = x_ref[pl.ds(Wp + 1, HW2), :]
        acc2 = res + b2_ref[...]
        for t in range(9):
            ky, kx = t // 3, t % 3
            off = lead + ky * Wp + kx
            patch = p2_ref[pl.ds(off, HW2), :]          # already bf16
            acc2 = acc2 + jnp.dot(patch, w2_ref[t],
                                  preferred_element_type=jnp.float32)

        # ---- ReLU, drop the 2 wrap columns per row, lane-dense store ------
        y2 = jnp.maximum(acc2, 0.0)
        out_ref[...] = y2.reshape(H, Wp, C)[:, :W, :].astype(out_ref.dtype)

    return kernel


def basic_block_pallas(x_nhwc, w1_folded, w2_folded, b1, b2):
    """x_nhwc: (N, H, W, C) f32.  w*_folded: (9, C, C) bf16 (BN scale folded).
    b1, b2: (1, C) f32 folded BN biases."""
    N, H, W, C = x_nhwc.shape
    Wp = W + 2
    HW2 = H * Wp
    lead = (-(Wp + 1)) % 16                      # aligns the bf16 bulk store
    p1_rows = _round_up((H + 2) * Wp + 2, 8)     # +2: tap over-read of wrap rows
    p2_rows = _round_up(lead + HW2 + 2 * W + 6, 16)

    # Single flat zero-padded input stream (also provides the residual).
    xp = jnp.pad(x_nhwc, ((0, 0), (1, 1), (1, 1), (0, 0)))
    xp = xp.reshape(N, (H + 2) * Wp, C)
    xp = jnp.pad(xp, ((0, 0), (0, p1_rows - (H + 2) * Wp), (0, 0)))

    kernel = _make_basic_block_kernel(H, W, C, p2_rows, lead)

    grid_spec = pltpu.PrefetchScalarGridSpec(
        num_scalar_prefetch=0,
        grid=(N,),
        in_specs=[
            pl.BlockSpec((None, p1_rows, C), lambda n: (n, 0, 0)),   # flat padded x
            pl.BlockSpec((9, C, C), lambda n: (0, 0, 0)),            # w1 (bf16)
            pl.BlockSpec((9, C, C), lambda n: (0, 0, 0)),            # w2 (bf16)
            pl.BlockSpec((1, C), lambda n: (0, 0)),                  # bias1
            pl.BlockSpec((1, C), lambda n: (0, 0)),                  # bias2
        ],
        out_specs=pl.BlockSpec((None, H, W, C), lambda n: (n, 0, 0, 0)),
        scratch_shapes=[pltpu.VMEM((p2_rows, C), jnp.bfloat16)],
    )

    return pl.pallas_call(
        kernel,
        out_shape=jax.ShapeDtypeStruct((N, H, W, C), x_nhwc.dtype),
        grid_spec=grid_spec,
        compiler_params=pltpu.CompilerParams(
            dimension_semantics=("parallel",)),
    )(xp, w1_folded, w2_folded, b1, b2)


def basic_block_reference(x_nhwc, w1_folded, w2_folded, b1, b2):
    """Pure-JAX reference mirroring the kernel numerics (bf16 conv operands,
    f32 accumulation, f32 elementwise)."""
    C = x_nhwc.shape[-1]
    w1 = w1_folded.reshape(3, 3, C, C)
    w2 = w2_folded.reshape(3, 3, C, C)

    def conv(x, w):
        return jax.lax.conv_general_dilated(
            x.astype(jnp.bfloat16), w, window_strides=(1, 1), padding="SAME",
            dimension_numbers=("NHWC", "HWIO", "NHWC"),
            preferred_element_type=jnp.float32)

    y1 = jnp.maximum(conv(x_nhwc, w1) + b1, 0.0)
    y2 = conv(y1, w2) + b2
    return jnp.maximum(y2 + x_nhwc, 0.0)


if __name__ == "__main__":
    # layer1 BasicBlock of ResNet_FeatureExtractor(output_channel=512):
    # inplanes == planes == 128 (lane-dense), small spatial extent.
    N, C, H, W = 2, 128, 16, 16
    key = jax.random.PRNGKey(0)
    kx, kw1, kw2 = jax.random.split(key, 3)

    # Input in PyTorch NCHW convention, moved to NHWC for the kernel.
    x_nchw = jax.random.normal(kx, (N, C, H, W), dtype=jnp.float32)
    x_nhwc = jnp.transpose(x_nchw, (0, 2, 3, 1))

    # PyTorch conv weights (OIHW) -> HWIO.
    w1_oihw = 0.05 * jax.random.normal(kw1, (C, C, 3, 3), dtype=jnp.float32)
    w2_oihw = 0.05 * jax.random.normal(kw2, (C, C, 3, 3), dtype=jnp.float32)
    w1_hwio = jnp.transpose(w1_oihw, (2, 3, 1, 0))
    w2_hwio = jnp.transpose(w2_oihw, (2, 3, 1, 0))

    # Eval-mode BatchNorm parameters, folded into scale/bias.
    eps = 1e-5
    ar = jnp.arange(C, dtype=jnp.float32)
    gamma1, beta1 = 1.0 + 0.003 * ar, 0.02 * jnp.cos(ar)
    mean1, var1 = 0.01 * jnp.sin(ar), 1.0 + 0.02 * ar
    gamma2, beta2 = 1.0 - 0.002 * ar, -0.02 * jnp.sin(ar)
    mean2, var2 = -0.01 * jnp.cos(ar), 1.0 + 0.01 * ar
    s1 = gamma1 / jnp.sqrt(var1 + eps)
    s2 = gamma2 / jnp.sqrt(var2 + eps)
    b1 = (beta1 - mean1 * s1).reshape(1, C)
    b2 = (beta2 - mean2 * s2).reshape(1, C)

    # Fold BN scales into the conv weights; ship them to HBM as bf16 (9, C, C).
    w1_folded = (w1_hwio * s1).reshape(9, C, C).astype(jnp.bfloat16)
    w2_folded = (w2_hwio * s2).reshape(9, C, C).astype(jnp.bfloat16)

    out_nhwc = basic_block_pallas(x_nhwc, w1_folded, w2_folded, b1, b2)
    out_nhwc = jax.block_until_ready(out_nhwc)

    ref_nhwc = basic_block_reference(x_nhwc, w1_folded, w2_folded, b1, b2)
    np.testing.assert_allclose(np.asarray(out_nhwc), np.asarray(ref_nhwc),
                               rtol=2e-2, atol=2e-2)

    # Back to NCHW to match the PyTorch output convention (shape check only).
    out_nchw = jnp.transpose(out_nhwc, (0, 3, 1, 2))
    assert out_nchw.shape == (N, C, H, W)

    print("KERNEL_OK")
</pallas_src>

<mosaic_0001>
module attributes {stable_mosaic.version = 11 : i64} {
  func.func @kernel(%arg0: i32, %arg1: memref<1x328x128xf32, #tpu.memory_space<vmem>>, %arg2: memref<9x128x128xbf16, #tpu.memory_space<vmem>>, %arg3: memref<9x128x128xbf16, #tpu.memory_space<vmem>>, %arg4: memref<1x128xf32, #tpu.memory_space<vmem>>, %arg5: memref<1x128xf32, #tpu.memory_space<vmem>>, %arg6: memref<1x16x16x128xf32, #tpu.memory_space<vmem>>, %arg7: memref<352x128xbf16, #tpu.memory_space<vmem>>) attributes {dimension_semantics = [#tpu.dimension_semantics<parallel>], iteration_bounds = array<i64: 2>, scalar_prefetch = 0 : i64, scratch_operands = 1 : i64, tpu.core_type = #tpu.core_type<tc>, window_params = [{transform_indices = @transform_0, window_bounds = array<i64: 1, 328, 128>}, {pipeline_mode = #tpu.pipeline_mode<synchronous>, transform_indices = @transform_1, window_bounds = array<i64: 9, 128, 128>}, {pipeline_mode = #tpu.pipeline_mode<synchronous>, transform_indices = @transform_2, window_bounds = array<i64: 9, 128, 128>}, {pipeline_mode = #tpu.pipeline_mode<synchronous>, transform_indices = @transform_3, window_bounds = array<i64: 1, 128>}, {pipeline_mode = #tpu.pipeline_mode<synchronous>, transform_indices = @transform_4, window_bounds = array<i64: 1, 128>}, {transform_indices = @transform_5, window_bounds = array<i64: 1, 16, 16, 128>}]} {
    %c0 = arith.constant 0 : index
    %c0_0 = arith.constant 0 : index
    %0 = vector.load %arg4[%c0, %c0_0] : memref<1x128xf32, #tpu.memory_space<vmem>>, vector<1x128xf32>
    %1 = vector.shape_cast %0 : vector<1x128xf32> to vector<1x128xf32>
    %2 = vector.broadcast %1 : vector<1x128xf32> to vector<288x128xf32>
    %c0_1 = arith.constant 0 : index
    %c0_2 = arith.constant 0 : index
    %c0_3 = arith.constant 0 : index
    %3 = vector.load %arg1[%c0_1, %c0_2, %c0_3] : memref<1x328x128xf32, #tpu.memory_space<vmem>>, vector<1x288x128xf32>
    %4 = vector.shape_cast %3 : vector<1x288x128xf32> to vector<288x128xf32>
    %5 = arith.truncf %4 : vector<288x128xf32> to vector<288x128xbf16>
    %c0_4 = arith.constant 0 : index
    %c0_5 = arith.constant 0 : index
    %c0_6 = arith.constant 0 : index
    %6 = vector.load %arg2[%c0_4, %c0_5, %c0_6] : memref<9x128x128xbf16, #tpu.memory_space<vmem>>, vector<1x128x128xbf16>
    %7 = vector.shape_cast %6 : vector<1x128x128xbf16> to vector<128x128xbf16>
    %cst = arith.constant dense<0.000000e+00> : vector<288x128xf32>
    %8 = tpu.matmul %5, %7, %cst {dimension_numbers = #tpu.dot_dimension_numbers<[1], [0], [0], [1], [0, 0, 1, 1], [], []>} : vector<288x128xbf16>, vector<128x128xbf16>, vector<288x128xf32> -> vector<288x128xf32>
    %9 = arith.addf %2, %8 : vector<288x128xf32>
    %c0_7 = arith.constant 0 : index
    %c1 = arith.constant 1 : index
    %c0_8 = arith.constant 0 : index
    %10 = vector.load %arg1[%c0_7, %c1, %c0_8] : memref<1x328x128xf32, #tpu.memory_space<vmem>>, vector<1x288x128xf32>
    %11 = vector.shape_cast %10 : vector<1x288x128xf32> to vector<288x128xf32>
    %12 = arith.truncf %11 : vector<288x128xf32> to vector<288x128xbf16>
    %c1_9 = arith.constant 1 : index
    %c0_10 = arith.constant 0 : index
    %c0_11 = arith.constant 0 : index
    %13 = vector.load %arg2[%c1_9, %c0_10, %c0_11] : memref<9x128x128xbf16, #tpu.memory_space<vmem>>, vector<1x128x128xbf16>
    %14 = vector.shape_cast %13 : vector<1x128x128xbf16> to vector<128x128xbf16>
    %cst_12 = arith.constant dense<0.000000e+00> : vector<288x128xf32>
    %15 = tpu.matmul %12, %14, %cst_12 {dimension_numbers = #tpu.dot_dimension_numbers<[1], [0], [0], [1], [0, 0, 1, 1], [], []>} : vector<288x128xbf16>, vector<128x128xbf16>, vector<288x128xf32> -> vector<288x128xf32>
    %16 = arith.addf %9, %15 : vector<288x128xf32>
    %c0_13 = arith.constant 0 : index
    %c2 = arith.constant 2 : index
    %c0_14 = arith.constant 0 : index
    %17 = vector.load %arg1[%c0_13, %c2, %c0_14] : memref<1x328x128xf32, #tpu.memory_space<vmem>>, vector<1x288x128xf32>
    %18 = vector.shape_cast %17 : vector<1x288x128xf32> to vector<288x128xf32>
    %19 = arith.truncf %18 : vector<288x128xf32> to vector<288x128xbf16>
    %c2_15 = arith.constant 2 : index
    %c0_16 = arith.constant 0 : index
    %c0_17 = arith.constant 0 : index
    %20 = vector.load %arg2[%c2_15, %c0_16, %c0_17] : memref<9x128x128xbf16, #tpu.memory_space<vmem>>, vector<1x128x128xbf16>
    %21 = vector.shape_cast %20 : vector<1x128x128xbf16> to vector<128x128xbf16>
    %cst_18 = arith.constant dense<0.000000e+00> : vector<288x128xf32>
    %22 = tpu.matmul %19, %21, %cst_18 {dimension_numbers = #tpu.dot_dimension_numbers<[1], [0], [0], [1], [0, 0, 1, 1], [], []>} : vector<288x128xbf16>, vector<128x128xbf16>, vector<288x128xf32> -> vector<288x128xf32>
    %23 = arith.addf %16, %22 : vector<288x128xf32>
    %c0_19 = arith.constant 0 : index
    %c18 = arith.constant 18 : index
    %c0_20 = arith.constant 0 : index
    %24 = vector.load %arg1[%c0_19, %c18, %c0_20] : memref<1x328x128xf32, #tpu.memory_space<vmem>>, vector<1x288x128xf32>
    %25 = vector.shape_cast %24 : vector<1x288x128xf32> to vector<288x128xf32>
    %26 = arith.truncf %25 : vector<288x128xf32> to vector<288x128xbf16>
    %c3 = arith.constant 3 : index
    %c0_21 = arith.constant 0 : index
    %c0_22 = arith.constant 0 : index
    %27 = vector.load %arg2[%c3, %c0_21, %c0_22] : memref<9x128x128xbf16, #tpu.memory_space<vmem>>, vector<1x128x128xbf16>
    %28 = vector.shape_cast %27 : vector<1x128x128xbf16> to vector<128x128xbf16>
    %cst_23 = arith.constant dense<0.000000e+00> : vector<288x128xf32>
    %29 = tpu.matmul %26, %28, %cst_23 {dimension_numbers = #tpu.dot_dimension_numbers<[1], [0], [0], [1], [0, 0, 1, 1], [], []>} : vector<288x128xbf16>, vector<128x128xbf16>, vector<288x128xf32> -> vector<288x128xf32>
    %30 = arith.addf %23, %29 : vector<288x128xf32>
    %c0_24 = arith.constant 0 : index
    %c19 = arith.constant 19 : index
    %c0_25 = arith.constant 0 : index
    %31 = vector.load %arg1[%c0_24, %c19, %c0_25] : memref<1x328x128xf32, #tpu.memory_space<vmem>>, vector<1x288x128xf32>
    %32 = vector.shape_cast %31 : vector<1x288x128xf32> to vector<288x128xf32>
    %33 = arith.truncf %32 : vector<288x128xf32> to vector<288x128xbf16>
    %c4 = arith.constant 4 : index
    %c0_26 = arith.constant 0 : index
    %c0_27 = arith.constant 0 : index
    %34 = vector.load %arg2[%c4, %c0_26, %c0_27] : memref<9x128x128xbf16, #tpu.memory_space<vmem>>, vector<1x128x128xbf16>
    %35 = vector.shape_cast %34 : vector<1x128x128xbf16> to vector<128x128xbf16>
    %cst_28 = arith.constant dense<0.000000e+00> : vector<288x128xf32>
    %36 = tpu.matmul %33, %35, %cst_28 {dimension_numbers = #tpu.dot_dimension_numbers<[1], [0], [0], [1], [0, 0, 1, 1], [], []>} : vector<288x128xbf16>, vector<128x128xbf16>, vector<288x128xf32> -> vector<288x128xf32>
    %37 = arith.addf %30, %36 : vector<288x128xf32>
    %c0_29 = arith.constant 0 : index
    %c20 = arith.constant 20 : index
    %c0_30 = arith.constant 0 : index
    %38 = vector.load %arg1[%c0_29, %c20, %c0_30] : memref<1x328x128xf32, #tpu.memory_space<vmem>>, vector<1x288x128xf32>
    %39 = vector.shape_cast %38 : vector<1x288x128xf32> to vector<288x128xf32>
    %40 = arith.truncf %39 : vector<288x128xf32> to vector<288x128xbf16>
    %c5 = arith.constant 5 : index
    %c0_31 = arith.constant 0 : index
    %c0_32 = arith.constant 0 : index
    %41 = vector.load %arg2[%c5, %c0_31, %c0_32] : memref<9x128x128xbf16, #tpu.memory_space<vmem>>, vector<1x128x128xbf16>
    %42 = vector.shape_cast %41 : vector<1x128x128xbf16> to vector<128x128xbf16>
    %cst_33 = arith.constant dense<0.000000e+00> : vector<288x128xf32>
    %43 = tpu.matmul %40, %42, %cst_33 {dimension_numbers = #tpu.dot_dimension_numbers<[1], [0], [0], [1], [0, 0, 1, 1], [], []>} : vector<288x128xbf16>, vector<128x128xbf16>, vector<288x128xf32> -> vector<288x128xf32>
    %44 = arith.addf %37, %43 : vector<288x128xf32>
    %c0_34 = arith.constant 0 : index
    %c36 = arith.constant 36 : index
    %c0_35 = arith.constant 0 : index
    %45 = vector.load %arg1[%c0_34, %c36, %c0_35] : memref<1x328x128xf32, #tpu.memory_space<vmem>>, vector<1x288x128xf32>
    %46 = vector.shape_cast %45 : vector<1x288x128xf32> to vector<288x128xf32>
    %47 = arith.truncf %46 : vector<288x128xf32> to vector<288x128xbf16>
    %c6 = arith.constant 6 : index
    %c0_36 = arith.constant 0 : index
    %c0_37 = arith.constant 0 : index
    %48 = vector.load %arg2[%c6, %c0_36, %c0_37] : memref<9x128x128xbf16, #tpu.memory_space<vmem>>, vector<1x128x128xbf16>
    %49 = vector.shape_cast %48 : vector<1x128x128xbf16> to vector<128x128xbf16>
    %cst_38 = arith.constant dense<0.000000e+00> : vector<288x128xf32>
    %50 = tpu.matmul %47, %49, %cst_38 {dimension_numbers = #tpu.dot_dimension_numbers<[1], [0], [0], [1], [0, 0, 1, 1], [], []>} : vector<288x128xbf16>, vector<128x128xbf16>, vector<288x128xf32> -> vector<288x128xf32>
    %51 = arith.addf %44, %50 : vector<288x128xf32>
    %c0_39 = arith.constant 0 : index
    %c37 = arith.constant 37 : index
    %c0_40 = arith.constant 0 : index
    %52 = vector.load %arg1[%c0_39, %c37, %c0_40] : memref<1x328x128xf32, #tpu.memory_space<vmem>>, vector<1x288x128xf32>
    %53 = vector.shape_cast %52 : vector<1x288x128xf32> to vector<288x128xf32>
    %54 = arith.truncf %53 : vector<288x128xf32> to vector<288x128xbf16>
    %c7 = arith.constant 7 : index
    %c0_41 = arith.constant 0 : index
    %c0_42 = arith.constant 0 : index
    %55 = vector.load %arg2[%c7, %c0_41, %c0_42] : memref<9x128x128xbf16, #tpu.memory_space<vmem>>, vector<1x128x128xbf16>
    %56 = vector.shape_cast %55 : vector<1x128x128xbf16> to vector<128x128xbf16>
    %cst_43 = arith.constant dense<0.000000e+00> : vector<288x128xf32>
    %57 = tpu.matmul %54, %56, %cst_43 {dimension_numbers = #tpu.dot_dimension_numbers<[1], [0], [0], [1], [0, 0, 1, 1], [], []>} : vector<288x128xbf16>, vector<128x128xbf16>, vector<288x128xf32> -> vector<288x128xf32>
    %58 = arith.addf %51, %57 : vector<288x128xf32>
    %c0_44 = arith.constant 0 : index
    %c38 = arith.constant 38 : index
    %c0_45 = arith.constant 0 : index
    %59 = vector.load %arg1[%c0_44, %c38, %c0_45] : memref<1x328x128xf32, #tpu.memory_space<vmem>>, vector<1x288x128xf32>
    %60 = vector.shape_cast %59 : vector<1x288x128xf32> to vector<288x128xf32>
    %61 = arith.truncf %60 : vector<288x128xf32> to vector<288x128xbf16>
    %c8 = arith.constant 8 : index
    %c0_46 = arith.constant 0 : index
    %c0_47 = arith.constant 0 : index
    %62 = vector.load %arg2[%c8, %c0_46, %c0_47] : memref<9x128x128xbf16, #tpu.memory_space<vmem>>, vector<1x128x128xbf16>
    %63 = vector.shape_cast %62 : vector<1x128x128xbf16> to vector<128x128xbf16>
    %cst_48 = arith.constant dense<0.000000e+00> : vector<288x128xf32>
    %64 = tpu.matmul %61, %63, %cst_48 {dimension_numbers = #tpu.dot_dimension_numbers<[1], [0], [0], [1], [0, 0, 1, 1], [], []>} : vector<288x128xbf16>, vector<128x128xbf16>, vector<288x128xf32> -> vector<288x128xf32>
    %65 = arith.addf %58, %64 : vector<288x128xf32>
    %cst_49 = arith.constant 0.000000e+00 : f32
    %66 = vector.broadcast %cst_49 : f32 to vector<288x128xf32>
    %67 = arith.maximumf %65, %66 : vector<288x128xf32>
    %68 = tpu.iota {dimensions = array<i32: 1>} : vector<16x18x1xi32>
    %69 = vector.shape_cast %68 : vector<16x18x1xi32> to vector<288x1xi32>
    %c16_i32 = arith.constant 16 : i32
    %70 = vector.broadcast %c16_i32 : i32 to vector<288x1xi32>
    %71 = arith.cmpi slt, %69, %70 : vector<288x1xi32>
    %cst_50 = arith.constant 0.000000e+00 : f32
    %72 = vector.shape_cast %71 : vector<288x1xi1> to vector<288x1xi1>
    %73 = vector.broadcast %72 : vector<288x1xi1> to vector<288x128xi1>
    %74 = vector.broadcast %cst_50 : f32 to vector<288x128xf32>
    %75 = arith.select %73, %67, %74 : vector<288x128xi1>, vector<288x128xf32>
    %cst_51 = arith.constant 0.000000e+00 : bf16
    %76 = vector.broadcast %cst_51 : bf16 to vector<32x128xbf16>
    %c0_52 = arith.constant 0 : index
    %c0_53 = arith.constant 0 : index
    %77 = vector.load %arg7[%c0_52, %c0_53] : memref<352x128xbf16, #tpu.memory_space<vmem>>, vector<32x128xbf16>
    tpu.vector_store %arg7[%c0_52, %c0_53], %76 {strides = array<i32>} : memref<352x128xbf16, #tpu.memory_space<vmem>>, vector<32x128xbf16>,
    %cst_54 = arith.constant 0.000000e+00 : bf16
    %78 = vector.broadcast %cst_54 : bf16 to vector<32x128xbf16>
    %c320 = arith.constant 320 : index
    %c0_55 = arith.constant 0 : index
    %79 = vector.load %arg7[%c320, %c0_55] : memref<352x128xbf16, #tpu.memory_space<vmem>>, vector<32x128xbf16>
    tpu.vector_store %arg7[%c320, %c0_55], %78 {strides = array<i32>} : memref<352x128xbf16, #tpu.memory_space<vmem>>, vector<32x128xbf16>,
    %80 = arith.truncf %75 : vector<288x128xf32> to vector<288x128xbf16>
    %c32 = arith.constant 32 : index
    %c0_56 = arith.constant 0 : index
    %81 = vector.load %arg7[%c32, %c0_56] : memref<352x128xbf16, #tpu.memory_space<vmem>>, vector<288x128xbf16>
    tpu.vector_store %arg7[%c32, %c0_56], %80 {strides = array<i32>} : memref<352x128xbf16, #tpu.memory_space<vmem>>, vector<288x128xbf16>,
    %c0_57 = arith.constant 0 : index
    %c19_58 = arith.constant 19 : index
    %c0_59 = arith.constant 0 : index
    %82 = vector.load %arg1[%c0_57, %c19_58, %c0_59] : memref<1x328x128xf32, #tpu.memory_space<vmem>>, vector<1x288x128xf32>
    %83 = vector.shape_cast %82 : vector<1x288x128xf32> to vector<288x128xf32>
    %c0_60 = arith.constant 0 : index
    %c0_61 = arith.constant 0 : index
    %84 = vector.load %arg5[%c0_60, %c0_61] : memref<1x128xf32, #tpu.memory_space<vmem>>, vector<1x128xf32>
    %85 = vector.broadcast %84 : vector<1x128xf32> to vector<288x128xf32>
    %86 = arith.addf %83, %85 : vector<288x128xf32>
    %c13 = arith.constant 13 : index
    %c0_62 = arith.constant 0 : index
    %87 = vector.load %arg7[%c13, %c0_62] : memref<352x128xbf16, #tpu.memory_space<vmem>>, vector<288x128xbf16>
    %c0_63 = arith.constant 0 : index
    %c0_64 = arith.constant 0 : index
    %c0_65 = arith.constant 0 : index
    %88 = vector.load %arg3[%c0_63, %c0_64, %c0_65] : memref<9x128x128xbf16, #tpu.memory_space<vmem>>, vector<1x128x128xbf16>
    %89 = vector.shape_cast %88 : vector<1x128x128xbf16> to vector<128x128xbf16>
    %cst_66 = arith.constant dense<0.000000e+00> : vector<288x128xf32>
    %90 = tpu.matmul %87, %89, %cst_66 {dimension_numbers = #tpu.dot_dimension_numbers<[1], [0], [0], [1], [0, 0, 1, 1], [], []>} : vector<288x128xbf16>, vector<128x128xbf16>, vector<288x128xf32> -> vector<288x128xf32>
    %91 = arith.addf %86, %90 : vector<288x128xf32>
    %c14 = arith.constant 14 : index
    %c0_67 = arith.constant 0 : index
    %92 = vector.load %arg7[%c14, %c0_67] : memref<352x128xbf16, #tpu.memory_space<vmem>>, vector<288x128xbf16>
    %c1_68 = arith.constant 1 : index
    %c0_69 = arith.constant 0 : index
    %c0_70 = arith.constant 0 : index
    %93 = vector.load %arg3[%c1_68, %c0_69, %c0_70] : memref<9x128x128xbf16, #tpu.memory_space<vmem>>, vector<1x128x128xbf16>
    %94 = vector.shape_cast %93 : vector<1x128x128xbf16> to vector<128x128xbf16>
    %cst_71 = arith.constant dense<0.000000e+00> : vector<288x128xf32>
    %95 = tpu.matmul %92, %94, %cst_71 {dimension_numbers = #tpu.dot_dimension_numbers<[1], [0], [0], [1], [0, 0, 1, 1], [], []>} : vector<288x128xbf16>, vector<128x128xbf16>, vector<288x128xf32> -> vector<288x128xf32>
    %96 = arith.addf %91, %95 : vector<288x128xf32>
    %c15 = arith.constant 15 : index
    %c0_72 = arith.constant 0 : index
    %97 = vector.load %arg7[%c15, %c0_72] : memref<352x128xbf16, #tpu.memory_space<vmem>>, vector<288x128xbf16>
    %c2_73 = arith.constant 2 : index
    %c0_74 = arith.constant 0 : index
    %c0_75 = arith.constant 0 : index
    %98 = vector.load %arg3[%c2_73, %c0_74, %c0_75] : memref<9x128x128xbf16, #tpu.memory_space<vmem>>, vector<1x128x128xbf16>
    %99 = vector.shape_cast %98 : vector<1x128x128xbf16> to vector<128x128xbf16>
    %cst_76 = arith.constant dense<0.000000e+00> : vector<288x128xf32>
    %100 = tpu.matmul %97, %99, %cst_76 {dimension_numbers = #tpu.dot_dimension_numbers<[1], [0], [0], [1], [0, 0, 1, 1], [], []>} : vector<288x128xbf16>, vector<128x128xbf16>, vector<288x128xf32> -> vector<288x128xf32>
    %101 = arith.addf %96, %100 : vector<288x128xf32>
    %c31 = arith.constant 31 : index
    %c0_77 = arith.constant 0 : index
    %102 = vector.load %arg7[%c31, %c0_77] : memref<352x128xbf16, #tpu.memory_space<vmem>>, vector<288x128xbf16>
    %c3_78 = arith.constant 3 : index
    %c0_79 = arith.constant 0 : index
    %c0_80 = arith.constant 0 : index
    %103 = vector.load %arg3[%c3_78, %c0_79, %c0_80] : memref<9x128x128xbf16, #tpu.memory_space<vmem>>, vector<1x128x128xbf16>
    %104 = vector.shape_cast %103 : vector<1x128x128xbf16> to vector<128x128xbf16>
    %cst_81 = arith.constant dense<0.000000e+00> : vector<288x128xf32>
    %105 = tpu.matmul %102, %104, %cst_81 {dimension_numbers = #tpu.dot_dimension_numbers<[1], [0], [0], [1], [0, 0, 1, 1], [], []>} : vector<288x128xbf16>, vector<128x128xbf16>, vector<288x128xf32> -> vector<288x128xf32>
    %106 = arith.addf %101, %105 : vector<288x128xf32>
    %c32_82 = arith.constant 32 : index
    %c0_83 = arith.constant 0 : index
    %107 = vector.load %arg7[%c32_82, %c0_83] : memref<352x128xbf16, #tpu.memory_space<vmem>>, vector<288x128xbf16>
    %c4_84 = arith.constant 4 : index
    %c0_85 = arith.constant 0 : index
    %c0_86 = arith.constant 0 : index
    %108 = vector.load %arg3[%c4_84, %c0_85, %c0_86] : memref<9x128x128xbf16, #tpu.memory_space<vmem>>, vector<1x128x128xbf16>
    %109 = vector.shape_cast %108 : vector<1x128x128xbf16> to vector<128x128xbf16>
    %cst_87 = arith.constant dense<0.000000e+00> : vector<288x128xf32>
    %110 = tpu.matmul %107, %109, %cst_87 {dimension_numbers = #tpu.dot_dimension_numbers<[1], [0], [0], [1], [0, 0, 1, 1], [], []>} : vector<288x128xbf16>, vector<128x128xbf16>, vector<288x128xf32> -> vector<288x128xf32>
    %111 = arith.addf %106, %110 : vector<288x128xf32>
    %c33 = arith.constant 33 : index
    %c0_88 = arith.constant 0 : index
    %112 = vector.load %arg7[%c33, %c0_88] : memref<352x128xbf16, #tpu.memory_space<vmem>>, vector<288x128xbf16>
    %c5_89 = arith.constant 5 : index
    %c0_90 = arith.constant 0 : index
    %c0_91 = arith.constant 0 : index
    %113 = vector.load %arg3[%c5_89, %c0_90, %c0_91] : memref<9x128x128xbf16, #tpu.memory_space<vmem>>, vector<1x128x128xbf16>
    %114 = vector.shape_cast %113 : vector<1x128x128xbf16> to vector<128x128xbf16>
    %cst_92 = arith.constant dense<0.000000e+00> : vector<288x128xf32>
    %115 = tpu.matmul %112, %114, %cst_92 {dimension_numbers = #tpu.dot_dimension_numbers<[1], [0], [0], [1], [0, 0, 1, 1], [], []>} : vector<288x128xbf16>, vector<128x128xbf16>, vector<288x128xf32> -> vector<288x128xf32>
    %116 = arith.addf %111, %115 : vector<288x128xf32>
    %c49 = arith.constant 49 : index
    %c0_93 = arith.constant 0 : index
    %117 = vector.load %arg7[%c49, %c0_93] : memref<352x128xbf16, #tpu.memory_space<vmem>>, vector<288x128xbf16>
    %c6_94 = arith.constant 6 : index
    %c0_95 = arith.constant 0 : index
    %c0_96 = arith.constant 0 : index
    %118 = vector.load %arg3[%c6_94, %c0_95, %c0_96] : memref<9x128x128xbf16, #tpu.memory_space<vmem>>, vector<1x128x128xbf16>
    %119 = vector.shape_cast %118 : vector<1x128x128xbf16> to vector<128x128xbf16>
    %cst_97 = arith.constant dense<0.000000e+00> : vector<288x128xf32>
    %120 = tpu.matmul %117, %119, %cst_97 {dimension_numbers = #tpu.dot_dimension_numbers<[1], [0], [0], [1], [0, 0, 1, 1], [], []>} : vector<288x128xbf16>, vector<128x128xbf16>, vector<288x128xf32> -> vector<288x128xf32>
    %121 = arith.addf %116, %120 : vector<288x128xf32>
    %c50 = arith.constant 50 : index
    %c0_98 = arith.constant 0 : index
    %122 = vector.load %arg7[%c50, %c0_98] : memref<352x128xbf16, #tpu.memory_space<vmem>>, vector<288x128xbf16>
    %c7_99 = arith.constant 7 : index
    %c0_100 = arith.constant 0 : index
    %c0_101 = arith.constant 0 : index
    %123 = vector.load %arg3[%c7_99, %c0_100, %c0_101] : memref<9x128x128xbf16, #tpu.memory_space<vmem>>, vector<1x128x128xbf16>
    %124 = vector.shape_cast %123 : vector<1x128x128xbf16> to vector<128x128xbf16>
    %cst_102 = arith.constant dense<0.000000e+00> : vector<288x128xf32>
    %125 = tpu.matmul %122, %124, %cst_102 {dimension_numbers = #tpu.dot_dimension_numbers<[1], [0], [0], [1], [0, 0, 1, 1], [], []>} : vector<288x128xbf16>, vector<128x128xbf16>, vector<288x128xf32> -> vector<288x128xf32>
    %126 = arith.addf %121, %125 : vector<288x128xf32>
    %c51 = arith.constant 51 : index
    %c0_103 = arith.constant 0 : index
    %127 = vector.load %arg7[%c51, %c0_103] : memref<352x128xbf16, #tpu.memory_space<vmem>>, vector<288x128xbf16>
    %c8_104 = arith.constant 8 : index
    %c0_105 = arith.constant 0 : index
    %c0_106 = arith.constant 0 : index
    %128 = vector.load %arg3[%c8_104, %c0_105, %c0_106] : memref<9x128x128xbf16, #tpu.memory_space<vmem>>, vector<1x128x128xbf16>
    %129 = vector.shape_cast %128 : vector<1x128x128xbf16> to vector<128x128xbf16>
    %cst_107 = arith.constant dense<0.000000e+00> : vector<288x128xf32>
    %130 = tpu.matmul %127, %129, %cst_107 {dimension_numbers = #tpu.dot_dimension_numbers<[1], [0], [0], [1], [0, 0, 1, 1], [], []>} : vector<288x128xbf16>, vector<128x128xbf16>, vector<288x128xf32> -> vector<288x128xf32>
    %131 = arith.addf %126, %130 : vector<288x128xf32>
    %cst_108 = arith.constant 0.000000e+00 : f32
    %132 = vector.broadcast %cst_108 : f32 to vector<288x128xf32>
    %133 = arith.maximumf %131, %132 : vector<288x128xf32>
    %134 = vector.shape_cast %133 : vector<288x128xf32> to vector<16x18x128xf32>
    %135 = vector.extract_strided_slice %134 {offsets = [0, 0, 0], sizes = [16, 16, 128], strides = [1, 1, 1]} : vector<16x18x128xf32> to vector<16x16x128xf32>
    %c0_109 = arith.constant 0 : index
    %c0_110 = arith.constant 0 : index
    %c0_111 = arith.constant 0 : index
    %c0_112 = arith.constant 0 : index
    %136 = vector.load %arg6[%c0_109, %c0_110, %c0_111, %c0_112] : memref<1x16x16x128xf32, #tpu.memory_space<vmem>>, vector<1x16x16x128xf32>
    %137 = vector.shape_cast %136 : vector<1x16x16x128xf32> to vector<16x16x128xf32>
    %138 = vector.shape_cast %135 : vector<16x16x128xf32> to vector<1x16x16x128xf32>
    tpu.vector_store %arg6[%c0_109, %c0_110, %c0_111, %c0_112], %138 {strides = array<i32>} : memref<1x16x16x128xf32, #tpu.memory_space<vmem>>, vector<1x16x16x128xf32>,
    return
  }
  func.func @transform_0(%arg0: i32) -> (i32, i32, i32) {
    %c0_i32 = arith.constant 0 : i32
    %c0_i32_0 = arith.constant 0 : i32
    %c0_i32_1 = arith.constant 0 : i32
    return %arg0, %c0_i32, %c0_i32_0 : i32, i32, i32
  }
  func.func @transform_1(%arg0: i32) -> (i32, i32, i32) {
    %c0_i32 = arith.constant 0 : i32
    %c0_i32_0 = arith.constant 0 : i32
    %c0_i32_1 = arith.constant 0 : i32
    %c0_i32_2 = arith.constant 0 : i32
    return %c0_i32, %c0_i32_0, %c0_i32_1 : i32, i32, i32
  }
  func.func @transform_2(%arg0: i32) -> (i32, i32, i32) {
    %c0_i32 = arith.constant 0 : i32
    %c0_i32_0 = arith.constant 0 : i32
    %c0_i32_1 = arith.constant 0 : i32
    %c0_i32_2 = arith.constant 0 : i32
    return %c0_i32, %c0_i32_0, %c0_i32_1 : i32, i32, i32
  }
  func.func @transform_3(%arg0: i32) -> (i32, i32) {
    %c0_i32 = arith.constant 0 : i32
    %c0_i32_0 = arith.constant 0 : i32
    %c0_i32_1 = arith.constant 0 : i32
    return %c0_i32, %c0_i32_0 : i32, i32
  }
  func.func @transform_4(%arg0: i32) -> (i32, i32) {
    %c0_i32 = arith.constant 0 : i32
    %c0_i32_0 = arith.constant 0 : i32
    %c0_i32_1 = arith.constant 0 : i32
    return %c0_i32, %c0_i32_0 : i32, i32
  }
  func.func @transform_5(%arg0: i32) -> (i32, i32, i32, i32) {
    %c0_i32 = arith.constant 0 : i32
    %c0_i32_0 = arith.constant 0 : i32
    %c0_i32_1 = arith.constant 0 : i32
    %c0_i32_2 = arith.constant 0 : i32
    return %arg0, %c0_i32, %c0_i32_0, %c0_i32_1 : i32, i32, i32, i32
  }
}

</mosaic_0001>

<bundles_post_ra>
// kernel: tpu_custom_call.1
= control target key start
LH: loop header
LB: loop body
LE: loop exit
PB: predicated region body
PF: predicated region fallthrough
CT: control target
= control target key end

     0   :  { %10 = vsyncpa [#allocation4], 0  ;;  %s17068_s0 = inlined_call_operand.hbm [shape: f32[2,328,128], index: 0, kind: input, shape index: {}]   ;;  %s17069_s1 = inlined_call_operand.hbm [shape: bf16[9,128,128], index: 1, kind: input, shape index: {}]   ;;  %s17070_s2 = inlined_call_operand.hbm [shape: bf16[9,128,128], index: 2, kind: input, shape index: {}]   ;;  %s17071_s3 = inlined_call_operand.vmem [shape: f32[1,128], index: 3, kind: input, shape index: {}]   ;;  %s17072_s4 = inlined_call_operand.vmem [shape: f32[1,128], index: 4, kind: input, shape index: {}]   ;;  %s17073_s5 = inlined_call_operand.hbm [shape: f32[2,16,16,128], index: 5, kind: output, shape index: {}]  }
   0x1   :  { %12 = vsyncpa [#allocation4 + $0x1], 0 }
   0x2   :  { %13 = vsyncpa [#allocation7], 0 }
   0x3   :  { %14 = vsyncpa [#allocation5], 0 }
   0x4   :  { %16 = vsyncpa [#allocation5 + $0x1], 0  ;;  %s13252_s18 = smov 0   ;;  %s13254_s19 = smov 0  }
   0x5   :  { %s13256_s20 = smov 0   ;;  %s13258_s21 = smov 0  }
   0x6 LB: > { %s13273_s22 = sadd.s32 4294967295, %s13204_s21   ;;  %s10885_s23 = sadd.s32 4294967294, %s13204_s21   ;;  %s13204_s21 = sphi %s13258_s21, %s17507_s21   ;;  %s13200_s20 = sphi %s13256_s20, %s17506_s20   ;;  %s13196_s19 = sphi %s13254_s19, %s17505_s19   ;;  %s13192_s18 = sphi %s13252_s18, %s17504_s18  }
   0x7   : > { %p42_p0 = scmp.ne.s32.totalorder %s13196_s19, %s13192_s18  ;;  %p17074_p1 = scmp.eq.s32.totalorder %s13273_s22, 0 }
   0x8   : > { %p156_p3 = scmp.eq.s32.totalorder %s10885_s23, 1  ;;  %p10886_p5 = scmp.ge.s32.totalorder %s13204_s21, 1 }
   0x9   : > { %p13282_p4 = por %p17074_p1, %p42_p0  ;;  %p163_p7 = scmp.lt.s32.totalorder %s13204_s21, 3 }
   0xa   : > { %p13287_p6 = por %p156_p3, %p42_p0  ;;  %s13206_s27 = smov [#allocation6]  }
   0xb   : > { %s17128_s24 = scalar_select %p13282_p4, 1, 0 }
   0xc   : > { %s17129_s25 = scalar_select %p13287_p6, 1, 0 }
   0xd   : > { %p13292_p8 = pnand %p10886_p5, %p163_p7  ;;  %s175_s28 = sshll.u32 %s13206_s27, 4  ;;  %s176_s28 = int_to_ptr.vmem [resolvable:$true] %s175_s28 }
   0xe   : > { %s13207_s30 = smov [#allocation8]   ;;  %s13067_s7 = scalar_lea.vmem %s176_s28, 9216 }
   0xf   : > { %s17130_s26 = scalar_select %p13292_p8, 1, 0 }
  0x10   : > { %p12744_p9 = pneg %p13292_p8  ;;  %s188_s6 = sshll.u32 %s13207_s30, 4  ;;  %s189_s6 = int_to_ptr.vmem [resolvable:$true] %s188_s6 }
  0x11   : > { %p13068_p13 = scmp.ne.s32.totalorder %s176_s28, %s13067_s7  ;;  %p13075_p5 = scmp.lt.s32.totalorder %s176_s28, %s176_s28 }
  0x12   : > { %p13301_p11 = pnand %p12744_p9, %p17074_p1  ;;  %p13076_p7 = scmp.lt.s32.totalorder %s13067_s7, %s13067_s7 }
  0x14   : > { %p13058_p12 = pneg %p13301_p11  ;;  %p13077_p10 = por %p13076_p7, %p13075_p5 }
  0x16   : > { %p13070_p0 = pnand %p13068_p13, %p13058_p12 }
  0x18   : > { %p13071_p3 = pneg %p13070_p0 }
  0x1a   : > { %p13078_p9 = pnand %p13077_p10, %p13071_p3 }
  0x1c   : > { %13081 = shalt.err (!%p13078_p9)
}
  0x1d   : > { %s13208_s8 = smov 64   ;;  %s13209_s9 = smov 4  }
  0x1e   : > { %12747 = dma.hbm_to_vmem [thread:$0]  (!%p13301_p11), %s17069_s1, 9216, %s176_s28, [#allocation7], %s13208_s8, %s13208_s8, %s13209_s9  }
  0x1f   : > { %s13093_s12 = scalar_lea.vmem %s189_s6, 9216  ;;  %p13101_p2 = scmp.lt.s32.totalorder %s189_s6, %s189_s6 }
  0x20   : > { %p13094_p1 = scmp.ne.s32.totalorder %s189_s6, %s13093_s12  ;;  %p13102_p6 = scmp.lt.s32.totalorder %s13093_s12, %s13093_s12 }
  0x22   : > { %p13096_p13 = pnand %p13094_p1, %p13058_p12  ;;  %p13103_p5 = por %p13102_p6, %p13101_p2 }
  0x24   : > { %p13097_p0 = pneg %p13096_p13 }
  0x26   : > { %p13104_p10 = pnand %p13103_p5, %p13097_p0 }
  0x28   : > { %13107 = shalt.err (!%p13104_p10)
}
  0x29   : > { %12750 = dma.hbm_to_vmem [thread:$0]  (!%p13301_p11), %s17070_s2, 9216, %s189_s6, [#allocation7], %s13208_s8, %s13208_s8, %s13209_s9  }
  0x2a   : > { %s13324_s15 = sadd.s32 1, %s13204_s21   ;;  %s29_s16 = sadd.s32 1, %s13200_s20 }
  0x2b   : > { %s26_s17 = ssub.s32 %s13204_s21, %s13324_s15  ;;  %p36_p1 = scmp.ne.s32.totalorder %s13200_s20, %s13196_s19 }
  0x2c   : > { %p27_p2 = scmp.eq.s32.totalorder %s26_s17, 0  ;;  %p37_p6 = scmp.eq.s32.totalorder %s13204_s21, 0 }
  0x2d   : > { %p17132_p12 = scmp.eq.s32.totalorder %s13273_s22, 1  ;;  %p12761_p7 = scmp.lt.s32.totalorder %s13204_s21, 2 }
  0x2e   : > { %s13340_s27 = scalar_select %p27_p2, %s13200_s20, %s29_s16  }
  0x2f   : > { %p13334_p3 = por %p17132_p12, %p36_p1  ;;  %p38_p9 = por %p37_p6, %p36_p1 }
  0x30   : > { %s208_s28 = sand.u32 1, %s13200_s20   ;;  %s12730_s30 = smul.u32 5248, %s13204_s21 }
  0x31   : > { %s17133_s23 = scalar_select %p13334_p3, 1, 0 }
  0x32   : > { %s12729_s29 = smul.u32 328, %s208_s28  ;;  %p13344_p11 = pnand %p12761_p7, %p38_p9 }
  0x33   : > { %s13351_s9 = scalar_lea.hbm %s17068_s0, %s12730_s30  ;;  %s13355_s12 = scalar_lea.sflag [#allocation4], %s208_s28 }
  0x34   : > { %s212_s10 = scalar_lea.vmem [#allocation3], %s12729_s29  ;;  %s13108_s13 = scalar_lea.hbm %s13351_s9, 5248 }
  0x35   : > { %s219_s11 = sshll.u32 %s212_s10, 4  ;;  %p13109_p13 = scmp.ne.s32.totalorder %s13351_s9, %s13108_s13  ;;  %s13353_s11 = int_to_ptr.vmem [resolvable:$true] %s219_s11 }
  0x36   : > { %p13110_p0 = pneg %p13344_p11  ;;  %s13113_s17 = scalar_lea.hbm %s17068_s0, 10496 }
  0x37   : > { %p13114_p1 = scmp.lt.s32.totalorder %s13351_s9, %s17068_s0  ;;  %p13115_p2 = scmp.lt.s32.totalorder %s13113_s17, %s13108_s13 }
  0x38   : > { %p13111_p5 = pnand %p13110_p0, %p13109_p13 }
  0x39   : > { %p13116_p6 = por %p13115_p2, %p13114_p1 }
  0x3a   : > { %p13112_p10 = pneg %p13111_p5 }
  0x3c   : > { %p13117_p12 = pnand %p13116_p6, %p13112_p10 }
  0x3e   : > { %13120 = shalt.err (!%p13117_p12)
}
  0x3f   : > { %s13121_s28 = scalar_lea.vmem %s13353_s11, 5248  ;;  %s13210_s29 = smov [#allocation3]  }
  0x40   : > { %p13122_p7 = scmp.ne.s32.totalorder %s13353_s11, %s13121_s28  ;;  %s13126_s8 = sshll.u32 %s13210_s29, 4  ;;  %s13127_s8 = int_to_ptr.vmem [resolvable:$false] %s13126_s8 }
  0x41   : > { %s13128_s10 = scalar_lea.vmem %s13127_s8, 10496  ;;  %p13129_p5 = scmp.lt.s32.totalorder %s13353_s11, %s13127_s8 }
  0x42   : > { %p13124_p9 = pnand %p13122_p7, %p13110_p0  ;;  %p13130_p3 = scmp.lt.s32.totalorder %s13128_s10, %s13121_s28 }
  0x44   : > { %p13125_p13 = pneg %p13124_p9  ;;  %p13131_p4 = por %p13130_p3, %p13129_p5 }
  0x46   : > { %p13132_p8 = pnand %p13131_p4, %p13125_p13 }
  0x48   : > { %13135 = shalt.err (!%p13132_p8)
}
  0x49   : > { %s13211_s13 = smov 128   ;;  %s13212_s14 = smov 8  }
  0x4a   : > { %12754 = dma.hbm_to_vmem [thread:$0]  (!%p13344_p11), %s13351_s9, 5248, %s13353_s11, %s13355_s12, %s13211_s13, %s13211_s13, %s13212_s14  }
  0x4b   : > { %p17135_p0 = scmp.ne.s32.totalorder %s17130_s26, 0 }
  0x4d   : > { %231 = sbr.rel (%p17135_p0) target bundleno = 1363 (0x553), region = 40 }
  0x52   : > { %s13379_s16 = sand.u32 1, %s13196_s19   ;;  %p17136_p4 = scmp.ne.s32.totalorder %s17128_s24, 0 }
  0x53   : > { %s12731_s17 = smul.u32 328, %s13379_s16  ;;  %s234_s30 = scalar_lea.sflag [#allocation4], %s13379_s16 }
  0x55   : > { %s13383_s7 = scalar_lea.vmem [#allocation3], %s12731_s17 }
  0x56   : > { %13179 = dma.done.wait (%p17136_p4), %s234_s30, 5248  }
  0x57   : > { %13181 = vsyncadd (%p17136_p4), %s234_s30, 4294962048  ;;  %p17137_p8 = scmp.eq.s32.totalorder %s13273_s22, 0 }
  0x59   : > { %13183 = dma.done.wait (%p17137_p8), [#allocation7], 18432   ;;  %p17138_p3 = pmov %p17137_p8 }
  0x5a   : > { %v12811_v0 = vld [vmem:[#allocation6 + $0x38] sm:$0xff]   ;;  %v12813_v2 = vld [vmem:[#allocation6 + $0x30] sm:$0xff]   ;;  %v12815_v4 = vld [vmem:[#allocation6 + $0x28] sm:$0xff]   ;;  %vm6009_vm9 = vcmask 1044480   ;;  %vm5538_vm10 = vsmask.f32 5376 }
  0x5b   : > { %13185 = vsyncadd (%p17138_p3), [#allocation7], 4294948864  ;;  %v12812_v1 = vld [vmem:[#allocation6 + $0x78] sm:$0xff]   ;;  %11793 = vmatprep.subr.bf16.mxu0 %v12811_v0  ;;  %v12814_v3 = vld [vmem:[#allocation6 + $0x70] sm:$0xff]   ;;  %vm6347_vm11 = vsmask.f32 4352 }
  0x5c   : > { %11794 = vmatpush3.bf16.msra.mxu0 %v12811_v0  ;;  %11845 = vmatprep.subr.bf16.mxu1 %v12812_v1  ;;  %v12816_v5 = vld [vmem:[#allocation6 + $0x68] sm:$0xff]   ;;  %v12817_v6 = vld [vmem:[#allocation6 + $0x20] sm:$0xff]   ;;  %v12819_v8 = vld [vmem:[#allocation6 + $0x18] sm:$0xff]   ;;  %vm7769_vm12 = vsmask.f32 7424  ;;  %vm8792_vm14 = vcmask 1046528  }
  0x5d   : > { %11846 = vmatpush3.bf16.msra.mxu1 %v12812_v1  ;;  %11795 = vmatprep.subr.bf16.mxu0 %v12813_v2  ;;  %v12818_v7 = vld [vmem:[#allocation6 + $0x60] sm:$0xff]   ;;  %v12820_v9 = vld [vmem:[#allocation6 + $0x58] sm:$0xff]   ;;  %v12821_v10 = vld [vmem:[#allocation6 + $0x10] sm:$0xff]   ;;  %vm9130_vm13 = vsmask.f32 6400  ;;  %s10894_s8 = sshll.u32 %s13379_s16, 8 }
  0x5e   : > { %11847 = vmatprep.subr.bf16.mxu1 %v12814_v3  ;;  %v280_v11 = vld [vmem:[%s13383_s7] sm:$0xff]  ;;  %v281_v12 = vld [vmem:[%s13383_s7 + $0x8] sm:$0xff]  ;;  %v12823_v18 = vld [vmem:[#allocation6 + $0x8] sm:$0xff]   ;;  %s16785_s10 = scalar_lea.vmem [#allocation9], %s10894_s8  ;;  %s11216_s13 = sshll.u32 %s13273_s22, 12 }
  0x5f   : > { %v12822_v13 = vld [vmem:[#allocation6 + $0x50] sm:$0xff]   ;;  %v316_v14 = vpack.c.bf16 %v281_v12, %v280_v11  ;;  %v612_v16 = vld [vmem:[%s13383_s7 + $0x9] sm:$0xff]  ;;  %s10793_s14 = sshll.u32 %s16785_s10, 4  ;;  %s10780_s22 = scalar_lea.sflag [#allocation5], %s13379_s16  ;;  %s17023_s14 = int_to_ptr.vmem [resolvable:$true] %s10793_s14 }
  0x60   : > { %11796 = vmatpush3.bf16.msra.mxu0 %v12813_v2  ;;  %v611_v15 = vld [vmem:[%s13383_s7 + $0x1] sm:$0xff]  ;;  %v12824_v19 = vld [vmem:[#allocation6 + $0x48] sm:$0xff]   ;;  %s13136_s24 = scalar_lea.vmem %s17023_s14, 4096  ;;  %p17501_p10 = scmp.ne.s32.totalorder %s17133_s23, 0 }
  0x61   : > { %11848 = vmatpush3.bf16.msra.mxu1 %v12814_v3  ;;  %11797 = vmatprep.subr.bf16.mxu0 %v12815_v4  ;;  %v647_v17 = vpack.c.bf16 %v612_v16, %v611_v15  ;;  %v12825_v20 = vld [vmem:[#allocation6] sm:$0xff]   ;;  %v283_v23 = vld [vmem:[%s13383_s7 + $0x18] sm:$0xff]  ;;  %v12827_v24 = vld [vmem:[#allocation6 + $0xb8] sm:$0xff]   ;;  %p13137_p11 = scmp.ne.s32.totalorder %s17023_s14, %s13136_s24  ;;  %s13219_s26 = smov [#allocation9]  }
  0x62   : > { %11849 = vmatprep.subr.bf16.mxu1 %v12816_v5  ;;  %11809 = vmatprep.mubr.bf16.mxu0 %v316_v14  ;;  %v12826_v21 = vld [vmem:[#allocation6 + $0x40] sm:$0xff]   ;;  %v614_v26 = vld [vmem:[%s13383_s7 + $0x19] sm:$0xff]  ;;  %s13140_s6 = sshll.u32 %s13219_s26, 4  ;;  %s13141_s6 = int_to_ptr.vmem [resolvable:$false] %s13140_s6 }
  0x63   : > { %11861 = vmatprep.mubr.bf16.mxu1 %v647_v17  ;;  %v282_v22 = vld [vmem:[%s13383_s7 + $0x10] sm:$0xff]  ;;  %v284_v27 = vld [vmem:[%s13383_s7 + $0x20] sm:$0xff]  ;;  %v285_v28 = vld [vmem:[%s13383_s7 + $0x28] sm:$0xff]  ;;  %p13138_p1 = pnand %p13137_p11, %p17501_p10  ;;  %s13142_s9 = scalar_lea.vmem %s13141_s6, 8192 }
  0x64   : > { %11798 = vmatpush3.bf16.msra.mxu0 %v12815_v4  ;;  %v613_v25 = vld [vmem:[%s13383_s7 + $0x11] sm:$0xff]  ;;  %v615_v29 = vld [vmem:[%s13383_s7 + $0x21] sm:$0xff]  ;;  %v616_v30 = vld [vmem:[%s13383_s7 + $0x29] sm:$0xff]  ;;  %v317_v31 = vpack.c.bf16 %v283_v23, %v282_v22  ;;  %v318_v33 = vpack.c.bf16 %v285_v28, %v284_v27  ;;  %p13143_p6 = scmp.lt.s32.totalorder %s17023_s14, %s13141_s6  ;;  %p13144_p12 = scmp.lt.s32.totalorder %s13142_s9, %s13136_s24 }
  0x65   : > { %11850 = vmatpush3.bf16.msra.mxu1 %v12816_v5  ;;  %11799 = vmatprep.subr.bf16.mxu0 %v12817_v6  ;;  %v648_v32 = vpack.c.bf16 %v614_v26, %v613_v25  ;;  %v649_v34 = vpack.c.bf16 %v616_v30, %v615_v29  ;;  %v12828_v35 = vld [vmem:[#allocation6 + $0xb0] sm:$0xff]   ;;  %v286_v36 = vld [vmem:[%s13383_s7 + $0x30] sm:$0xff]  ;;  %v289_v41 = vld [vmem:[%s13383_s7 + $0x48] sm:$0xff]  ;;  %p13139_p2 = pneg %p13138_p1 }
  0x66   : > { %11851 = vmatprep.subr.bf16.mxu1 %v12818_v7  ;;  %v287_v37 = vld [vmem:[%s13383_s7 + $0x38] sm:$0xff]  ;;  %v288_v40 = vld [vmem:[%s13383_s7 + $0x40] sm:$0xff]  ;;  %v620_v43 = vld [vmem:[%s13383_s7 + $0x49] sm:$0xff]  ;;  %p13145_p7 = por %p13144_p12, %p13143_p6 }
  0x67   : > { %v617_v38 = vld [vmem:[%s13383_s7 + $0x31] sm:$0xff]  ;;  %v618_v39 = vld [vmem:[%s13383_s7 + $0x39] sm:$0xff]  ;;  %v619_v42 = vld [vmem:[%s13383_s7 + $0x41] sm:$0xff]  ;;  %v319_v46 = vpack.c.bf16 %v287_v37, %v286_v36  ;;  %v320_v48 = vpack.c.bf16 %v289_v41, %v288_v40 }
  0x68   : > { %11800 = vmatpush3.bf16.msra.mxu0 %v12817_v6  ;;  %v12829_v44 = vld [vmem:[#allocation6 + $0xa8] sm:$0xff]   ;;  %v12832_v45 = vld [vmem:[#allocation6 + $0xf8] sm:$0xff]   ;;  %v650_v47 = vpack.c.bf16 %v618_v39, %v617_v38  ;;  %v12834_v49 = vld [vmem:[#allocation6 + $0xf0] sm:$0xff]   ;;  %v651_v50 = vpack.c.bf16 %v620_v43, %v619_v42  ;;  %p13146_p9 = pnand %p13145_p7, %p13139_p2 }
  0x69   : > { %11852 = vmatpush3.bf16.msra.mxu1 %v12818_v7  ;;  %11801 = vmatprep.subr.bf16.mxu0 %v12819_v8  ;;  %v290_v51 = vld [vmem:[%s13383_s7 + $0x50] sm:$0xff]  ;;  %v291_v52 = vld [vmem:[%s13383_s7 + $0x58] sm:$0xff]  ;;  %v292_v56 = vld [vmem:[%s13383_s7 + $0x60] sm:$0xff] }
  0x6a   : > { %11853 = vmatprep.subr.bf16.mxu1 %v12820_v9  ;;  %v12830_v53 = vld [vmem:[#allocation6 + $0xa0] sm:$0xff]   ;;  %v622_v55 = vld [vmem:[%s13383_s7 + $0x59] sm:$0xff]  ;;  %v321_v62 = vpack.c.bf16 %v291_v52, %v290_v51 }
  0x6b   : > { %v621_v54 = vld [vmem:[%s13383_s7 + $0x51] sm:$0xff]  ;;  %v293_v57 = vld [vmem:[%s13383_s7 + $0x68] sm:$0xff]  ;;  %v300_v25 = vld [vmem:[%s13383_s7 + $0xa0] sm:$0xff] }
  0x6c   : > { %11802 = vmatpush3.bf16.msra.mxu0 %v12819_v8  ;;  %v12835_v58 = vld [vmem:[#allocation6 + $0xe8] sm:$0xff]   ;;  %v623_v59 = vld [vmem:[%s13383_s7 + $0x61] sm:$0xff]  ;;  %v652_v0 = vpack.c.bf16 %v622_v55, %v621_v54  ;;  %v322_v1 = vpack.c.bf16 %v293_v57, %v292_v56 }
  0x6d   : > { %11854 = vmatpush3.bf16.msra.mxu1 %v12820_v9  ;;  %11803 = vmatprep.subr.bf16.mxu0 %v12821_v10  ;;  %v624_v60 = vld [vmem:[%s13383_s7 + $0x69] sm:$0xff]  ;;  %v12833_v3 = vld [vmem:[#allocation6 + $0x90] sm:$0xff]  }
  0x6e   : > { %11855 = vmatprep.subr.bf16.mxu1 %v12822_v13  ;;  %v12831_v61 = vld [vmem:[#allocation6 + $0x98] sm:$0xff]   ;;  %v12837_v63 = vld [vmem:[#allocation6 + $0xe0] sm:$0xff]   ;;  %v653_v2 = vpack.c.bf16 %v624_v60, %v623_v59  ;;  %v295_v5 = vld [vmem:[%s13383_s7 + $0x78] sm:$0xff] }
  0x6f   : > { %v294_v4 = vld [vmem:[%s13383_s7 + $0x70] sm:$0xff]  ;;  %v12838_v6 = vld [vmem:[#allocation6 + $0xd8] sm:$0xff]   ;;  %v12839_v15 = vld [vmem:[#allocation6 + $0xd0] sm:$0xff]  }
  0x70   : > { %11804 = vmatpush3.bf16.msra.mxu0 %v12821_v10  ;;  %v625_v7 = vld [vmem:[%s13383_s7 + $0x71] sm:$0xff]  ;;  %v626_v8 = vld [vmem:[%s13383_s7 + $0x79] sm:$0xff]  ;;  %v297_v10 = vld [vmem:[%s13383_s7 + $0x88] sm:$0xff]  ;;  %v323_v14 = vpack.c.bf16 %v295_v5, %v294_v4 }
  0x71   : > { %11856 = vmatpush3.bf16.msra.mxu1 %v12822_v13  ;;  %11805 = vmatprep.subr.bf16.mxu0 %v12823_v18  ;;  %v296_v9 = vld [vmem:[%s13383_s7 + $0x80] sm:$0xff]  ;;  %v628_v12 = vld [vmem:[%s13383_s7 + $0x89] sm:$0xff]  ;;  %v654_v16 = vpack.c.bf16 %v626_v8, %v625_v7  ;;  %v629_v23 = vld [vmem:[%s13383_s7 + $0x91] sm:$0xff] }
  0x72   : > { %11857 = vmatprep.subr.bf16.mxu1 %v12824_v19  ;;  %v627_v11 = vld [vmem:[%s13383_s7 + $0x81] sm:$0xff]  ;;  %v12836_v13 = vld [vmem:[#allocation6 + $0x88] sm:$0xff]   ;;  %v324_v17 = vpack.c.bf16 %v297_v10, %v296_v9 }
  0x73   : > { %v12841_v22 = vld [vmem:[#allocation6 + $0xc8] sm:$0xff]   ;;  %v301_v26 = vld [vmem:[%s13383_s7 + $0xa8] sm:$0xff]  ;;  %v304_v39 = vld [vmem:[%s13383_s7 + $0xc0] sm:$0xff] }
  0x74   : > { %11806 = vmatpush3.bf16.msra.mxu0 %v12823_v18  ;;  %v655_v18 = vpack.c.bf16 %v628_v12, %v627_v11  ;;  %v631_v27 = vld [vmem:[%s13383_s7 + $0xa1] sm:$0xff]  ;;  %v632_v28 = vld [vmem:[%s13383_s7 + $0xa9] sm:$0xff]  ;;  %v303_v36 = vld [vmem:[%s13383_s7 + $0xb8] sm:$0xff] }
  0x75   : > { %11858 = vmatpush3.bf16.msra.mxu1 %v12824_v19  ;;  %11807 = vmatprep.subr.bf16.mxu0 %v12825_v20  ;;  %v12840_v19 = vld [vmem:[#allocation6 + $0x80] sm:$0xff]   ;;  %v13437_v29 = vld [vmem:[#allocation6 + $0x138] sm:$0xff]   ;;  %v315_v9 = vld [vmem:[%s13383_s7 + $0x118] sm:$0xff] }
  0x76   : > { %11859 = vmatprep.subr.bf16.mxu1 %v12826_v21  ;;  %v633_v37 = vld [vmem:[%s13383_s7 + $0xb1] sm:$0xff]  ;;  %v634_v38 = vld [vmem:[%s13383_s7 + $0xb9] sm:$0xff]  ;;  %v305_v40 = vld [vmem:[%s13383_s7 + $0xc8] sm:$0xff] }
  0x77   : > { %v635_v41 = vld [vmem:[%s13383_s7 + $0xc1] sm:$0xff]  ;;  %v636_v42 = vld [vmem:[%s13383_s7 + $0xc9] sm:$0xff]  ;;  %v638_v51 = vld [vmem:[%s13383_s7 + $0xd9] sm:$0xff] }
  0x78   : > { %11808 = vmatpush3.bf16.msra.mxu0 %v12825_v20  ;;  %v298_v20 = vld [vmem:[%s13383_s7 + $0x90] sm:$0xff]  ;;  %v308_v52 = vld [vmem:[%s13383_s7 + $0xe0] sm:$0xff] }
  0x79   : > { %11860 = vmatpush3.bf16.msra.mxu1 %v12826_v21  ;;  %11897 = vmatprep.subr.bf16.mxu0 %v12827_v24  ;;  %v299_v21 = vld [vmem:[%s13383_s7 + $0x98] sm:$0xff]  ;;  %v639_v54 = vld [vmem:[%s13383_s7 + $0xe1] sm:$0xff]  ;;  %v640_v55 = vld [vmem:[%s13383_s7 + $0xe9] sm:$0xff] }
  0x7a   : > { %11949 = vmatprep.subr.bf16.mxu1 %v12832_v45  ;;  %v325_v30 = vpack.c.bf16 %v299_v21, %v298_v20  ;;  %v661_v59 = vpack.c.bf16 %v640_v55, %v639_v54  ;;  %v310_v60 = vld [vmem:[%s13383_s7 + $0xf0] sm:$0xff]  ;;  %v646_v11 = vld [vmem:[%s13383_s7 + $0x119] sm:$0xff]  ;;  %v943_v12 = vld [vmem:[%s13383_s7 + $0x2] sm:$0xff] }
  0x7b   : > { %11810 = vmatmul.mubr.bf16.vlgmr.msra.gmra.mxu0 %v317_v31  ;;  %v12842_v31 = vld [vmem:[#allocation6 + $0xc0] sm:$0xff]  }
  0x7c   : > { %11898 = vmatpush3.bf16.msra.mxu0 %v12827_v24  ;;  %11862 = vmatmul.mubr.bf16.vlgmr.msra.gmra.mxu1 %v648_v32  ;;  %v630_v24 = vld [vmem:[%s13383_s7 + $0x99] sm:$0xff]  ;;  %v314_v8 = vld [vmem:[%s13383_s7 + $0x110] sm:$0xff]  ;;  %v1277_v20 = vld [vmem:[%s13383_s7 + $0x22] sm:$0xff] }
  0x7d   : > { %11813 = vmatprep.mubr.bf16.mxu0 %v318_v33  ;;  %11865 = vmatprep.mubr.bf16.mxu1 %v649_v34  ;;  %v656_v32 = vpack.c.bf16 %v630_v24, %v629_v23  ;;  %v326_v33 = vpack.c.bf16 %v301_v26, %v300_v25  ;;  %v657_v34 = vpack.c.bf16 %v632_v28, %v631_v27  ;;  %v645_v10 = vld [vmem:[%s13383_s7 + $0x111] sm:$0xff]  ;;  %v950_v23 = vld [vmem:[%s13383_s7 + $0x3a] sm:$0xff]  ;;  %v1281_v28 = vld [vmem:[%s13383_s7 + $0x42] sm:$0xff] }
  0x7e   : > { %11899 = vmatprep.subr.bf16.mxu0 %v12828_v35  ;;  %11950 = vmatpush3.bf16.msra.mxu1 %v12832_v45  ;;  %v658_v45 = vpack.c.bf16 %v634_v38, %v633_v37  ;;  %v1278_v21 = vld [vmem:[%s13383_s7 + $0x2a] sm:$0xff]  ;;  %v12844_v26 = vld [vmem:[#allocation6 + $0x130] sm:$0xff]  }
  0x7f   : > { %11951 = vmatprep.subr.bf16.mxu1 %v12834_v49  ;;  %v1312_v24 = vpack.c.bf16 %v1278_v21, %v1277_v20  ;;  %v12850_v27 = vld [vmem:[#allocation6 + $0x170] sm:$0xff]   ;;  %v12853_v37 = vld [vmem:[#allocation6 + $0x160] sm:$0xff]  }
  0x80   : > { %11900 = vmatpush3.bf16.msra.mxu0 %v12828_v35  ;;  %v302_v35 = vld [vmem:[%s13383_s7 + $0xb0] sm:$0xff]  ;;  %v1285_v38 = vld [vmem:[%s13383_s7 + $0x62] sm:$0xff] }
  0x81   : > { %11901 = vmatprep.subr.bf16.mxu0 %v12829_v44  ;;  %v327_v43 = vpack.c.bf16 %v303_v36, %v302_v35  ;;  %v12846_v36 = vld [vmem:[#allocation6 + $0x120] sm:$0xff]  }
  0x82   : > { %11952 = vmatpush3.bf16.msra.mxu1 %v12834_v49  ;;  %v307_v49 = vld [vmem:[%s13383_s7 + $0xd8] sm:$0xff]  ;;  %v1309_v20 = vld [vmem:[%s13383_s7 + $0x122] sm:$0xff]  ;;  %v1310_v21 = vld [vmem:[%s13383_s7 + $0x12a] sm:$0xff] }
  0x83   : > { %11814 = vmatmul.mubr.bf16.gmra.mxu0 %v319_v46  ;;  %11953 = vmatprep.subr.bf16.mxu1 %v12835_v58  ;;  %v328_v46 = vpack.c.bf16 %v305_v40, %v304_v39  ;;  %v1286_v39 = vld [vmem:[%s13383_s7 + $0x6a] sm:$0xff]  ;;  %v957_v40 = vld [vmem:[%s13383_s7 + $0x72] sm:$0xff] }
  0x84   : > { %11866 = vmatmul.mubr.bf16.gmra.mxu1 %v650_v47  ;;  %11817 = vmatprep.mubr.bf16.mxu0 %v320_v48  ;;  %v659_v47 = vpack.c.bf16 %v636_v42, %v635_v41  ;;  %v306_v48 = vld [vmem:[%s13383_s7 + $0xd0] sm:$0xff]  ;;  %v958_v41 = vld [vmem:[%s13383_s7 + $0x7a] sm:$0xff] }
  0x85   : > { %11869 = vmatprep.mubr.bf16.mxu1 %v651_v50  ;;  %11902 = vmatpush3.bf16.msra.mxu0 %v12829_v44  ;;  %v13448_v44 = vld [vmem:[#allocation6 + $0x178] sm:$0xff]   ;;  %v637_v50 = vld [vmem:[%s13383_s7 + $0xd1] sm:$0xff]  ;;  %v329_v56 = vpack.c.bf16 %v307_v49, %v306_v48 }
  0x86   : > { %11903 = vmatprep.subr.bf16.mxu0 %v12830_v53  ;;  %11954 = vmatpush3.bf16.msra.mxu1 %v12835_v58  ;;  %v660_v57 = vpack.c.bf16 %v638_v51, %v637_v50  ;;  %v12847_v42 = vld [vmem:[#allocation6 + $0x118] sm:$0xff]   ;;  %v12855_v49 = vld [vmem:[#allocation6 + $0x150] sm:$0xff]  }
  0x87   : > { %11955 = vmatprep.subr.bf16.mxu1 %v12837_v63  ;;  %v1290_v48 = vld [vmem:[%s13383_s7 + $0x8a] sm:$0xff]  ;;  %v961_v50 = vld [vmem:[%s13383_s7 + $0x92] sm:$0xff]  ;;  %v962_v51 = vld [vmem:[%s13383_s7 + $0x9a] sm:$0xff] }
  0x88   : > { %v988_v55 = vpack.c.bf16 %v962_v51, %v961_v50  ;;  %v1947_v50 = vld [vmem:[%s13383_s7 + $0x54] sm:$0xff]  ;;  %v1948_v51 = vld [vmem:[%s13383_s7 + $0x5c] sm:$0xff] }
  0x89   : > { %11904 = vmatpush3.bf16.msra.mxu0 %v12830_v53  ;;  %v309_v53 = vld [vmem:[%s13383_s7 + $0xe8] sm:$0xff] }
  0x8a   : > { %11905 = vmatprep.subr.bf16.mxu0 %v12831_v61  ;;  %11956 = vmatpush3.bf16.msra.mxu1 %v12837_v63  ;;  %v330_v58 = vpack.c.bf16 %v309_v53, %v308_v52  ;;  %v642_v63 = vld [vmem:[%s13383_s7 + $0xf9] sm:$0xff] }
  0x8b   : > { %11818 = vmatmul.mubr.bf16.gmra.mxu0 %v321_v62  ;;  %11957 = vmatprep.subr.bf16.mxu1 %v12838_v6  ;;  %v641_v62 = vld [vmem:[%s13383_s7 + $0xf1] sm:$0xff] }
  0x8c   : > { %11870 = vmatmul.mubr.bf16.gmra.mxu1 %v652_v0  ;;  %11821 = vmatprep.mubr.bf16.mxu0 %v322_v1  ;;  %v312_v0 = vld [vmem:[%s13383_s7 + $0x100] sm:$0xff]  ;;  %v313_v1 = vld [vmem:[%s13383_s7 + $0x108] sm:$0xff]  ;;  %v662_v5 = vpack.c.bf16 %v642_v63, %v641_v62  ;;  %v12852_v52 = vld [vmem:[#allocation6 + $0x108] sm:$0xff]  }
  0x8d   : > { %11873 = vmatprep.mubr.bf16.mxu1 %v653_v2  ;;  %11906 = vmatpush3.bf16.msra.mxu0 %v12831_v61  ;;  %v311_v61 = vld [vmem:[%s13383_s7 + $0xf8] sm:$0xff]  ;;  %v643_v2 = vld [vmem:[%s13383_s7 + $0x101] sm:$0xff] }
  0x8e   : > { %11907 = vmatprep.subr.bf16.mxu0 %v12833_v3  ;;  %11958 = vmatpush3.bf16.msra.mxu1 %v12838_v6  ;;  %v331_v4 = vpack.c.bf16 %v311_v61, %v310_v60  ;;  %v332_v6 = vpack.c.bf16 %v313_v1, %v312_v0  ;;  %v12857_v53 = vld [vmem:[#allocation6 + $0x148] sm:$0xff]   ;;  %v13497_v62 = vld [vmem:[#allocation6 + $0x1b8] sm:$0xff]  }
  0x8f   : > { %11959 = vmatprep.subr.bf16.mxu1 %v12839_v15  ;;  %v965_v60 = vld [vmem:[%s13383_s7 + $0xb2] sm:$0xff]  ;;  %v966_v61 = vld [vmem:[%s13383_s7 + $0xba] sm:$0xff] }
  0x90   : > { %v13499_v63 = vld [vmem:[#allocation6 + $0x1f8] sm:$0xff]   ;;  %v990_v1 = vpack.c.bf16 %v966_v61, %v965_v60  ;;  %v12869_v60 = vld [vmem:[#allocation6 + $0x1e0] sm:$0xff]  }
  0x91   : > { %11908 = vmatpush3.bf16.msra.mxu0 %v12833_v3  ;;  %v644_v3 = vld [vmem:[%s13383_s7 + $0x109] sm:$0xff] }
  0x92   : > { %11909 = vmatprep.subr.bf16.mxu0 %v12836_v13  ;;  %11960 = vmatpush3.bf16.msra.mxu1 %v12839_v15  ;;  %v663_v7 = vpack.c.bf16 %v644_v3, %v643_v2  ;;  %v946_v15 = vld [vmem:[%s13383_s7 + $0x1a] sm:$0xff]  ;;  %v1297_v2 = vld [vmem:[%s13383_s7 + $0xc2] sm:$0xff]  ;;  %v1298_v3 = vld [vmem:[%s13383_s7 + $0xca] sm:$0xff] }
  0x93   : > { %11822 = vmatmul.mubr.bf16.gmra.mxu0 %v323_v14  ;;  %11961 = vmatprep.subr.bf16.mxu1 %v12841_v22  ;;  %v945_v14 = vld [vmem:[%s13383_s7 + $0x12] sm:$0xff]  ;;  %v1949_v61 = vld [vmem:[%s13383_s7 + $0x64] sm:$0xff] }
  0x94   : > { %11874 = vmatmul.mubr.bf16.gmra.mxu1 %v654_v16  ;;  %11825 = vmatprep.mubr.bf16.mxu0 %v324_v17  ;;  %v333_v16 = vpack.c.bf16 %v315_v9, %v314_v8  ;;  %v664_v17 = vpack.c.bf16 %v646_v11, %v645_v10  ;;  %v1301_v8 = vld [vmem:[%s13383_s7 + $0xe2] sm:$0xff]  ;;  %v1302_v9 = vld [vmem:[%s13383_s7 + $0xea] sm:$0xff]  ;;  %v973_v10 = vld [vmem:[%s13383_s7 + $0xf2] sm:$0xff] }
  0x95   : > { %11877 = vmatprep.mubr.bf16.mxu1 %v655_v18  ;;  %11910 = vmatpush3.bf16.msra.mxu0 %v12836_v13  ;;  %v944_v13 = vld [vmem:[%s13383_s7 + $0xa] sm:$0xff]  ;;  %v974_v11 = vld [vmem:[%s13383_s7 + $0xfa] sm:$0xff] }
  0x96   : > { %11911 = vmatprep.subr.bf16.mxu0 %v12840_v19  ;;  %11962 = vmatpush3.bf16.msra.mxu1 %v12841_v22  ;;  %v979_v18 = vpack.c.bf16 %v944_v13, %v943_v12  ;;  %v949_v22 = vld [vmem:[%s13383_s7 + $0x32] sm:$0xff]  ;;  %v1324_v12 = vpack.c.bf16 %v1302_v9, %v1301_v8  ;;  %v994_v13 = vpack.c.bf16 %v974_v11, %v973_v10  ;;  %v1621_v11 = vld [vmem:[%s13383_s7 + $0x83] sm:$0xff] }
  0x97   : > { %11963 = vmatprep.subr.bf16.mxu1 %v12842_v31  ;;  %v982_v25 = vpack.c.bf16 %v950_v23, %v949_v22  ;;  %v1607_v22 = vld [vmem:[%s13383_s7 + $0x13] sm:$0xff]  ;;  %v1608_v23 = vld [vmem:[%s13383_s7 + $0x1b] sm:$0xff] }
  0x98   : > { %v12865_v8 = vld [vmem:[#allocation6 + $0x190] sm:$0xff]  }
  0x99   : > { %11912 = vmatpush3.bf16.msra.mxu0 %v12840_v19  ;;  %v980_v19 = vpack.c.bf16 %v946_v15, %v945_v14  ;;  %v1305_v14 = vld [vmem:[%s13383_s7 + $0x102] sm:$0xff]  ;;  %v1306_v15 = vld [vmem:[%s13383_s7 + $0x10a] sm:$0xff] }
  0x9a   : > { %12001 = vmatprep.subr.bf16.mxu0 %v13437_v29  ;;  %11964 = vmatpush3.bf16.msra.mxu1 %v12842_v31  ;;  %v12845_v31 = vld [vmem:[#allocation6 + $0x128] sm:$0xff]   ;;  %v12871_v10 = vld [vmem:[#allocation6 + $0x1d0] sm:$0xff]  }
  0x9b   : > { %11826 = vmatmul.mubr.bf16.gmra.mxu0 %v325_v30  ;;  %12053 = vmatprep.subr.bf16.mxu1 %v13448_v44  ;;  %v1282_v30 = vld [vmem:[%s13383_s7 + $0x4a] sm:$0xff] }
  0x9c   : > { %11878 = vmatmul.mubr.bf16.gmra.mxu1 %v656_v32  ;;  %11829 = vmatprep.mubr.bf16.mxu0 %v326_v33  ;;  %v953_v32 = vld [vmem:[%s13383_s7 + $0x52] sm:$0xff]  ;;  %v954_v33 = vld [vmem:[%s13383_s7 + $0x5a] sm:$0xff]  ;;  %v1314_v35 = vpack.c.bf16 %v1282_v30, %v1281_v28  ;;  %v1609_v30 = vld [vmem:[%s13383_s7 + $0x23] sm:$0xff] }
  0x9d   : > { %11881 = vmatprep.mubr.bf16.mxu1 %v657_v34  ;;  %v12851_v34 = vld [vmem:[#allocation6 + $0x168] sm:$0xff]  }
  0xa3   : > { %11830 = vmatmul.mubr.bf16.gmra.mxu0 %v327_v43  ;;  %v12854_v43 = vld [vmem:[#allocation6 + $0x158] sm:$0xff]  }
  0xa4   : > { %11882 = vmatmul.mubr.bf16.gmra.mxu1 %v658_v45  ;;  %11833 = vmatprep.mubr.bf16.mxu0 %v328_v46  ;;  %v986_v45 = vpack.c.bf16 %v958_v41, %v957_v40  ;;  %v12849_v46 = vld [vmem:[#allocation6 + $0x110] sm:$0xff]  }
  0xa5   : > { %11885 = vmatprep.mubr.bf16.mxu1 %v659_v47  ;;  %v1289_v47 = vld [vmem:[%s13383_s7 + $0x82] sm:$0xff] }
  0xa6   : > { %v1318_v54 = vpack.c.bf16 %v1290_v48, %v1289_v47  ;;  %v1613_v41 = vld [vmem:[%s13383_s7 + $0x43] sm:$0xff]  ;;  %v1615_v47 = vld [vmem:[%s13383_s7 + $0x53] sm:$0xff]  ;;  %v1616_v48 = vld [vmem:[%s13383_s7 + $0x5b] sm:$0xff] }
  0xab   : > { %11834 = vmatmul.mubr.bf16.gmra.mxu0 %v329_v56  ;;  %v12856_v56 = vld [vmem:[#allocation6 + $0x100] sm:$0xff]  }
  0xac   : > { %11886 = vmatmul.mubr.bf16.gmra.mxu1 %v660_v57  ;;  %11837 = vmatprep.mubr.bf16.mxu0 %v330_v58  ;;  %v12858_v57 = vld [vmem:[#allocation6 + $0x140] sm:$0xff]  }
  0xad   : > { %11889 = vmatprep.mubr.bf16.mxu1 %v661_v59  ;;  %v1293_v58 = vld [vmem:[%s13383_s7 + $0xa2] sm:$0xff]  ;;  %v1294_v59 = vld [vmem:[%s13383_s7 + $0xaa] sm:$0xff] }
  0xae   : > { %v1320_v0 = vpack.c.bf16 %v1294_v59, %v1293_v58  ;;  %v1618_v58 = vld [vmem:[%s13383_s7 + $0x6b] sm:$0xff] }
  0xaf   : > { %v12862_v59 = vld [vmem:[#allocation6 + $0x1a0] sm:$0xff]  }
  0xb3   : > { %11838 = vmatmul.mubr.bf16.gmra.mxu0 %v331_v4  ;;  %v969_v4 = vld [vmem:[%s13383_s7 + $0xd2] sm:$0xff] }
  0xb4   : > { %11890 = vmatmul.mubr.bf16.gmra.mxu1 %v662_v5  ;;  %11841 = vmatprep.mubr.bf16.mxu0 %v332_v6  ;;  %v970_v5 = vld [vmem:[%s13383_s7 + $0xda] sm:$0xff]  ;;  %v1322_v6 = vpack.c.bf16 %v1298_v3, %v1297_v2 }
  0xb5   : > { %11893 = vmatprep.mubr.bf16.mxu1 %v663_v7  ;;  %v992_v7 = vpack.c.bf16 %v970_v5, %v969_v4  ;;  %v1952_v2 = vld [vmem:[%s13383_s7 + $0x7c] sm:$0xff] }
  0xb6   : > { %v12863_v3 = vld [vmem:[#allocation6 + $0x198] sm:$0xff]  }
  0xb7   : > { %v12870_v5 = vld [vmem:[#allocation6 + $0x1d8] sm:$0xff]  }
  0xbb   : > { %11842 = vmatmul.mubr.bf16.gmra.mxu0 %v333_v16  ;;  %v977_v16 = vld [vmem:[%s13383_s7 + $0x112] sm:$0xff] }
  0xbc   : > { %11894 = vmatmul.mubr.bf16.gmra.mxu1 %v664_v17  ;;  %11913 = vmatprep.mubr.bf16.mxu0 %v979_v18  ;;  %v978_v17 = vld [vmem:[%s13383_s7 + $0x11a] sm:$0xff]  ;;  %v1326_v18 = vpack.c.bf16 %v1306_v15, %v1305_v14  ;;  %v1954_v14 = vld [vmem:[%s13383_s7 + $0x8c] sm:$0xff] }
  0xbd   : > { %11965 = vmatprep.mubr.bf16.mxu1 %v980_v19  ;;  %v1623_v15 = vld [vmem:[%s13383_s7 + $0x93] sm:$0xff] }
  0xc3   : > { %11914 = vmatmul.mubr.bf16.vlgmr.msra.gmra.mxu0 %v980_v19  ;;  %v996_v19 = vpack.c.bf16 %v978_v17, %v977_v16  ;;  %v1624_v16 = vld [vmem:[%s13383_s7 + $0x9b] sm:$0xff] }
  0xc4   : > { %12002 = vmatpush3.bf16.msra.mxu0 %v13437_v29  ;;  %11966 = vmatmul.mubr.bf16.vlgmr.msra.gmra.mxu1 %v1312_v24  ;;  %v984_v29 = vpack.c.bf16 %v954_v33, %v953_v32  ;;  %v1941_v32 = vld [vmem:[%s13383_s7 + $0x24] sm:$0xff]  ;;  %v1942_v33 = vld [vmem:[%s13383_s7 + $0x2c] sm:$0xff]  ;;  %v1955_v17 = vld [vmem:[%s13383_s7 + $0x94] sm:$0xff] }
  0xc5   : > { %11917 = vmatprep.mubr.bf16.mxu0 %v1312_v24  ;;  %11969 = vmatprep.mubr.bf16.mxu1 %v982_v25  ;;  %v1939_v24 = vld [vmem:[%s13383_s7 + $0x14] sm:$0xff] }
  0xc6   : > { %12003 = vmatprep.subr.bf16.mxu0 %v12844_v26  ;;  %12054 = vmatpush3.bf16.msra.mxu1 %v13448_v44  ;;  %v1316_v44 = vpack.c.bf16 %v1286_v39, %v1285_v38  ;;  %v13529_v38 = vpack.c.bf16 %v1942_v33, %v1941_v32  ;;  %v1627_v32 = vld [vmem:[%s13383_s7 + $0xb3] sm:$0xff]  ;;  %v1628_v33 = vld [vmem:[%s13383_s7 + $0xbb] sm:$0xff] }
  0xc7   : > { %12055 = vmatprep.subr.bf16.mxu1 %v12850_v27 }
  0xc8   : > { %12004 = vmatpush3.bf16.msra.mxu0 %v12844_v26  ;;  %v1328_v26 = vpack.c.bf16 %v1310_v21, %v1309_v20  ;;  %v12873_v21 = vld [vmem:[#allocation6 + $0x1c8] sm:$0xff]  }
  0xc9   : > { %12005 = vmatprep.subr.bf16.mxu0 %v12845_v31 }
  0xca   : > { %12056 = vmatpush3.bf16.msra.mxu1 %v12850_v27  ;;  %v1643_v27 = vpack.c.bf16 %v1608_v23, %v1607_v22  ;;  %v1651_v23 = vpack.c.bf16 %v1624_v16, %v1623_v15  ;;  %v1639_v15 = vld [vmem:[%s13383_s7 + $0x113] sm:$0xff]  ;;  %v1640_v16 = vld [vmem:[%s13383_s7 + $0x11b] sm:$0xff] }
  0xcb   : > { %11918 = vmatmul.mubr.bf16.gmra.mxu0 %v982_v25  ;;  %12057 = vmatprep.subr.bf16.mxu1 %v12851_v34  ;;  %v1940_v25 = vld [vmem:[%s13383_s7 + $0x1c] sm:$0xff] }
  0xcc   : > { %11970 = vmatmul.mubr.bf16.gmra.mxu1 %v1314_v35  ;;  %11921 = vmatprep.mubr.bf16.mxu0 %v1314_v35  ;;  %v1975_v28 = vpack.c.bf16 %v1940_v25, %v1939_v24  ;;  %v1612_v35 = vld [vmem:[%s13383_s7 + $0x3b] sm:$0xff]  ;;  %v12872_v25 = vld [vmem:[#allocation6 + $0x180] sm:$0xff]  }
  0xcd   : > { %11973 = vmatprep.mubr.bf16.mxu1 %v984_v29  ;;  %12006 = vmatpush3.bf16.msra.mxu0 %v12845_v31  ;;  %v1610_v31 = vld [vmem:[%s13383_s7 + $0x2b] sm:$0xff] }
  0xce   : > { %12007 = vmatprep.subr.bf16.mxu0 %v12846_v36  ;;  %12058 = vmatpush3.bf16.msra.mxu1 %v12851_v34  ;;  %v1611_v34 = vld [vmem:[%s13383_s7 + $0x33] sm:$0xff] }
  0xcf   : > { %12059 = vmatprep.subr.bf16.mxu1 %v12853_v37  ;;  %v1645_v39 = vpack.c.bf16 %v1612_v35, %v1611_v34  ;;  %v1959_v34 = vld [vmem:[%s13383_s7 + $0xb4] sm:$0xff]  ;;  %v1960_v35 = vld [vmem:[%s13383_s7 + $0xbc] sm:$0xff] }
  0xd1   : > { %12008 = vmatpush3.bf16.msra.mxu0 %v12846_v36  ;;  %v1944_v36 = vld [vmem:[%s13383_s7 + $0x3c] sm:$0xff] }
  0xd2   : > { %12009 = vmatprep.subr.bf16.mxu0 %v12847_v42  ;;  %12060 = vmatpush3.bf16.msra.mxu1 %v12853_v37  ;;  %v1644_v37 = vpack.c.bf16 %v1610_v31, %v1609_v30  ;;  %v1957_v30 = vld [vmem:[%s13383_s7 + $0xa4] sm:$0xff]  ;;  %v1958_v31 = vld [vmem:[%s13383_s7 + $0xac] sm:$0xff] }
  0xd3   : > { %11922 = vmatmul.mubr.bf16.gmra.mxu0 %v984_v29  ;;  %12061 = vmatprep.subr.bf16.mxu1 %v12854_v43  ;;  %v1943_v29 = vld [vmem:[%s13383_s7 + $0x34] sm:$0xff] }
  0xd4   : > { %11974 = vmatmul.mubr.bf16.gmra.mxu1 %v1316_v44  ;;  %11925 = vmatprep.mubr.bf16.mxu0 %v1316_v44  ;;  %v13531_v40 = vpack.c.bf16 %v1944_v36, %v1943_v29  ;;  %v12866_v44 = vld [vmem:[#allocation6 + $0x1f0] sm:$0xff]   ;;  %v13587_v29 = vld [vmem:[#allocation6 + $0x238] sm:$0xff]  }
  0xd5   : > { %11977 = vmatprep.mubr.bf16.mxu1 %v986_v45  ;;  %12010 = vmatpush3.bf16.msra.mxu0 %v12847_v42  ;;  %v1614_v42 = vld [vmem:[%s13383_s7 + $0x4b] sm:$0xff] }
  0xd6   : > { %12011 = vmatprep.subr.bf16.mxu0 %v12849_v46  ;;  %12062 = vmatpush3.bf16.msra.mxu1 %v12854_v43  ;;  %v12860_v43 = vld [vmem:[#allocation6 + $0x1b0] sm:$0xff]  }
  0xd7   : > { %12063 = vmatprep.subr.bf16.mxu1 %v12855_v49 }
  0xd9   : > { %12012 = vmatpush3.bf16.msra.mxu0 %v12849_v46  ;;  %v1946_v46 = vld [vmem:[%s13383_s7 + $0x4c] sm:$0xff] }
  0xda   : > { %12013 = vmatprep.subr.bf16.mxu0 %v12852_v52  ;;  %12064 = vmatpush3.bf16.msra.mxu1 %v12855_v49  ;;  %v12861_v49 = vld [vmem:[#allocation6 + $0x1a8] sm:$0xff]  }
  0xdb   : > { %11926 = vmatmul.mubr.bf16.gmra.mxu0 %v986_v45  ;;  %12065 = vmatprep.subr.bf16.mxu1 %v12857_v53  ;;  %v1945_v45 = vld [vmem:[%s13383_s7 + $0x44] sm:$0xff] }
  0xdc   : > { %11978 = vmatmul.mubr.bf16.gmra.mxu1 %v1318_v54  ;;  %11929 = vmatprep.mubr.bf16.mxu0 %v1318_v54  ;;  %v13545_v54 = vpack.c.bf16 %v1946_v46, %v1945_v45  ;;  %v1962_v45 = vld [vmem:[%s13383_s7 + $0xcc] sm:$0xff] }
  0xdd   : > { %11981 = vmatprep.mubr.bf16.mxu1 %v988_v55  ;;  %12014 = vmatpush3.bf16.msra.mxu0 %v12852_v52  ;;  %v12867_v52 = vld [vmem:[#allocation6 + $0x1e8] sm:$0xff]  }
  0xde   : > { %12015 = vmatprep.subr.bf16.mxu0 %v12856_v56  ;;  %12066 = vmatpush3.bf16.msra.mxu1 %v12857_v53  ;;  %v1646_v53 = vpack.c.bf16 %v1614_v42, %v1613_v41  ;;  %v13591_v41 = vpack.c.bf16 %v1960_v35, %v1959_v34  ;;  %v1629_v42 = vld [vmem:[%s13383_s7 + $0xc3] sm:$0xff]  ;;  %v1631_v46 = vld [vmem:[%s13383_s7 + $0xd3] sm:$0xff] }
  0xdf   : > { %12067 = vmatprep.subr.bf16.mxu1 %v12858_v57 }
  0xe1   : > { %12016 = vmatpush3.bf16.msra.mxu0 %v12856_v56  ;;  %v13547_v56 = vpack.c.bf16 %v1948_v51, %v1947_v50 }
  0xe2   : > { %12068 = vmatpush3.bf16.msra.mxu1 %v12858_v57  ;;  %12105 = vmatprep.subr.bf16.mxu0 %v13497_v62  ;;  %v1617_v57 = vld [vmem:[%s13383_s7 + $0x63] sm:$0xff] }
  0xe3   : > { %11930 = vmatmul.mubr.bf16.gmra.mxu0 %v988_v55  ;;  %12157 = vmatprep.subr.bf16.mxu1 %v13499_v63  ;;  %v1647_v55 = vpack.c.bf16 %v1616_v48, %v1615_v47  ;;  %v1648_v4 = vpack.c.bf16 %v1618_v58, %v1617_v57  ;;  %v1632_v47 = vld [vmem:[%s13383_s7 + $0xdb] sm:$0xff]  ;;  %v1634_v57 = vld [vmem:[%s13383_s7 + $0xeb] sm:$0xff] }
  0xe4   : > { %11982 = vmatmul.mubr.bf16.gmra.mxu1 %v1320_v0  ;;  %11933 = vmatprep.mubr.bf16.mxu0 %v1320_v0  ;;  %v1620_v0 = vld [vmem:[%s13383_s7 + $0x7b] sm:$0xff]  ;;  %v1965_v58 = vld [vmem:[%s13383_s7 + $0xe4] sm:$0xff] }
  0xe5   : > { %11985 = vmatprep.mubr.bf16.mxu1 %v990_v1  ;;  %v1963_v48 = vld [vmem:[%s13383_s7 + $0xd4] sm:$0xff] }
  0xeb   : > { %11934 = vmatmul.mubr.bf16.gmra.mxu0 %v990_v1  ;;  %v1951_v1 = vld [vmem:[%s13383_s7 + $0x74] sm:$0xff] }
  0xec   : > { %11986 = vmatmul.mubr.bf16.gmra.mxu1 %v1322_v6  ;;  %11937 = vmatprep.mubr.bf16.mxu0 %v1322_v6  ;;  %v13561_v9 = vpack.c.bf16 %v1952_v2, %v1951_v1 }
  0xed   : > { %11989 = vmatprep.mubr.bf16.mxu1 %v992_v7 }
  0xf3   : > { %11938 = vmatmul.mubr.bf16.gmra.mxu0 %v992_v7 }
  0xf4   : > { %11990 = vmatmul.mubr.bf16.gmra.mxu1 %v1324_v12  ;;  %11941 = vmatprep.mubr.bf16.mxu0 %v1324_v12  ;;  %v1622_v12 = vld [vmem:[%s13383_s7 + $0x8b] sm:$0xff] }
  0xf5   : > { %11993 = vmatprep.mubr.bf16.mxu1 %v994_v13  ;;  %v1650_v20 = vpack.c.bf16 %v1622_v12, %v1621_v11  ;;  %v1638_v11 = vld [vmem:[%s13383_s7 + $0x10b] sm:$0xff] }
  0xf6   : > { %v1969_v12 = vld [vmem:[%s13383_s7 + $0x104] sm:$0xff] }
  0xfb   : > { %11942 = vmatmul.mubr.bf16.gmra.mxu0 %v994_v13  ;;  %v1953_v13 = vld [vmem:[%s13383_s7 + $0x84] sm:$0xff] }
  0xfc   : > { %11994 = vmatmul.mubr.bf16.gmra.mxu1 %v1326_v18  ;;  %11945 = vmatprep.mubr.bf16.mxu0 %v1326_v18  ;;  %v1956_v18 = vld [vmem:[%s13383_s7 + $0x9c] sm:$0xff]  ;;  %v13573_v22 = vpack.c.bf16 %v1954_v14, %v1953_v13  ;;  %v1970_v14 = vld [vmem:[%s13383_s7 + $0x10c] sm:$0xff] }
  0xfd   : > { %11997 = vmatprep.mubr.bf16.mxu1 %v996_v19  ;;  %v13575_v24 = vpack.c.bf16 %v1956_v18, %v1955_v17 }
 0x103   : > { %11946 = vmatmul.mubr.bf16.gmra.mxu0 %v996_v19  ;;  %v12868_v19 = vld [vmem:[#allocation6 + $0x188] sm:$0xff]  }
 0x104   : > { %11998 = vmatmul.mubr.bf16.gmra.mxu1 %v1328_v26  ;;  %12017 = vmatprep.mubr.bf16.mxu0 %v1643_v27  ;;  %v12874_v26 = vld [vmem:[#allocation6 + $0x1c0] sm:$0xff]  }
 0x105   : > { %12069 = vmatprep.mubr.bf16.mxu1 %v1975_v28  ;;  %v1625_v27 = vld [vmem:[%s13383_s7 + $0xa3] sm:$0xff]  ;;  %v1626_v28 = vld [vmem:[%s13383_s7 + $0xab] sm:$0xff] }
 0x106   : > { %v1652_v36 = vpack.c.bf16 %v1626_v28, %v1625_v27 }
 0x10b   : > { %12018 = vmatmul.mubr.bf16.vlgmr.msra.gmra.mxu0 %v1644_v37  ;;  %v13589_v37 = vpack.c.bf16 %v1958_v31, %v1957_v30  ;;  %v13644_v30 = vpack.c.bf16 %v1970_v14, %v1969_v12  ;;  %v1659_v31 = vpack.c.bf16 %v1640_v16, %v1639_v15  ;;  %v2605_v16 = vld [vmem:[%s13383_s7 + $0x35] sm:$0xff] }
 0x10c   : > { %12106 = vmatpush3.bf16.msra.mxu0 %v13497_v62  ;;  %12070 = vmatmul.mubr.bf16.vlgmr.msra.gmra.mxu1 %v13529_v38  ;;  %v1950_v62 = vld [vmem:[%s13383_s7 + $0x6c] sm:$0xff] }
 0x10d   : > { %12021 = vmatprep.mubr.bf16.mxu0 %v1645_v39  ;;  %12073 = vmatprep.mubr.bf16.mxu1 %v13531_v40  ;;  %v13559_v6 = vpack.c.bf16 %v1950_v62, %v1949_v61  ;;  %v1653_v39 = vpack.c.bf16 %v1628_v33, %v1627_v32  ;;  %v1636_v61 = vld [vmem:[%s13383_s7 + $0xfb] sm:$0xff] }
 0x10e   : > { %12107 = vmatprep.subr.bf16.mxu0 %v12860_v43  ;;  %12158 = vmatpush3.bf16.msra.mxu1 %v13499_v63  ;;  %v1619_v63 = vld [vmem:[%s13383_s7 + $0x73] sm:$0xff] }
 0x10f   : > { %12159 = vmatprep.subr.bf16.mxu1 %v12866_v44  ;;  %v1649_v7 = vpack.c.bf16 %v1620_v0, %v1619_v63  ;;  %v1967_v62 = vld [vmem:[%s13383_s7 + $0xf4] sm:$0xff]  ;;  %v1968_v63 = vld [vmem:[%s13383_s7 + $0xfc] sm:$0xff] }
 0x110   : > { %12108 = vmatpush3.bf16.msra.mxu0 %v12860_v43  ;;  %v1630_v43 = vld [vmem:[%s13383_s7 + $0xcb] sm:$0xff] }
 0x111   : > { %12109 = vmatprep.subr.bf16.mxu0 %v12861_v49  ;;  %v1654_v50 = vpack.c.bf16 %v1630_v43, %v1629_v42 }
 0x112   : > { %12160 = vmatpush3.bf16.msra.mxu1 %v12866_v44  ;;  %v1961_v44 = vld [vmem:[%s13383_s7 + $0xc4] sm:$0xff] }
 0x113   : > { %12022 = vmatmul.mubr.bf16.gmra.mxu0 %v1646_v53  ;;  %12161 = vmatprep.subr.bf16.mxu1 %v12867_v52  ;;  %v13604_v51 = vpack.c.bf16 %v1962_v45, %v1961_v44  ;;  %v1641_v45 = vld [vmem:[%s13383_s7 + $0x123] sm:$0xff] }
 0x114   : > { %12074 = vmatmul.mubr.bf16.gmra.mxu1 %v13545_v54  ;;  %12025 = vmatprep.mubr.bf16.mxu0 %v1647_v55  ;;  %v1633_v55 = vld [vmem:[%s13383_s7 + $0xe3] sm:$0xff] }
 0x115   : > { %12077 = vmatprep.mubr.bf16.mxu1 %v13547_v56  ;;  %12110 = vmatpush3.bf16.msra.mxu0 %v12861_v49  ;;  %v1964_v49 = vld [vmem:[%s13383_s7 + $0xdc] sm:$0xff]  ;;  %v1656_v0 = vpack.c.bf16 %v1634_v57, %v1633_v55  ;;  %v2603_v57 = vld [vmem:[%s13383_s7 + $0x25] sm:$0xff] }
 0x116   : > { %12111 = vmatprep.subr.bf16.mxu0 %v12862_v59  ;;  %12162 = vmatpush3.bf16.msra.mxu1 %v12867_v52  ;;  %v1655_v52 = vpack.c.bf16 %v1632_v47, %v1631_v46  ;;  %v13606_v53 = vpack.c.bf16 %v1964_v49, %v1963_v48  ;;  %v1642_v46 = vld [vmem:[%s13383_s7 + $0x12b] sm:$0xff] }
 0x117   : > { %12163 = vmatprep.subr.bf16.mxu1 %v12869_v60  ;;  %v1973_v48 = vld [vmem:[%s13383_s7 + $0x124] sm:$0xff]  ;;  %v1974_v49 = vld [vmem:[%s13383_s7 + $0x12c] sm:$0xff] }
 0x119   : > { %12112 = vmatpush3.bf16.msra.mxu0 %v12862_v59  ;;  %v1966_v59 = vld [vmem:[%s13383_s7 + $0xec] sm:$0xff] }
 0x11a   : > { %12113 = vmatprep.subr.bf16.mxu0 %v12863_v3  ;;  %12164 = vmatpush3.bf16.msra.mxu1 %v12869_v60  ;;  %v1635_v60 = vld [vmem:[%s13383_s7 + $0xf3] sm:$0xff]  ;;  %v13618_v1 = vpack.c.bf16 %v1966_v59, %v1965_v58 }
 0x11b   : > { %12026 = vmatmul.mubr.bf16.gmra.mxu0 %v1648_v4  ;;  %12165 = vmatprep.subr.bf16.mxu1 %v12870_v5  ;;  %v1657_v2 = vpack.c.bf16 %v1636_v61, %v1635_v60  ;;  %v13625_v4 = vpack.c.bf16 %v1968_v63, %v1967_v62  ;;  %v2604_v58 = vld [vmem:[%s13383_s7 + $0x2d] sm:$0xff]  ;;  %v1660_v60 = vpack.c.bf16 %v1642_v46, %v1641_v45  ;;  %v12876_v45 = vld [vmem:[#allocation6 + $0x230] sm:$0xff]  }
 0x11c   : > { %12078 = vmatmul.mubr.bf16.gmra.mxu1 %v13559_v6  ;;  %12029 = vmatprep.mubr.bf16.mxu0 %v1649_v7 }
 0x11d   : > { %12081 = vmatprep.mubr.bf16.mxu1 %v13561_v9  ;;  %12114 = vmatpush3.bf16.msra.mxu0 %v12863_v3  ;;  %v13623_v3 = vld [vmem:[%s17071_s3] ss:$0 sm:$0xff] }
 0x11e   : > { %12115 = vmatprep.subr.bf16.mxu0 %v12865_v8  ;;  %12166 = vmatpush3.bf16.msra.mxu1 %v12870_v5 }
 0x11f   : > { %12167 = vmatprep.subr.bf16.mxu1 %v12871_v10 }
 0x121   : > { %12116 = vmatpush3.bf16.msra.mxu0 %v12865_v8 }
 0x122   : > { %12117 = vmatprep.subr.bf16.mxu0 %v12868_v19  ;;  %12168 = vmatpush3.bf16.msra.mxu1 %v12871_v10  ;;  %v1637_v10 = vld [vmem:[%s13383_s7 + $0x103] sm:$0xff] }
 0x123   : > { %12030 = vmatmul.mubr.bf16.gmra.mxu0 %v1650_v20  ;;  %12169 = vmatprep.subr.bf16.mxu1 %v12873_v21  ;;  %v1971_v20 = vld [vmem:[%s13383_s7 + $0x114] sm:$0xff] }
 0x124   : > { %12082 = vmatmul.mubr.bf16.gmra.mxu1 %v13573_v22  ;;  %12033 = vmatprep.mubr.bf16.mxu0 %v1651_v23 }
 0x125   : > { %12085 = vmatprep.mubr.bf16.mxu1 %v13575_v24  ;;  %12118 = vmatpush3.bf16.msra.mxu0 %v12868_v19 }
 0x126   : > { %12119 = vmatprep.subr.bf16.mxu0 %v12872_v25  ;;  %12170 = vmatpush3.bf16.msra.mxu1 %v12873_v21  ;;  %v1972_v21 = vld [vmem:[%s13383_s7 + $0x11c] sm:$0xff] }
 0x127   : > { %12171 = vmatprep.subr.bf16.mxu1 %v12874_v26  ;;  %v13646_v33 = vpack.c.bf16 %v1972_v21, %v1971_v20 }
 0x129   : > { %12120 = vmatpush3.bf16.msra.mxu0 %v12872_v25  ;;  %v1658_v25 = vpack.c.bf16 %v1638_v11, %v1637_v10 }
 0x12a   : > { %12172 = vmatpush3.bf16.msra.mxu1 %v12874_v26  ;;  %12209 = vmatprep.subr.bf16.mxu0 %v13587_v29 }
 0x12b   : > { %12034 = vmatmul.mubr.bf16.gmra.mxu0 %v1652_v36 }
 0x12c   : > { %12086 = vmatmul.mubr.bf16.gmra.mxu1 %v13589_v37  ;;  %12037 = vmatprep.mubr.bf16.mxu0 %v1653_v39 }
 0x12d   : > { %12089 = vmatprep.mubr.bf16.mxu1 %v13591_v41 }
 0x133   : > { %12038 = vmatmul.mubr.bf16.gmra.mxu0 %v1654_v50 }
 0x134   : > { %12090 = vmatmul.mubr.bf16.gmra.mxu1 %v13604_v51  ;;  %12041 = vmatprep.mubr.bf16.mxu0 %v1655_v52 }
 0x135   : > { %12093 = vmatprep.mubr.bf16.mxu1 %v13606_v53 }
 0x13b   : > { %v11811_v5 = vpop.f32.mrf.mxu0  ;;  %12042 = vmatmul.mubr.bf16.gmra.mxu0 %v1656_v0  ;;  %v13668_v0 = vpack.c.bf16 %v1974_v49, %v1973_v48 }
 0x13c   : > { %v577_v7 = vadd.f32 %v11811_v5, %v13623_v3  ;;  %v11863_v8 = vpop.f32.mrf.mxu1  ;;  %12094 = vmatmul.mubr.bf16.gmra.mxu1 %v13618_v1  ;;  %12045 = vmatprep.mubr.bf16.mxu0 %v1657_v2  ;;  %v2639_v5 = vpack.c.bf16 %v2604_v58, %v2603_v57  ;;  %v2610_v57 = vld [vmem:[%s13383_s7 + $0x5d] sm:$0xff] }
 0x13d   : > { %v432_v13 = vpop.f32.mrf.mxu0  ;;  %12097 = vmatprep.mubr.bf16.mxu1 %v13625_v4  ;;  %v12877_v58 = vld [vmem:[#allocation6 + $0x228] sm:$0xff]  }
 0x13e   : > { %v575_v17 = vadd.f32 %v13623_v3, %v432_v13  ;;  %v13637_v18 = vadd.f32 %v11863_v8, %v577_v7  ;;  %v764_v19 = vpop.f32.mrf.mxu1 }
 0x13f   : > { %v11812_v23 = vpop.f32.mrf.mxu0 }
 0x140   : > { %v578_v26 = vadd.f32 %v11812_v23, %v13623_v3  ;;  %v13642_v27 = vadd.f32 %v764_v19, %v575_v17  ;;  %v11864_v28 = vpop.f32.mrf.mxu1  ;;  %v2606_v17 = vld [vmem:[%s13383_s7 + $0x3d] sm:$0xff]  ;;  %v2607_v23 = vld [vmem:[%s13383_s7 + $0x45] sm:$0xff] }
 0x141   : > { %v435_v32 = vpop.f32.mrf.mxu0 }
 0x142   : > { %v576_v34 = vadd.f32 %v13623_v3, %v435_v32  ;;  %v13649_v35 = vadd.f32 %v11864_v28, %v578_v26  ;;  %v767_v36 = vpop.f32.mrf.mxu1 }
 0x143   : > { %v11815_v39 = vpop.f32.mrf.mxu0  ;;  %12046 = vmatmul.mubr.bf16.gmra.mxu0 %v1658_v25  ;;  %v2608_v25 = vld [vmem:[%s13383_s7 + $0x4d] sm:$0xff] }
 0x144   : > { %v581_v42 = vadd.f32 %v11815_v39, %v13623_v3  ;;  %v13652_v43 = vadd.f32 %v767_v36, %v576_v34  ;;  %v11867_v44 = vpop.f32.mrf.mxu1  ;;  %12098 = vmatmul.mubr.bf16.gmra.mxu1 %v13644_v30  ;;  %12049 = vmatprep.mubr.bf16.mxu0 %v1659_v31  ;;  %v2640_v34 = vpack.c.bf16 %v2606_v17, %v2605_v16  ;;  %v12878_v16 = vld [vmem:[#allocation6 + $0x220] sm:$0xff]  }
 0x145   : > { %v448_v47 = vpop.f32.mrf.mxu0  ;;  %12101 = vmatprep.mubr.bf16.mxu1 %v13646_v33 }
 0x146   : > { %v579_v50 = vadd.f32 %v13623_v3, %v448_v47  ;;  %v13661_v52 = vadd.f32 %v11867_v44, %v581_v42  ;;  %v780_v55 = vpop.f32.mrf.mxu1 }
 0x147   : > { %v11816_v59 = vpop.f32.mrf.mxu0 }
 0x148   : > { %v582_v61 = vadd.f32 %v11816_v59, %v13623_v3  ;;  %v13666_v62 = vadd.f32 %v780_v55, %v579_v50  ;;  %v11868_v63 = vpop.f32.mrf.mxu1  ;;  %v2609_v55 = vld [vmem:[%s13383_s7 + $0x55] sm:$0xff] }
 0x149   : > { %v451_v2 = vpop.f32.mrf.mxu0 }
 0x14a   : > { %v580_v7 = vadd.f32 %v13623_v3, %v451_v2  ;;  %v13671_v8 = vadd.f32 %v11868_v63, %v582_v61  ;;  %v783_v10 = vpop.f32.mrf.mxu1  ;;  %v2611_v61 = vld [vmem:[%s13383_s7 + $0x65] sm:$0xff]  ;;  %v2612_v63 = vld [vmem:[%s13383_s7 + $0x6d] sm:$0xff] }
 0x14b   : > { %v11819_v11 = vpop.f32.mrf.mxu0  ;;  %12050 = vmatmul.mubr.bf16.gmra.mxu0 %v1660_v60 }
 0x14c   : > { %v585_v12 = vadd.f32 %v11819_v11, %v13623_v3  ;;  %v13674_v13 = vadd.f32 %v783_v10, %v580_v7  ;;  %v11871_v14 = vpop.f32.mrf.mxu1  ;;  %12102 = vmatmul.mubr.bf16.gmra.mxu1 %v13668_v0  ;;  %12121 = vmatprep.mubr.bf16.mxu0 %v13529_v38  ;;  %v2641_v38 = vpack.c.bf16 %v2608_v25, %v2607_v23 }
 0x14d   : > { %v464_v15 = vpop.f32.mrf.mxu0  ;;  %12173 = vmatprep.mubr.bf16.mxu1 %v2639_v5  ;;  %v2642_v10 = vpack.c.bf16 %v2610_v57, %v2609_v55  ;;  %v2643_v11 = vpack.c.bf16 %v2612_v63, %v2611_v61 }
 0x14e   : > { %v583_v19 = vadd.f32 %v13623_v3, %v464_v15  ;;  %v13681_v20 = vadd.f32 %v11871_v14, %v585_v12  ;;  %v796_v21 = vpop.f32.mrf.mxu1 }
 0x14f   : > { %v11820_v26 = vpop.f32.mrf.mxu0 }
 0x150   : > { %v586_v28 = vadd.f32 %v11820_v26, %v13623_v3  ;;  %v13686_v31 = vadd.f32 %v796_v21, %v583_v19  ;;  %v11872_v32 = vpop.f32.mrf.mxu1  ;;  %v2613_v26 = vld [vmem:[%s13383_s7 + $0x75] sm:$0xff] }
 0x151   : > { %v467_v36 = vpop.f32.mrf.mxu0 }
 0x152   : > { %v584_v39 = vadd.f32 %v13623_v3, %v467_v36  ;;  %v13689_v42 = vadd.f32 %v11872_v32, %v586_v28  ;;  %v799_v44 = vpop.f32.mrf.mxu1  ;;  %v2614_v28 = vld [vmem:[%s13383_s7 + $0x7d] sm:$0xff] }
 0x153   : > { %v11823_v46 = vpop.f32.mrf.mxu0  ;;  %12122 = vmatmul.mubr.bf16.vlgmr.msra.gmra.mxu0 %v13531_v40 }
 0x154   : > { %v589_v47 = vadd.f32 %v11823_v46, %v13623_v3  ;;  %v13693_v48 = vadd.f32 %v799_v44, %v584_v39  ;;  %12210 = vmatpush3.bf16.msra.mxu0 %v13587_v29  ;;  %v11875_v49 = vpop.f32.mrf.mxu1  ;;  %12174 = vmatmul.mubr.bf16.vlgmr.msra.gmra.mxu1 %v2640_v34  ;;  %v12879_v39 = vld [vmem:[#allocation6 + $0x218] sm:$0xff]  }
 0x155   : > { %v480_v50 = vpop.f32.mrf.mxu0  ;;  %12125 = vmatprep.mubr.bf16.mxu0 %v13545_v54  ;;  %12177 = vmatprep.mubr.bf16.mxu1 %v2641_v38  ;;  %v2615_v38 = vld [vmem:[%s13383_s7 + $0x85] sm:$0xff] }
 0x156   : > { %v587_v59 = vadd.f32 %v13623_v3, %v480_v50  ;;  %v13700_v40 = vadd.f32 %v11875_v49, %v589_v47  ;;  %v812_v60 = vpop.f32.mrf.mxu1  ;;  %12211 = vmatprep.subr.bf16.mxu0 %v12876_v45  ;;  %v2644_v47 = vpack.c.bf16 %v2614_v28, %v2613_v26 }
 0x157   : > { %v11824_v2 = vpop.f32.mrf.mxu0 }
 0x158   : > { %v590_v29 = vadd.f32 %v11824_v2, %v13623_v3  ;;  %v13705_v5 = vadd.f32 %v812_v60, %v587_v59  ;;  %v11876_v7 = vpop.f32.mrf.mxu1  ;;  %12212 = vmatpush3.bf16.msra.mxu0 %v12876_v45  ;;  %v12880_v59 = vld [vmem:[#allocation6 + $0x210] sm:$0xff]  }
 0x159   : > { %v483_v54 = vpop.f32.mrf.mxu0  ;;  %12213 = vmatprep.subr.bf16.mxu0 %v12877_v58 }
 0x15a   : > { %v588_v12 = vadd.f32 %v13623_v3, %v483_v54  ;;  %v13708_v14 = vadd.f32 %v11876_v7, %v590_v29  ;;  %v815_v15 = vpop.f32.mrf.mxu1  ;;  %v2617_v7 = vld [vmem:[%s13383_s7 + $0x95] sm:$0xff] }
 0x15b   : > { %v11827_v17 = vpop.f32.mrf.mxu0  ;;  %12126 = vmatmul.mubr.bf16.gmra.mxu0 %v13547_v56  ;;  %v2616_v56 = vld [vmem:[%s13383_s7 + $0x8d] sm:$0xff] }
 0x15c   : > { %v593_v19 = vadd.f32 %v11827_v17, %v13623_v3  ;;  %v13712_v21 = vadd.f32 %v815_v15, %v588_v12  ;;  %v11879_v23 = vpop.f32.mrf.mxu1  ;;  %12178 = vmatmul.mubr.bf16.gmra.mxu1 %v2642_v10  ;;  %12129 = vmatprep.mubr.bf16.mxu0 %v13559_v6  ;;  %v2645_v50 = vpack.c.bf16 %v2616_v56, %v2615_v38  ;;  %v2618_v10 = vld [vmem:[%s13383_s7 + $0x9d] sm:$0xff]  ;;  %v2619_v15 = vld [vmem:[%s13383_s7 + $0xa5] sm:$0xff] }
 0x15d   : > { %v496_v25 = vpop.f32.mrf.mxu0  ;;  %12181 = vmatprep.mubr.bf16.mxu1 %v2643_v11  ;;  %12214 = vmatpush3.bf16.msra.mxu0 %v12877_v58  ;;  %v12882_v56 = vld [vmem:[#allocation6 + $0x200] sm:$0xff]  }
 0x15e   : > { %v591_v32 = vadd.f32 %v13623_v3, %v496_v25  ;;  %v13718_v34 = vadd.f32 %v11879_v23, %v593_v19  ;;  %v828_v36 = vpop.f32.mrf.mxu1  ;;  %12215 = vmatprep.subr.bf16.mxu0 %v12878_v16  ;;  %v2646_v25 = vpack.c.bf16 %v2618_v10, %v2617_v7 }
 0x15f   : > { %v11828_v44 = vpop.f32.mrf.mxu0 }
 0x160   : > { %v594_v45 = vadd.f32 %v11828_v44, %v13623_v3  ;;  %v13723_v46 = vadd.f32 %v828_v36, %v591_v32  ;;  %v11880_v6 = vpop.f32.mrf.mxu1 }
 0x161   : > { %v499_v49 = vpop.f32.mrf.mxu0  ;;  %12216 = vmatpush3.bf16.msra.mxu0 %v12878_v16  ;;  %v12881_v16 = vld [vmem:[#allocation6 + $0x208] sm:$0xff]  }
 0x162   : > { %v592_v55 = vadd.f32 %v13623_v3, %v499_v49  ;;  %v13726_v57 = vadd.f32 %v11880_v6, %v594_v45  ;;  %v831_v58 = vpop.f32.mrf.mxu1  ;;  %12217 = vmatprep.subr.bf16.mxu0 %v12879_v39  ;;  %v2621_v49 = vld [vmem:[%s13383_s7 + $0xb5] sm:$0xff] }
 0x163   : > { %v11831_v60 = vpop.f32.mrf.mxu0  ;;  %12130 = vmatmul.mubr.bf16.gmra.mxu0 %v13561_v9  ;;  %v2620_v9 = vld [vmem:[%s13383_s7 + $0xad] sm:$0xff] }
 0x164   : > { %v597_v61 = vadd.f32 %v11831_v60, %v13623_v3  ;;  %v13730_v63 = vadd.f32 %v831_v58, %v592_v55  ;;  %v11883_v2 = vpop.f32.mrf.mxu1  ;;  %12182 = vmatmul.mubr.bf16.gmra.mxu1 %v2644_v47  ;;  %12133 = vmatprep.mubr.bf16.mxu0 %v13573_v22  ;;  %v2647_v28 = vpack.c.bf16 %v2620_v9, %v2619_v15  ;;  %v2623_v60 = vld [vmem:[%s13383_s7 + $0xc5] sm:$0xff] }
 0x165   : > { %v512_v29 = vpop.f32.mrf.mxu0  ;;  %12185 = vmatprep.mubr.bf16.mxu1 %v2645_v50  ;;  %12218 = vmatpush3.bf16.msra.mxu0 %v12879_v39  ;;  %v2622_v50 = vld [vmem:[%s13383_s7 + $0xbd] sm:$0xff] }
 0x166   : > { %v595_v54 = vadd.f32 %v13623_v3, %v512_v29  ;;  %v13736_v11 = vadd.f32 %v11883_v2, %v597_v61  ;;  %v844_v12 = vpop.f32.mrf.mxu1  ;;  %12219 = vmatprep.subr.bf16.mxu0 %v12880_v59 }
 0x167   : > { %v11832_v17 = vpop.f32.mrf.mxu0 }
 0x168   : > { %v598_v19 = vadd.f32 %v11832_v17, %v13623_v3  ;;  %v13741_v23 = vadd.f32 %v844_v12, %v595_v54  ;;  %v11884_v22 = vpop.f32.mrf.mxu1 }
 0x169   : > { %v515_v26 = vpop.f32.mrf.mxu0  ;;  %12220 = vmatpush3.bf16.msra.mxu0 %v12880_v59 }
 0x16a   : > { %v596_v32 = vadd.f32 %v13623_v3, %v515_v26  ;;  %v13744_v36 = vadd.f32 %v11884_v22, %v598_v19  ;;  %v847_v38 = vpop.f32.mrf.mxu1  ;;  %12221 = vmatprep.subr.bf16.mxu0 %v12881_v16  ;;  %v2625_v26 = vld [vmem:[%s13383_s7 + $0xd5] sm:$0xff] }
 0x16b   : > { %v11835_v39 = vpop.f32.mrf.mxu0  ;;  %12134 = vmatmul.mubr.bf16.gmra.mxu0 %v13575_v24  ;;  %v2624_v24 = vld [vmem:[%s13383_s7 + $0xcd] sm:$0xff] }
 0x16c   : > { %v601_v44 = vadd.f32 %v11835_v39, %v13623_v3  ;;  %v13748_v45 = vadd.f32 %v847_v38, %v596_v32  ;;  %v11887_v6 = vpop.f32.mrf.mxu1  ;;  %12186 = vmatmul.mubr.bf16.gmra.mxu1 %v2646_v25  ;;  %12137 = vmatprep.mubr.bf16.mxu0 %v13589_v37  ;;  %v2648_v37 = vpack.c.bf16 %v2622_v50, %v2621_v49  ;;  %v2627_v39 = vld [vmem:[%s13383_s7 + $0xe5] sm:$0xff] }
 0x16d   : > { %v528_v47 = vpop.f32.mrf.mxu0  ;;  %12189 = vmatprep.mubr.bf16.mxu1 %v2647_v28  ;;  %12222 = vmatpush3.bf16.msra.mxu0 %v12881_v16  ;;  %v2649_v54 = vpack.c.bf16 %v2624_v24, %v2623_v60  ;;  %v2626_v28 = vld [vmem:[%s13383_s7 + $0xdd] sm:$0xff] }
 0x16e   : > { %v599_v55 = vadd.f32 %v13623_v3, %v528_v47  ;;  %v13754_v58 = vadd.f32 %v11887_v6, %v601_v44  ;;  %v860_v59 = vpop.f32.mrf.mxu1  ;;  %12223 = vmatprep.subr.bf16.mxu0 %v12882_v56  ;;  %v2628_v44 = vld [vmem:[%s13383_s7 + $0xed] sm:$0xff]  ;;  %v2650_v50 = vpack.c.bf16 %v2626_v28, %v2625_v26 }
 0x16f   : > { %v11836_v61 = vpop.f32.mrf.mxu0 }
 0x170   : > { %v602_v2 = vadd.f32 %v11836_v61, %v13623_v3  ;;  %v13759_v29 = vadd.f32 %v860_v59, %v599_v55  ;;  %v11888_v7 = vpop.f32.mrf.mxu1  ;;  %v2651_v55 = vpack.c.bf16 %v2628_v44, %v2627_v39 }
 0x171   : > { %v531_v10 = vpop.f32.mrf.mxu0  ;;  %12224 = vmatpush3.bf16.msra.mxu0 %v12882_v56 }
 0x172   : > { %v600_v12 = vadd.f32 %v13623_v3, %v531_v10  ;;  %v13762_v15 = vadd.f32 %v11888_v7, %v602_v2  ;;  %v863_v9 = vpop.f32.mrf.mxu1 }
 0x173   : > { %v11839_v16 = vpop.f32.mrf.mxu0  ;;  %12138 = vmatmul.mubr.bf16.gmra.mxu0 %v13591_v41 }
 0x174   : > { %v605_v17 = vadd.f32 %v11839_v16, %v13623_v3  ;;  %v13766_v19 = vadd.f32 %v863_v9, %v600_v12  ;;  %v11891_v22 = vpop.f32.mrf.mxu1  ;;  %12190 = vmatmul.mubr.bf16.gmra.mxu1 %v2648_v37  ;;  %12141 = vmatprep.mubr.bf16.mxu0 %v13604_v51  ;;  %v2630_v12 = vld [vmem:[%s13383_s7 + $0xfd] sm:$0xff] }
 0x175   : > { %v544_v25 = vpop.f32.mrf.mxu0  ;;  %12193 = vmatprep.mubr.bf16.mxu1 %v2649_v54  ;;  %v2629_v54 = vld [vmem:[%s13383_s7 + $0xf5] sm:$0xff] }
 0x176   : > { %v603_v32 = vadd.f32 %v13623_v3, %v544_v25  ;;  %v13772_v38 = vadd.f32 %v11891_v22, %v605_v17  ;;  %v876_v56 = vpop.f32.mrf.mxu1  ;;  %v2631_v22 = vld [vmem:[%s13383_s7 + $0x105] sm:$0xff]  ;;  %v2632_v25 = vld [vmem:[%s13383_s7 + $0x10d] sm:$0xff] }
 0x177   : > { %v11840_v41 = vpop.f32.mrf.mxu0  ;;  %v2653_v39 = vpack.c.bf16 %v2632_v25, %v2631_v22 }
 0x178   : > { %v606_v6 = vadd.f32 %v11840_v41, %v13623_v3  ;;  %v13777_v47 = vadd.f32 %v876_v56, %v603_v32  ;;  %v11892_v49 = vpop.f32.mrf.mxu1 }
 0x179   : > { %v547_v51 = vpop.f32.mrf.mxu0 }
 0x17a   : > { %v604_v59 = vadd.f32 %v13623_v3, %v547_v51  ;;  %v13780_v60 = vadd.f32 %v11892_v49, %v606_v6  ;;  %v879_v24 = vpop.f32.mrf.mxu1  ;;  %v2633_v51 = vld [vmem:[%s13383_s7 + $0x115] sm:$0xff] }
 0x17b   : > { %v11843_v61 = vpop.f32.mrf.mxu0  ;;  %12142 = vmatmul.mubr.bf16.gmra.mxu0 %v13606_v53 }
 0x17c   : > { %v609_v2 = vadd.f32 %v11843_v61, %v13623_v3  ;;  %v13784_v7 = vadd.f32 %v879_v24, %v604_v59  ;;  %v11895_v37 = vpop.f32.mrf.mxu1  ;;  %12194 = vmatmul.mubr.bf16.gmra.mxu1 %v2650_v50  ;;  %12145 = vmatprep.mubr.bf16.mxu0 %v13618_v1  ;;  %v2652_v1 = vpack.c.bf16 %v2630_v12, %v2629_v54 }
 0x17d   : > { %v560_v10 = vpop.f32.mrf.mxu0  ;;  %12197 = vmatprep.mubr.bf16.mxu1 %v2651_v55  ;;  %v2634_v55 = vld [vmem:[%s13383_s7 + $0x11d] sm:$0xff] }
 0x17e   : > { %v607_v9 = vadd.f32 %v13623_v3, %v560_v10  ;;  %v13790_v16 = vadd.f32 %v11895_v37, %v609_v2  ;;  %v892_v17 = vpop.f32.mrf.mxu1  ;;  %v2635_v2 = vld [vmem:[%s13383_s7 + $0x125] sm:$0xff]  ;;  %v2636_v37 = vld [vmem:[%s13383_s7 + $0x12d] sm:$0xff]  ;;  %v2654_v54 = vpack.c.bf16 %v2634_v55, %v2633_v51 }
 0x17f   : > { %v11844_v53 = vpop.f32.mrf.mxu0 }
 0x180   : > { %v610_v26 = vadd.f32 %v11844_v53, %v13623_v3  ;;  %v13795_v28 = vadd.f32 %v892_v17, %v607_v9  ;;  %v11896_v32 = vpop.f32.mrf.mxu1  ;;  %v2655_v9 = vpack.c.bf16 %v2636_v37, %v2635_v2 }
 0x181   : > { %v13797_v56 = vpop.f32.mrf.mxu0 }
 0x182   : > { %v13799_v44 = vadd.f32 %v11896_v32, %v610_v26  ;;  %v13801_v41 = vpop.f32.mrf.mxu1  ;;  %v2305_v26 = vld [vmem:[%s13383_s7 + $0x134] sm:$0xff]  ;;  %v2306_v32 = vld [vmem:[%s13383_s7 + $0x13c] sm:$0xff] }
 0x183   : > { %v11915_v6 = vpop.f32.mrf.mxu0  ;;  %12146 = vmatmul.mubr.bf16.gmra.mxu0 %v13625_v4  ;;  %v2324_v55 = vpack.c.bf16 %v2306_v32, %v2305_v26 }
 0x184   : > { %v1241_v3 = vadd.f32 %v11915_v6, %v13637_v18  ;;  %v11967_v49 = vpop.f32.mrf.mxu1  ;;  %12198 = vmatmul.mubr.bf16.gmra.mxu1 %v2652_v1  ;;  %12149 = vmatprep.mubr.bf16.mxu0 %v13644_v30  ;;  %v2637_v1 = vld [vmem:[%s13383_s7 + $0x135] sm:$0xff]  ;;  %v2935_v6 = vld [vmem:[%s13383_s7 + $0x26] sm:$0xff] }
 0x185   : > { %v1096_v50 = vpop.f32.mrf.mxu0  ;;  %12201 = vmatprep.mubr.bf16.mxu1 %v2653_v39 }
 0x186   : > { %v1239_v59 = vadd.f32 %v1096_v50, %v13642_v27  ;;  %v13809_v24 = vadd.f32 %v11967_v49, %v1241_v3  ;;  %v1428_v61 = vpop.f32.mrf.mxu1  ;;  %v2936_v3 = vld [vmem:[%s13383_s7 + $0x2e] sm:$0xff] }
 0x187   : > { %v11916_v10 = vpop.f32.mrf.mxu0  ;;  %v2971_v2 = vpack.c.bf16 %v2936_v3, %v2935_v6 }
 0x188   : > { %v1242_v4 = vadd.f32 %v11916_v10, %v13649_v35  ;;  %v13814_v18 = vadd.f32 %v1428_v61, %v1239_v59  ;;  %v11968_v30 = vpop.f32.mrf.mxu1 }
 0x189   : > { %v1099_v12 = vpop.f32.mrf.mxu0 }
 0x18a   : > { %v13817_v27 = vadd.f32 %v1099_v12, %v13652_v43  ;;  %v13819_v17 = vadd.f32 %v11968_v30, %v1242_v4  ;;  %v13821_v22 = vpop.f32.mrf.mxu1  ;;  %v2638_v43 = vld [vmem:[%s13383_s7 + $0x13d] sm:$0xff] }
 0x18b   : > { %v11919_v25 = vpop.f32.mrf.mxu0  ;;  %12150 = vmatmul.mubr.bf16.gmra.mxu0 %v13646_v33  ;;  %v2656_v61 = vpack.c.bf16 %v2638_v43, %v2637_v1  ;;  %v2937_v12 = vld [vmem:[%s13383_s7 + $0x36] sm:$0xff] }
 0x18c   : > { %v1245_v35 = vadd.f32 %v11919_v25, %v13661_v52  ;;  %v11971_v53 = vpop.f32.mrf.mxu1  ;;  %12202 = vmatmul.mubr.bf16.gmra.mxu1 %v2654_v54  ;;  %12153 = vmatprep.mubr.bf16.mxu0 %v13668_v0 }
 0x18d   : > { %v1112_v39 = vpop.f32.mrf.mxu0  ;;  %12205 = vmatprep.mubr.bf16.mxu1 %v2655_v9  ;;  %v2938_v9 = vld [vmem:[%s13383_s7 + $0x3e] sm:$0xff] }
 0x18e   : > { %v1243_v49 = vadd.f32 %v1112_v39, %v13666_v62  ;;  %v13833_v50 = vadd.f32 %v11971_v53, %v1245_v35  ;;  %v1444_v51 = vpop.f32.mrf.mxu1  ;;  %v2939_v35 = vld [vmem:[%s13383_s7 + $0x46] sm:$0xff]  ;;  %v2940_v53 = vld [vmem:[%s13383_s7 + $0x4e] sm:$0xff]  ;;  %v2972_v39 = vpack.c.bf16 %v2938_v9, %v2937_v12 }
 0x18f   : > { %v11920_v33 = vpop.f32.mrf.mxu0  ;;  %v2973_v3 = vpack.c.bf16 %v2940_v53, %v2939_v35 }
 0x190   : > { %v1246_v52 = vadd.f32 %v11920_v33, %v13671_v8  ;;  %v13836_v0 = vadd.f32 %v1444_v51, %v1243_v49  ;;  %v11972_v59 = vpop.f32.mrf.mxu1 }
 0x191   : > { %v1115_v37 = vpop.f32.mrf.mxu0 }
 0x192   : > { %v13839_v10 = vadd.f32 %v1115_v37, %v13674_v13  ;;  %v13841_v62 = vadd.f32 %v11972_v59, %v1246_v52  ;;  %v13843_v4 = vpop.f32.mrf.mxu1  ;;  %v2943_v37 = vld [vmem:[%s13383_s7 + $0x66] sm:$0xff] }
 0x193   : > { %v11923_v30 = vpop.f32.mrf.mxu0  ;;  %12154 = vmatmul.mubr.bf16.gmra.mxu0 %v2324_v55 }
 0x194   : > { %v1249_v8 = vadd.f32 %v11923_v30, %v13681_v20  ;;  %v11975_v54 = vpop.f32.mrf.mxu1  ;;  %12206 = vmatmul.mubr.bf16.gmra.mxu1 %v2656_v61  ;;  %12225 = vmatprep.mubr.bf16.mxu0 %v2971_v2  ;;  %v2942_v61 = vld [vmem:[%s13383_s7 + $0x5e] sm:$0xff]  ;;  %v2944_v30 = vld [vmem:[%s13383_s7 + $0x6e] sm:$0xff] }
 0x195   : > { %v1128_v25 = vpop.f32.mrf.mxu0  ;;  %v2975_v53 = vpack.c.bf16 %v2944_v30, %v2943_v37 }
 0x196   : > { %v1247_v26 = vadd.f32 %v1128_v25, %v13686_v31  ;;  %v13851_v13 = vadd.f32 %v11975_v54, %v1249_v8  ;;  %v1460_v32 = vpop.f32.mrf.mxu1 }
 0x197   : > { %v11924_v1 = vpop.f32.mrf.mxu0 }
 0x198   : > { %v1250_v43 = vadd.f32 %v11924_v1, %v13689_v42  ;;  %v13854_v20 = vadd.f32 %v1460_v32, %v1247_v26  ;;  %v11976_v6 = vpop.f32.mrf.mxu1  ;;  %v2941_v42 = vld [vmem:[%s13383_s7 + $0x56] sm:$0xff] }
 0x199   : > { %v1131_v49 = vpop.f32.mrf.mxu0  ;;  %v2974_v9 = vpack.c.bf16 %v2942_v61, %v2941_v42 }
 0x19a   : > { %v13857_v51 = vadd.f32 %v1131_v49, %v13693_v48  ;;  %v13859_v31 = vadd.f32 %v11976_v6, %v1250_v43  ;;  %v13861_v33 = vpop.f32.mrf.mxu1 }
 0x19b   : > { %v11927_v55 = vpop.f32.mrf.mxu0  ;;  %12226 = vmatmul.mubr.bf16.vlgmr.msra.gmra.mxu0 %v2972_v39 }
 0x19c   : > { %v1253_v52 = vadd.f32 %v11927_v55, %v13700_v40  ;;  %v11979_v59 = vpop.f32.mrf.mxu1  ;;  %12229 = vmatprep.mubr.bf16.mxu0 %v2973_v3  ;;  %v2946_v3 = vld [vmem:[%s13383_s7 + $0x7e] sm:$0xff]  ;;  %v2947_v55 = vld [vmem:[%s13383_s7 + $0x86] sm:$0xff] }
 0x19d   : > { %v1144_v2 = vpop.f32.mrf.mxu0 }
 0x19e   : > { %v1251_v8 = vadd.f32 %v1144_v2, %v13705_v5  ;;  %v13869_v54 = vadd.f32 %v11979_v59, %v1253_v52  ;;  %v1476_v48 = vpop.f32.mrf.mxu1  ;;  %v2948_v52 = vld [vmem:[%s13383_s7 + $0x8e] sm:$0xff] }
 0x19f   : > { %v11928_v12 = vpop.f32.mrf.mxu0 }
 0x1a0   : > { %v1254_v25 = vadd.f32 %v11928_v12, %v13708_v14  ;;  %v13872_v40 = vadd.f32 %v1476_v48, %v1251_v8  ;;  %v11980_v35 = vpop.f32.mrf.mxu1  ;;  %v2945_v14 = vld [vmem:[%s13383_s7 + $0x76] sm:$0xff]  ;;  %v2977_v8 = vpack.c.bf16 %v2948_v52, %v2947_v55 }
 0x1a1   : > { %v1147_v26 = vpop.f32.mrf.mxu0  ;;  %v2976_v2 = vpack.c.bf16 %v2946_v3, %v2945_v14 }
 0x1a2   : > { %v13875_v32 = vadd.f32 %v1147_v26, %v13712_v21  ;;  %v13877_v5 = vadd.f32 %v11980_v35, %v1254_v25  ;;  %v13879_v1 = vpop.f32.mrf.mxu1  ;;  %v2950_v26 = vld [vmem:[%s13383_s7 + $0x9e] sm:$0xff] }
 0x1a3   : > { %v11931_v39 = vpop.f32.mrf.mxu0  ;;  %12230 = vmatmul.mubr.bf16.gmra.mxu0 %v2974_v9 }
 0x1a4   : > { %v1257_v43 = vadd.f32 %v11931_v39, %v13718_v34  ;;  %v11983_v6 = vpop.f32.mrf.mxu1  ;;  %12233 = vmatprep.mubr.bf16.mxu0 %v2975_v53 }
 0x1a5   : > { %v1160_v49 = vpop.f32.mrf.mxu0 }
 0x1a6   : > { %v1255_v59 = vadd.f32 %v1160_v49, %v13723_v46  ;;  %v13887_v42 = vadd.f32 %v11983_v6, %v1257_v43  ;;  %v1492_v21 = vpop.f32.mrf.mxu1  ;;  %v2951_v43 = vld [vmem:[%s13383_s7 + $0xa6] sm:$0xff]  ;;  %v2952_v6 = vld [vmem:[%s13383_s7 + $0xae] sm:$0xff] }
 0x1a7   : > { %v11932_v61 = vpop.f32.mrf.mxu0 }
 0x1a8   : > { %v1258_v37 = vadd.f32 %v11932_v61, %v13726_v57  ;;  %v13890_v34 = vadd.f32 %v1492_v21, %v1255_v59  ;;  %v11984_v30 = vpop.f32.mrf.mxu1  ;;  %v2949_v57 = vld [vmem:[%s13383_s7 + $0x96] sm:$0xff]  ;;  %v2979_v21 = vpack.c.bf16 %v2952_v6, %v2951_v43 }
 0x1a9   : > { %v1163_v48 = vpop.f32.mrf.mxu0  ;;  %v2978_v55 = vpack.c.bf16 %v2950_v26, %v2949_v57  ;;  %v2956_v57 = vld [vmem:[%s13383_s7 + $0xce] sm:$0xff] }
 0x1aa   : > { %v13893_v12 = vadd.f32 %v1163_v48, %v13730_v63  ;;  %v13895_v46 = vadd.f32 %v11984_v30, %v1258_v37  ;;  %v13897_v9 = vpop.f32.mrf.mxu1 }
 0x1ab   : > { %v11935_v25 = vpop.f32.mrf.mxu0  ;;  %12234 = vmatmul.mubr.bf16.gmra.mxu0 %v2976_v2 }
 0x1ac   : > { %v1261_v35 = vadd.f32 %v11935_v25, %v13736_v11  ;;  %v11987_v53 = vpop.f32.mrf.mxu1  ;;  %12237 = vmatprep.mubr.bf16.mxu0 %v2977_v8  ;;  %v2954_v25 = vld [vmem:[%s13383_s7 + $0xbe] sm:$0xff] }
 0x1ad   : > { %v1176_v39 = vpop.f32.mrf.mxu0 }
 0x1ae   : > { %v1259_v14 = vadd.f32 %v1176_v39, %v13741_v23  ;;  %v13905_v3 = vadd.f32 %v11987_v53, %v1261_v35  ;;  %v1508_v63 = vpop.f32.mrf.mxu1  ;;  %v2955_v53 = vld [vmem:[%s13383_s7 + $0xc6] sm:$0xff] }
 0x1af   : > { %v11936_v49 = vpop.f32.mrf.mxu0 }
 0x1b0   : > { %v1262_v52 = vadd.f32 %v11936_v49, %v13744_v36  ;;  %v13908_v11 = vadd.f32 %v1508_v63, %v1259_v14  ;;  %v11988_v59 = vpop.f32.mrf.mxu1  ;;  %v2953_v36 = vld [vmem:[%s13383_s7 + $0xb6] sm:$0xff]  ;;  %v2981_v49 = vpack.c.bf16 %v2956_v57, %v2955_v53 }
 0x1b1   : > { %v1179_v61 = vpop.f32.mrf.mxu0  ;;  %v2980_v6 = vpack.c.bf16 %v2954_v25, %v2953_v36  ;;  %v2959_v36 = vld [vmem:[%s13383_s7 + $0xe6] sm:$0xff]  ;;  %v2960_v25 = vld [vmem:[%s13383_s7 + $0xee] sm:$0xff] }
 0x1b2   : > { %v13911_v2 = vadd.f32 %v1179_v61, %v13748_v45  ;;  %v13913_v23 = vadd.f32 %v11988_v59, %v1262_v52  ;;  %v13915_v37 = vpop.f32.mrf.mxu1 }
 0x1b3   : > { %v11939_v30 = vpop.f32.mrf.mxu0  ;;  %12238 = vmatmul.mubr.bf16.gmra.mxu0 %v2978_v55 }
 0x1b4   : > { %v1265_v8 = vadd.f32 %v11939_v30, %v13754_v58  ;;  %v11991_v48 = vpop.f32.mrf.mxu1  ;;  %12241 = vmatprep.mubr.bf16.mxu0 %v2979_v21 }
 0x1b5   : > { %v1192_v35 = vpop.f32.mrf.mxu0 }
 0x1b6   : > { %v1263_v26 = vadd.f32 %v1192_v35, %v13759_v29  ;;  %v13923_v39 = vadd.f32 %v11991_v48, %v1265_v8  ;;  %v1524_v45 = vpop.f32.mrf.mxu1  ;;  %v2958_v8 = vld [vmem:[%s13383_s7 + $0xde] sm:$0xff] }
 0x1b7   : > { %v11940_v43 = vpop.f32.mrf.mxu0 }
 0x1b8   : > { %v1266_v14 = vadd.f32 %v11940_v43, %v13762_v15  ;;  %v13926_v58 = vadd.f32 %v1524_v45, %v1263_v26  ;;  %v11992_v63 = vpop.f32.mrf.mxu1  ;;  %v2957_v15 = vld [vmem:[%s13383_s7 + $0xd6] sm:$0xff] }
 0x1b9   : > { %v1195_v55 = vpop.f32.mrf.mxu0  ;;  %v2982_v26 = vpack.c.bf16 %v2958_v8, %v2957_v15  ;;  %v2962_v15 = vld [vmem:[%s13383_s7 + $0xfe] sm:$0xff] }
 0x1ba   : > { %v13929_v52 = vadd.f32 %v1195_v55, %v13766_v19  ;;  %v13931_v29 = vadd.f32 %v11992_v63, %v1266_v14  ;;  %v13933_v59 = vpop.f32.mrf.mxu1  ;;  %v12883_v14 = vld [vmem:[#allocation8 + $0x38] sm:$0xff]  }
 0x1bb   : > { %v11943_v21 = vpop.f32.mrf.mxu0  ;;  %12242 = vmatmul.mubr.bf16.gmra.mxu0 %v2980_v6  ;;  %v2983_v6 = vpack.c.bf16 %v2960_v25, %v2959_v36  ;;  %12261 = vmatprep.subr.bf16.mxu1 %v12883_v14  ;;  %v2964_v36 = vld [vmem:[%s13383_s7 + $0x10e] sm:$0xff] }
 0x1bc   : > { %v1269_v61 = vadd.f32 %v11943_v21, %v13772_v38  ;;  %v11995_v30 = vpop.f32.mrf.mxu1  ;;  %12245 = vmatprep.mubr.bf16.mxu0 %v2981_v49  ;;  %12262 = vmatpush3.bf16.msra.mxu1 %v12883_v14 }
 0x1bd   : > { %v1208_v48 = vpop.f32.mrf.mxu0 }
 0x1be   : > { %v1267_v35 = vadd.f32 %v1208_v48, %v13777_v47  ;;  %v13941_v53 = vadd.f32 %v11995_v30, %v1269_v61  ;;  %v1540_v19 = vpop.f32.mrf.mxu1  ;;  %v2961_v30 = vld [vmem:[%s13383_s7 + $0xf6] sm:$0xff]  ;;  %v2963_v48 = vld [vmem:[%s13383_s7 + $0x106] sm:$0xff] }
 0x1bf   : > { %v11944_v57 = vpop.f32.mrf.mxu0 }
 0x1c0   : > { %v1270_v45 = vadd.f32 %v11944_v57, %v13780_v60  ;;  %v13944_v43 = vadd.f32 %v1540_v19, %v1267_v35  ;;  %v11996_v38 = vpop.f32.mrf.mxu1  ;;  %v2984_v57 = vpack.c.bf16 %v2962_v15, %v2961_v30  ;;  %v2966_v30 = vld [vmem:[%s13383_s7 + $0x11e] sm:$0xff] }
 0x1c1   : > { %v1211_v63 = vpop.f32.mrf.mxu0 }
 0x1c2   : > { %v13947_v49 = vadd.f32 %v1211_v63, %v13784_v7  ;;  %v13949_v47 = vadd.f32 %v11996_v38, %v1270_v45  ;;  %v13951_v55 = vpop.f32.mrf.mxu1  ;;  %v2985_v38 = vpack.c.bf16 %v2964_v36, %v2963_v48  ;;  %v2968_v48 = vld [vmem:[%s13383_s7 + $0x12e] sm:$0xff] }
 0x1c3   : > { %v11947_v21 = vpop.f32.mrf.mxu0  ;;  %12246 = vmatmul.mubr.bf16.gmra.mxu0 %v2982_v26 }
 0x1c4   : > { %v1273_v60 = vadd.f32 %v11947_v21, %v13790_v16  ;;  %v11999_v61 = vpop.f32.mrf.mxu1  ;;  %12249 = vmatprep.mubr.bf16.mxu0 %v2983_v6  ;;  %v12884_v6 = vld [vmem:[#allocation8 + $0x30] sm:$0xff]  }
 0x1c5   : > { %v1224_v8 = vpop.f32.mrf.mxu0  ;;  %12263 = vmatprep.subr.bf16.mxu1 %v12884_v6 }
 0x1c6   : > { %v1271_v7 = vadd.f32 %v1224_v8, %v13795_v28  ;;  %v13959_v25 = vadd.f32 %v11999_v61, %v1273_v60  ;;  %v1556_v35 = vpop.f32.mrf.mxu1  ;;  %12264 = vmatpush3.bf16.msra.mxu1 %v12884_v6  ;;  %v2965_v61 = vld [vmem:[%s13383_s7 + $0x116] sm:$0xff]  ;;  %v2967_v8 = vld [vmem:[%s13383_s7 + $0x126] sm:$0xff] }
 0x1c7   : > { %v11948_v19 = vpop.f32.mrf.mxu0 }
 0x1c8   : > { %v1274_v26 = vadd.f32 %v11948_v19, %v13799_v44  ;;  %v13962_v45 = vadd.f32 %v1556_v35, %v1271_v7  ;;  %v12000_v16 = vpop.f32.mrf.mxu1 }
 0x1c9   : > { %v13964_v14 = vpop.f32.mrf.mxu0 }
 0x1ca   : > { %v13966_v63 = vadd.f32 %v12000_v16, %v1274_v26  ;;  %v13968_v28 = vpop.f32.mrf.mxu1  ;;  %v2986_v26 = vpack.c.bf16 %v2966_v30, %v2965_v61  ;;  %v2969_v61 = vld [vmem:[%s13383_s7 + $0x136] sm:$0xff]  ;;  %v2970_v30 = vld [vmem:[%s13383_s7 + $0x13e] sm:$0xff] }
 0x1cb   : > { %17139 = vst [vmem:[#allocation13_spill] sm:$0xff] %v13968_v28  ;;  %v12019_v21 = vpop.f32.mrf.mxu0  ;;  %12250 = vmatmul.mubr.bf16.gmra.mxu0 %v2984_v57 }
 0x1cc   : > { %v1905_v44 = vadd.f32 %v12019_v21, %v13809_v24  ;;  %v12071_v60 = vpop.f32.mrf.mxu1  ;;  %12253 = vmatprep.mubr.bf16.mxu0 %v2985_v38  ;;  %v2987_v38 = vpack.c.bf16 %v2968_v48, %v2967_v8 }
 0x1cd   : > { %v1760_v15 = vpop.f32.mrf.mxu0 }
 0x1ce   : > { %v1903_v36 = vadd.f32 %v1760_v15, %v13814_v18  ;;  %v13976_v7 = vadd.f32 %v12071_v60, %v1905_v44  ;;  %v2092_v35 = vpop.f32.mrf.mxu1  ;;  %v12885_v18 = vld [vmem:[#allocation8 + $0x28] sm:$0xff]  }
 0x1cf   : > { %v12020_v19 = vpop.f32.mrf.mxu0  ;;  %12265 = vmatprep.subr.bf16.mxu1 %v12885_v18 }
 0x1d0   : > { %v1906_v57 = vadd.f32 %v12020_v19, %v13819_v17  ;;  %v13979_v16 = vadd.f32 %v2092_v35, %v1903_v36  ;;  %v12072_v24 = vpop.f32.mrf.mxu1  ;;  %12266 = vmatpush3.bf16.msra.mxu1 %v12885_v18  ;;  %v2988_v19 = vpack.c.bf16 %v2970_v30, %v2969_v61 }
 0x1d1   : > { %v13981_v6 = vpop.f32.mrf.mxu0 }
 0x1d2   : > { %v13983_v21 = vadd.f32 %v12072_v24, %v1906_v57  ;;  %v13985_v28 = vpop.f32.mrf.mxu1 }
 0x1d3   : > { %17140 = vst [vmem:[#allocation14_spill] sm:$0xff] %v13985_v28  ;;  %v12023_v44 = vpop.f32.mrf.mxu0  ;;  %12254 = vmatmul.mubr.bf16.gmra.mxu0 %v2986_v26  ;;  %v12886_v28 = vld [vmem:[#allocation8 + $0x20] sm:$0xff]  }
 0x1d4   : > { %v1909_v60 = vadd.f32 %v12023_v44, %v13833_v50  ;;  %v12075_v15 = vpop.f32.mrf.mxu1  ;;  %12257 = vmatprep.mubr.bf16.mxu0 %v2987_v38  ;;  %12267 = vmatprep.subr.bf16.mxu1 %v12886_v28 }
 0x1d5   : > { %v1776_v17 = vpop.f32.mrf.mxu0  ;;  %12268 = vmatpush3.bf16.msra.mxu1 %v12886_v28 }
 0x1d6   : > { %v1907_v8 = vadd.f32 %v1776_v17, %v13836_v0  ;;  %v13991_v48 = vadd.f32 %v12075_v15, %v1909_v60  ;;  %v2108_v36 = vpop.f32.mrf.mxu1 }
 0x1d7   : > { %v12024_v35 = vpop.f32.mrf.mxu0 }
 0x1d8   : > { %v1910_v57 = vadd.f32 %v12024_v35, %v13841_v62  ;;  %v13994_v24 = vadd.f32 %v2108_v36, %v1907_v8  ;;  %v12076_v26 = vpop.f32.mrf.mxu1 }
 0x1d9   : > { %v13996_v50 = vpop.f32.mrf.mxu0 }
 0x1da   : > { %v13998_v38 = vadd.f32 %v12076_v26, %v1910_v57  ;;  %v14000_v44 = vpop.f32.mrf.mxu1 }
 0x1db   : > { %17141 = vst [vmem:[#allocation15_spill] sm:$0xff] %v14000_v44  ;;  %v12027_v18 = vpop.f32.mrf.mxu0  ;;  %12258 = vmatmul.mubr.bf16.gmra.mxu0 %v2988_v19 }
 0x1dc   : > { %v1913_v0 = vadd.f32 %v12027_v18, %v13851_v13  ;;  %v12079_v60 = vpop.f32.mrf.mxu1 }
 0x1dd   : > { %v1792_v15 = vpop.f32.mrf.mxu0 }
 0x1de   : > { %v1911_v62 = vadd.f32 %v1792_v15, %v13854_v20  ;;  %v14004_v61 = vadd.f32 %v12079_v60, %v1913_v0  ;;  %v2124_v30 = vpop.f32.mrf.mxu1 }
 0x1df   : > { %v12028_v17 = vpop.f32.mrf.mxu0 }
 0x1e0   : > { %v1914_v8 = vadd.f32 %v12028_v17, %v13859_v31  ;;  %v14007_v36 = vadd.f32 %v2124_v30, %v1911_v62  ;;  %v12080_v35 = vpop.f32.mrf.mxu1 }
 0x1e1   : > { %v14009_v57 = vpop.f32.mrf.mxu0 }
 0x1e2   : > { %17142 = vst [vmem:[#allocation16_spill] sm:$0xff] %v14009_v57  ;;  %v14011_v19 = vadd.f32 %v12080_v35, %v1914_v8  ;;  %v14013_v13 = vpop.f32.mrf.mxu1  ;;  %v12888_v8 = vld [vmem:[#allocation8 + $0x78] sm:$0xff]  }
 0x1e3   : > { %17143 = vst [vmem:[#allocation17_spill] sm:$0xff] %v14013_v13  ;;  %v12031_v26 = vpop.f32.mrf.mxu0  ;;  %12313 = vmatprep.subr.bf16.mxu0 %v12888_v8 }
 0x1e4   : > { %v1917_v28 = vadd.f32 %v12031_v26, %v13869_v54  ;;  %v12083_v18 = vpop.f32.mrf.mxu1  ;;  %12314 = vmatpush3.bf16.msra.mxu0 %v12888_v8 }
 0x1e5   : > { %v1808_v20 = vpop.f32.mrf.mxu0 }
 0x1e6   : > { %v1915_v0 = vadd.f32 %v1808_v20, %v13872_v40  ;;  %v14017_v60 = vadd.f32 %v12083_v18, %v1917_v28  ;;  %v2140_v15 = vpop.f32.mrf.mxu1 }
 0x1e7   : > { %v12032_v31 = vpop.f32.mrf.mxu0 }
 0x1e8   : > { %v1918_v62 = vadd.f32 %v12032_v31, %v13877_v5  ;;  %v14020_v30 = vadd.f32 %v2140_v15, %v1915_v0  ;;  %v12084_v17 = vpop.f32.mrf.mxu1 }
 0x1e9   : > { %v14022_v35 = vpop.f32.mrf.mxu0 }
 0x1ea   : > { %17144 = vst [vmem:[#allocation18_spill] sm:$0xff] %v14022_v35  ;;  %v14024_v13 = vadd.f32 %v12084_v17, %v1918_v62  ;;  %v14026_v57 = vpop.f32.mrf.mxu1  ;;  %v12889_v17 = vld [vmem:[#allocation8 + $0x70] sm:$0xff]  }
 0x1eb   : > { %17145 = vst [vmem:[#allocation19_spill] sm:$0xff] %v14026_v57  ;;  %v12035_v54 = vpop.f32.mrf.mxu0  ;;  %12315 = vmatprep.subr.bf16.mxu0 %v12889_v17 }
 0x1ec   : > { %v1921_v40 = vadd.f32 %v12035_v54, %v13887_v42  ;;  %v12087_v26 = vpop.f32.mrf.mxu1  ;;  %12316 = vmatpush3.bf16.msra.mxu0 %v12889_v17 }
 0x1ed   : > { %v1824_v28 = vpop.f32.mrf.mxu0 }
 0x1ee   : > { %v1919_v18 = vadd.f32 %v1824_v28, %v13890_v34  ;;  %v14030_v5 = vadd.f32 %v12087_v26, %v1921_v40  ;;  %v2156_v20 = vpop.f32.mrf.mxu1 }
 0x1ef   : > { %v12036_v0 = vpop.f32.mrf.mxu0 }
 0x1f0   : > { %v1922_v15 = vadd.f32 %v12036_v0, %v13895_v46  ;;  %v14033_v31 = vadd.f32 %v2156_v20, %v1919_v18  ;;  %v12088_v62 = vpop.f32.mrf.mxu1 }
 0x1f1   : > { %v14035_v57 = vpop.f32.mrf.mxu0 }
 0x1f2   : > { %17146 = vst [vmem:[#allocation20_spill] sm:$0xff] %v14035_v57  ;;  %v14037_v35 = vadd.f32 %v12088_v62, %v1922_v15  ;;  %v14039_v8 = vpop.f32.mrf.mxu1 }
 0x1f3   : > { %17147 = vst [vmem:[#allocation21_spill] sm:$0xff] %v14039_v8  ;;  %v12039_v42 = vpop.f32.mrf.mxu0  ;;  %v12890_v8 = vld [vmem:[#allocation8 + $0x68] sm:$0xff]  }
 0x1f4   : > { %v1925_v34 = vadd.f32 %v12039_v42, %v13905_v3  ;;  %v12091_v54 = vpop.f32.mrf.mxu1  ;;  %v12887_v42 = vld [vmem:[#allocation8 + $0x18] sm:$0xff]   ;;  %12317 = vmatprep.subr.bf16.mxu0 %v12890_v8 }
 0x1f5   : > { %v1840_v40 = vpop.f32.mrf.mxu0  ;;  %12318 = vmatpush3.bf16.msra.mxu0 %v12890_v8  ;;  %12269 = vmatprep.subr.bf16.mxu1 %v12887_v42 }
 0x1f6   : > { %v1923_v26 = vadd.f32 %v1840_v40, %v13908_v11  ;;  %v14043_v46 = vadd.f32 %v12091_v54, %v1925_v34  ;;  %v2172_v28 = vpop.f32.mrf.mxu1  ;;  %12270 = vmatpush3.bf16.msra.mxu1 %v12887_v42 }
 0x1f7   : > { %v12040_v18 = vpop.f32.mrf.mxu0 }
 0x1f8   : > { %v1926_v20 = vadd.f32 %v12040_v18, %v13913_v23  ;;  %v14046_v0 = vadd.f32 %v2172_v28, %v1923_v26  ;;  %v12092_v15 = vpop.f32.mrf.mxu1 }
 0x1f9   : > { %v14048_v62 = vpop.f32.mrf.mxu0 }
 0x1fa   : > { %17148 = vst [vmem:[#allocation22_spill] sm:$0xff] %v14048_v62  ;;  %v14050_v57 = vadd.f32 %v12092_v15, %v1926_v20  ;;  %v14052_v17 = vpop.f32.mrf.mxu1  ;;  %v12892_v62 = vld [vmem:[#allocation8 + $0x60] sm:$0xff]  }
 0x1fb   : > { %17149 = vst [vmem:[#allocation23_spill] sm:$0xff] %v14052_v17  ;;  %v12043_v3 = vpop.f32.mrf.mxu0  ;;  %12319 = vmatprep.subr.bf16.mxu0 %v12892_v62 }
 0x1fc   : > { %v1929_v11 = vadd.f32 %v12043_v3, %v13923_v39  ;;  %v12095_v34 = vpop.f32.mrf.mxu1  ;;  %12320 = vmatpush3.bf16.msra.mxu0 %v12892_v62 }
 0x1fd   : > { %v1856_v54 = vpop.f32.mrf.mxu0 }
 0x1fe   : > { %v1927_v23 = vadd.f32 %v1856_v54, %v13926_v58  ;;  %v14056_v40 = vadd.f32 %v12095_v34, %v1929_v11  ;;  %v2188_v26 = vpop.f32.mrf.mxu1 }
 0x1ff   : > { %v12044_v28 = vpop.f32.mrf.mxu0 }
 0x200   : > { %v1930_v18 = vadd.f32 %v12044_v28, %v13931_v29  ;;  %v14059_v20 = vadd.f32 %v2188_v26, %v1927_v23  ;;  %v12096_v15 = vpop.f32.mrf.mxu1 }
 0x201   : > { %v14061_v17 = vpop.f32.mrf.mxu0 }
 0x202   : > { %17150 = vst [vmem:[#allocation24_spill] sm:$0xff] %v14061_v17  ;;  %v14063_v39 = vadd.f32 %v12096_v15, %v1930_v18  ;;  %v14065_v8 = vpop.f32.mrf.mxu1  ;;  %v12893_v15 = vld [vmem:[#allocation8 + $0x58] sm:$0xff]   ;;  %v12891_v17 = vld [vmem:[#allocation8 + $0x10] sm:$0xff]  }
 0x203   : > { %17151 = vst [vmem:[#allocation25_spill] sm:$0xff] %v14065_v8  ;;  %v12047_v3 = vpop.f32.mrf.mxu0  ;;  %12321 = vmatprep.subr.bf16.mxu0 %v12893_v15  ;;  %12271 = vmatprep.subr.bf16.mxu1 %v12891_v17 }
 0x204   : > { %v1933_v58 = vadd.f32 %v12047_v3, %v13941_v53  ;;  %v12099_v11 = vpop.f32.mrf.mxu1  ;;  %12322 = vmatpush3.bf16.msra.mxu0 %v12893_v15  ;;  %12272 = vmatpush3.bf16.msra.mxu1 %v12891_v17 }
 0x205   : > { %v1872_v42 = vpop.f32.mrf.mxu0 }
 0x206   : > { %v1931_v34 = vadd.f32 %v1872_v42, %v13944_v43  ;;  %v14069_v29 = vadd.f32 %v12099_v11, %v1933_v58  ;;  %v2204_v54 = vpop.f32.mrf.mxu1 }
 0x207   : > { %v12048_v23 = vpop.f32.mrf.mxu0 }
 0x208   : > { %v1934_v26 = vadd.f32 %v12048_v23, %v13949_v47  ;;  %v14072_v28 = vadd.f32 %v2204_v54, %v1931_v34  ;;  %v12100_v18 = vpop.f32.mrf.mxu1 }
 0x209   : > { %v14074_v8 = vpop.f32.mrf.mxu0 }
 0x20a   : > { %v14076_v44 = vadd.f32 %v12100_v18, %v1934_v26  ;;  %v14078_v53 = vpop.f32.mrf.mxu1  ;;  %v12895_v18 = vld [vmem:[#allocation8 + $0x50] sm:$0xff]  }
 0x20b   : > { %17152 = vst [vmem:[#allocation26_spill] sm:$0xff] %v14078_v53  ;;  %v12051_v62 = vpop.f32.mrf.mxu0  ;;  %12323 = vmatprep.subr.bf16.mxu0 %v12895_v18 }
 0x20c   : > { %v1937_v43 = vadd.f32 %v12051_v62, %v13959_v25  ;;  %v12103_v3 = vpop.f32.mrf.mxu1  ;;  %12324 = vmatpush3.bf16.msra.mxu0 %v12895_v18 }
 0x20d   : > { %v1888_v47 = vpop.f32.mrf.mxu0 }
 0x20e   : > { %v1935_v58 = vadd.f32 %v1888_v47, %v13962_v45  ;;  %v14082_v11 = vadd.f32 %v12103_v3, %v1937_v43  ;;  %v2220_v42 = vpop.f32.mrf.mxu1 }
 0x20f   : > { %v12052_v34 = vpop.f32.mrf.mxu0 }
 0x210   : > { %v1938_v54 = vadd.f32 %v12052_v34, %v13966_v63  ;;  %v14085_v23 = vadd.f32 %v2220_v42, %v1935_v58  ;;  %v12104_v26 = vpop.f32.mrf.mxu1  ;;  %v12894_v34 = vld [vmem:[#allocation8 + $0x8] sm:$0xff]  }
 0x211   : > { %v14087_v53 = vpop.f32.mrf.mxu0  ;;  %12273 = vmatprep.subr.bf16.mxu1 %v12894_v34 }
 0x212   : > { %17153 = vst [vmem:[#allocation27_spill] sm:$0xff] %v14085_v23  ;;  %v14089_v15 = vadd.f32 %v12104_v26, %v1938_v54  ;;  %v14091_v25 = vpop.f32.mrf.mxu1  ;;  %v12896_v54 = vld [vmem:[#allocation8 + $0x48] sm:$0xff]   ;;  %12274 = vmatpush3.bf16.msra.mxu1 %v12894_v34 }
 0x213   : > { %v12123_v17 = vpop.f32.mrf.mxu0  ;;  %12325 = vmatprep.subr.bf16.mxu0 %v12896_v54 }
 0x214   : > { %17154 = vst [vmem:[#allocation28_spill] sm:$0xff] %v14089_v15  ;;  %v14094_v45 = vadd.f32 %v12123_v17, %v13976_v7  ;;  %v14096_v62 = vpop.f32.mrf.mxu1  ;;  %12326 = vmatpush3.bf16.msra.mxu0 %v12896_v54 }
 0x215   : > { %v2424_v43 = vpop.f32.mrf.mxu0 }
 0x216   : > { %v14099_v63 = vadd.f32 %v2424_v43, %v13979_v16  ;;  %v14101_v3 = vpop.f32.mrf.mxu1  ;;  %v13213_v16 = vmov 0  }
 0x217   : > { %v12124_v47 = vpop.f32.mrf.mxu0  ;;  %4334 = vst [vmem:[#allocation2 + $0x4] sm:$0xf] %v13213_v16  ;;  %4335 = vst [vmem:[#allocation2 + $0x8] sm:$0xf] %v13213_v16 }
 0x218   : > { %v14104_v58 = vadd.f32 %v12124_v47, %v13983_v21  ;;  %v14106_v42 = vpop.f32.mrf.mxu1  ;;  %4336 = vst [vmem:[#allocation2 + $0xc] sm:$0xf] %v13213_v16  ;;  %4337 = vst [vmem:[#allocation2 + $0xa0] sm:$0xf] %v13213_v16 }
 0x219   : > { %v14108_v26 = vpop.f32.mrf.mxu0  ;;  %4338 = vst [vmem:[#allocation2 + $0xa4] sm:$0xf] %v13213_v16  ;;  %4339 = vst [vmem:[#allocation2 + $0xa8] sm:$0xf] %v13213_v16 }
 0x21a   : > { %v14110_v7 = vpop.f32.mrf.mxu1 }
 0x21b   : > { %17155 = vst [vmem:[#allocation29_spill] sm:$0xff] %v14110_v7  ;;  %v12127_v18 = vpop.f32.mrf.mxu0 }
 0x21c   : > { %v14113_v21 = vadd.f32 %v12127_v18, %v13991_v48  ;;  %v14115_v17 = vpop.f32.mrf.mxu1  ;;  %v12897_v48 = vld [vmem:[#allocation8] sm:$0xff]  }
 0x21d   : > { %17157 = vst [vmem:[#allocation31_spill] sm:$0xff] %v14115_v17  ;;  %v2440_v43 = vpop.f32.mrf.mxu0  ;;  %12275 = vmatprep.subr.bf16.mxu1 %v12897_v48 }
 0x21e   : > { %17156 = vst [vmem:[#allocation30_spill] sm:$0xff] %v14113_v21  ;;  %v14118_v47 = vadd.f32 %v2440_v43, %v13994_v24  ;;  %v14120_v15 = vpop.f32.mrf.mxu1  ;;  %v12898_v21 = vld [vmem:[#allocation8 + $0x40] sm:$0xff]   ;;  %12276 = vmatpush3.bf16.msra.mxu1 %v12897_v48 }
 0x21f   : > { %v12128_v34 = vpop.f32.mrf.mxu0  ;;  %12327 = vmatprep.subr.bf16.mxu0 %v12898_v21 }
 0x220   : > { %v14123_v54 = vadd.f32 %v12128_v34, %v13998_v38  ;;  %v14125_v23 = vpop.f32.mrf.mxu1  ;;  %12328 = vmatpush3.bf16.msra.mxu0 %v12898_v21 }
 0x221   : > { %17159 = vst [vmem:[#allocation33_spill] sm:$0xff] %v14125_v23  ;;  %v14127_v7 = vpop.f32.mrf.mxu0 }
 0x222   : > { %17158 = vst [vmem:[#allocation32_spill] sm:$0xff] %v14123_v54  ;;  %v14129_v16 = vpop.f32.mrf.mxu1 }
 0x223   : > { %17160 = vst [vmem:[#allocation34_spill] sm:$0xff] %v14129_v16  ;;  %v12131_v18 = vpop.f32.mrf.mxu0 }
 0x224   : > { %v14132_v17 = vadd.f32 %v12131_v18, %v14004_v61  ;;  %v14134_v24 = vpop.f32.mrf.mxu1 }
 0x225   : > { %17162 = vst [vmem:[#allocation36_spill] sm:$0xff] %v14134_v24  ;;  %v2456_v43 = vpop.f32.mrf.mxu0 }
 0x226   : > { %17161 = vst [vmem:[#allocation35_spill] sm:$0xff] %v14132_v17  ;;  %v14137_v38 = vadd.f32 %v2456_v43, %v14007_v36  ;;  %v14139_v34 = vpop.f32.mrf.mxu1 }
 0x227   : > { %v12132_v23 = vpop.f32.mrf.mxu0 }
 0x228   : > { %v14142_v16 = vadd.f32 %v12132_v23, %v14011_v19  ;;  %v14144_v54 = vpop.f32.mrf.mxu1 }
 0x229   : > { %17164 = vst [vmem:[#allocation38_spill] sm:$0xff] %v14144_v54  ;;  %v14146_v61 = vpop.f32.mrf.mxu0 }
 0x22a   : > { %17163 = vst [vmem:[#allocation37_spill] sm:$0xff] %v14142_v16  ;;  %v14148_v18 = vpop.f32.mrf.mxu1 }
 0x22b   : > { %17165 = vst [vmem:[#allocation39_spill] sm:$0xff] %v14148_v18  ;;  %v12135_v24 = vpop.f32.mrf.mxu0 }
 0x22c   : > { %v14151_v48 = vadd.f32 %v12135_v24, %v14017_v60  ;;  %v14153_v17 = vpop.f32.mrf.mxu1 }
 0x22d   : > { %17167 = vst [vmem:[#allocation41_spill] sm:$0xff] %v14153_v17  ;;  %v2472_v36 = vpop.f32.mrf.mxu0 }
 0x22e   : > { %17166 = vst [vmem:[#allocation40_spill] sm:$0xff] %v14151_v48  ;;  %v14156_v43 = vadd.f32 %v2472_v36, %v14020_v30  ;;  %v14158_v21 = vpop.f32.mrf.mxu1  ;;  %v13218_v48 = vmov 1987475062  }
 0x22f   : > { %17169 = vst [vmem:[#allocation43_spill] sm:$0xff] %v14158_v21  ;;  %v12136_v19 = vpop.f32.mrf.mxu0 }
 0x230   : > { %17168 = vst [vmem:[#allocation42_spill] sm:$0xff] %v14156_v43  ;;  %v14161_v23 = vadd.f32 %v12136_v19, %v14024_v13  ;;  %v14163_v54 = vpop.f32.mrf.mxu1 }
 0x231   : > { %17171 = vst [vmem:[#allocation45_spill] sm:$0xff] %v14163_v54  ;;  %v14165_v16 = vpop.f32.mrf.mxu0 }
 0x232   : > { %17170 = vst [vmem:[#allocation44_spill] sm:$0xff] %v14161_v23  ;;  %v14167_v18 = vpop.f32.mrf.mxu1 }
 0x233   : > { %17172 = vst [vmem:[#allocation46_spill] sm:$0xff] %v14167_v18  ;;  %v12139_v60 = vpop.f32.mrf.mxu0 }
 0x234   : > { %v14170_v24 = vadd.f32 %v12139_v60, %v14030_v5  ;;  %v14172_v17 = vpop.f32.mrf.mxu1 }
 0x235   : > { %17174 = vst [vmem:[#allocation48_spill] sm:$0xff] %v14172_v17  ;;  %v2488_v30 = vpop.f32.mrf.mxu0 }
 0x236   : > { %17173 = vst [vmem:[#allocation47_spill] sm:$0xff] %v14170_v24  ;;  %v14175_v36 = vadd.f32 %v2488_v30, %v14033_v31  ;;  %v14177_v21 = vpop.f32.mrf.mxu1 }
 0x237   : > { %17176 = vst [vmem:[#allocation50_spill] sm:$0xff] %v14177_v21  ;;  %v12140_v13 = vpop.f32.mrf.mxu0 }
 0x238   : > { %17175 = vst [vmem:[#allocation49_spill] sm:$0xff] %v14175_v36  ;;  %v14180_v19 = vadd.f32 %v12140_v13, %v14037_v35  ;;  %v14182_v54 = vpop.f32.mrf.mxu1  ;;  %v13053_v35 = vld [vmem:[%s17071_s3] ss:$0 sm:$0xff] }
 0x239   : > { %17178 = vst [vmem:[#allocation52_spill] sm:$0xff] %v14182_v54  ;;  %v14184_v23 = vpop.f32.mrf.mxu0  ;;  %v608_v13 = vadd.f32 %v13053_v35, %v13797_v56  ;;  %v13217_v35 = vmov 1983009808  }
 0x23a   : > { %17177 = vst [vmem:[#allocation51_spill] sm:$0xff] %v14180_v19  ;;  %v14186_v18 = vpop.f32.mrf.mxu1  ;;  %v3435_v43 = vunpack.c.l.s4 %v13217_v35 }
 0x23b   : > { %17179 = vst [vmem:[#allocation53_spill] sm:$0xff] %v14186_v18  ;;  %v12143_v5 = vpop.f32.mrf.mxu0  ;;  %v3303_v18 = vlaneseq  ;;  %v940_v24 = vadd.f32 %v13801_v41, %v608_v13 }
 0x23c   : > { %v14189_v60 = vadd.f32 %v12143_v5, %v14043_v46  ;;  %v14191_v17 = vpop.f32.mrf.mxu1  ;;  %v13214_v5 = vmov 269488144  }
 0x23d   : > { %17181 = vst [vmem:[#allocation55_spill] sm:$0xff] %v14191_v17  ;;  %v2504_v31 = vpop.f32.mrf.mxu0  ;;  %v3308_v17 = vunpack.c.l.s4 %v13214_v5  ;;  %v1272_v35 = vadd.f32 %v13964_v14, %v940_v24 }
 0x23e   : > { %17180 = vst [vmem:[#allocation54_spill] sm:$0xff] %v14189_v60  ;;  %v14194_v30 = vadd.f32 %v2504_v31, %v14046_v0  ;;  %v14196_v21 = vpop.f32.mrf.mxu1  ;;  %v13215_v0 = vmov 842150450  }
 0x23f   : > { %17183 = vst [vmem:[#allocation57_spill] sm:$0xff] %v14196_v21  ;;  %v12144_v54 = vpop.f32.mrf.mxu0  ;;  %v3315_v31 = vunpack.c.l.s4 %v13215_v0  ;;  %v13216_v21 = vmov 1414812756   ;;  %v14219_v0 = vshrl.u32 %v3303_v18, 7 }
 0x240   : > { %17182 = vst [vmem:[#allocation56_spill] sm:$0xff] %v14194_v30  ;;  %v14203_v19 = vadd.f32 %v12144_v54, %v14050_v57  ;;  %v14205_v46 = vpop.f32.mrf.mxu1  ;;  %v3322_v30 = vunpack.c.l.s4 %v13216_v21  ;;  %v3329_v57 = vunpack.c.l.s4 %v13218_v48  ;;  %v1572_v54 = vadd.f32 %v13821_v22, %v13817_v27 }
 0x241   : > { %17185 = vst [vmem:[#allocation59_spill] sm:$0xff] %v14205_v46  ;;  %v14207_v60 = vpop.f32.mrf.mxu0  ;;  %v3309_v21 = vunpack.c.0.s8 %v3308_v17  ;;  %v3316_v13 = vunpack.c.0.s8 %v3315_v31 }
 0x242   : > { %17184 = vst [vmem:[#allocation58_spill] sm:$0xff] %v14203_v19  ;;  %v14209_v36 = vpop.f32.mrf.mxu1  ;;  %v3323_v19 = vunpack.c.0.s8 %v3322_v30  ;;  %v1904_v48 = vadd.f32 %v13981_v6, %v1572_v54  ;;  %v17190_v54 = vld [vmem:[#allocation16_spill] sm:$0xff] }
 0x243   : > { %17186 = vst [vmem:[#allocation60_spill] sm:$0xff] %v14209_v36  ;;  %v12147_v56 = vpop.f32.mrf.mxu0  ;;  %v1576_v36 = vadd.f32 %v13843_v4, %v13839_v10  ;;  %v3330_v10 = vunpack.c.0.s8 %v3329_v57  ;;  %v1584_v4 = vadd.f32 %v13879_v1, %v13875_v32  ;;  %v14244_v24 = vsub.s32 %v3309_v21, %v14219_v0 }
 0x244   : > { %v14215_v5 = vadd.f32 %v12147_v56, %v14056_v40  ;;  %v14217_v46 = vpop.f32.mrf.mxu1  ;;  %v1580_v40 = vadd.f32 %v13861_v33, %v13857_v51  ;;  %v3436_v56 = vunpack.c.0.s8 %v3435_v43  ;;  %v1588_v51 = vadd.f32 %v13897_v9, %v13893_v12  ;;  %v17188_v12 = vld [vmem:[#allocation14_spill] sm:$0xff] }
 0x245   : > { %v2520_v41 = vpop.f32.mrf.mxu0  ;;  %v1908_v17 = vadd.f32 %v13996_v50, %v1576_v36  ;;  %v1592_v33 = vadd.f32 %v13915_v37, %v13911_v2  ;;  %v14253_v32 = vsub.s32 %v3316_v13, %v14219_v0  ;;  %v14256_v1 = vsub.s32 %v3323_v19, %v14219_v0  ;;  %v17187_v36 = vld [vmem:[#allocation13_spill] sm:$0xff]  ;;  %v12903_v2 = vld [vmem:[#allocation8 + $0xb8] sm:$0xff]   ;;  %v17189_v37 = vld [vmem:[#allocation15_spill] sm:$0xff] }
 0x246   : > { %v14226_v27 = vadd.f32 %v2520_v41, %v14059_v20  ;;  %v14228_v22 = vpop.f32.mrf.mxu1  ;;  %v14241_v20 = vadd.s32 16, %v14219_v0  ;;  %v1600_v43 = vadd.f32 %v13951_v55, %v13947_v49  ;;  %v1604_v30 = vadd.f32 %v17187_v36, %v1272_v35  ;;  %v5392_v49 = vld [vmem:[#allocation2 + $0x4] sm:$0xc]  ;;  %12365 = vmatprep.subr.bf16.mxu1 %v12903_v2 }
 0x247   : > { %v12148_v18 = vpop.f32.mrf.mxu0  ;;  %v2236_v9 = vadd.f32 %v17188_v12, %v1904_v48  ;;  %v2240_v57 = vadd.f32 %v17189_v37, %v1908_v17  ;;  %v1912_v21 = vadd.f32 %v17190_v54, %v1580_v40  ;;  %v14269_v19 = vsub.s32 %v3436_v56, %v14219_v0  ;;  %v17192_v17 = vld [vmem:[#allocation18_spill] sm:$0xff]  ;;  %v17193_v56 = vld [vmem:[#allocation20_spill] sm:$0xff] }
 0x248   : > { %v14236_v14 = vadd.f32 %v12148_v18, %v14063_v39  ;;  %v14238_v6 = vpop.f32.mrf.mxu1  ;;  %v1596_v39 = vadd.f32 %v13933_v59, %v13929_v52  ;;  %v14272_v52 = vsub.s32 %v3330_v10, %v14219_v0  ;;  %v5393_v59 = vld [vmem:[#allocation2 + $0x8] sm:$0xf]  ;;  %v3369_v48 = vrot.slane %v14241_v20, %v14244_v24 }
 0x249   : > { %v14250_v50 = vpop.f32.mrf.mxu0  ;;  %17191 = vst [vmem:[#allocation13_spill] sm:$0xff] %v14269_v19  ;;  %v14284_v40 = vadd.s32 8, %v14219_v0  ;;  %v1916_v18 = vadd.f32 %v17192_v17, %v1584_v4  ;;  %v1920_v10 = vadd.f32 %v17193_v56, %v1588_v51  ;;  %v17194_v37 = vld [vmem:[#allocation22_spill] sm:$0xff]  ;;  %v11005_v2 = vcombine.low %v5392_v49, %v5393_v59  ;;  %v17196_v4 = vld [vmem:[#allocation17_spill] sm:$0xff] }
 0x24a   : > { %v14264_v31 = vpop.f32.mrf.mxu1  ;;  %v1924_v54 = vadd.f32 %v17194_v37, %v1592_v33  ;;  %v2244_v17 = vadd.f32 %v17196_v4, %v1912_v21  ;;  %v1932_v51 = vadd.f32 %v14074_v8, %v1600_v43  ;;  %v1936_v56 = vadd.f32 %v14087_v53, %v1604_v30  ;;  %v17199_v43 = vld [vmem:[#allocation19_spill] sm:$0xff]  ;;  %v17200_v30 = vld [vmem:[#allocation21_spill] sm:$0xff] }
 0x24b   : > { %v12151_v41 = vpop.f32.mrf.mxu0  ;;  %v2248_v53 = vadd.f32 %v17199_v43, %v1916_v18  ;;  %v2252_v21 = vadd.f32 %v17200_v30, %v1920_v10  ;;  %v5543_v8 = vshll.u32 %v11005_v2, 16  ;;  %v2899_v30 = vadd.f32 %v14101_v3, %v14099_v63 }
 0x24c   : > { %v14275_v55 = vadd.f32 %v12151_v41, %v14069_v29  ;;  %v14277_v13 = vpop.f32.mrf.mxu1  ;;  %v17195_v41 = vld [vmem:[#allocation24_spill] sm:$0xff]  ;;  %v2268_v10 = vadd.f32 %v14091_v25, %v1936_v56  ;;  %v17205_v25 = vld [vmem:[#allocation29_spill] sm:$0xff]  ;;  %v14353_v63 = vadd.f32 %v14120_v15, %v14118_v47  ;;  %v2576_v3 = vadd.f32 %v14146_v61, %v2244_v17  ;;  %v17214_v15 = vld [vmem:[#allocation35_spill] sm:$0xff] }
 0x24d   : > { %v2536_v36 = vpop.f32.mrf.mxu0  ;;  %v1928_v35 = vadd.f32 %v17195_v41, %v1596_v39  ;;  %v17201_v41 = vld [vmem:[#allocation23_spill] sm:$0xff]  ;;  %v17215_v47 = vld [vmem:[#allocation36_spill] sm:$0xff]  ;;  %v2584_v61 = vadd.f32 %v14184_v23, %v2252_v21  ;;  %vm14383_vm0 = vcmp.lt.s32.totalorder %v3369_v48, 16  ;;  %v17228_v48 = vrot.slane %v14219_v0, %v14244_v24 }
 0x24e   : > { %v14295_v20 = vadd.f32 %v2536_v36, %v14072_v28  ;;  %v14297_v19 = vpop.f32.mrf.mxu1  ;;  %v2568_v36 = vadd.f32 %v14108_v26, %v2236_v9  ;;  %v2256_v4 = vadd.f32 %v17201_v41, %v1924_v54  ;;  %v17202_v28 = vld [vmem:[#allocation25_spill] sm:$0xff]  ;;  %v2901_v26 = vadd.f32 %v14096_v62, %v14094_v45  ;;  %v17206_v45 = vld [vmem:[#allocation30_spill] sm:$0xff]  ;;  %v17207_v62 = vld [vmem:[#allocation31_spill] sm:$0xff] }
 0x24f   : > { %v12152_v29 = vpop.f32.mrf.mxu0  ;;  %v2260_v12 = vadd.f32 %v17202_v28, %v1928_v35  ;;  %v2572_v9 = vadd.f32 %v14127_v7, %v2240_v57  ;;  %v14335_v35 = vadd.f32 %v14106_v42, %v14104_v58  ;;  %v14349_v7 = vadd.f32 %v17207_v62, %v17206_v45  ;;  %v17208_v42 = vld [vmem:[#allocation27_spill] sm:$0xff]  ;;  %v17211_v28 = vld [vmem:[#allocation32_spill] sm:$0xff]  ;;  %v17213_v41 = vld [vmem:[#allocation34_spill] sm:$0xff] }
 0x250   : > { %v14305_v33 = vadd.f32 %v12152_v29, %v14076_v44  ;;  %v14307_v39 = vpop.f32.mrf.mxu1  ;;  %v5988_v29 = vld [vmem:[#allocation2 + $0x4] sm:$0x8]  ;;  %v14345_v56 = vadd.f32 %v17205_v25, %v2568_v36  ;;  %v14371_v25 = vadd.f32 %v17215_v47, %v17214_v15  ;;  %v17218_v62 = vld [vmem:[#allocation28_spill] sm:$0xff]  ;;  %v2588_v47 = vadd.f32 %v14207_v60, %v2256_v4  ;;  %v17236_v60 = vld [vmem:[#allocation46_spill] sm:$0xff] }
 0x251   : > { %17198 = vst [vmem:[#allocation15_spill] sm:$0xff] %v14307_v39  ;;  %v14318_v37 = vpop.f32.mrf.mxu0  ;;  %v5540_v39 = vshrl.u32 %v11005_v2, 16  ;;  %v17212_v36 = vld [vmem:[#allocation33_spill] sm:$0xff]  ;;  %v17222_v21 = vld [vmem:[#allocation40_spill] sm:$0xff]  ;;  %vm14403_vm1 = vcmp.lt.s32.totalorder %v17228_v48, 16  ;;  %v17241_v44 = vld [vmem:[#allocation50_spill] sm:$0xff] }
 0x252   : > { %17197 = vst [vmem:[#allocation14_spill] sm:$0xff] %v14305_v33  ;;  %v14324_v49 = vpop.f32.mrf.mxu1  ;;  %v17203_v33 = vld [vmem:[#allocation26_spill] sm:$0xff] }
 0x253   : > { %v2264_v18 = vadd.f32 %v17203_v33, %v1932_v51  ;;  %v12155_v43 = vpop.f32.mrf.mxu0  ;;  %v14342_v51 = vcombine.low %v5988_v29, %v5393_v59  ;;  %v14358_v59 = vrot.slane %v5540_v39, 2  ;;  %v14360_v33 = vrot.slane %v5543_v8, 3  ;;  %v17216_v8 = vld [vmem:[#allocation37_spill] sm:$0xff] }
 0x254   : > { %v14338_v54 = vadd.f32 %v12155_v43, %v14082_v11  ;;  %v14340_v2 = vpop.f32.mrf.mxu1  ;;  %v2580_v11 = vadd.f32 %v14165_v16, %v2248_v53  ;;  %v14364_v29 = vadd.f32 %v17212_v36, %v17211_v28  ;;  %v14367_v43 = vadd.f32 %v17213_v41, %v2572_v9  ;;  %v17217_v53 = vld [vmem:[#allocation38_spill] sm:$0xff]  ;;  %v17221_v28 = vld [vmem:[#allocation39_spill] sm:$0xff]  ;;  %v17223_v36 = vld [vmem:[#allocation41_spill] sm:$0xff] }
 0x255   : > { %17204 = vst [vmem:[#allocation16_spill] sm:$0xff] %v14342_v51  ;;  %v2552_v58 = vpop.f32.mrf.mxu0  ;;  %17209 = vst [vmem:[#allocation18_spill] sm:$0xff] %v14358_v59  ;;  %v14376_v39 = vadd.f32 %v14139_v34, %v14137_v38  ;;  %v14380_v45 = vadd.f32 %v17217_v53, %v17216_v8  ;;  %v14389_v23 = vadd.f32 %v17221_v28, %v2576_v3  ;;  %v17225_v38 = vld [vmem:[#allocation42_spill] sm:$0xff]  ;;  %v17226_v34 = vld [vmem:[#allocation43_spill] sm:$0xff] }
 0x256   : > { %v2599_v57 = vadd.f32 %v2552_v58, %v17208_v42  ;;  %17210 = vst [vmem:[#allocation20_spill] sm:$0xff] %v14360_v33  ;;  %v2884_v17 = vpop.f32.mrf.mxu1  ;;  %v14393_v41 = vadd.f32 %v17223_v36, %v17222_v21  ;;  %v14397_v15 = vadd.f32 %v17226_v34, %v17225_v38  ;;  %v17231_v3 = vrot.slane %v14219_v0, %v14253_v32  ;;  %v17235_v28 = vld [vmem:[#allocation45_spill] sm:$0xff]  ;;  %v17238_v36 = vld [vmem:[#allocation47_spill] sm:$0xff]  ;;  %v17239_v38 = vld [vmem:[#allocation48_spill] sm:$0xff] }
 0x257   : > { %v12156_v16 = vpop.f32.mrf.mxu0  ;;  %v14419_v4 = vadd.f32 %v17236_v60, %v2580_v11  ;;  %v14423_v34 = vadd.f32 %v17239_v38, %v17238_v36  ;;  %v17240_v42 = vld [vmem:[#allocation49_spill] sm:$0xff]  ;;  %v17242_v51 = vld [vmem:[#allocation51_spill] sm:$0xff]  ;;  %v2592_v11 = vadd.f32 %v14250_v50, %v2260_v12  ;;  %v17246_v36 = vrot.slane %v14219_v0, %v14256_v1  ;;  %v17255_v33 = vld [vmem:[#allocation60_spill] sm:$0xff] }
 0x258   : > { %v2602_v58 = vadd.f32 %v12156_v16, %v17218_v62  ;;  %17224 = vst [vmem:[#allocation22_spill] sm:$0xff] %v14393_v41  ;;  %17227 = vst [vmem:[#allocation24_spill] sm:$0xff] %v14397_v15  ;;  %vm14410_vm2 = vcmp.lt.s32.totalorder %v17231_v3, 16  ;;  %v17234_v62 = vld [vmem:[#allocation44_spill] sm:$0xff]  ;;  %v14429_v3 = vadd.f32 %v17241_v44, %v17240_v42  ;;  %v12208_v60 = vpop.f32.mrf.mxu1  ;;  %v17249_v44 = vld [vmem:[#allocation54_spill] sm:$0xff] }
 0x259   : > { %v2555_v16 = vpop.f32.mrf.mxu0  ;;  %v14416_v21 = vadd.f32 %v17235_v28, %v17234_v62  ;;  %17237 = vst [vmem:[#allocation17_spill] sm:$0xff] %v14419_v4  ;;  %v17243_v15 = vld [vmem:[#allocation52_spill] sm:$0xff]  ;;  %v17244_v62 = vld [vmem:[#allocation53_spill] sm:$0xff]  ;;  %vm14442_vm3 = vcmp.lt.s32.totalorder %v17246_v36, 16  ;;  %v17250_v42 = vld [vmem:[#allocation55_spill] sm:$0xff]  ;;  %v14463_v36 = vadd.f32 %v14217_v46, %v14215_v5 }
 0x25a   : > { %v14433_v41 = vadd.f32 %v17243_v15, %v17242_v51  ;;  %v14436_v28 = vadd.f32 %v17244_v62, %v2584_v61  ;;  %v14448_v48 = vadd.f32 %v17250_v42, %v17249_v44  ;;  %v17251_v51 = vld [vmem:[#allocation56_spill] sm:$0xff]  ;;  %v17252_v15 = vld [vmem:[#allocation57_spill] sm:$0xff]  ;;  %v17253_v61 = vld [vmem:[#allocation58_spill] sm:$0xff]  ;;  %v14467_v44 = vadd.f32 %v14228_v22, %v14226_v27 }
 0x25b   : > { %v12227_v4 = vpop.f32.mrf.mxu0  ;;  %v14452_v59 = vadd.f32 %v17252_v15, %v17251_v51  ;;  %v17254_v62 = vld [vmem:[#allocation59_spill] sm:$0xff]  ;;  %v2596_v42 = vadd.f32 %v14318_v37, %v2264_v18  ;;  %v17256_v15 = vrot.slane %v14219_v0, %v14272_v52  ;;  %v2600_v46 = vadd.f32 %v2555_v16, %v2268_v10 }
 0x25c   : > { %17245 = vst [vmem:[#allocation19_spill] sm:$0xff] %v14436_v28  ;;  %v14456_v50 = vadd.f32 %v17254_v62, %v17253_v61  ;;  %v3233_v12 = vadd.f32 %v12227_v4, %v2901_v26  ;;  %v14459_v28 = vadd.f32 %v17255_v33, %v2588_v47  ;;  %v14479_v26 = vadd.f32 %v14238_v6, %v14236_v14  ;;  %v17262_v6 = vld [vmem:[#allocation14_spill] sm:$0xff]  ;;  %v17263_v18 = vld [vmem:[#allocation15_spill] sm:$0xff] }
 0x25d   : > { %v3088_v51 = vpop.f32.mrf.mxu0  ;;  %vm14473_vm4 = vcmp.lt.s32.totalorder %v17256_v15, 16  ;;  %v17259_v27 = vrot.slane %v14284_v40, %v14253_v32  ;;  %v14489_v0 = vadd.f32 %v14264_v31, %v2592_v11  ;;  %v14493_v37 = vadd.f32 %v14277_v13, %v14275_v55  ;;  %v2887_v32 = vpop.f32.mrf.mxu1  ;;  %v17267_v55 = vld [vmem:[#allocation13_spill] sm:$0xff] }
 0x25e   : > { %v3269_v5 = vmax.f32 %v3233_v12, 0.0  ;;  %v3231_v33 = vadd.f32 %v3088_v51, %v2899_v30  ;;  %v14497_v14 = vadd.f32 %v14297_v19, %v14295_v20  ;;  %v14501_v10 = vadd.f32 %v17263_v18, %v17262_v6 }
 0x25f   : > { %vm14484_vm5 = vcmp.lt.s32.totalorder %v17259_v27, 16  ;;  %v12228_v30 = vpop.f32.mrf.mxu0  ;;  %v17264_v47 = vrot.slane %v14284_v40, %v14244_v24  ;;  %v17268_v20 = vrot.slane %v14284_v40, %v14256_v1  ;;  %v14520_v62 = vadd.f32 %v14324_v49, %v2596_v42 }
 0x260   : > { %v3467_v16 = vcombine.high %v3269_v5, %v3269_v5  ;;  %v3474_v13 = vrot.slane %v3269_v5, %v17267_v55  ;;  %v3267_v4 = vmax.f32 %v3231_v33, 0.0  ;;  %v3234_v19 = vadd.f32 %v12228_v30, %v14335_v35 }
 0x261   : > { %vm14506_vm6 = vcmp.lt.s32.totalorder %v17264_v47, 16  ;;  %vm14515_vm7 = vcmp.lt.s32.totalorder %v17268_v20, 16  ;;  %v14524_v24 = vadd.f32 %v14340_v2, %v14338_v54  ;;  %v14526_v12 = vadd.f32 %v2884_v17, %v2599_v57  ;;  %v3091_v15 = vpop.f32.mrf.mxu0 }
 0x262   : > { %v14528_v51 = vadd.f32 %v12208_v60, %v2602_v58  ;;  %v14530_v35 = vadd.f32 %v2887_v32, %v2600_v46  ;;  %v3481_v1 = vrot.slane %v3467_v16, %v17267_v55  ;;  %v3482_v5 = vcombine.high %v3474_v13, %v3474_v13 }
 0x263   : > { %v3433_v33 = vcombine.high %v3267_v4, %v3267_v4  ;;  %v4197_v27 = vsel %vm14383_vm0, %v3474_v13, 0.0  ;;  %v3440_v49 = vrot.slane %v3267_v4, %v17267_v55  ;;  %v3270_v42 = vmax.f32 %v3234_v19, 0.0  ;;  %v12231_v2 = vpop.f32.mrf.mxu0 }
 0x264   : > { %v3232_v54 = vadd.f32 %v3091_v15, %v14345_v56  ;;  %v3483_v57 = vcombine.high %v3481_v1, %v3481_v1  ;;  %v4198_v17 = vsel %vm14403_vm1, %v3482_v5, 0.0  ;;  %v4199_v58 = vsel %vm14410_vm2, %v3481_v1, 0.0 }
 0x265   : > { %v3447_v60 = vrot.slane %v3433_v33, %v17267_v55  ;;  %v4519_v46 = vcombine.low %v4197_v27, %v4198_v17  ;;  %v3448_v6 = vcombine.high %v3440_v49, %v3440_v49  ;;  %v4189_v18 = vsel %vm14403_vm1, %v3440_v49, 0.0  ;;  %v3104_v30 = vpop.f32.mrf.mxu0 }
 0x266   : > { %v3484_v32 = vcombine.high %v3270_v42, %v3270_v42  ;;  %v4200_v56 = vsel %vm14442_vm3, %v3483_v57, 0.0  ;;  %v3491_v13 = vrot.slane %v3270_v42, %v17267_v55  ;;  %v17271_v1 = vrot.slane %v14284_v40, %v14272_v52 }
 0x267   : > { %v3449_v47 = vcombine.high %v3447_v60, %v3447_v60  ;;  %v4191_v16 = vsel %vm14442_vm3, %v3447_v60, 0.0  ;;  %v4520_v4 = vcombine.low %v4199_v58, %v4200_v56  ;;  %v4527_v19 = vrot.slane %v4519_v46, %v17267_v55  ;;  %v12232_v52 = vpop.f32.mrf.mxu0 }
 0x268   : > { %v4190_v20 = vsel %vm14410_vm2, %v3448_v6, 0.0  ;;  %v3498_v15 = vrot.slane %v3484_v32, %v17267_v55  ;;  %vm14556_vm8 = vcmp.lt.s32.totalorder %v17271_v1, 16  ;;  %v3499_v49 = vcombine.high %v3491_v13, %v3491_v13 }
 0x269   : > { %v4192_v33 = vsel %vm14473_vm4, %v3449_v47, 0.0  ;;  %v4485_v27 = vcombine.low %v4189_v18, %v4190_v20  ;;  %v4201_v42 = vsel %vm14473_vm4, %v3491_v13, 0.0  ;;  %v4534_v57 = vrot.slane %v4520_v4, %v17267_v55 }
 0x26a   : > { %v4486_v17 = vcombine.low %v4191_v16, %v4192_v33  ;;  %v3500_v58 = vcombine.high %v3498_v15, %v3498_v15  ;;  %v4203_v60 = vsel %vm14484_vm5, %v3498_v15, 0.0  ;;  %v4202_v46 = vsel %vm14506_vm6, %v3499_v49, 0.0 }
 0x26b   : > { %v4493_v40 = vrot.slane %v4485_v27, %v17267_v55  ;;  %v3268_v6 = vmax.f32 %v3232_v54, 0.0  ;;  %v3237_v18 = vadd.f32 %v12231_v2, %v14349_v7  ;;  %v4535_v32 = vcombine.low %v4527_v19, %v4534_v57  ;;  %v3107_v7 = vpop.f32.mrf.mxu0 }
 0x26c   : > { %v4500_v56 = vrot.slane %v4486_v17, %v17267_v55  ;;  %v4204_v47 = vsel %vm14515_vm7, %v3500_v58, 0.0  ;;  %v4536_v16 = vcombine.low %v4201_v42, %v4202_v46  ;;  %v3235_v27 = vadd.f32 %v3104_v30, %v14353_v63 }
 0x26d   : > { %v4537_v13 = vcombine.low %v4203_v60, %v4204_v47  ;;  %v3450_v4 = vcombine.high %v3268_v6, %v3268_v6  ;;  %v3457_v20 = vrot.slane %v3268_v6, %v17267_v55  ;;  %v3273_v15 = vmax.f32 %v3237_v18, 0.0 }
 0x26e   : > { %v4501_v1 = vcombine.low %v4493_v40, %v4500_v56  ;;  %v4544_v33 = vrot.slane %v4536_v16, %v17267_v55  ;;  %v3238_v54 = vadd.f32 %v12232_v52, %v14364_v29  ;;  %v3271_v58 = vmax.f32 %v3235_v27, 0.0  ;;  %v12235_v56 = vpop.f32.mrf.mxu0 }
 0x26f   : > { %v4551_v2 = vrot.slane %v4537_v13, %v17267_v55  ;;  %v3464_v19 = vrot.slane %v3450_v4, %v17267_v55  ;;  %v3465_v49 = vcombine.high %v3457_v20, %v3457_v20  ;;  %v4193_v42 = vsel %vm14506_vm6, %v3457_v20, 0.0 }
 0x270   : > { %v3535_v57 = vcombine.high %v3273_v15, %v3273_v15  ;;  %v3542_v17 = vrot.slane %v3273_v15, %v17267_v55  ;;  %v3274_v60 = vmax.f32 %v3238_v54, 0.0  ;;  %v3501_v13 = vcombine.high %v3271_v58, %v3271_v58 }
 0x271   : > { %v4552_v40 = vcombine.low %v4544_v33, %v4551_v2  ;;  %v3466_v46 = vcombine.high %v3464_v19, %v3464_v19  ;;  %v4194_v63 = vsel %vm14484_vm5, %v3465_v49, 0.0  ;;  %v4195_v29 = vsel %vm14515_vm7, %v3464_v19, 0.0 }
 0x272   : > { %v4502_v30 = vcombine.low %v4193_v42, %v4194_v63  ;;  %v3549_v52 = vrot.slane %v3535_v57, %v17267_v55  ;;  %v3550_v6 = vcombine.high %v3542_v17, %v3542_v17  ;;  %v4213_v18 = vsel %vm14515_vm7, %v3542_v17, 0.0 }
 0x273   : > { %v11225_v47 = vpack.c.bf16 %v4552_v40, %v4535_v32  ;;  %v4196_v16 = vsel %vm14556_vm8, %v3466_v46, 0.0  ;;  %v3508_v4 = vrot.slane %v3271_v58, %v17267_v55  ;;  %v3515_v32 = vrot.slane %v3501_v13, %v17267_v55  ;;  %v3120_v58 = vpop.f32.mrf.mxu0 }
 0x274   : > { %v4503_v20 = vcombine.low %v4195_v29, %v4196_v16  ;;  %v4510_v15 = vrot.slane %v4502_v30, %v17267_v55  ;;  %v3551_v33 = vcombine.high %v3549_v52, %v3549_v52  ;;  %v4214_v27 = vsel %vm14556_vm8, %v3550_v6, 0.0 }
 0x275   : > { %11308 = vst [vmem:[#allocation2 + $0x18] sm:$0xff] %v11225_v47   ;;  %v4215_v54 = vsel %vm14383_vm0, %v3549_v52, 0.0  ;;  %v4587_v2 = vcombine.low %v4213_v18, %v4214_v27  ;;  %v3516_v19 = vcombine.high %v3508_v4, %v3508_v4  ;;  %v4205_v57 = vsel %vm14556_vm8, %v3508_v4, 0.0 }
 0x276   : > { %v4517_v49 = vrot.slane %v4503_v20, %v17267_v55  ;;  %v4216_v42 = vsel %vm14403_vm1, %v3551_v33, 0.0  ;;  %v3552_v17 = vcombine.high %v3274_v60, %v3274_v60  ;;  %v3517_v63 = vcombine.high %v3515_v32, %v3515_v32 }
 0x277   : > { %v4588_v40 = vcombine.low %v4215_v54, %v4216_v42  ;;  %v4595_v46 = vrot.slane %v4587_v2, %v17267_v55  ;;  %v4206_v29 = vsel %vm14383_vm0, %v3516_v19, 0.0  ;;  %v4207_v52 = vsel %vm14403_vm1, %v3515_v32, 0.0  ;;  %v12236_v54 = vpop.f32.mrf.mxu0 }
 0x278   : > { %v4518_v30 = vcombine.low %v4510_v15, %v4517_v49  ;;  %v4553_v6 = vcombine.low %v4205_v57, %v4206_v29  ;;  %v3559_v18 = vrot.slane %v3274_v60, %v17267_v55  ;;  %v4208_v16 = vsel %vm14410_vm2, %v3517_v63, 0.0 }
 0x279   : > { %v4602_v47 = vrot.slane %v4588_v40, %v17267_v55  ;;  %v3566_v13 = vrot.slane %v3552_v17, %v17267_v55  ;;  %v3236_v4 = vadd.f32 %v3107_v7, %v14367_v43  ;;  %v4554_v33 = vcombine.low %v4207_v52, %v4208_v16 }
 0x27a   : > { %v11220_v20 = vpack.c.bf16 %v4518_v30, %v4501_v1  ;;  %v4561_v27 = vrot.slane %v4553_v6, %v17267_v55  ;;  %v3567_v15 = vcombine.high %v3559_v18, %v3559_v18  ;;  %v4217_v60 = vsel %vm14410_vm2, %v3559_v18, 0.0 }
 0x27b   : > { %v4603_v2 = vcombine.low %v4595_v46, %v4602_v47  ;;  %v3568_v32 = vcombine.high %v3566_v13, %v3566_v13  ;;  %v4219_v19 = vsel %vm14473_vm4, %v3566_v13, 0.0  ;;  %v4568_v49 = vrot.slane %v4554_v33, %v17267_v55 }
 0x27c   : > { %11307 = vst [vmem:[#allocation2 + $0x10] sm:$0xff] %v11220_v20   ;;  %v4218_v43 = vsel %vm14442_vm3, %v3567_v15, 0.0  ;;  %v3272_v1 = vmax.f32 %v3236_v4, 0.0  ;;  %v3241_v7 = vadd.f32 %v12235_v56, %v14371_v25  ;;  %v3239_v17 = vadd.f32 %v3120_v58, %v14376_v39 }
 0x27d   : > { %v4220_v42 = vsel %vm14506_vm6, %v3568_v32, 0.0  ;;  %v4604_v57 = vcombine.low %v4217_v60, %v4218_v43  ;;  %v3242_v40 = vadd.f32 %v12236_v54, %v14380_v45  ;;  %v14628_v46 = vcombine.low %v4561_v27, %v4568_v49  ;;  %v3123_v45 = vpop.f32.mrf.mxu0 }
 0x27e   : > { %v4605_v63 = vcombine.low %v4219_v19, %v4220_v42  ;;  %v3518_v29 = vcombine.high %v3272_v1, %v3272_v1  ;;  %v3525_v30 = vrot.slane %v3272_v1, %v17267_v55  ;;  %v3277_v6 = vmax.f32 %v3241_v7, 0.0 }
 0x27f   : > { %v4612_v52 = vrot.slane %v4604_v57, %v17267_v55  ;;  %v3275_v18 = vmax.f32 %v3239_v17, 0.0  ;;  %v3278_v47 = vmax.f32 %v3242_v40, 0.0  ;;  %v12239_v57 = vpop.f32.mrf.mxu0 }
 0x280   : > { %v4619_v25 = vrot.slane %v4605_v63, %v17267_v55  ;;  %v3532_v56 = vrot.slane %v3518_v29, %v17267_v55  ;;  %v3533_v16 = vcombine.high %v3525_v30, %v3525_v30  ;;  %v4209_v39 = vsel %vm14442_vm3, %v3525_v30, 0.0 }
 0x281   : > { %v3603_v58 = vcombine.high %v3277_v6, %v3277_v6  ;;  %v3610_v13 = vrot.slane %v3277_v6, %v17267_v55  ;;  %v3569_v4 = vcombine.high %v3275_v18, %v3275_v18  ;;  %v3576_v20 = vrot.slane %v3275_v18, %v17267_v55 }
 0x282   : > { %v4620_v33 = vcombine.low %v4612_v52, %v4619_v25  ;;  %v3534_v27 = vcombine.high %v3532_v56, %v3532_v56  ;;  %v4210_v15 = vsel %vm14473_vm4, %v3533_v16, 0.0  ;;  %v4211_v54 = vsel %vm14506_vm6, %v3532_v56, 0.0 }
 0x283   : > { %v4570_v32 = vcombine.low %v4209_v39, %v4210_v15  ;;  %v3617_v60 = vrot.slane %v3603_v58, %v17267_v55  ;;  %v3618_v19 = vcombine.high %v3610_v13, %v3610_v13  ;;  %v4229_v49 = vsel %vm14506_vm6, %v3610_v13, 0.0 }
 0x284   : > { %v11235_v43 = vpack.c.bf16 %v4620_v33, %v4603_v2  ;;  %v4212_v1 = vsel %vm14484_vm5, %v3534_v27, 0.0  ;;  %v3583_v7 = vrot.slane %v3569_v4, %v17267_v55  ;;  %v3584_v42 = vcombine.high %v3576_v20, %v3576_v20  ;;  %v3136_v33 = vpop.f32.mrf.mxu0 }
 0x285   : > { %v4571_v17 = vcombine.low %v4211_v54, %v4212_v1  ;;  %v4578_v40 = vrot.slane %v4570_v32, %v17267_v55  ;;  %v3619_v63 = vcombine.high %v3617_v60, %v3617_v60  ;;  %v4230_v29 = vsel %vm14484_vm5, %v3618_v19, 0.0 }
 0x286   : > { %11310 = vst [vmem:[#allocation2 + $0x28] sm:$0xff] %v11235_v43   ;;  %v4231_v30 = vsel %vm14515_vm7, %v3617_v60, 0.0  ;;  %v4655_v52 = vcombine.low %v4229_v49, %v4230_v29  ;;  %v3585_v2 = vcombine.high %v3583_v7, %v3583_v7  ;;  %v4221_v6 = vsel %vm14484_vm5, %v3576_v20, 0.0  ;;  %v17274_v49 = vld [vmem:[#allocation22_spill] sm:$0xff] }
 0x287   : > { %v4585_v18 = vrot.slane %v4571_v17, %v17267_v55  ;;  %v4232_v25 = vsel %vm14556_vm8, %v3619_v63, 0.0  ;;  %v4222_v56 = vsel %vm14515_vm7, %v3584_v42, 0.0  ;;  %v4223_v16 = vsel %vm14556_vm8, %v3583_v7, 0.0 }
 0x288   : > { %v4656_v39 = vcombine.low %v4231_v30, %v4232_v25  ;;  %v4663_v58 = vrot.slane %v4655_v52, %v17267_v55  ;;  %v4224_v13 = vsel %vm14383_vm0, %v3585_v2, 0.0  ;;  %v4621_v4 = vcombine.low %v4221_v6, %v4222_v56  ;;  %v12240_v30 = vpop.f32.mrf.mxu0  ;;  %v14682_v25 = vld [vmem:[#allocation8 + $0xf8] sm:$0xff]  }
 0x289   : > { %v4586_v20 = vcombine.low %v4578_v40, %v4585_v18  ;;  %v4622_v27 = vcombine.low %v4223_v16, %v4224_v13  ;;  %v3620_v15 = vcombine.high %v3278_v47, %v3278_v47  ;;  %v3627_v54 = vrot.slane %v3278_v47, %v17267_v55  ;;  %12417 = vmatprep.subr.bf16.mxu0 %v14682_v25 }
 0x28a   : > { %v4670_v32 = vrot.slane %v4656_v39, %v17267_v55  ;;  %v4629_v60 = vrot.slane %v4621_v4, %v17267_v55  ;;  %v3240_v19 = vadd.f32 %v3123_v45, %v14389_v23  ;;  %v3245_v43 = vadd.f32 %v12239_v57, %v17274_v49  ;;  %v17275_v39 = vld [vmem:[#allocation24_spill] sm:$0xff] }
 0x28b   : > { %v11230_v1 = vpack.c.bf16 %v4586_v20, %v14628_v46  ;;  %v4636_v7 = vrot.slane %v4622_v27, %v17267_v55  ;;  %v3634_v42 = vrot.slane %v3620_v15, %v17267_v55  ;;  %v3635_v17 = vcombine.high %v3627_v54, %v3627_v54 }
 0x28c   : > { %v4671_v40 = vcombine.low %v4663_v58, %v4670_v32  ;;  %v4233_v63 = vsel %vm14383_vm0, %v3627_v54, 0.0  ;;  %v3276_v47 = vmax.f32 %v3240_v19, 0.0  ;;  %v3281_v29 = vmax.f32 %v3245_v43, 0.0 }
 0x28d   : > { %11309 = vst [vmem:[#allocation2 + $0x20] sm:$0xff] %v11230_v1   ;;  %v14675_v52 = vcombine.low %v4629_v60, %v4636_v7  ;;  %v3636_v23 = vcombine.high %v3634_v42, %v3634_v42  ;;  %v4234_v45 = vsel %vm14403_vm1, %v3635_v17, 0.0  ;;  %v4235_v46 = vsel %vm14410_vm2, %v3634_v42, 0.0 }
 0x28e   : > { %v4672_v57 = vcombine.low %v4233_v63, %v4234_v45  ;;  %v3586_v2 = vcombine.high %v3276_v47, %v3276_v47  ;;  %v3593_v6 = vrot.slane %v3276_v47, %v17267_v55  ;;  %v3671_v18 = vcombine.high %v3281_v29, %v3281_v29 }
 0x28f   : > { %v4236_v56 = vsel %vm14442_vm3, %v3636_v23, 0.0  ;;  %v3678_v16 = vrot.slane %v3281_v29, %v17267_v55  ;;  %v3243_v58 = vadd.f32 %v3136_v33, %v17275_v39  ;;  %v3246_v13 = vadd.f32 %v12240_v30, %v14416_v21  ;;  %v3139_v33 = vpop.f32.mrf.mxu0 }
 0x290   : > { %v4673_v4 = vcombine.low %v4235_v46, %v4236_v56  ;;  %v4680_v20 = vrot.slane %v4672_v57, %v17267_v55  ;;  %v3600_v27 = vrot.slane %v3586_v2, %v17267_v55  ;;  %v3601_v15 = vcombine.high %v3593_v6, %v3593_v6 }
 0x291   : > { %v4225_v54 = vsel %vm14403_vm1, %v3593_v6, 0.0  ;;  %v3685_v32 = vrot.slane %v3671_v18, %v17267_v55  ;;  %v3686_v60 = vcombine.high %v3678_v16, %v3678_v16  ;;  %v4245_v19 = vsel %vm14442_vm3, %v3678_v16, 0.0  ;;  %v12243_v6 = vpop.f32.mrf.mxu0 }
 0x292   : > { %v4687_v21 = vrot.slane %v4673_v4, %v17267_v55  ;;  %v3602_v49 = vcombine.high %v3600_v27, %v3600_v27  ;;  %v4226_v43 = vsel %vm14410_vm2, %v3601_v15, 0.0  ;;  %v4227_v1 = vsel %vm14442_vm3, %v3600_v27, 0.0 }
 0x293   : > { %v4638_v7 = vcombine.low %v4225_v54, %v4226_v43  ;;  %v3687_v42 = vcombine.high %v3685_v32, %v3685_v32  ;;  %v4246_v17 = vsel %vm14473_vm4, %v3686_v60, 0.0  ;;  %v4247_v63 = vsel %vm14506_vm6, %v3685_v32, 0.0  ;;  %v17276_v32 = vld [vmem:[#allocation17_spill] sm:$0xff] }
 0x294   : > { %v4688_v47 = vcombine.low %v4680_v20, %v4687_v21  ;;  %v4228_v29 = vsel %vm14473_vm4, %v3602_v49, 0.0  ;;  %v4723_v30 = vcombine.low %v4245_v19, %v4246_v17  ;;  %v3279_v23 = vmax.f32 %v3243_v58, 0.0 }
 0x295   : > { %v4639_v45 = vcombine.low %v4227_v1, %v4228_v29  ;;  %v4646_v46 = vrot.slane %v4638_v7, %v17267_v55  ;;  %v4248_v57 = vsel %vm14484_vm5, %v3687_v42, 0.0  ;;  %v3282_v2 = vmax.f32 %v3246_v13, 0.0 }
 0x296   : > { %v11245_v18 = vpack.c.bf16 %v4688_v47, %v4671_v40  ;;  %v4724_v56 = vcombine.low %v4247_v63, %v4248_v57  ;;  %v4731_v16 = vrot.slane %v4723_v30, %v17267_v55  ;;  %v3637_v39 = vcombine.high %v3279_v23, %v3279_v23  ;;  %v3152_v47 = vpop.f32.mrf.mxu0 }
 0x297   : > { %v4653_v4 = vrot.slane %v4639_v45, %v17267_v55  ;;  %v3644_v20 = vrot.slane %v3279_v23, %v17267_v55  ;;  %v3688_v27 = vcombine.high %v3282_v2, %v3282_v2  ;;  %v3695_v58 = vrot.slane %v3282_v2, %v17267_v55 }
 0x298   : > { %11312 = vst [vmem:[#allocation2 + $0x38] sm:$0xff] %v11245_v18   ;;  %v4738_v15 = vrot.slane %v4724_v56, %v17267_v55  ;;  %v3651_v54 = vrot.slane %v3637_v39, %v17267_v55  ;;  %v3244_v13 = vadd.f32 %v3139_v33, %v17276_v32  ;;  %v3249_v40 = vadd.f32 %v12243_v6, %v14423_v34 }
 0x299   : > { %v4654_v60 = vcombine.low %v4646_v46, %v4653_v4  ;;  %v3652_v19 = vcombine.high %v3644_v20, %v3644_v20  ;;  %v4237_v21 = vsel %vm14473_vm4, %v3644_v20, 0.0  ;;  %v3702_v49 = vrot.slane %v3688_v27, %v17267_v55 }
 0x29a   : > { %v4739_v43 = vcombine.low %v4731_v16, %v4738_v15  ;;  %v3653_v1 = vcombine.high %v3651_v54, %v3651_v54  ;;  %v4239_v7 = vsel %vm14484_vm5, %v3651_v54, 0.0  ;;  %v3703_v42 = vcombine.high %v3695_v58, %v3695_v58 }
 0x29b   : > { %v11240_v17 = vpack.c.bf16 %v4654_v60, %v14675_v52  ;;  %v4238_v33 = vsel %vm14506_vm6, %v3652_v19, 0.0  ;;  %v3704_v63 = vcombine.high %v3702_v49, %v3702_v49  ;;  %v4249_v34 = vsel %vm14515_vm7, %v3695_v58, 0.0 }
 0x29c   : > { %v4240_v29 = vsel %vm14515_vm7, %v3653_v1, 0.0  ;;  %v4689_v30 = vcombine.low %v4237_v21, %v4238_v33  ;;  %v4250_v23 = vsel %vm14556_vm8, %v3703_v42, 0.0  ;;  %v4251_v45 = vsel %vm14383_vm0, %v3702_v49, 0.0 }
 0x29d   : > { %11311 = vst [vmem:[#allocation2 + $0x30] sm:$0xff] %v11240_v17   ;;  %v4690_v52 = vcombine.low %v4239_v7, %v4240_v29  ;;  %v4252_v46 = vsel %vm14403_vm1, %v3704_v63, 0.0  ;;  %v4740_v57 = vcombine.low %v4249_v34, %v4250_v23  ;;  %v3280_v2 = vmax.f32 %v3244_v13, 0.0  ;;  %v12244_v7 = vpop.f32.mrf.mxu0 }
 0x29e   : > { %v4697_v6 = vrot.slane %v4689_v30, %v17267_v55  ;;  %v4741_v18 = vcombine.low %v4251_v45, %v4252_v46  ;;  %v3285_v56 = vmax.f32 %v3249_v40, 0.0  ;;  %v3247_v16 = vadd.f32 %v3152_v47, %v14429_v3 }
 0x29f   : > { %v4704_v39 = vrot.slane %v4690_v52, %v17267_v55  ;;  %v4748_v4 = vrot.slane %v4740_v57, %v17267_v55  ;;  %v3654_v20 = vcombine.high %v3280_v2, %v3280_v2  ;;  %v3661_v27 = vrot.slane %v3280_v2, %v17267_v55  ;;  %v14761_v57 = vld [vmem:[#allocation2 + $0xc] sm:$0xff]  }
 0x2a0   : > { %v4755_v58 = vrot.slane %v4741_v18, %v17267_v55  ;;  %v3739_v15 = vcombine.high %v3285_v56, %v3285_v56  ;;  %v3746_v54 = vrot.slane %v3285_v56, %v17267_v55  ;;  %v3283_v32 = vmax.f32 %v3247_v16, 0.0  ;;  %v3155_v56 = vpop.f32.mrf.mxu0 }
 0x2a1   : > { %v4705_v13 = vcombine.low %v4697_v6, %v4704_v39  ;;  %v3668_v60 = vrot.slane %v3654_v20, %v17267_v55  ;;  %v3669_v40 = vcombine.high %v3661_v27, %v3661_v27  ;;  %v4241_v3 = vsel %vm14556_vm8, %v3661_v27, 0.0 }
 0x2a2   : > { %v4756_v19 = vcombine.low %v4748_v4, %v4755_v58  ;;  %v3753_v21 = vrot.slane %v3739_v15, %v17267_v55  ;;  %v3754_v49 = vcombine.high %v3746_v54, %v3746_v54  ;;  %v4261_v1 = vsel %vm14403_vm1, %v3746_v54, 0.0 }
 0x2a3   : > { %v3670_v42 = vcombine.high %v3668_v60, %v3668_v60  ;;  %v4242_v17 = vsel %vm14383_vm0, %v3669_v40, 0.0  ;;  %v4243_v33 = vsel %vm14403_vm1, %v3668_v60, 0.0  ;;  %v3705_v63 = vcombine.high %v3283_v32, %v3283_v32  ;;  %v17277_v40 = vld [vmem:[#allocation19_spill] sm:$0xff] }
 0x2a4   : > { %v11255_v34 = vpack.c.bf16 %v4756_v19, %v4739_v43  ;;  %v4706_v47 = vcombine.low %v4241_v3, %v4242_v17  ;;  %v3755_v29 = vcombine.high %v3753_v21, %v3753_v21  ;;  %v4262_v30 = vsel %vm14410_vm2, %v3754_v49, 0.0  ;;  %v12247_v17 = vpop.f32.mrf.mxu0 }
 0x2a5   : > { %v4244_v23 = vsel %vm14410_vm2, %v3670_v42, 0.0  ;;  %v4263_v45 = vsel %vm14442_vm3, %v3753_v21, 0.0  ;;  %v4791_v52 = vcombine.low %v4261_v1, %v4262_v30  ;;  %v3712_v46 = vrot.slane %v3283_v32, %v17267_v55 }
 0x2a6   : > { %11314 = vst [vmem:[#allocation2 + $0x48] sm:$0xff] %v11255_v34   ;;  %v4707_v2 = vcombine.low %v4243_v33, %v4244_v23  ;;  %v4714_v43 = vrot.slane %v4706_v47, %v17267_v55  ;;  %v4264_v6 = vsel %vm14473_vm4, %v3755_v29, 0.0  ;;  %v3719_v18 = vrot.slane %v3705_v63, %v17267_v55  ;;  %v14781_v33 = vld [vmem:[#allocation2 + $0x14] sm:$0xff]  }
 0x2a7   : > { %v4792_v16 = vcombine.low %v4263_v45, %v4264_v6  ;;  %v4799_v39 = vrot.slane %v4791_v52, %v17267_v55  ;;  %v3720_v4 = vcombine.high %v3712_v46, %v3712_v46  ;;  %v4253_v20 = vsel %vm14410_vm2, %v3712_v46, 0.0  ;;  %v17278_v34 = vld [vmem:[#allocation16_spill] sm:$0xff] }
 0x2a8   : > { %v4721_v27 = vrot.slane %v4707_v2, %v17267_v55  ;;  %v3721_v58 = vcombine.high %v3719_v18, %v3719_v18  ;;  %v4255_v15 = vsel %vm14473_vm4, %v3719_v18, 0.0  ;;  %v3250_v54 = vadd.f32 %v12244_v7, %v14433_v41 }
 0x2a9   : > { %v4806_v32 = vrot.slane %v4792_v16, %v17267_v55  ;;  %v4254_v60 = vsel %vm14442_vm3, %v3720_v4, 0.0  ;;  %v3248_v3 = vadd.f32 %v3155_v56, %v17277_v40  ;;  %v6011_v19 = vrot.slane %v14761_v57, 3 }
 0x2aa   : > { %v4722_v21 = vcombine.low %v4714_v43, %v4721_v27  ;;  %v4256_v49 = vsel %vm14506_vm6, %v3721_v58, 0.0  ;;  %v4757_v1 = vcombine.low %v4253_v20, %v4254_v60  ;;  %v3286_v42 = vmax.f32 %v3250_v54, 0.0 }
 0x2ab   : > { %v14783_v63 = vcombine.low %v4799_v39, %v4806_v32  ;;  %v4758_v41 = vcombine.low %v4255_v15, %v4256_v49  ;;  %v3284_v7 = vmax.f32 %v3248_v3, 0.0  ;;  %v17279_v47 = vrot.slane %v17278_v34, 3 }
 0x2ac   : > { %v11250_v30 = vpack.c.bf16 %v4722_v21, %v4705_v13  ;;  %v4765_v23 = vrot.slane %v4757_v1, %v17267_v55  ;;  %v3756_v45 = vcombine.high %v3286_v42, %v3286_v42  ;;  %v3763_v52 = vrot.slane %v3286_v42, %v17267_v55  ;;  %v3168_v21 = vpop.f32.mrf.mxu0 }
 0x2ad   : > { %v6012_v29 = vsel %vm6009_vm9, %v17279_v47, %v6011_v19  ;;  %v4772_v46 = vrot.slane %v4758_v41, %v17267_v55  ;;  %v3722_v2 = vcombine.high %v3284_v7, %v3284_v7  ;;  %v3729_v43 = vrot.slane %v3284_v7, %v17267_v55  ;;  %v12919_v41 = vld [vmem:[#allocation8 + $0xf0] sm:$0xff]  }
 0x2ae   : > { %12329 = vmatprep.mubr.bf16.mxu0 %v6012_v29  ;;  %v3253_v6 = vadd.f32 %v12247_v17, %v14448_v48  ;;  %11313 = vst [vmem:[#allocation2 + $0x40] sm:$0xff] %v11250_v30   ;;  %v3770_v18 = vrot.slane %v3756_v45, %v17267_v55  ;;  %v3771_v56 = vcombine.high %v3763_v52, %v3763_v52  ;;  %v4265_v13 = vsel %vm14506_vm6, %v3763_v52, 0.0 }
 0x2af   : > { %v6013_v16 = vrot.slane %v14781_v33, 3  ;;  %v14797_v39 = vcombine.low %v4765_v23, %v4772_v46  ;;  %v3736_v4 = vrot.slane %v3722_v2, %v17267_v55  ;;  %v3737_v20 = vcombine.high %v3729_v43, %v3729_v43 }
 0x2b0   : > { %v4257_v27 = vsel %vm14484_vm5, %v3729_v43, 0.0  ;;  %v3772_v58 = vcombine.high %v3770_v18, %v3770_v18  ;;  %v4266_v48 = vsel %vm14484_vm5, %v3771_v56, 0.0  ;;  %v4267_v15 = vsel %vm14515_vm7, %v3770_v18, 0.0  ;;  %v12248_v56 = vpop.f32.mrf.mxu0 }
 0x2b1   : > { %v3289_v54 = vmax.f32 %v3253_v6, 0.0  ;;  %v4808_v32 = vcombine.low %v4265_v13, %v4266_v48  ;;  %v3738_v60 = vcombine.high %v3736_v4, %v3736_v4  ;;  %v4258_v40 = vsel %vm14515_vm7, %v3737_v20, 0.0 }
 0x2b2   : > { %v4259_v3 = vsel %vm14556_vm8, %v3736_v4, 0.0  ;;  %v4268_v49 = vsel %vm14556_vm8, %v3772_v58, 0.0  ;;  %v4774_v1 = vcombine.low %v4257_v27, %v4258_v40  ;;  %v6014_v30 = vsel %vm6009_vm9, %v6011_v19, %v6013_v16  ;;  %v12922_v27 = vld [vmem:[#allocation8 + $0xe8] sm:$0xff]  }
 0x2b3   : > { %v3807_v42 = vcombine.high %v3289_v54, %v3289_v54  ;;  %v3814_v17 = vrot.slane %v3289_v54, %v17267_v55  ;;  %v4809_v7 = vcombine.low %v4267_v15, %v4268_v49  ;;  %v4816_v47 = vrot.slane %v4808_v32, %v17267_v55  ;;  %12330 = vmatmul.mubr.bf16.vlgmr.msra.gmra.mxu0 %v6014_v30 }
 0x2b4   : > { %v4260_v29 = vsel %vm14383_vm0, %v3738_v60, 0.0  ;;  %v4782_v45 = vrot.slane %v4774_v1, %v17267_v55  ;;  %v3251_v6 = vadd.f32 %v3168_v21, %v14452_v59  ;;  %v5548_v18 = vshrl.u32 %v14761_v57, 16  ;;  %12418 = vmatpush3.bf16.msra.mxu0 %v14682_v25 }
 0x2b5   : > { %v4775_v23 = vcombine.low %v4259_v3, %v4260_v29  ;;  %v3821_v52 = vrot.slane %v3807_v42, %v17267_v55  ;;  %v3822_v46 = vcombine.high %v3814_v17, %v3814_v17  ;;  %v4823_v2 = vrot.slane %v4809_v7, %v17267_v55  ;;  %12419 = vmatprep.subr.bf16.mxu0 %v12919_v41 }
 0x2b6   : > { %v4277_v43 = vsel %vm14556_vm8, %v3814_v17, 0.0  ;;  %v3287_v15 = vmax.f32 %v3251_v6, 0.0  ;;  %v5550_v59 = vrot.slane %v5548_v18, 2  ;;  %v5551_v32 = vshll.u32 %v14761_v57, 16  ;;  %v15313_v57 = vld [vmem:[#allocation2 + $0x40] sm:$0xf] }
 0x2b7   : > { %v4789_v19 = vrot.slane %v4775_v23, %v17267_v55  ;;  %v3823_v13 = vcombine.high %v3821_v52, %v3821_v52  ;;  %v4278_v4 = vsel %vm14383_vm0, %v3822_v46, 0.0  ;;  %v4279_v20 = vsel %vm14403_vm1, %v3821_v52, 0.0 }
 0x2b8   : > { %v4824_v58 = vcombine.low %v4816_v47, %v4823_v2  ;;  %v4859_v48 = vcombine.low %v4277_v43, %v4278_v4  ;;  %v3254_v60 = vadd.f32 %v12248_v56, %v14456_v50  ;;  %v3773_v49 = vcombine.high %v3287_v15, %v3287_v15  ;;  %12420 = vmatpush3.bf16.msra.mxu0 %v12919_v41  ;;  %v12924_v47 = vld [vmem:[#allocation8 + $0xe0] sm:$0xff]   ;;  %v3171_v41 = vpop.f32.mrf.mxu0  ;;  %v17281_v4 = vld [vmem:[#allocation18_spill] sm:$0xff] }
 0x2b9   : > { %v4790_v54 = vcombine.low %v4782_v45, %v4789_v19  ;;  %v4280_v25 = vsel %vm14410_vm2, %v3823_v13, 0.0  ;;  %v3780_v42 = vrot.slane %v3287_v15, %v17267_v55  ;;  %v5553_v17 = vrot.slane %v5551_v32, 3  ;;  %12421 = vmatprep.subr.bf16.mxu0 %v12922_v27  ;;  %v14855_v56 = vld [vmem:[#allocation2 + $0x1c] sm:$0xff]  }
 0x2ba   : > { %v11265_v40 = vpack.c.bf16 %v4824_v58, %v14783_v63  ;;  %v4860_v3 = vcombine.low %v4279_v20, %v4280_v25  ;;  %v4867_v21 = vrot.slane %v4859_v48, %v17267_v55  ;;  %v3290_v7 = vmax.f32 %v3254_v60, 0.0  ;;  %v17280_v13 = vld [vmem:[#allocation20_spill] sm:$0xff] }
 0x2bb   : > { %v11260_v1 = vpack.c.bf16 %v4790_v54, %v14797_v39  ;;  %v3787_v63 = vrot.slane %v3773_v49, %v17267_v55  ;;  %v5557_v29 = vshrl.u32 %v14781_v33, 16  ;;  %v5560_v30 = vshll.u32 %v14781_v33, 16  ;;  %v12956_v33 = vld [vmem:[#allocation8 + $0x170] sm:$0xff]  }
 0x2bc   : > { %11316 = vst [vmem:[#allocation2 + $0x58] sm:$0xff] %v11265_v40   ;;  %v4874_v50 = vrot.slane %v4860_v3, %v17267_v55  ;;  %v3788_v39 = vcombine.high %v3780_v42, %v3780_v42  ;;  %v4269_v23 = vsel %vm14383_vm0, %v3780_v42, 0.0  ;;  %v5554_v45 = vor.u32 %v5553_v17, %v5550_v59  ;;  %12422 = vmatpush3.bf16.msra.mxu0 %v12922_v27  ;;  %v12927_v59 = vld [vmem:[#allocation8 + $0xd8] sm:$0xff]   ;;  %v12251_v40 = vpop.f32.mrf.mxu0  ;;  %v14874_v42 = vld [vmem:[#allocation2 + $0x24] sm:$0xff]  }
 0x2bd   : > { %11315 = vst [vmem:[#allocation2 + $0x50] sm:$0xff] %v11260_v1   ;;  %v3824_v52 = vcombine.high %v3290_v7, %v3290_v7  ;;  %v3789_v2 = vcombine.high %v3787_v63, %v3787_v63  ;;  %v4271_v43 = vsel %vm14410_vm2, %v3787_v63, 0.0  ;;  %v3831_v6 = vrot.slane %v3290_v7, %v17267_v55  ;;  %12423 = vmatprep.subr.bf16.mxu0 %v12924_v47 }
 0x2be   : > { %v14850_v46 = vcombine.low %v4867_v21, %v4874_v50  ;;  %v4270_v19 = vsel %vm14403_vm1, %v3788_v39, 0.0  ;;  %v17282_v20 = vor.u32 %v17280_v13, %v17281_v4  ;;  %v5559_v15 = vrot.slane %v5557_v29, 2 }
 0x2bf   : > { %v3838_v48 = vrot.slane %v3824_v52, %v17267_v55  ;;  %v4272_v54 = vsel %vm14442_vm3, %v3789_v2, 0.0  ;;  %v4825_v25 = vcombine.low %v4269_v23, %v4270_v19  ;;  %v3839_v27 = vcombine.high %v3831_v6, %v3831_v6 }
 0x2c0   : > { %v5555_v58 = vsel %vm5538_vm10, %v17282_v20, %v5554_v45  ;;  %v4281_v60 = vsel %vm14442_vm3, %v3831_v6, 0.0  ;;  %v4826_v3 = vcombine.low %v4271_v43, %v4272_v54  ;;  %v5562_v1 = vrot.slane %v5560_v30, 3  ;;  %12424 = vmatpush3.bf16.msra.mxu0 %v12924_v47  ;;  %v12929_v43 = vld [vmem:[#allocation8 + $0xd0] sm:$0xff]  }
 0x2c1   : > { %12277 = vmatprep.mubr.bf16.mxu1 %v5555_v58  ;;  %v3840_v21 = vcombine.high %v3838_v48, %v3838_v48  ;;  %v4283_v49 = vsel %vm14506_vm6, %v3838_v48, 0.0  ;;  %v4833_v17 = vrot.slane %v4825_v25, %v17267_v55  ;;  %v4282_v7 = vsel %vm14473_vm4, %v3839_v27, 0.0  ;;  %12425 = vmatprep.subr.bf16.mxu0 %v12927_v59  ;;  %v12906_v47 = vld [vmem:[#allocation8 + $0xb0] sm:$0xff]  }
 0x2c2   : > { %v3252_v50 = vadd.f32 %v3171_v41, %v14459_v28  ;;  %v6015_v63 = vrot.slane %v14855_v56, 3  ;;  %v4840_v39 = vrot.slane %v4826_v3, %v17267_v55  ;;  %v4876_v52 = vcombine.low %v4281_v60, %v4282_v7  ;;  %v3184_v41 = vpop.f32.mrf.mxu0  ;;  %v12932_v3 = vld [vmem:[#allocation8 + $0xc8] sm:$0xff]  }
 0x2c3   : > { %v4284_v23 = vsel %vm14484_vm5, %v3840_v21, 0.0  ;;  %v14884_v2 = vor.u32 %v5562_v1, %v5559_v15  ;;  %v3257_v28 = vadd.f32 %v12251_v40, %v14463_v36  ;;  %v6017_v48 = vrot.slane %v14874_v42, 3  ;;  %v13054_v36 = vld [vmem:[#allocation8 + $0xb8] sm:$0xff]  }
 0x2c4   : > { %v4877_v6 = vcombine.low %v4283_v49, %v4284_v23  ;;  %v3288_v19 = vmax.f32 %v3252_v50, 0.0  ;;  %v6016_v13 = vsel %vm6009_vm9, %v6013_v16, %v6015_v63  ;;  %v14890_v4 = vcombine.low %v4833_v17, %v4840_v39  ;;  %12426 = vmatpush3.bf16.msra.mxu0 %v12927_v59  ;;  %v12909_v17 = vld [vmem:[#allocation8 + $0xa8] sm:$0xff]  }
 0x2c5   : > { %v4884_v20 = vrot.slane %v4876_v52, %v17267_v55  ;;  %v5564_v58 = vsel %vm5538_vm10, %v5554_v45, %v14884_v2  ;;  %12333 = vmatprep.mubr.bf16.mxu0 %v6016_v13  ;;  %v3293_v25 = vmax.f32 %v3257_v28, 0.0  ;;  %v6018_v27 = vsel %vm6009_vm9, %v6015_v63, %v6017_v48  ;;  %12427 = vmatprep.subr.bf16.mxu0 %v12929_v43 }
 0x2c6   : > { %v4891_v15 = vrot.slane %v4877_v6, %v17267_v55  ;;  %12278 = vmatmul.mubr.bf16.vlgmr.msra.gmra.mxu1 %v5564_v58  ;;  %v3790_v54 = vcombine.high %v3288_v19, %v3288_v19  ;;  %v3797_v16 = vrot.slane %v3288_v19, %v17267_v55  ;;  %v3255_v60 = vadd.f32 %v3184_v41, %v14467_v44  ;;  %v12252_v19 = vpop.f32.mrf.mxu0  ;;  %v12938_v58 = vld [vmem:[#allocation8 + $0xc0] sm:$0xff]  }
 0x2c7   : > { %12366 = vmatpush3.bf16.msra.mxu1 %v13054_v36  ;;  %v5566_v45 = vshrl.u32 %v14855_v56, 16  ;;  %v5569_v40 = vshll.u32 %v14855_v56, 16  ;;  %12334 = vmatmul.mubr.bf16.gmra.mxu0 %v6018_v27  ;;  %v3875_v7 = vcombine.high %v3293_v25, %v3293_v25  ;;  %v3882_v50 = vrot.slane %v3293_v25, %v17267_v55 }
 0x2c8   : > { %v4892_v21 = vcombine.low %v4884_v20, %v4891_v15  ;;  %v3804_v49 = vrot.slane %v3790_v54, %v17267_v55  ;;  %v3805_v1 = vcombine.high %v3797_v16, %v3797_v16  ;;  %v4273_v59 = vsel %vm14473_vm4, %v3797_v16, 0.0  ;;  %12367 = vmatprep.subr.bf16.mxu1 %v12906_v47  ;;  %12428 = vmatpush3.bf16.msra.mxu0 %v12929_v43  ;;  %v12913_v16 = vld [vmem:[#allocation8 + $0xa0] sm:$0xff]  }
 0x2c9   : > { %v3291_v44 = vmax.f32 %v3255_v60, 0.0  ;;  %v5568_v63 = vrot.slane %v5566_v45, 2  ;;  %v3889_v28 = vrot.slane %v3875_v7, %v17267_v55  ;;  %v3890_v41 = vcombine.high %v3882_v50, %v3882_v50  ;;  %12429 = vmatprep.subr.bf16.mxu0 %v12932_v3 }
 0x2ca   : > { %v11275_v39 = vpack.c.bf16 %v4892_v21, %v14850_v46  ;;  %v3806_v23 = vcombine.high %v3804_v49, %v3804_v49  ;;  %v4274_v52 = vsel %vm14506_vm6, %v3805_v1, 0.0  ;;  %v4275_v6 = vsel %vm14484_vm5, %v3804_v49, 0.0 }
 0x2cb   : > { %v4842_v13 = vcombine.low %v4273_v59, %v4274_v52  ;;  %v4293_v20 = vsel %vm14484_vm5, %v3882_v50, 0.0  ;;  %12368 = vmatpush3.bf16.msra.mxu1 %v12906_v47  ;;  %v3841_v15 = vcombine.high %v3291_v44, %v3291_v44  ;;  %v3848_v54 = vrot.slane %v3291_v44, %v17267_v55  ;;  %v3187_v59 = vpop.f32.mrf.mxu0 }
 0x2cc   : > { %11318 = vst [vmem:[#allocation2 + $0x68] sm:$0xff] %v11275_v39   ;;  %v4276_v46 = vsel %vm14515_vm7, %v3806_v23, 0.0  ;;  %v5571_v43 = vrot.slane %v5569_v40, 3  ;;  %12369 = vmatprep.subr.bf16.mxu1 %v12909_v17  ;;  %v3891_v27 = vcombine.high %v3889_v28, %v3889_v28  ;;  %v4294_v47 = vsel %vm14515_vm7, %v3890_v41, 0.0  ;;  %12430 = vmatpush3.bf16.msra.mxu0 %v12932_v3  ;;  %v12917_v3 = vld [vmem:[#allocation8 + $0x98] sm:$0xff]  }
 0x2cd   : > { %v4843_v25 = vcombine.low %v4275_v6, %v4276_v46  ;;  %v4850_v36 = vrot.slane %v4842_v13, %v17267_v55  ;;  %v4295_v60 = vsel %vm14556_vm8, %v3889_v28, 0.0  ;;  %v4927_v21 = vcombine.low %v4293_v20, %v4294_v47  ;;  %12431 = vmatprep.subr.bf16.mxu0 %v12938_v58 }
 0x2ce   : > { %v3855_v49 = vrot.slane %v3841_v15, %v17267_v55  ;;  %v3856_v1 = vcombine.high %v3848_v54, %v3848_v54  ;;  %v4296_v50 = vsel %vm14383_vm0, %v3891_v27, 0.0  ;;  %v4285_v44 = vsel %vm14515_vm7, %v3848_v54, 0.0 }
 0x2cf   : > { %v4857_v7 = vrot.slane %v4843_v25, %v17267_v55  ;;  %v5572_v39 = vor.u32 %v5571_v43, %v5568_v63  ;;  %12370 = vmatpush3.bf16.msra.mxu1 %v12909_v17  ;;  %v4928_v23 = vcombine.low %v4295_v60, %v4296_v50  ;;  %v4935_v52 = vrot.slane %v4927_v21, %v17267_v55  ;;  %v14941_v63 = vld [vmem:[#allocation2 + $0x2c] sm:$0xff]   ;;  %v12255_v25 = vpop.f32.mrf.mxu0 }
 0x2d0   : > { %v3857_v6 = vcombine.high %v3855_v49, %v3855_v49  ;;  %v4286_v13 = vsel %vm14556_vm8, %v3856_v1, 0.0  ;;  %12371 = vmatprep.subr.bf16.mxu1 %v12913_v16  ;;  %v4287_v41 = vsel %vm14383_vm0, %v3855_v49, 0.0  ;;  %v3258_v54 = vadd.f32 %v12252_v19, %v14479_v26  ;;  %12432 = vmatpush3.bf16.msra.mxu0 %v12938_v58  ;;  %v12923_v1 = vld [vmem:[#allocation8 + $0x90] sm:$0xff]  }
 0x2d1   : > { %v4858_v28 = vcombine.low %v4850_v36, %v4857_v7  ;;  %v4893_v20 = vcombine.low %v4285_v44, %v4286_v13  ;;  %v5573_v46 = vsel %vm5538_vm10, %v14884_v2, %v5572_v39  ;;  %v4942_v17 = vrot.slane %v4928_v23, %v17267_v55  ;;  %v14948_v36 = vld [vmem:[#allocation2 + $0x34] sm:$0xff]  }
 0x2d2   : > { %v4288_v15 = vsel %vm14403_vm1, %v3857_v6, 0.0  ;;  %12281 = vmatprep.mubr.bf16.mxu1 %v5573_v46  ;;  %v5575_v43 = vshrl.u32 %v14874_v42, 16  ;;  %v5578_v60 = vshll.u32 %v14874_v42, 16  ;;  %v3294_v49 = vmax.f32 %v3258_v54, 0.0 }
 0x2d3   : > { %v11270_v27 = vpack.c.bf16 %v4858_v28, %v14890_v4  ;;  %v4894_v47 = vcombine.low %v4287_v41, %v4288_v15  ;;  %v4901_v2 = vrot.slane %v4893_v20, %v17267_v55  ;;  %12372 = vmatpush3.bf16.msra.mxu1 %v12913_v16  ;;  %v14953_v21 = vcombine.low %v4935_v52, %v4942_v17  ;;  %v14972_v28 = vld [vmem:[#allocation8 + $0x178] sm:$0xff]   ;;  %v12928_v17 = vld [vmem:[#allocation8 + $0x88] sm:$0xff]  }
 0x2d4   : > { %v5577_v26 = vrot.slane %v5575_v43, 2  ;;  %v3256_v19 = vadd.f32 %v3187_v59, %v14489_v0  ;;  %12373 = vmatprep.subr.bf16.mxu1 %v12917_v3  ;;  %v5580_v4 = vrot.slane %v5578_v60, 3  ;;  %v6019_v7 = vrot.slane %v14941_v63, 3  ;;  %12521 = vmatprep.subr.bf16.mxu0 %v14972_v28 }
 0x2d5   : > { %11317 = vst [vmem:[#allocation2 + $0x60] sm:$0xff] %v11270_v27   ;;  %v4908_v58 = vrot.slane %v4894_v47, %v17267_v55  ;;  %v3261_v16 = vadd.f32 %v12255_v25, %v14493_v37  ;;  %v3892_v50 = vcombine.high %v3294_v49, %v3294_v49  ;;  %v3899_v44 = vrot.slane %v3294_v49, %v17267_v55 }
 0x2d6   : > { %v3292_v23 = vmax.f32 %v3256_v19, 0.0  ;;  %v6021_v52 = vrot.slane %v14948_v36, 3  ;;  %v14967_v0 = vor.u32 %v5580_v4, %v5577_v26  ;;  %v6020_v59 = vsel %vm6009_vm9, %v6017_v48, %v6019_v7 }
 0x2d7   : > { %v14965_v6 = vcombine.low %v4901_v2, %v4908_v58  ;;  %v3297_v13 = vmax.f32 %v3261_v16, 0.0  ;;  %12374 = vmatpush3.bf16.msra.mxu1 %v12917_v3  ;;  %v3906_v37 = vrot.slane %v3892_v50, %v17267_v55  ;;  %v3907_v41 = vcombine.high %v3899_v44, %v3899_v44  ;;  %12337 = vmatprep.mubr.bf16.mxu0 %v6020_v59  ;;  %v3200_v58 = vpop.f32.mrf.mxu0 }
 0x2d8   : > { %v4297_v20 = vsel %vm14403_vm1, %v3899_v44, 0.0  ;;  %v3858_v46 = vcombine.high %v3292_v23, %v3292_v23  ;;  %12375 = vmatprep.subr.bf16.mxu1 %v12923_v1  ;;  %v5582_v15 = vsel %vm5538_vm10, %v5572_v39, %v14967_v0  ;;  %v3865_v54 = vrot.slane %v3292_v23, %v17267_v55  ;;  %v12937_v23 = vld [vmem:[#allocation8 + $0x80] sm:$0xff]  }
 0x2d9   : > { %v3943_v48 = vcombine.high %v3297_v13, %v3297_v13  ;;  %v3950_v3 = vrot.slane %v3297_v13, %v17267_v55  ;;  %v3908_v25 = vcombine.high %v3906_v37, %v3906_v37  ;;  %v4298_v27 = vsel %vm14410_vm2, %v3907_v41, 0.0  ;;  %12282 = vmatmul.mubr.bf16.gmra.mxu1 %v5582_v15 }
 0x2da   : > { %v4299_v47 = vsel %vm14442_vm3, %v3906_v37, 0.0  ;;  %v3872_v2 = vrot.slane %v3858_v46, %v17267_v55  ;;  %v4944_v49 = vcombine.low %v4297_v20, %v4298_v27  ;;  %v3873_v26 = vcombine.high %v3865_v54, %v3865_v54 }
 0x2db   : > { %v4289_v39 = vsel %vm14410_vm2, %v3865_v54, 0.0  ;;  %v3957_v19 = vrot.slane %v3943_v48, %v17267_v55  ;;  %12376 = vmatpush3.bf16.msra.mxu1 %v12923_v1  ;;  %v4300_v4 = vsel %vm14473_vm4, %v3908_v25, 0.0  ;;  %v3958_v44 = vcombine.high %v3950_v3, %v3950_v3 }
 0x2dc   : > { %v3874_v16 = vcombine.high %v3872_v2, %v3872_v2  ;;  %v4291_v50 = vsel %vm14473_vm4, %v3872_v2, 0.0  ;;  %12377 = vmatprep.subr.bf16.mxu1 %v12928_v17  ;;  %v4945_v59 = vcombine.low %v4299_v47, %v4300_v4  ;;  %v4952_v13 = vrot.slane %v4944_v49, %v17267_v55  ;;  %v12256_v47 = vpop.f32.mrf.mxu0  ;;  %v15008_v2 = vld [vmem:[#allocation8 + $0x138] sm:$0xff]  }
 0x2dd   : > { %v4290_v37 = vsel %vm14442_vm3, %v3873_v26, 0.0  ;;  %v3959_v41 = vcombine.high %v3957_v19, %v3957_v19  ;;  %v4309_v46 = vsel %vm14473_vm4, %v3950_v3, 0.0  ;;  %v4310_v15 = vsel %vm14506_vm6, %v3958_v44, 0.0 }
 0x2de   : > { %v4292_v1 = vsel %vm14506_vm6, %v3874_v16, 0.0  ;;  %v4910_v20 = vcombine.low %v4289_v39, %v4290_v37  ;;  %v4959_v54 = vrot.slane %v4945_v59, %v17267_v55  ;;  %v4311_v25 = vsel %vm14484_vm5, %v3957_v19, 0.0 }
 0x2df   : > { %v4911_v48 = vcombine.low %v4291_v50, %v4292_v1  ;;  %v4312_v27 = vsel %vm14515_vm7, %v3959_v41, 0.0  ;;  %12378 = vmatpush3.bf16.msra.mxu1 %v12928_v17  ;;  %v4995_v26 = vcombine.low %v4309_v46, %v4310_v15  ;;  %v6022_v39 = vsel %vm6009_vm9, %v6019_v7, %v6021_v52 }
 0x2e0   : > { %v4918_v49 = vrot.slane %v4910_v20, %v17267_v55  ;;  %v4996_v3 = vcombine.low %v4311_v25, %v4312_v27  ;;  %12379 = vmatprep.subr.bf16.mxu1 %v12937_v23  ;;  %v4960_v4 = vcombine.low %v4952_v13, %v4959_v54  ;;  %12338 = vmatmul.mubr.bf16.gmra.mxu0 %v6022_v39  ;;  %v17103_v50 = vshrl.u32 %v14941_v63, 16  ;;  %v3203_v20 = vpop.f32.mrf.mxu0 }
 0x2e1   : > { %v4925_v16 = vrot.slane %v4911_v48, %v17267_v55  ;;  %v3259_v19 = vadd.f32 %v3200_v58, %v14497_v14  ;;  %v5003_v17 = vrot.slane %v4995_v26, %v17267_v55  ;;  %v17102_v59 = vshll.u32 %v14941_v63, 16 }
 0x2e2   : > { %v5010_v44 = vrot.slane %v4996_v3, %v17267_v55  ;;  %v3262_v37 = vadd.f32 %v12256_v47, %v14501_v10  ;;  %v11285_v41 = vpack.c.bf16 %v4960_v4, %v14953_v21  ;;  %v5586_v13 = vrot.slane %v17103_v50, 2  ;;  %v12259_v39 = vpop.f32.mrf.mxu0  ;;  %v15285_v50 = vld [vmem:[#allocation2 + $0x30] sm:$0xf] }
 0x2e3   : > { %v4926_v7 = vcombine.low %v4918_v49, %v4925_v16  ;;  %v3295_v1 = vmax.f32 %v3259_v19, 0.0  ;;  %12380 = vmatpush3.bf16.msra.mxu1 %v12937_v23  ;;  %v5589_v58 = vrot.slane %v17102_v59, 3  ;;  %v17094_v15 = vshrl.u32 %v14948_v36, 16 }
 0x2e4   : > { %v15024_v14 = vcombine.low %v5003_v17, %v5010_v44  ;;  %v3298_v46 = vmax.f32 %v3262_v37, 0.0  ;;  %12469 = vmatprep.subr.bf16.mxu1 %v15008_v2  ;;  %11320 = vst [vmem:[#allocation2 + $0x78] sm:$0xff] %v11285_v41   ;;  %v17093_v48 = vshll.u32 %v14948_v36, 16  ;;  %v15046_v44 = vld [vmem:[#allocation2 + $0x3c] sm:$0xff]  }
 0x2e5   : > { %v11280_v10 = vpack.c.bf16 %v4926_v7, %v14965_v6  ;;  %v3909_v21 = vcombine.high %v3295_v1, %v3295_v1  ;;  %v3916_v54 = vrot.slane %v3295_v1, %v17267_v55  ;;  %v5590_v25 = vor.u32 %v5589_v58, %v5586_v13 }
 0x2e6   : > { %v3960_v23 = vcombine.high %v3298_v46, %v3298_v46  ;;  %v3967_v27 = vrot.slane %v3298_v46, %v17267_v55  ;;  %v5595_v47 = vrot.slane %v17094_v15, 2  ;;  %v5598_v6 = vrot.slane %v17093_v48, 3 }
 0x2e7   : > { %11319 = vst [vmem:[#allocation2 + $0x70] sm:$0xff] %v11280_v10   ;;  %v3923_v49 = vrot.slane %v3909_v21, %v17267_v55  ;;  %v3924_v26 = vcombine.high %v3916_v54, %v3916_v54  ;;  %v4301_v3 = vsel %vm14506_vm6, %v3916_v54, 0.0  ;;  %v5591_v4 = vsel %vm5538_vm10, %v14967_v0, %v5590_v25  ;;  %v15058_v10 = vld [vmem:[#allocation2 + $0x44] sm:$0xff]  }
 0x2e8   : > { %v3974_v16 = vrot.slane %v3960_v23, %v17267_v55  ;;  %v3975_v19 = vcombine.high %v3967_v27, %v3967_v27  ;;  %v4313_v17 = vsel %vm14556_vm8, %v3967_v27, 0.0  ;;  %12285 = vmatprep.mubr.bf16.mxu1 %v5591_v4  ;;  %v15052_v1 = vor.u32 %v5598_v6, %v5595_v47  ;;  %v3216_v47 = vpop.f32.mrf.mxu0 }
 0x2e9   : > { %v3925_v37 = vcombine.high %v3923_v49, %v3923_v49  ;;  %v4302_v41 = vsel %vm14484_vm5, %v3924_v26, 0.0  ;;  %v4303_v7 = vsel %vm14515_vm7, %v3923_v49, 0.0  ;;  %v3260_v27 = vadd.f32 %v3203_v20, %v14520_v62 }
 0x2ea   : > { %v4961_v13 = vcombine.low %v4301_v3, %v4302_v41  ;;  %v3976_v0 = vcombine.high %v3974_v16, %v3974_v16  ;;  %v4314_v58 = vsel %vm14383_vm0, %v3975_v19, 0.0  ;;  %v4315_v46 = vsel %vm14403_vm1, %v3974_v16, 0.0 }
 0x2eb   : > { %v4304_v21 = vsel %vm14556_vm8, %v3925_v37, 0.0  ;;  %v5012_v54 = vcombine.low %v4313_v17, %v4314_v58  ;;  %v5600_v23 = vsel %vm5538_vm10, %v5590_v25, %v15052_v1  ;;  %v6023_v6 = vrot.slane %v15046_v44, 3 }
 0x2ec   : > { %v4962_v49 = vcombine.low %v4303_v7, %v4304_v21  ;;  %v4969_v26 = vrot.slane %v4961_v13, %v17267_v55  ;;  %v4316_v3 = vsel %vm14410_vm2, %v3976_v0, 0.0  ;;  %12286 = vmatmul.mubr.bf16.gmra.mxu1 %v5600_v23  ;;  %v3296_v19 = vmax.f32 %v3260_v27, 0.0 }
 0x2ed   : > { %v5013_v4 = vcombine.low %v4315_v46, %v4316_v3  ;;  %v5020_v16 = vrot.slane %v5012_v54, %v17267_v55  ;;  %v3265_v17 = vadd.f32 %v12259_v39, %v14524_v24  ;;  %v6024_v62 = vsel %vm6009_vm9, %v6021_v52, %v6023_v6 }
 0x2ee   : > { %v4976_v25 = vrot.slane %v4962_v49, %v17267_v55  ;;  %v6025_v20 = vrot.slane %v15058_v10, 3  ;;  %v3263_v37 = vadd.f32 %v3216_v47, %v14526_v12  ;;  %v3926_v7 = vcombine.high %v3296_v19, %v3296_v19  ;;  %12341 = vmatprep.mubr.bf16.mxu0 %v6024_v62 }
 0x2ef   : > { %v5027_v41 = vrot.slane %v5013_v4, %v17267_v55  ;;  %v3933_v13 = vrot.slane %v3296_v19, %v17267_v55  ;;  %v3301_v0 = vmax.f32 %v3265_v17, 0.0  ;;  %v17108_v46 = vshrl.u32 %v15046_v44, 16 }
 0x2f0   : > { %v4977_v58 = vcombine.low %v4969_v26, %v4976_v25  ;;  %v6026_v24 = vsel %vm6009_vm9, %v6023_v6, %v6025_v20  ;;  %v3299_v39 = vmax.f32 %v3263_v37, 0.0  ;;  %v3940_v21 = vrot.slane %v3926_v7, %v17267_v55  ;;  %v12260_v7 = vpop.f32.mrf.mxu0 }
 0x2f1   : > { %v5028_v52 = vcombine.low %v5020_v16, %v5027_v41  ;;  %v3941_v54 = vcombine.high %v3933_v13, %v3933_v13  ;;  %v4305_v12 = vsel %vm14383_vm0, %v3933_v13, 0.0  ;;  %12342 = vmatmul.mubr.bf16.gmra.mxu0 %v6026_v24  ;;  %v4011_v23 = vcombine.high %v3301_v0, %v3301_v0 }
 0x2f2   : > { %v4018_v27 = vrot.slane %v3301_v0, %v17267_v55  ;;  %v3977_v47 = vcombine.high %v3299_v39, %v3299_v39  ;;  %v3984_v49 = vrot.slane %v3299_v39, %v17267_v55  ;;  %v3942_v3 = vcombine.high %v3940_v21, %v3940_v21  ;;  %v3219_v61 = vpop.f32.mrf.mxu0 }
 0x2f3   : > { %v11295_v26 = vpack.c.bf16 %v5028_v52, %v15024_v14  ;;  %v4306_v6 = vsel %vm14403_vm1, %v3941_v54, 0.0  ;;  %v4307_v4 = vsel %vm14410_vm2, %v3940_v21, 0.0  ;;  %v4025_v19 = vrot.slane %v4011_v23, %v17267_v55 }
 0x2f4   : > { %v4978_v16 = vcombine.low %v4305_v12, %v4306_v6  ;;  %v4026_v17 = vcombine.high %v4018_v27, %v4018_v27  ;;  %v4325_v25 = vsel %vm14410_vm2, %v4018_v27, 0.0  ;;  %v4308_v62 = vsel %vm14442_vm3, %v3942_v3, 0.0 }
 0x2f5   : > { %11322 = vst [vmem:[#allocation2 + $0x88] sm:$0xff] %v11295_v26   ;;  %v3991_v14 = vrot.slane %v3977_v47, %v17267_v55  ;;  %v3992_v37 = vcombine.high %v3984_v49, %v3984_v49  ;;  %v4317_v41 = vsel %vm14442_vm3, %v3984_v49, 0.0  ;;  %v4979_v13 = vcombine.low %v4307_v4, %v4308_v62 }
 0x2f6   : > { %v4986_v0 = vrot.slane %v4978_v16, %v17267_v55  ;;  %v4027_v24 = vcombine.high %v4025_v19, %v4025_v19  ;;  %v4326_v39 = vsel %vm14442_vm3, %v4026_v17, 0.0  ;;  %v4327_v53 = vsel %vm14473_vm4, %v4025_v19, 0.0  ;;  %v15120_v17 = vld [vmem:[#allocation2 + $0x4c] sm:$0xff]  }
 0x2f7   : > { %v5063_v52 = vcombine.low %v4325_v25, %v4326_v39  ;;  %v3993_v21 = vcombine.high %v3991_v14, %v3991_v14  ;;  %v4318_v54 = vsel %vm14473_vm4, %v3992_v37, 0.0  ;;  %v4993_v12 = vrot.slane %v4979_v13, %v17267_v55  ;;  %v15126_v37 = vld [vmem:[#allocation2 + $0x54] sm:$0xff]  }
 0x2f8   : > { %v4328_v23 = vsel %vm14506_vm6, %v4027_v24, 0.0  ;;  %v4319_v27 = vsel %vm14506_vm6, %v3991_v14, 0.0  ;;  %v5029_v47 = vcombine.low %v4317_v41, %v4318_v54  ;;  %v5604_v3 = vrot.slane %v17108_v46, 2 }
 0x2f9   : > { %v5064_v49 = vcombine.low %v4327_v53, %v4328_v23  ;;  %v5071_v38 = vrot.slane %v5063_v52, %v17267_v55  ;;  %v4320_v26 = vsel %vm14484_vm5, %v3993_v21, 0.0  ;;  %v4994_v6 = vcombine.low %v4986_v0, %v4993_v12 }
 0x2fa   : > { %v5030_v4 = vcombine.low %v4319_v27, %v4320_v26  ;;  %v5037_v16 = vrot.slane %v5029_v47, %v17267_v55  ;;  %v17107_v19 = vshll.u32 %v15046_v44, 16  ;;  %v3266_v25 = vadd.f32 %v12260_v7, %v14528_v51 }
 0x2fb   : > { %v5078_v31 = vrot.slane %v5064_v49, %v17267_v55  ;;  %v17106_v62 = vshrl.u32 %v15058_v10, 16  ;;  %v17101_v14 = vshll.u32 %v15058_v10, 16  ;;  %v11290_v41 = vpack.c.bf16 %v4994_v6, %v4977_v58 }
 0x2fc   : > { %v5044_v13 = vrot.slane %v5030_v4, %v17267_v55  ;;  %v5607_v0 = vrot.slane %v17107_v19, 3  ;;  %v3264_v24 = vadd.f32 %v3219_v61, %v14530_v35  ;;  %v3302_v53 = vmax.f32 %v3266_v25, 0.0 }
 0x2fd   : > { %v15132_v39 = vcombine.low %v5071_v38, %v5078_v31  ;;  %v5613_v51 = vrot.slane %v17106_v62, 2  ;;  %v5616_v7 = vrot.slane %v17101_v14, 3  ;;  %11321 = vst [vmem:[#allocation2 + $0x80] sm:$0xff] %v11290_v41   ;;  %v6027_v54 = vrot.slane %v15120_v17, 3 }
 0x2fe   : > { %v15138_v52 = vcombine.low %v5037_v16, %v5044_v13  ;;  %v5608_v58 = vor.u32 %v5607_v0, %v5604_v3  ;;  %v3300_v21 = vmax.f32 %v3264_v24, 0.0  ;;  %v4028_v12 = vcombine.high %v3302_v53, %v3302_v53 }
 0x2ff   : > { %v4035_v23 = vrot.slane %v3302_v53, %v17267_v55  ;;  %v5617_v35 = vor.u32 %v5616_v7, %v5613_v51  ;;  %v6029_v27 = vrot.slane %v15126_v37, 3  ;;  %v6028_v26 = vsel %vm6009_vm9, %v6025_v20, %v6027_v54  ;;  %v15166_v7 = vld [vmem:[#allocation2 + $0x5c] sm:$0xff]  }
 0x300   : > { %v5609_v47 = vsel %vm5538_vm10, %v15052_v1, %v5608_v58  ;;  %v3994_v49 = vcombine.high %v3300_v21, %v3300_v21  ;;  %v4001_v38 = vrot.slane %v3300_v21, %v17267_v55  ;;  %v4042_v3 = vrot.slane %v4028_v12, %v17267_v55  ;;  %12345 = vmatprep.mubr.bf16.mxu0 %v6028_v26 }
 0x301   : > { %12289 = vmatprep.mubr.bf16.mxu1 %v5609_v47  ;;  %v4043_v61 = vcombine.high %v4035_v23, %v4035_v23  ;;  %v4329_v6 = vsel %vm14484_vm5, %v4035_v23, 0.0  ;;  %v5618_v4 = vsel %vm5538_vm10, %v5608_v58, %v5617_v35  ;;  %v6030_v25 = vsel %vm6009_vm9, %v6027_v54, %v6029_v27  ;;  %v15168_v58 = vld [vmem:[#allocation2 + $0x64] sm:$0xff]  }
 0x302   : > { %12290 = vmatmul.mubr.bf16.gmra.mxu1 %v5618_v4  ;;  %v4008_v1 = vrot.slane %v3994_v49, %v17267_v55  ;;  %v4009_v16 = vcombine.high %v4001_v38, %v4001_v38  ;;  %v4321_v31 = vsel %vm14515_vm7, %v4001_v38, 0.0  ;;  %v4044_v20 = vcombine.high %v4042_v3, %v4042_v3  ;;  %12346 = vmatmul.mubr.bf16.gmra.mxu0 %v6030_v25 }
 0x303   : > { %v4330_v41 = vsel %vm14515_vm7, %v4043_v61, 0.0  ;;  %v4331_v22 = vsel %vm14556_vm8, %v4042_v3, 0.0  ;;  %v17099_v13 = vshrl.u32 %v15120_v17, 16  ;;  %v17098_v12 = vshll.u32 %v15120_v17, 16 }
 0x304   : > { %v5080_v0 = vcombine.low %v4329_v6, %v4330_v41  ;;  %v4010_v24 = vcombine.high %v4008_v1, %v4008_v1  ;;  %v4322_v53 = vsel %vm14556_vm8, %v4009_v16, 0.0  ;;  %v4323_v51 = vsel %vm14383_vm0, %v4008_v1, 0.0  ;;  %v15194_v41 = vld [vmem:[#allocation2 + $0x74] sm:$0xff]  }
 0x305   : > { %v4332_v11 = vsel %vm14383_vm0, %v4044_v20, 0.0  ;;  %v5046_v21 = vcombine.low %v4321_v31, %v4322_v53  ;;  %v5622_v54 = vrot.slane %v17099_v13, 2  ;;  %v17096_v49 = vshrl.u32 %v15126_v37, 16  ;;  %v15192_v20 = vld [vmem:[#allocation2 + $0x6c] sm:$0xff]  }
 0x306   : > { %v5081_v23 = vcombine.low %v4331_v22, %v4332_v11  ;;  %v5088_v5 = vrot.slane %v5080_v0, %v17267_v55  ;;  %v4324_v47 = vsel %vm14403_vm1, %v4010_v24, 0.0  ;;  %v5625_v9 = vrot.slane %v17098_v12, 3 }
 0x307   : > { %v5047_v38 = vcombine.low %v4323_v51, %v4324_v47  ;;  %v5054_v26 = vrot.slane %v5046_v21, %v17267_v55  ;;  %v17095_v3 = vshll.u32 %v15126_v37, 16  ;;  %v5631_v6 = vrot.slane %v17096_v49, 2 }
 0x308   : > { %v5095_v61 = vrot.slane %v5081_v23, %v17267_v55  ;;  %v6031_v4 = vrot.slane %v15166_v7, 3  ;;  %v6033_v8 = vrot.slane %v15168_v58, 3  ;;  %v5626_v16 = vor.u32 %v5625_v9, %v5622_v54 }
 0x309   : > { %v5061_v1 = vrot.slane %v5047_v38, %v17267_v55  ;;  %v5634_v31 = vrot.slane %v17095_v3, 3  ;;  %v17092_v25 = vshrl.u32 %v15166_v7, 16  ;;  %v17091_v53 = vshll.u32 %v15166_v7, 16 }
 0x30a   : > { %v5096_v22 = vcombine.low %v5088_v5, %v5095_v61  ;;  %v6032_v0 = vsel %vm6009_vm9, %v6029_v27, %v6031_v4  ;;  %v6034_v24 = vsel %vm6009_vm9, %v6031_v4, %v6033_v8  ;;  %v5627_v11 = vsel %vm5538_vm10, %v5617_v35, %v5626_v16  ;;  %v15211_v61 = vld [vmem:[#allocation2 + $0x7c] sm:$0xff]  }
 0x30b   : > { %v5062_v51 = vcombine.low %v5054_v26, %v5061_v1  ;;  %v5635_v21 = vor.u32 %v5634_v31, %v5631_v6  ;;  %12349 = vmatprep.mubr.bf16.mxu0 %v6032_v0  ;;  %v5640_v54 = vrot.slane %v17092_v25, 2  ;;  %12293 = vmatprep.mubr.bf16.mxu1 %v5627_v11  ;;  %v5643_v5 = vrot.slane %v17091_v53, 3  ;;  %v15225_v11 = vld [vmem:[#allocation2 + $0x84] sm:$0xff]  }
 0x30c   : > { %v11305_v23 = vpack.c.bf16 %v5096_v22, %v15132_v39  ;;  %12350 = vmatmul.mubr.bf16.gmra.mxu0 %v6034_v24  ;;  %v17087_v27 = vshrl.u32 %v15168_v58, 16  ;;  %v17086_v47 = vshll.u32 %v15168_v58, 16  ;;  %v6035_v26 = vrot.slane %v15192_v20, 3 }
 0x30d   : > { %v11300_v38 = vpack.c.bf16 %v5062_v51, %v15138_v52  ;;  %v5636_v35 = vsel %vm5538_vm10, %v5626_v16, %v5635_v21  ;;  %v6037_v9 = vrot.slane %v15194_v41, 3  ;;  %v5644_v39 = vor.u32 %v5643_v5, %v5640_v54  ;;  %v6712_v5 = vld [vmem:[#allocation2 + $0xc] sm:$0x8] }
 0x30e   : > { %11324 = vst [vmem:[#allocation2 + $0x98] sm:$0xff] %v11305_v23   ;;  %12294 = vmatmul.mubr.bf16.gmra.mxu1 %v5636_v35  ;;  %v5649_v6 = vrot.slane %v17087_v27, 2  ;;  %v5652_v4 = vrot.slane %v17086_v47, 3  ;;  %v17084_v1 = vshrl.u32 %v15192_v20, 16  ;;  %v6036_v52 = vsel %vm6009_vm9, %v6033_v8, %v6035_v26 }
 0x30f   : > { %11323 = vst [vmem:[#allocation2 + $0x90] sm:$0xff] %v11300_v38   ;;  %v17083_v16 = vshll.u32 %v15192_v20, 16  ;;  %v17085_v31 = vshrl.u32 %v15194_v41, 16  ;;  %v5645_v22 = vsel %vm5538_vm10, %v5635_v21, %v5644_v39  ;;  %12353 = vmatprep.mubr.bf16.mxu0 %v6036_v52  ;;  %v17088_v51 = vshll.u32 %v15194_v41, 16 }
 0x310   : > { %v5653_v0 = vor.u32 %v5652_v4, %v5649_v6  ;;  %v5658_v24 = vrot.slane %v17084_v1, 2  ;;  %12297 = vmatprep.mubr.bf16.mxu1 %v5645_v22  ;;  %v6038_v54 = vsel %vm6009_vm9, %v6035_v26, %v6037_v9  ;;  %v6039_v23 = vrot.slane %v15211_v61, 3  ;;  %v15235_v6 = vld [vmem:[#allocation2 + $0x10] sm:$0xf]  ;;  %v15243_v1 = vld [vmem:[#allocation2 + $0x18] sm:$0xf] }
 0x311   : > { %v5661_v8 = vrot.slane %v17083_v16, 3  ;;  %v5667_v21 = vrot.slane %v17085_v31, 2  ;;  %v17089_v38 = vshrl.u32 %v15211_v61, 16  ;;  %v17090_v35 = vshll.u32 %v15211_v61, 16  ;;  %v15241_v16 = vld [vmem:[#allocation2 + $0x14] sm:$0xf] }
 0x312   : > { %v5654_v4 = vsel %vm5538_vm10, %v5644_v39, %v5653_v0  ;;  %v5670_v26 = vrot.slane %v17088_v51, 3  ;;  %v6040_v22 = vsel %vm6009_vm9, %v6037_v9, %v6039_v23  ;;  %17283 = vst [vmem:[#allocation21_spill] sm:$0xff] %v15243_v1  ;;  %v17097_v27 = vshrl.u32 %v15225_v11, 16  ;;  %v15250_v39 = vld [vmem:[#allocation2 + $0x1c] sm:$0xf] }
 0x313   : > { %v5662_v52 = vor.u32 %v5661_v8, %v5658_v24  ;;  %v5676_v31 = vrot.slane %v17089_v38, 2  ;;  %v5679_v47 = vrot.slane %v17090_v35, 3  ;;  %17284 = vst [vmem:[#allocation23_spill] sm:$0xff] %v15250_v39  ;;  %v6041_v9 = vrot.slane %v15225_v11, 3 }
 0x314   : > { %12354 = vmatmul.mubr.bf16.gmra.mxu0 %v6038_v54  ;;  %v17100_v8 = vshll.u32 %v15225_v11, 16  ;;  %v11050_v51 = vcombine.low %v6712_v5, %v15235_v6  ;;  %v11051_v38 = vcombine.low %v15241_v16, %v15243_v1  ;;  %v5671_v35 = vor.u32 %v5670_v26, %v5667_v21  ;;  %v15265_v5 = vld [vmem:[#allocation2 + $0x20] sm:$0xf] }
 0x315   : > { %v5663_v24 = vsel %vm5538_vm10, %v5653_v0, %v5662_v52  ;;  %12357 = vmatprep.mubr.bf16.mxu0 %v6040_v22  ;;  %v5680_v22 = vor.u32 %v5679_v47, %v5676_v31  ;;  %v5685_v48 = vrot.slane %v17097_v27, 2  ;;  %v6042_v3 = vsel %vm6009_vm9, %v6039_v23, %v6041_v9 }
 0x316   : > { %12298 = vmatmul.mubr.bf16.gmra.mxu1 %v5654_v4  ;;  %v15256_v54 = vld [vmem:[#allocation2 + $0x8c] sm:$0xff]   ;;  %v6860_v53 = vshrl.u32 %v11050_v51, 16  ;;  %v6863_v25 = vshll.u32 %v11050_v51, 16  ;;  %v6868_v4 = vshrl.u32 %v11051_v38, 16  ;;  %v6871_v51 = vshll.u32 %v11051_v38, 16 }
 0x317   : > { %12301 = vmatprep.mubr.bf16.mxu1 %v5663_v24  ;;  %v6043_v15 = vrot.slane %v15256_v54, 3  ;;  %v5688_v24 = vrot.slane %v17100_v8, 3  ;;  %v12931_v21 = vld [vmem:[#allocation2 + $0x94] ss:$0 sps:$4 sm:$0x77]   ;;  %v17105_v31 = vshrl.u32 %v15256_v54, 16  ;;  %v5672_v27 = vsel %vm5538_vm10, %v5662_v52, %v5671_v35 }
 0x318   : > { %v6862_v26 = vrot.slane %v6860_v53, 3  ;;  %v6865_v0 = vrot.slane %v6863_v25, 4  ;;  %v6870_v47 = vrot.slane %v6868_v4, 3  ;;  %v11052_v12 = vcombine.low %v15250_v39, %v15265_v5  ;;  %v15281_v4 = vld [vmem:[#allocation2 + $0x24] sm:$0xf] }
 0x319   : > { %v6044_v49 = vsel %vm6009_vm9, %v6041_v9, %v6043_v15  ;;  %v6873_v13 = vrot.slane %v6871_v51, 4  ;;  %v17104_v23 = vshll.u32 %v15256_v54, 16  ;;  %v5681_v8 = vsel %vm5538_vm10, %v5671_v35, %v5680_v22  ;;  %v15283_v51 = vld [vmem:[#allocation2 + $0x28] sm:$0xf]  ;;  %v15487_v39 = vld [vmem:[#allocation2 + $0x84] sm:$0xf] }
 0x31a   : > { %v5694_v53 = vrot.slane %v17105_v31, 2  ;;  %v5689_v38 = vor.u32 %v5688_v24, %v5685_v48  ;;  %v6045_v25 = vrot.slane %v12931_v21, 3  ;;  %v5701_v52 = vshrl.u32 %v12931_v21, 16  ;;  %17309 = vst [vmem:[#allocation25_spill] sm:$0xff] %v15487_v39 }
 0x31b   : > { %v5697_v9 = vrot.slane %v17104_v23, 3  ;;  %v5704_v14 = vshll.u32 %v12931_v21, 16  ;;  %v6874_v35 = vor.u32 %v6873_v13, %v6870_v47  ;;  %v6877_v59 = vshrl.u32 %v11052_v12, 16 }
 0x31c   : > { %12358 = vmatmul.mubr.bf16.gmra.mxu0 %v6042_v3  ;;  %v6866_v3 = vor.u32 %v6865_v0, %v6862_v26  ;;  %v11053_v24 = vcombine.low %v15281_v4, %v15283_v51  ;;  %v5690_v23 = vsel %vm5538_vm10, %v5680_v22, %v5689_v38  ;;  %v6349_v21 = vshrl.u32 %v17278_v34, 16  ;;  %v15293_v26 = vld [vmem:[#allocation2 + $0x34] sm:$0xf]  ;;  %v15298_v22 = vld [vmem:[#allocation2 + $0x2c] sm:$0xf] }
 0x31d   : > { %12361 = vmatprep.mubr.bf16.mxu0 %v6044_v49  ;;  %v5698_v48 = vor.u32 %v5697_v9, %v5694_v53  ;;  %v6880_v49 = vshll.u32 %v11052_v12, 16  ;;  %v6352_v31 = vshll.u32 %v17278_v34, 16  ;;  %v5706_v62 = vrot.slane %v5704_v14, 3 }
 0x31e   : > { %12302 = vmatmul.mubr.bf16.gmra.mxu1 %v5672_v27  ;;  %v6046_v27 = vsel %vm6009_vm9, %v6043_v15, %v6045_v25  ;;  %v6886_v0 = vshrl.u32 %v11053_v24, 16  ;;  %v6889_v13 = vshll.u32 %v11053_v24, 16  ;;  %v6875_v47 = vsel %vm6347_vm11, %v6866_v3, %v6874_v35 }
 0x31f   : > { %12305 = vmatprep.mubr.bf16.mxu1 %v5681_v8  ;;  %v5703_v8 = vrot.slane %v5701_v52, 2  ;;  %v6356_v12 = vrot.slane %v5548_v18, 3  ;;  %v6879_v53 = vrot.slane %v6877_v59, 3  ;;  %v6882_v9 = vrot.slane %v6880_v49, 4  ;;  %v15303_v52 = vld [vmem:[#allocation2 + $0x38] sm:$0xf] }
 0x320   : > { %v5699_v15 = vsel %vm5538_vm10, %v5689_v38, %v5698_v48  ;;  %v6888_v25 = vrot.slane %v6886_v0, 3  ;;  %v6891_v34 = vrot.slane %v6889_v13, 4  ;;  %v11054_v14 = vcombine.low %v15298_v22, %v15285_v50 }
 0x321   : > { %v6351_v24 = vrot.slane %v6349_v21, 3  ;;  %v6354_v3 = vrot.slane %v6352_v31, 4  ;;  %v6357_v18 = vrot.slane %v5551_v32, 4  ;;  %v11055_v59 = vcombine.low %v15293_v26, %v15303_v52 }
 0x322   : > { %v5707_v49 = vor.u32 %v5706_v62, %v5703_v8  ;;  %v6898_v38 = vshll.u32 %v11054_v14, 16  ;;  %v6883_v0 = vor.u32 %v6882_v9, %v6879_v53  ;;  %v6892_v46 = vor.u32 %v6891_v34, %v6888_v25  ;;  %v15319_v8 = vld [vmem:[#allocation2 + $0x44] sm:$0xf] }
 0x323   : > { %v6904_v13 = vshrl.u32 %v11055_v59, 16  ;;  %v6907_v19 = vshll.u32 %v11055_v59, 16  ;;  %v6361_v31 = vrot.slane %v5560_v30, 4  ;;  %v6355_v32 = vor.u32 %v6354_v3, %v6351_v24 }
 0x324   : > { %12362 = vmatmul.mubr.bf16.gmra.mxu0 %v6046_v27  ;;  %v6895_v27 = vshrl.u32 %v11054_v14, 16  ;;  %v6358_v21 = vor.u32 %v6357_v18, %v6356_v12  ;;  %v6364_v62 = vrot.slane %v5566_v45, 3  ;;  %v5708_v53 = vsel %vm5538_vm10, %v5698_v48, %v5707_v49  ;;  %v15327_v45 = vld [vmem:[#allocation2 + $0x48] sm:$0xf] }
 0x325   : > { %12433 = vmatprep.mubr.bf16.mxu0 %v6875_v47  ;;  %v6360_v47 = vrot.slane %v5557_v29, 3  ;;  %v15322_v29 = vld [vmem:[#allocation2 + $0x3c] sm:$0xf]  ;;  %v6884_v30 = vsel %vm6347_vm11, %v6874_v35, %v6883_v0  ;;  %v6906_v25 = vrot.slane %v6904_v13, 3  ;;  %v6909_v34 = vrot.slane %v6907_v19, 4 }
 0x326   : > { %12306 = vmatmul.mubr.bf16.gmra.mxu1 %v5690_v23  ;;  %v6365_v23 = vrot.slane %v5569_v40, 4  ;;  %v6897_v9 = vrot.slane %v6895_v27, 3  ;;  %v11056_v12 = vcombine.low %v15322_v29, %v15313_v57  ;;  %v6893_v56 = vsel %vm6347_vm11, %v6883_v0, %v6892_v46  ;;  %v15335_v35 = vld [vmem:[#allocation2 + $0x50] sm:$0xf]  ;;  %v15344_v27 = vld [vmem:[#allocation2 + $0x54] sm:$0xf] }
 0x327   : > { %12309 = vmatprep.mubr.bf16.mxu1 %v5699_v15  ;;  %v6900_v15 = vrot.slane %v6898_v38, 4  ;;  %v6362_v40 = vor.u32 %v6361_v31, %v6360_v47  ;;  %v11057_v48 = vcombine.low %v15319_v8, %v15327_v45  ;;  %v6359_v14 = vsel %vm6347_vm11, %v6355_v32, %v6358_v21  ;;  %v12958_v38 = vld [vmem:[#allocation8 + $0x168] sm:$0xff]  }
 0x328   : > { %v15333_v24 = vor.u32 %v6365_v23, %v6364_v62  ;;  %v6368_v3 = vrot.slane %v5575_v43, 3  ;;  %v6369_v18 = vrot.slane %v5578_v60, 4  ;;  %v17285_v59 = vshrl.u32 %v15046_v44, 16  ;;  %v15350_v32 = vld [vmem:[#allocation2 + $0x4c] sm:$0xf] }
 0x329   : > { %v6901_v19 = vor.u32 %v6900_v15, %v6897_v9  ;;  %v15346_v0 = vor.u32 %v6909_v34, %v6906_v25  ;;  %v6913_v13 = vshrl.u32 %v11056_v12, 16  ;;  %v17286_v47 = vshll.u32 %v15046_v44, 16  ;;  %v15353_v62 = vld [vmem:[#allocation2 + $0x58] sm:$0xf] }
 0x32a   : > { %v6380_v49 = vrot.slane %v17285_v59, 3  ;;  %v6363_v42 = vsel %vm6347_vm11, %v6358_v21, %v6362_v40  ;;  %v6922_v43 = vshrl.u32 %v11057_v48, 16  ;;  %v6925_v60 = vshll.u32 %v11057_v48, 16 }
 0x32b   : > { %v6381_v31 = vrot.slane %v17286_v47, 4  ;;  %v17287_v23 = vshrl.u32 %v15058_v10, 16  ;;  %v6367_v9 = vsel %vm6347_vm11, %v6362_v40, %v15333_v24  ;;  %v11058_v44 = vcombine.low %v15350_v32, %v15335_v35 }
 0x32c   : > { %12434 = vmatmul.mubr.bf16.vlgmr.msra.gmra.mxu0 %v6884_v30  ;;  %v11059_v30 = vcombine.low %v15344_v27, %v15353_v62  ;;  %v15365_v21 = vor.u32 %v6369_v18, %v6368_v3  ;;  %v17288_v25 = vshrl.u32 %v14941_v63, 16  ;;  %v17290_v48 = vshll.u32 %v15058_v10, 16  ;;  %v12943_v3 = vld [vmem:[#allocation8 + $0x130] sm:$0xff]  }
 0x32d   : > { %12437 = vmatprep.mubr.bf16.mxu0 %v6893_v56  ;;  %12522 = vmatpush3.bf16.msra.mxu0 %v14972_v28  ;;  %v6916_v28 = vshll.u32 %v11056_v12, 16  ;;  %v15359_v15 = vor.u32 %v6381_v31, %v6380_v49  ;;  %v17289_v12 = vshll.u32 %v14941_v63, 16  ;;  %v6902_v59 = vsel %vm6347_vm11, %v6892_v46, %v6901_v19 }
 0x32e   : > { %12310 = vmatmul.mubr.bf16.gmra.mxu1 %v5708_v53  ;;  %12523 = vmatprep.subr.bf16.mxu0 %v12956_v33  ;;  %v6384_v53 = vrot.slane %v17287_v23, 3  ;;  %v6372_v34 = vrot.slane %v17288_v25, 3  ;;  %v6385_v40 = vrot.slane %v17290_v48, 4  ;;  %v6911_v49 = vsel %vm6347_vm11, %v6901_v19, %v15346_v0 }
 0x32f   : > { %12381 = vmatprep.mubr.bf16.mxu1 %v6359_v14  ;;  %v6373_v56 = vrot.slane %v17289_v12, 4  ;;  %v12961_v14 = vld [vmem:[#allocation8 + $0x160] sm:$0xff]   ;;  %v6915_v47 = vrot.slane %v6913_v13, 3  ;;  %v6924_v18 = vrot.slane %v6922_v43, 3  ;;  %v6927_v31 = vrot.slane %v6925_v60, 4 }
 0x330   : > { %v6386_v23 = vor.u32 %v6385_v40, %v6384_v53  ;;  %v17291_v63 = vshrl.u32 %v15120_v17, 16  ;;  %v6931_v10 = vshrl.u32 %v11058_v44, 16  ;;  %v6934_v12 = vshll.u32 %v11058_v44, 16  ;;  %v12963_v40 = vld [vmem:[#allocation8 + $0x158] sm:$0xff]  }
 0x331   : > { %12524 = vmatpush3.bf16.msra.mxu0 %v12956_v33  ;;  %v6918_v33 = vrot.slane %v6916_v28, 4  ;;  %v6940_v48 = vshrl.u32 %v11059_v30, 16  ;;  %v17292_v55 = vshll.u32 %v15120_v17, 16  ;;  %v6943_v19 = vshll.u32 %v11059_v30, 16 }
 0x332   : > { %12525 = vmatprep.subr.bf16.mxu0 %v12958_v38  ;;  %v6388_v25 = vrot.slane %v17291_v63, 3  ;;  %v15382_v13 = vsel %vm6347_vm11, %v15359_v15, %v6386_v23  ;;  %v17293_v28 = vshrl.u32 %v15126_v37, 16  ;;  %v17294_v60 = vshll.u32 %v15126_v37, 16  ;;  %v12946_v37 = vld [vmem:[#allocation8 + $0x128] sm:$0xff]   ;;  %v15397_v63 = vld [vmem:[#allocation2 + $0x60] sm:$0xf] }
 0x333   : > { %v6389_v46 = vrot.slane %v17292_v55, 4  ;;  %v15389_v17 = vor.u32 %v6373_v56, %v6372_v34  ;;  %v6919_v55 = vor.u32 %v6918_v33, %v6915_v47  ;;  %v17295_v44 = vshrl.u32 %v14948_v36, 16  ;;  %v15402_v34 = vld [vmem:[#allocation2 + $0x64] sm:$0xf] }
 0x334   : > { %12438 = vmatmul.mubr.bf16.gmra.mxu0 %v6902_v59  ;;  %v6392_v43 = vrot.slane %v17293_v28, 3  ;;  %v6393_v53 = vrot.slane %v17294_v60, 4  ;;  %v17296_v59 = vshll.u32 %v14948_v36, 16  ;;  %v6936_v60 = vrot.slane %v6934_v12, 4  ;;  %v12966_v12 = vld [vmem:[#allocation8 + $0x150] sm:$0xff]  }
 0x335   : > { %12441 = vmatprep.mubr.bf16.mxu0 %v6911_v49  ;;  %12526 = vmatpush3.bf16.msra.mxu0 %v12958_v38  ;;  %v6390_v38 = vor.u32 %v6389_v46, %v6388_v25  ;;  %v6376_v30 = vrot.slane %v17295_v44, 3  ;;  %v17297_v56 = vshrl.u32 %v15166_v7, 16  ;;  %v6942_v33 = vrot.slane %v6940_v48, 3  ;;  %v15420_v46 = vld [vmem:[#allocation2 + $0x68] sm:$0xf] }
 0x336   : > { %12382 = vmatmul.mubr.bf16.vlgmr.msra.gmra.mxu1 %v6363_v42  ;;  %12527 = vmatprep.subr.bf16.mxu0 %v12961_v14  ;;  %v15391_v42 = vor.u32 %v6927_v31, %v6924_v18  ;;  %v6377_v49 = vrot.slane %v17296_v59, 4  ;;  %v6394_v28 = vor.u32 %v6393_v53, %v6392_v43  ;;  %v6945_v18 = vrot.slane %v6943_v19, 4  ;;  %v15406_v31 = vld [vmem:[#allocation2 + $0x5c] sm:$0xf]  ;;  %v12949_v53 = vld [vmem:[#allocation8 + $0x120] sm:$0xff]  }
 0x337   : > { %12385 = vmatprep.mubr.bf16.mxu1 %v6367_v9  ;;  %12470 = vmatpush3.bf16.msra.mxu1 %v15008_v2  ;;  %v6933_v9 = vrot.slane %v6931_v10, 3  ;;  %v15400_v2 = vsel %vm6347_vm11, %v6386_v23, %v6390_v38  ;;  %v6396_v47 = vrot.slane %v17297_v56, 3  ;;  %v17298_v25 = vshll.u32 %v15166_v7, 16 }
 0x338   : > { %12471 = vmatprep.subr.bf16.mxu1 %v12943_v3  ;;  %v15409_v36 = vsel %vm6347_vm11, %v6390_v38, %v6394_v28  ;;  %v6371_v23 = vsel %vm6347_vm11, %v15333_v24, %v15365_v21  ;;  %v11060_v48 = vcombine.low %v15406_v31, %v15397_v63  ;;  %v17299_v19 = vshrl.u32 %v15168_v58, 16 }
 0x339   : > { %12528 = vmatpush3.bf16.msra.mxu0 %v12961_v14  ;;  %v6397_v10 = vrot.slane %v17298_v25, 4  ;;  %v6920_v14 = vsel %vm6347_vm11, %v15346_v0, %v6919_v55  ;;  %v6929_v7 = vsel %vm6347_vm11, %v6919_v55, %v15391_v42  ;;  %v11061_v24 = vcombine.low %v15402_v34, %v15420_v46  ;;  %v15433_v25 = vld [vmem:[#allocation2 + $0x70] sm:$0xf] }
 0x33a   : > { %12529 = vmatprep.subr.bf16.mxu0 %v12963_v40  ;;  %v6400_v43 = vrot.slane %v17299_v19, 3  ;;  %v17300_v0 = vshll.u32 %v15168_v58, 16  ;;  %v6375_v44 = vsel %vm6347_vm11, %v15365_v21, %v15389_v17  ;;  %v6378_v59 = vor.u32 %v6377_v49, %v6376_v30  ;;  %v15442_v49 = vld [vmem:[#allocation2 + $0x6c] sm:$0xf] }
 0x33b   : > { %12472 = vmatpush3.bf16.msra.mxu1 %v12943_v3  ;;  %v6398_v3 = vor.u32 %v6397_v10, %v6396_v47  ;;  %v6937_v56 = vor.u32 %v6936_v60, %v6933_v9  ;;  %v17301_v55 = vshrl.u32 %v15192_v20, 16  ;;  %v15437_v19 = vor.u32 %v6945_v18, %v6942_v33  ;;  %v12968_v10 = vld [vmem:[#allocation8 + $0x148] sm:$0xff]  }
 0x33c   : > { %12442 = vmatmul.mubr.bf16.gmra.mxu0 %v6920_v14  ;;  %12473 = vmatprep.subr.bf16.mxu1 %v12946_v37  ;;  %v6401_v38 = vrot.slane %v17300_v0, 4  ;;  %v6949_v21 = vshrl.u32 %v11060_v48, 16  ;;  %v6952_v30 = vshll.u32 %v11060_v48, 16  ;;  %v17302_v9 = vshll.u32 %v15192_v20, 16 }
 0x33d   : > { %12445 = vmatprep.mubr.bf16.mxu0 %v6929_v7  ;;  %v6404_v14 = vrot.slane %v17301_v55, 3  ;;  %12530 = vmatpush3.bf16.msra.mxu0 %v12963_v40  ;;  %v15440_v47 = vsel %vm6347_vm11, %v6394_v28, %v6398_v3  ;;  %v6958_v40 = vshrl.u32 %v11061_v24, 16  ;;  %v11062_v33 = vcombine.low %v15442_v49, %v15433_v25  ;;  %v12953_v28 = vld [vmem:[#allocation8 + $0x118] sm:$0xff]  }
 0x33e   : > { %12386 = vmatmul.mubr.bf16.gmra.mxu1 %v6371_v23  ;;  %v6402_v58 = vor.u32 %v6401_v38, %v6400_v43  ;;  %12531 = vmatprep.subr.bf16.mxu0 %v12966_v12  ;;  %v6405_v60 = vrot.slane %v17302_v9, 4  ;;  %v6961_v23 = vshll.u32 %v11061_v24, 16  ;;  %v15451_v43 = vld [vmem:[#allocation2 + $0x74] sm:$0xf]  ;;  %v17303_v48 = vshrl.u32 %v15194_v41, 16 }
 0x33f   : > { %12389 = vmatprep.mubr.bf16.mxu1 %v6375_v44  ;;  %12474 = vmatpush3.bf16.msra.mxu1 %v12946_v37  ;;  %v17304_v0 = vshll.u32 %v15194_v41, 16  ;;  %v6379_v24 = vsel %vm6347_vm11, %v15389_v17, %v6378_v59  ;;  %v6938_v38 = vsel %vm6347_vm11, %v15391_v42, %v6937_v56  ;;  %v12973_v44 = vld [vmem:[#allocation8 + $0x140] sm:$0xff]   ;;  %v6951_v55 = vrot.slane %v6949_v21, 3  ;;  %v15463_v9 = vld [vmem:[#allocation2 + $0x78] sm:$0xf] }
 0x340   : > { %12475 = vmatprep.subr.bf16.mxu1 %v12949_v53  ;;  %v15449_v18 = vsel %vm6347_vm11, %v6398_v3, %v6402_v58  ;;  %v6406_v37 = vor.u32 %v6405_v60, %v6404_v14  ;;  %v6408_v7 = vrot.slane %v17303_v48, 3  ;;  %v6947_v3 = vsel %vm6347_vm11, %v6937_v56, %v15437_v19  ;;  %v12960_v56 = vld [vmem:[#allocation8 + $0x110] sm:$0xff]  }
 0x341   : > { %v6409_v20 = vrot.slane %v17304_v0, 4  ;;  %12532 = vmatpush3.bf16.msra.mxu0 %v12966_v12  ;;  %v6954_v14 = vrot.slane %v6952_v30, 4  ;;  %v6960_v60 = vrot.slane %v6958_v40, 3  ;;  %v6963_v17 = vrot.slane %v6961_v23, 4 }
 0x342   : > { %12533 = vmatprep.subr.bf16.mxu0 %v12968_v10  ;;  %v15466_v41 = vsel %vm6347_vm11, %v6402_v58, %v6406_v37  ;;  %v6967_v48 = vshrl.u32 %v11062_v33, 16  ;;  %v11063_v42 = vcombine.low %v15451_v43, %v15463_v9  ;;  %v6970_v0 = vshll.u32 %v11062_v33, 16 }
 0x343   : > { %12476 = vmatpush3.bf16.msra.mxu1 %v12949_v53  ;;  %v6410_v12 = vor.u32 %v6409_v20, %v6408_v7  ;;  %v17305_v53 = vshrl.u32 %v15211_v61, 16  ;;  %v17306_v58 = vshll.u32 %v15211_v61, 16  ;;  %v6383_v40 = vsel %vm6347_vm11, %v6378_v59, %v15359_v15  ;;  %v12965_v15 = vld [vmem:[#allocation8 + $0x108] sm:$0xff]  }
 0x344   : > { %12446 = vmatmul.mubr.bf16.gmra.mxu0 %v6938_v38  ;;  %12477 = vmatprep.subr.bf16.mxu1 %v12953_v28  ;;  %v17307_v23 = vshrl.u32 %v15225_v11, 16  ;;  %v15481_v38 = vld [vmem:[#allocation8 + $0x1f8] sm:$0xff]   ;;  %v6955_v33 = vor.u32 %v6954_v14, %v6951_v55  ;;  %v17308_v61 = vshll.u32 %v15225_v11, 16  ;;  %v17310_v59 = vshrl.u32 %v15256_v54, 16 }
 0x345   : > { %12449 = vmatprep.mubr.bf16.mxu0 %v6947_v3  ;;  %v15471_v21 = vsel %vm6347_vm11, %v6406_v37, %v6410_v12  ;;  %v6412_v30 = vrot.slane %v17305_v53, 3  ;;  %v6413_v7 = vrot.slane %v17306_v58, 4  ;;  %12534 = vmatpush3.bf16.msra.mxu0 %v12968_v10  ;;  %v15483_v37 = vld [vmem:[#allocation2 + $0x80] sm:$0xf]  ;;  %v6964_v10 = vor.u32 %v6963_v17, %v6960_v60  ;;  %v15491_v55 = vld [vmem:[#allocation2 + $0x7c] sm:$0xf] }
 0x346   : > { %12390 = vmatmul.mubr.bf16.gmra.mxu1 %v6379_v24  ;;  %v6416_v20 = vrot.slane %v17307_v23, 3  ;;  %12535 = vmatprep.subr.bf16.mxu0 %v12973_v44  ;;  %v6417_v53 = vrot.slane %v17308_v61, 4  ;;  %v6976_v24 = vshrl.u32 %v11063_v42, 16  ;;  %v6979_v58 = vshll.u32 %v11063_v42, 16  ;;  %v15498_v60 = vld [vmem:[#allocation2 + $0x88] sm:$0xf] }
 0x347   : > { %12393 = vmatprep.mubr.bf16.mxu1 %v6383_v40  ;;  %12478 = vmatpush3.bf16.msra.mxu1 %v12953_v28  ;;  %v6414_v3 = vor.u32 %v6413_v7, %v6412_v30  ;;  %v6420_v23 = vrot.slane %v17310_v59, 3  ;;  %v6969_v1 = vrot.slane %v6967_v48, 3  ;;  %v6972_v40 = vrot.slane %v6970_v0, 4  ;;  %17311 = vst [vmem:[#allocation26_spill] sm:$0xff] %v15498_v60  ;;  %v12972_v61 = vld [vmem:[#allocation2 + $0x94] ss:$0 sps:$4 sm:$0xff]  }
 0x348   : > { %12479 = vmatprep.subr.bf16.mxu1 %v12960_v56  ;;  %v6418_v14 = vor.u32 %v6417_v53, %v6416_v20  ;;  %v11064_v11 = vcombine.low %v15491_v55, %v15483_v37  ;;  %v17312_v17 = vshll.u32 %v15256_v54, 16  ;;  %v6956_v48 = vsel %vm6347_vm11, %v15437_v19, %v6955_v33  ;;  %v12971_v20 = vld [vmem:[#allocation8 + $0x100] sm:$0xff]  }
 0x349   : > { %v15494_v28 = vsel %vm6347_vm11, %v6410_v12, %v6414_v3  ;;  %12536 = vmatpush3.bf16.msra.mxu0 %v12973_v44  ;;  %v11065_v0 = vcombine.low %v15487_v39, %v15498_v60  ;;  %v6965_v44 = vsel %vm6347_vm11, %v6955_v33, %v6964_v10  ;;  %v6978_v30 = vrot.slane %v6976_v24, 3  ;;  %v15516_v24 = vld [vmem:[#allocation2 + $0x90] sm:$0xf] }
 0x34a   : > { %v6421_v42 = vrot.slane %v17312_v17, 4  ;;  %12625 = vmatprep.subr.bf16.mxu0 %v15481_v38  ;;  %v15508_v12 = vsel %vm6347_vm11, %v6414_v3, %v6418_v14  ;;  %v6981_v7 = vrot.slane %v6979_v58, 4  ;;  %v6973_v53 = vor.u32 %v6972_v40, %v6969_v1  ;;  %17313 = vst [vmem:[#allocation29_spill] sm:$0xff] %v15516_v24 }
 0x34b   : > { %12480 = vmatpush3.bf16.msra.mxu1 %v12960_v56  ;;  %v6985_v19 = vshrl.u32 %v11064_v11, 16  ;;  %v6988_v59 = vshll.u32 %v11064_v11, 16  ;;  %v6994_v3 = vshrl.u32 %v11065_v0, 16  ;;  %v6997_v17 = vshll.u32 %v11065_v0, 16 }
 0x34c   : > { %12450 = vmatmul.mubr.bf16.gmra.mxu0 %v6956_v48  ;;  %12481 = vmatprep.subr.bf16.mxu1 %v12965_v15  ;;  %v6422_v54 = vor.u32 %v6421_v42, %v6420_v23  ;;  %v6982_v33 = vor.u32 %v6981_v7, %v6978_v30  ;;  %v6425_v58 = vshrl.u32 %v12972_v61, 16  ;;  %v6428_v23 = vshll.u32 %v12972_v61, 16  ;;  %v15525_v42 = vld [vmem:[#allocation2 + $0x8c] sm:$0xf]  ;;  %v15529_v7 = vld [vmem:[#allocation2 + $0x98] sm:$0xf] }
 0x34d   : > { %12453 = vmatprep.mubr.bf16.mxu0 %v6965_v44  ;;  %v11077_v1 = vcombine.low %v15235_v6, %v15241_v16  ;;  %v6974_v40 = vsel %vm6347_vm11, %v6964_v10, %v6973_v53  ;;  %v6987_v11 = vrot.slane %v6985_v19, 3  ;;  %17315 = vst [vmem:[#allocation31_spill] sm:$0xff] %v15525_v42  ;;  %v6996_v0 = vrot.slane %v6994_v3, 3  ;;  %17316 = vst [vmem:[#allocation27_spill] sm:$0xff] %v15529_v7  ;;  %v15550_v3 = vld [vmem:[#allocation2 + $0x9c] sm:$0xf] }
 0x34e   : > { %12394 = vmatmul.mubr.bf16.gmra.mxu1 %v15382_v13  ;;  %v15513_v56 = vsel %vm6347_vm11, %v6418_v14, %v6422_v54  ;;  %v15520_v13 = vld [vmem:[#allocation8 + $0x1b8] sm:$0xff]   ;;  %v15523_v14 = vld [vmem:[#allocation2 + $0x94] sm:$0xf]  ;;  %v6430_v48 = vrot.slane %v6428_v23, 4  ;;  %v6999_v44 = vrot.slane %v6997_v17, 4  ;;  %v11066_v30 = vcombine.low %v15525_v42, %v15516_v24  ;;  %17317 = vst [vmem:[#allocation32_spill] sm:$0xff] %v15550_v3 }
 0x34f   : > { %12397 = vmatprep.mubr.bf16.mxu1 %v15400_v2  ;;  %12482 = vmatpush3.bf16.msra.mxu1 %v12965_v15  ;;  %17314 = vst [vmem:[#allocation30_spill] sm:$0xff] %v15523_v14  ;;  %v6990_v2 = vrot.slane %v6988_v59, 4  ;;  %v6427_v15 = vrot.slane %v6425_v58, 3  ;;  %v11079_v61 = vcombine.low %v15265_v5, %v15281_v4  ;;  %v6983_v10 = vsel %vm6347_vm11, %v6973_v53, %v6982_v33  ;;  %v15610_v16 = vld [vmem:[#allocation2 + $0x58] sm:$0xff]   ;;  %v15612_v6 = vld [vmem:[#allocation2 + $0x70] sm:$0xff]  }
 0x350   : > { %12483 = vmatprep.subr.bf16.mxu1 %v12971_v20  ;;  %v11067_v19 = vcombine.low %v15523_v14, %v15529_v7  ;;  %v7000_v58 = vor.u32 %v6999_v44, %v6996_v0  ;;  %v7003_v23 = vshrl.u32 %v11066_v30, 16  ;;  %v12969_v0 = vld [vmem:[#allocation2 + $0x10] sm:$0xff]   ;;  %v5316_v24 = vld [vmem:[%s13383_s7 + $0x2b] sm:$0xff] }
 0x351   : > { %v6431_v59 = vor.u32 %v6430_v48, %v6427_v15  ;;  %v6991_v53 = vor.u32 %v6990_v2, %v6987_v11 }
 0x352   : > { %v7012_v15 = vshrl.u32 %v11067_v19, 16  ;;  %v7015_v48 = vshll.u32 %v11067_v19, 16  ;;  %v7005_v17 = vrot.slane %v7003_v23, 3  ;;  %v11068_v19 = vcombine.low %v15550_v3, %v15550_v3 }
 0x353   : > { %12484 = vmatpush3.bf16.msra.mxu1 %v12971_v20  ;;  %v15541_v20 = vsel %vm6347_vm11, %v6422_v54, %v6431_v59  ;;  %v6992_v54 = vsel %vm6347_vm11, %v6982_v33, %v6991_v53  ;;  %v7001_v59 = vsel %vm6347_vm11, %v6991_v53, %v7000_v58  ;;  %v12975_v53 = vld [vmem:[#allocation2 + $0x20] sm:$0xff]  }
 0x354   : > { %12454 = vmatmul.mubr.bf16.gmra.mxu0 %v6974_v40  ;;  %12573 = vmatprep.subr.bf16.mxu1 %v15520_v13  ;;  %v7006_v40 = vshll.u32 %v11066_v30, 16  ;;  %v7014_v11 = vrot.slane %v7012_v15, 3  ;;  %v7017_v2 = vrot.slane %v7015_v48, 4  ;;  %v7773_v15 = vshll.u32 %v12969_v0, 16  ;;  %v12970_v30 = vld [vmem:[#allocation2 + $0x18] sm:$0xff]  }
 0x355   : > { %12457 = vmatprep.mubr.bf16.mxu0 %v6983_v10  ;;  %v7021_v48 = vshrl.u32 %v11068_v19, 16 }
 0x356   : > { %12398 = vmatmul.mubr.bf16.gmra.mxu1 %v15409_v36  ;;  %v15634_v36 = vld [vmem:[#allocation2 + $0x88] sm:$0xff]  }
 0x357   : > { %12401 = vmatprep.mubr.bf16.mxu1 %v15440_v47  ;;  %v7008_v47 = vrot.slane %v7006_v40, 4  ;;  %v7018_v40 = vor.u32 %v7017_v2, %v7014_v11  ;;  %v7023_v23 = vrot.slane %v7021_v48, 3  ;;  %v12979_v2 = vld [vmem:[#allocation2 + $0x30] sm:$0xff]  }
 0x359   : > { %v7009_v33 = vor.u32 %v7008_v47, %v7005_v17  ;;  %v7775_v47 = vrot.slane %v7773_v15, 1 }
 0x35b   : > { %v7019_v17 = vsel %vm6347_vm11, %v7009_v33, %v7018_v40 }
 0x35c   : > { %12458 = vmatmul.mubr.bf16.gmra.mxu0 %v6992_v54  ;;  %v7024_v54 = vshll.u32 %v11068_v19, 16  ;;  %v7771_v19 = vshrl.u32 %v12969_v0, 16 }
 0x35d   : > { %12461 = vmatprep.mubr.bf16.mxu0 %v7001_v59  ;;  %v7778_v59 = vshll.u32 %v12970_v30, 16 }
 0x35e   : > { %12402 = vmatmul.mubr.bf16.gmra.mxu1 %v15449_v18  ;;  %v7026_v11 = vrot.slane %v7024_v54, 4  ;;  %v12976_v54 = vld [vmem:[#allocation2 + $0x28] sm:$0xff]  }
 0x35f   : > { %12405 = vmatprep.mubr.bf16.mxu1 %v15466_v41  ;;  %v7010_v41 = vsel %vm6347_vm11, %v7000_v58, %v7009_v33  ;;  %v7776_v58 = vor.u32 %v7775_v47, %v7771_v19  ;;  %v7780_v48 = vrot.slane %v7778_v59, 1  ;;  %v15587_v59 = vld [vmem:[#allocation2 + $0x28] sm:$0xff]  }
 0x360   : > { %v7027_v33 = vor.u32 %v7026_v11, %v7023_v23  ;;  %v7794_v23 = vshll.u32 %v12976_v54, 16  ;;  %17318 = vst [vmem:[#allocation33_spill] sm:$0xff] %v15587_v59  ;;  %v7782_v11 = vshrl.u32 %v12970_v30, 16 }
 0x361   : > { %v7781_v0 = vsel %vm7769_vm12, %v7776_v58, %v7780_v48  ;;  %v12980_v58 = vld [vmem:[#allocation2 + $0x38] sm:$0xff]  }
 0x364   : > { %12462 = vmatmul.mubr.bf16.gmra.mxu0 %v7010_v41  ;;  %v7786_v41 = vshll.u32 %v12975_v53, 16 }
 0x365   : > { %12465 = vmatprep.mubr.bf16.mxu0 %v7019_v17  ;;  %v12984_v17 = vld [vmem:[#allocation2 + $0x40] sm:$0xff]  }
 0x366   : > { %12406 = vmatmul.mubr.bf16.gmra.mxu1 %v15471_v21  ;;  %v7028_v21 = vsel %vm6347_vm11, %v7018_v40, %v7027_v33  ;;  %v7788_v18 = vrot.slane %v7786_v41, 1  ;;  %v7802_v40 = vshll.u32 %v12979_v2, 16  ;;  %v7784_v33 = vor.u32 %v7782_v11, %v7780_v48  ;;  %v13003_v41 = vld [vmem:[#allocation8 + $0x1f0] sm:$0xff]  }
 0x367   : > { %12409 = vmatprep.mubr.bf16.mxu1 %v15494_v28  ;;  %v7790_v28 = vshrl.u32 %v12975_v53, 16  ;;  %v7806_v48 = vshrl.u32 %v12979_v2, 16  ;;  %v7798_v11 = vshrl.u32 %v12976_v54, 16  ;;  %v15607_v2 = vld [vmem:[#allocation2 + $0x60] sm:$0xff]   ;;  %v12983_v54 = vld [vmem:[#allocation8 + $0x1b0] sm:$0xff]  }
 0x368   : > { %v7789_v53 = vsel %vm7769_vm12, %v7784_v33, %v7788_v18  ;;  %v7804_v15 = vrot.slane %v7802_v40, 1 }
 0x369   : > { %v7792_v19 = vor.u32 %v7790_v28, %v7788_v18  ;;  %v7810_v28 = vshll.u32 %v12980_v58, 16  ;;  %v13006_v18 = vld [vmem:[#allocation8 + $0x1e8] sm:$0xff]  }
 0x36a   : > { %v7808_v33 = vor.u32 %v7806_v48, %v7804_v15  ;;  %v15620_v48 = vld [vmem:[#allocation2 + $0x78] sm:$0xff]  }
 0x36b   : > { %v7874_v5 = vshll.u32 %v15620_v48, 16 }
 0x36c   : > { %12466 = vmatmul.mubr.bf16.gmra.mxu0 %v7028_v21  ;;  %v7796_v21 = vrot.slane %v7794_v23, 1  ;;  %v12985_v23 = vld [vmem:[#allocation2 + $0x48] sm:$0xff]  }
 0x36d   : > { %12537 = vmatprep.mubr.bf16.mxu0 %v7781_v0  ;;  %v17113_v0 = vshll.u32 %v15587_v59, 16 }
 0x36e   : > { %12410 = vmatmul.mubr.bf16.gmra.mxu1 %v15508_v12  ;;  %v17112_v12 = vshrl.u32 %v15587_v59, 16  ;;  %v7797_v47 = vsel %vm7769_vm12, %v7792_v19, %v7796_v21  ;;  %v7818_v19 = vshll.u32 %v12984_v17, 16 }
 0x36f   : > { %12413 = vmatprep.mubr.bf16.mxu1 %v15513_v56  ;;  %v9144_v30 = vrot.slane %v17113_v0, 2 }
 0x370   : > { %v9143_v56 = vrot.slane %v17112_v12, 1  ;;  %v13010_v12 = vld [vmem:[#allocation8 + $0x1e0] sm:$0xff]   ;;  %v7820_v44 = vrot.slane %v7818_v19, 1  ;;  %v7814_v19 = vshrl.u32 %v12980_v58, 16  ;;  %v7830_v58 = vshrl.u32 %v12985_v23, 16 }
 0x372   : > { %v15603_v40 = vor.u32 %v9144_v30, %v9143_v56  ;;  %v7822_v56 = vshrl.u32 %v12984_v17, 16 }
 0x373   : > { %v15643_v59 = vpop.f32.mrf.mxu0 }
 0x374   : > { %12538 = vmatmul.mubr.bf16.vlgmr.msra.gmra.mxu0 %v7789_v53  ;;  %v7800_v53 = vor.u32 %v7798_v11, %v7796_v21  ;;  %v15615_v21 = vld [vmem:[#allocation2 + $0x68] sm:$0xff]   ;;  %v7824_v17 = vor.u32 %v7822_v56, %v7820_v44 }
 0x375   : > { %12541 = vmatprep.mubr.bf16.mxu0 %v7797_v47  ;;  %12626 = vmatpush3.bf16.msra.mxu0 %v15481_v38  ;;  %v15605_v47 = vld [vmem:[#allocation2 + $0x50] sm:$0xff]   ;;  %v7812_v38 = vrot.slane %v7810_v28, 1 }
 0x376   : > { %12414 = vmatmul.mubr.bf16.gmra.mxu1 %v15541_v20  ;;  %12627 = vmatprep.subr.bf16.mxu0 %v13003_v41  ;;  %v7826_v20 = vshll.u32 %v12985_v23, 16  ;;  %v7805_v0 = vsel %vm7769_vm12, %v7800_v53, %v7804_v15  ;;  %v7834_v30 = vshll.u32 %v15605_v47, 16  ;;  %v17319_v15 = vld [vmem:[#allocation21_spill] sm:$0xff]  ;;  %v17320_v28 = vld [vmem:[#allocation23_spill] sm:$0xff]  ;;  %v13013_v53 = vld [vmem:[#allocation8 + $0x1d8] sm:$0xff]  }
 0x377   : > { %12485 = vmatprep.mubr.bf16.mxu1 %v11077_v1  ;;  %v7813_v1 = vsel %vm7769_vm12, %v7808_v33, %v7812_v38  ;;  %v17321_v11 = vcombine.low %v17319_v15, %v17320_v28  ;;  %v7850_v33 = vshll.u32 %v15607_v2, 16  ;;  %v7816_v15 = vor.u32 %v7814_v19, %v7812_v38  ;;  %v12988_v28 = vld [vmem:[#allocation8 + $0x1a8] sm:$0xff]   ;;  %v15639_v38 = vld [vmem:[#allocation2 + $0x90] sm:$0xff]  }
 0x378   : > { %v7836_v10 = vrot.slane %v7834_v30, 1  ;;  %v13017_v23 = vld [vmem:[#allocation8 + $0x1d0] sm:$0xff]   ;;  %v7846_v30 = vshrl.u32 %v15610_v16, 16 }
 0x379   : > { %12628 = vmatpush3.bf16.msra.mxu0 %v13003_v41  ;;  %v15617_v41 = vld [vmem:[#allocation2 + $0x80] sm:$0xff]   ;;  %v7821_v4 = vsel %vm7769_vm12, %v7816_v15, %v7820_v44  ;;  %v7852_v56 = vrot.slane %v7850_v33, 1  ;;  %v7876_v15 = vrot.slane %v7874_v5, 1 }
 0x37a   : > { %12629 = vmatprep.subr.bf16.mxu0 %v13006_v18  ;;  %v15649_v44 = vld [vmem:[%s17072_s4] ss:$0 sm:$0xff] }
 0x37c   : > { %12542 = vmatmul.mubr.bf16.gmra.mxu0 %v7805_v0  ;;  %v7828_v0 = vrot.slane %v7826_v20, 1  ;;  %v7858_v20 = vshll.u32 %v15615_v21, 16 }
 0x37d   : > { %12545 = vmatprep.mubr.bf16.mxu0 %v7813_v1  ;;  %12630 = vmatpush3.bf16.msra.mxu0 %v13006_v18  ;;  %v7842_v1 = vshll.u32 %v15610_v16, 16  ;;  %v7866_v18 = vshll.u32 %v15612_v6, 16  ;;  %v7890_v16 = vshll.u32 %v15634_v36, 16 }
 0x37e   : > { %12486 = vmatmul.mubr.bf16.vlgmr.msra.gmra.mxu1 %v17321_v11  ;;  %12631 = vmatprep.subr.bf16.mxu0 %v13010_v12  ;;  %v7882_v11 = vshll.u32 %v15617_v41, 16  ;;  %v7829_v19 = vsel %vm7769_vm12, %v7824_v17, %v7828_v0  ;;  %v7860_v33 = vrot.slane %v7858_v20, 1  ;;  %v7886_v20 = vshrl.u32 %v15617_v41, 16  ;;  %v15670_v41 = vld [vmem:[#allocation2 + $0x98] sm:$0xff]  }
 0x37f   : > { %12489 = vmatprep.mubr.bf16.mxu1 %v11079_v61  ;;  %12574 = vmatpush3.bf16.msra.mxu1 %v15520_v13  ;;  %v7832_v13 = vor.u32 %v7830_v58, %v7828_v0  ;;  %v7838_v61 = vshrl.u32 %v15605_v47, 16  ;;  %v7844_v3 = vrot.slane %v7842_v1, 1  ;;  %v7868_v7 = vrot.slane %v7866_v18, 1  ;;  %v12993_v47 = vld [vmem:[#allocation8 + $0x1a0] sm:$0xff]  }
 0x380   : > { %12575 = vmatprep.subr.bf16.mxu1 %v12983_v54  ;;  %v7884_v0 = vrot.slane %v7882_v11, 1  ;;  %v7870_v18 = vshrl.u32 %v15612_v6, 16  ;;  %v5313_v58 = vld [vmem:[%s13383_s7 + $0x13] sm:$0xff]  ;;  %v17323_v6 = vcombine.low %v15285_v50, %v15293_v26 }
 0x381   : > { %12632 = vmatpush3.bf16.msra.mxu0 %v13010_v12  ;;  %v5315_v12 = vld [vmem:[%s13383_s7 + $0x23] sm:$0xff]  ;;  %v7837_v17 = vsel %vm7769_vm12, %v7832_v13, %v7836_v10  ;;  %v7840_v1 = vor.u32 %v7838_v61, %v7836_v10  ;;  %v13020_v10 = vld [vmem:[#allocation8 + $0x1c8] sm:$0xff]   ;;  %v5356_v50 = vadd.f32 %v15649_v44, %v5313_v58 }
 0x382   : > { %12633 = vmatprep.subr.bf16.mxu0 %v13013_v53  ;;  %v5358_v11 = vadd.f32 %v15649_v44, %v5315_v12  ;;  %v7872_v5 = vor.u32 %v7870_v18, %v7868_v7  ;;  %v12999_v61 = vld [vmem:[#allocation8 + $0x198] sm:$0xff]   ;;  %v7888_v12 = vor.u32 %v7886_v20, %v7884_v0  ;;  %v5359_v18 = vadd.f32 %v15649_v44, %v5316_v24 }
 0x383   : > { %12576 = vmatpush3.bf16.msra.mxu1 %v12983_v54  ;;  %v7854_v54 = vshrl.u32 %v15607_v2, 16  ;;  %v7862_v2 = vshrl.u32 %v15615_v21, 16  ;;  %v7898_v21 = vshll.u32 %v15639_v38, 16 }
 0x384   : > { %12546 = vmatmul.mubr.bf16.gmra.mxu0 %v7821_v4  ;;  %12577 = vmatprep.subr.bf16.mxu1 %v12988_v28  ;;  %v17322_v4 = vcombine.low %v15283_v51, %v15298_v22  ;;  %v7878_v51 = vshrl.u32 %v15620_v48, 16  ;;  %v15667_v22 = vpop.f32.mrf.mxu0  ;;  %v15690_v24 = vsel %vm7769_vm12, %v7872_v5, %v7876_v15 }
 0x385   : > { %12549 = vmatprep.mubr.bf16.mxu0 %v7829_v19  ;;  %12634 = vmatpush3.bf16.msra.mxu0 %v13013_v53  ;;  %v7856_v14 = vor.u32 %v7854_v54, %v7852_v56  ;;  %v7848_v53 = vor.u32 %v7846_v30, %v7844_v3  ;;  %v7864_v13 = vor.u32 %v7862_v2, %v7860_v33  ;;  %v7892_v54 = vrot.slane %v7890_v16, 1  ;;  %v8771_v2 = vld [vmem:[#allocation2 + $0x18] sm:$0xe] }
 0x386   : > { %12490 = vmatmul.mubr.bf16.gmra.mxu1 %v17322_v4  ;;  %v12279_v19 = vpop.f32.mrf.mxu1  ;;  %12635 = vmatprep.subr.bf16.mxu0 %v13017_v23  ;;  %v7880_v30 = vor.u32 %v7878_v51, %v7876_v15  ;;  %v15678_v4 = vld [vmem:[#allocation2 + $0x1c] sm:$0xf]  ;;  %v13008_v15 = vld [vmem:[#allocation8 + $0x190] sm:$0xff]  }
 0x387   : > { %12493 = vmatprep.mubr.bf16.mxu1 %v17323_v6  ;;  %12578 = vmatpush3.bf16.msra.mxu1 %v12988_v28  ;;  %v7845_v28 = vsel %vm7769_vm12, %v7840_v1, %v7844_v3  ;;  %v15675_v48 = vsel %vm7769_vm12, %v7848_v53, %v7852_v56  ;;  %17324 = vst [vmem:[#allocation34_spill] sm:$0xff] %v15678_v4  ;;  %v7894_v3 = vshrl.u32 %v15634_v36, 16  ;;  %v5319_v56 = vld [vmem:[%s13383_s7 + $0x43] sm:$0xff]  ;;  %v5317_v1 = vld [vmem:[%s13383_s7 + $0x33] sm:$0xff] }
 0x388   : > { %12579 = vmatprep.subr.bf16.mxu1 %v12993_v47  ;;  %v5809_v26 = vpop.f32.mrf.mxu1  ;;  %v15681_v20 = vsel %vm7769_vm12, %v7856_v14, %v7860_v33  ;;  %v15684_v16 = vsel %vm7769_vm12, %v7864_v13, %v7868_v7  ;;  %v5954_v58 = vadd.f32 %v12279_v19, %v5358_v11  ;;  %v13025_v53 = vld [vmem:[#allocation8 + $0x1c0] sm:$0xff]   ;;  %v15693_v14 = vsel %vm7769_vm12, %v7880_v30, %v7884_v0  ;;  %v15701_v19 = vld [vmem:[#allocation2 + $0x30] sm:$0xff]  }
 0x389   : > { %12636 = vmatpush3.bf16.msra.mxu0 %v13017_v23  ;;  %v12332_v23 = vpop.f32.mrf.mxu0  ;;  %v15695_v7 = vrot.slane %v7898_v21, 1  ;;  %v7906_v33 = vshll.u32 %v15670_v41, 16  ;;  %v5320_v11 = vld [vmem:[%s13383_s7 + $0x4b] sm:$0xff]  ;;  %v5952_v5 = vadd.f32 %v5809_v26, %v5356_v50  ;;  %v15706_v51 = vor.u32 %v7894_v3, %v7892_v54  ;;  %v5318_v0 = vld [vmem:[%s13383_s7 + $0x3b] sm:$0xff]  ;;  %v5323_v13 = vld [vmem:[%s13383_s7 + $0x63] sm:$0xff] }
 0x38a   : > { %v12280_v6 = vpop.f32.mrf.mxu1  ;;  %12637 = vmatprep.subr.bf16.mxu0 %v13020_v10  ;;  %v15699_v36 = vld [vmem:[#allocation2 + $0x20] sm:$0xff]   ;;  %v7902_v30 = vshrl.u32 %v15639_v38, 16  ;;  %v15712_v42 = vadd.f32 %v15649_v44, %v5319_v56  ;;  %v15715_v60 = vadd.f32 %v15649_v44, %v5317_v1  ;;  %v15726_v50 = vcombine.low %v8771_v2, %v15678_v4  ;;  %v15730_v26 = vld [vmem:[#allocation2 + $0x48] sm:$0xff]  }
 0x38b   : > { %12580 = vmatpush3.bf16.msra.mxu1 %v12993_v47  ;;  %17325 = vst [vmem:[#allocation35_spill] sm:$0xff] %v15699_v36  ;;  %v15704_v47 = vsel %vm7769_vm12, %v7888_v12, %v7892_v54  ;;  %v5955_v21 = vadd.f32 %v12280_v6, %v5359_v18  ;;  %v17326_v12 = vcombine.low %v15303_v52, %v15322_v29  ;;  %v15728_v38 = vld [vmem:[#allocation2 + $0x40] sm:$0xff]   ;;  %v15738_v52 = vpop.f32.mrf.mxu0  ;;  %v15743_v18 = vrot.slane %v7906_v33, 1  ;;  %v15760_v1 = vld [vmem:[#allocation2 + $0x68] sm:$0xff]  }
 0x38c   : > { %12550 = vmatmul.mubr.bf16.gmra.mxu0 %v7837_v17  ;;  %12581 = vmatprep.subr.bf16.mxu1 %v12999_v61  ;;  %v15717_v17 = vld [vmem:[#allocation2 + $0x38] sm:$0xff]   ;;  %v15723_v54 = vadd.f32 %v15649_v44, %v5320_v11  ;;  %17327 = vst [vmem:[#allocation36_spill] sm:$0xff] %v15726_v50  ;;  %17330 = vst [vmem:[#allocation38_spill] sm:$0xff] %v15738_v52  ;;  %v15741_v29 = vor.u32 %v7902_v30, %v15695_v7  ;;  %v15758_v56 = vld [vmem:[#allocation2 + $0x60] sm:$0xff]   ;;  %v17339_v4 = vshll.u32 %v15701_v19, 16 }
 0x38d   : > { %12553 = vmatprep.mubr.bf16.mxu0 %v7845_v28  ;;  %12638 = vmatpush3.bf16.msra.mxu0 %v13020_v10  ;;  %v15733_v28 = vadd.f32 %v15643_v59, %v5954_v58  ;;  %v17329_v10 = vcombine.low %v15313_v57, %v15319_v8  ;;  %v15746_v2 = vadd.f32 %v15649_v44, %v5318_v0  ;;  %v15751_v59 = vld [vmem:[#allocation2 + $0x50] sm:$0xff]   ;;  %v15753_v58 = vld [vmem:[#allocation2 + $0x58] sm:$0xff]   ;;  %v13015_v57 = vld [vmem:[#allocation8 + $0x188] sm:$0xff]   ;;  %v15782_v0 = vpop.f32.mrf.mxu0  ;;  %v17341_v39 = vshll.u32 %v15717_v17, 16 }
 0x38e   : > { %12494 = vmatmul.mubr.bf16.gmra.mxu1 %v17326_v12  ;;  %12639 = vmatprep.subr.bf16.mxu0 %v13025_v53  ;;  %v15749_v6 = vadd.f32 %v15649_v44, %v5323_v13  ;;  %v15763_v33 = vadd.f32 %v15667_v22, %v5952_v5  ;;  %v15768_v30 = vld [vmem:[#allocation2 + $0x70] sm:$0xff]   ;;  %v15770_v12 = vld [vmem:[#allocation2 + $0x78] sm:$0xff]   ;;  %v15778_v5 = vld [vmem:[#allocation2 + $0x80] sm:$0xff]   ;;  %v9148_v3 = vrot.slane %v17339_v4, 2 }
 0x38f   : > { %17328 = vst [vmem:[#allocation37_spill] sm:$0xff] %v15733_v28  ;;  %12497 = vmatprep.mubr.bf16.mxu1 %v17329_v10  ;;  %12582 = vmatpush3.bf16.msra.mxu1 %v12999_v61  ;;  %v15772_v10 = vadd.f32 %v12332_v23, %v5955_v21  ;;  %v15780_v11 = vld [vmem:[#allocation2 + $0x88] sm:$0xff]   ;;  %v15788_v8 = vld [vmem:[#allocation2 + $0x90] sm:$0xff]   ;;  %v13023_v22 = vld [vmem:[#allocation8 + $0x180] sm:$0xff]   ;;  %v9132_v21 = vshrl.u32 %v15726_v50, 16  ;;  %v6163_v23 = vpop.f32.mrf.mxu0  ;;  %v17336_v61 = vshrl.u32 %v15699_v36, 16 }
 0x390   : > { %12583 = vmatprep.subr.bf16.mxu1 %v13008_v15  ;;  %17331 = vst [vmem:[#allocation28_spill] sm:$0xff] %v15763_v33  ;;  %v15795_v52 = vld [vmem:[#allocation2 + $0x98] sm:$0xff]   ;;  %v17340_v33 = vshrl.u32 %v15717_v17, 16 }
 0x391   : > { %12640 = vmatpush3.bf16.msra.mxu0 %v13025_v53  ;;  %17332 = vst [vmem:[#allocation39_spill] sm:$0xff] %v15772_v10  ;;  %v17333_v53 = vcombine.low %v15327_v45, %v15350_v32  ;;  %v15810_v10 = vld [vmem:[#allocation2 + $0xa0] sm:$0xff]   ;;  %v9139_v13 = vrot.slane %v17336_v61, 1  ;;  %v17338_v45 = vshrl.u32 %v15701_v19, 16 }
 0x393   : > { %12584 = vmatpush3.bf16.msra.mxu1 %v13008_v15  ;;  %v15805_v15 = vpop.f32.mrf.mxu1  ;;  %v9147_v28 = vrot.slane %v17338_v45, 1  ;;  %v9152_v45 = vrot.slane %v17341_v39, 2 }
 0x394   : > { %12554 = vmatmul.mubr.bf16.gmra.mxu0 %v15675_v48  ;;  %12585 = vmatprep.subr.bf16.mxu1 %v13015_v57  ;;  %17334 = vst [vmem:[#allocation40_spill] sm:$0xff] %v15805_v15  ;;  %v17335_v48 = vcombine.low %v15335_v35, %v15344_v27  ;;  %v9134_v35 = vrot.slane %v9132_v21, 1  ;;  %v17337_v27 = vshll.u32 %v15699_v36, 16  ;;  %v9151_v21 = vrot.slane %v17340_v33, 1 }
 0x395   : > { %12557 = vmatprep.mubr.bf16.mxu0 %v15681_v20  ;;  %v15821_v20 = vld [vmem:[#allocation8 + $0x238] sm:$0xff]   ;;  %v9149_v33 = vor.u32 %v9148_v3, %v9147_v28  ;;  %v17344_v28 = vcombine.low %v15353_v62, %v15406_v31 }
 0x396   : > { %12498 = vmatmul.mubr.bf16.gmra.mxu1 %v17333_v53  ;;  %v9135_v53 = vshll.u32 %v15726_v50, 16 }
 0x397   : > { %12501 = vmatprep.mubr.bf16.mxu1 %v17335_v48  ;;  %12586 = vmatpush3.bf16.msra.mxu1 %v13015_v57  ;;  %v9140_v57 = vrot.slane %v17337_v27, 2  ;;  %v12336_v27 = vpop.f32.mrf.mxu0  ;;  %v17127_v48 = vshrl.u32 %v15810_v10, 16 }
 0x398   : > { %12587 = vmatprep.subr.bf16.mxu1 %v13023_v22  ;;  %v9137_v32 = vrot.slane %v9135_v53, 2 }
 0x399   : > { %v12283_v15 = vpop.f32.mrf.mxu1  ;;  %v9141_v50 = vor.u32 %v9140_v57, %v9139_v13  ;;  %v15862_v57 = vsel %vm9130_vm13, %v15603_v40, %v9149_v33 }
 0x39a   : > { %v5958_v36 = vadd.f32 %v12283_v15, %v15712_v42  ;;  %v9138_v53 = vor.u32 %v9137_v32, %v9134_v35  ;;  %v17342_v42 = vshrl.u32 %v15728_v38, 16  ;;  %v9153_v35 = vor.u32 %v9152_v45, %v9151_v21 }
 0x39b   : > { %12588 = vmatpush3.bf16.msra.mxu1 %v13023_v22  ;;  %v5825_v61 = vpop.f32.mrf.mxu1  ;;  %v15843_v4 = vsel %vm9130_vm13, %v9141_v50, %v15603_v40  ;;  %v17343_v22 = vshll.u32 %v15728_v38, 16  ;;  %v17348_v40 = vshrl.u32 %v15751_v59, 16 }
 0x39c   : > { %12558 = vmatmul.mubr.bf16.gmra.mxu0 %v15684_v16  ;;  %12677 = vmatprep.subr.bf16.mxu1 %v15821_v20  ;;  %v9155_v13 = vrot.slane %v17342_v42, 1  ;;  %v5956_v39 = vadd.f32 %v5825_v61, %v15715_v60  ;;  %v15852_v16 = vadd.f32 %v15782_v0, %v5958_v36  ;;  %v15855_v32 = vsel %vm9130_vm13, %v9138_v53, %v9141_v50  ;;  %v6166_v61 = vpop.f32.mrf.mxu0 }
 0x39d   : > { %v9156_v15 = vrot.slane %v17343_v22, 2  ;;  %12561 = vmatprep.mubr.bf16.mxu0 %v15690_v24  ;;  %v12284_v3 = vpop.f32.mrf.mxu1  ;;  %v17345_v24 = vshrl.u32 %v15730_v26, 16  ;;  %v17346_v36 = vshll.u32 %v15730_v26, 16  ;;  %v17347_v50 = vcombine.low %v15397_v63, %v15402_v34 }
 0x39e   : > { %12502 = vmatmul.mubr.bf16.gmra.mxu1 %v17344_v28  ;;  %v5959_v62 = vadd.f32 %v12284_v3, %v15723_v54  ;;  %v15872_v31 = vadd.f32 %v6163_v23, %v5956_v39  ;;  %v15875_v21 = vsel %vm9130_vm13, %v9149_v33, %v9153_v35  ;;  %v9163_v53 = vrot.slane %v17348_v40, 1 }
 0x39f   : > { %v9157_v42 = vor.u32 %v9156_v15, %v9155_v13  ;;  %v9159_v60 = vrot.slane %v17345_v24, 1  ;;  %v9160_v0 = vrot.slane %v17346_v36, 2  ;;  %12505 = vmatprep.mubr.bf16.mxu1 %v17347_v50  ;;  %v5828_v45 = vpop.f32.mrf.mxu1  ;;  %v17350_v15 = vshll.u32 %v15751_v59, 16 }
 0x3a0   : > { %v17351_v34 = vshrl.u32 %v15753_v58, 16  ;;  %v5957_v54 = vadd.f32 %v5828_v45, %v15746_v2  ;;  %v15887_v23 = vadd.f32 %v12336_v27, %v5959_v62  ;;  %v17352_v33 = vshll.u32 %v15753_v58, 16 }
 0x3a1   : > { %v15880_v13 = vsel %vm9130_vm13, %v9153_v35, %v9157_v42  ;;  %v9161_v22 = vor.u32 %v9160_v0, %v9159_v60  ;;  %v9164_v63 = vrot.slane %v17350_v15, 2  ;;  %v17353_v3 = vshrl.u32 %v15758_v56, 16  ;;  %v15900_v15 = vpop.f32.mrf.mxu0 }
 0x3a2   : > { %17349 = vst [vmem:[#allocation41_spill] sm:$0xff] %v15880_v13  ;;  %v9167_v28 = vrot.slane %v17351_v34, 1  ;;  %v9168_v39 = vrot.slane %v17352_v33, 2  ;;  %v17355_v36 = vshll.u32 %v15758_v56, 16  ;;  %v17356_v50 = vshrl.u32 %v15760_v1, 16  ;;  %v5336_v13 = vld [vmem:[%s13383_s7 + $0xcb] sm:$0xff] }
 0x3a3   : > { %v9171_v24 = vrot.slane %v17353_v3, 1  ;;  %v15894_v35 = vsel %vm9130_vm13, %v9157_v42, %v9161_v22  ;;  %v9165_v60 = vor.u32 %v9164_v63, %v9163_v53  ;;  %v15902_v2 = vadd.f32 %v6166_v61, %v5957_v54 }
 0x3a4   : > { %17354 = vst [vmem:[#allocation42_spill] sm:$0xff] %v15894_v35  ;;  %v9172_v0 = vrot.slane %v17355_v36, 2  ;;  %v9175_v40 = vrot.slane %v17356_v50, 1  ;;  %v9169_v27 = vor.u32 %v9168_v39, %v9167_v28  ;;  %v17357_v62 = vshll.u32 %v15760_v1, 16  ;;  %12562 = vmatmul.mubr.bf16.gmra.mxu0 %v15693_v14 }
 0x3a5   : > { %v17358_v34 = vshrl.u32 %v15768_v30, 16  ;;  %v15910_v42 = vsel %vm9130_vm13, %v9161_v22, %v9165_v60  ;;  %v17360_v63 = vshll.u32 %v15768_v30, 16  ;;  %v17361_v36 = vshrl.u32 %v15770_v12, 16  ;;  %12565 = vmatprep.mubr.bf16.mxu0 %v15704_v47 }
 0x3a6   : > { %v9176_v45 = vrot.slane %v17357_v62, 2  ;;  %17359 = vst [vmem:[#allocation43_spill] sm:$0xff] %v15910_v42  ;;  %v9173_v53 = vor.u32 %v9172_v0, %v9171_v24  ;;  %v15918_v28 = vsel %vm9130_vm13, %v9165_v60, %v9169_v27  ;;  %v17363_v39 = vshll.u32 %v15770_v12, 16  ;;  %v13019_v0 = vld [vmem:[#allocation2 + $0xa0] ss:$0 sps:$4 sm:$0x11]  }
 0x3a7   : > { %v9179_v33 = vrot.slane %v17358_v34, 1  ;;  %v9180_v3 = vrot.slane %v17360_v63, 2  ;;  %v9183_v61 = vrot.slane %v17361_v36, 1  ;;  %17362 = vst [vmem:[#allocation44_spill] sm:$0xff] %v15918_v28  ;;  %v17364_v22 = vshrl.u32 %v15778_v5, 16  ;;  %v6179_v36 = vpop.f32.mrf.mxu0 }
 0x3a8   : > { %v9177_v54 = vor.u32 %v9176_v45, %v9175_v40  ;;  %v9184_v14 = vrot.slane %v17363_v39, 2  ;;  %v17365_v24 = vcombine.low %v15420_v46, %v15442_v49  ;;  %v15928_v62 = vsel %vm9130_vm13, %v9169_v27, %v9173_v53 }
 0x3a9   : > { %v9187_v50 = vrot.slane %v17364_v22, 1  ;;  %17366 = vst [vmem:[#allocation45_spill] sm:$0xff] %v15928_v62  ;;  %v9181_v47 = vor.u32 %v9180_v3, %v9179_v33  ;;  %v17367_v60 = vshll.u32 %v15778_v5, 16  ;;  %v17368_v40 = vshrl.u32 %v15780_v11, 16  ;;  %v5321_v22 = vld [vmem:[%s13383_s7 + $0x53] sm:$0xff] }
 0x3aa   : > { %12506 = vmatmul.mubr.bf16.gmra.mxu1 %v17365_v24  ;;  %v17369_v63 = vcombine.low %v15433_v25, %v15451_v43  ;;  %v15938_v46 = vsel %vm9130_vm13, %v9173_v53, %v9177_v54  ;;  %v9185_v49 = vor.u32 %v9184_v14, %v9183_v61  ;;  %v17371_v27 = vshll.u32 %v15780_v11, 16 }
 0x3ab   : > { %v9188_v34 = vrot.slane %v17367_v60, 2  ;;  %v9191_v45 = vrot.slane %v17368_v40, 1  ;;  %17370 = vst [vmem:[#allocation46_spill] sm:$0xff] %v15938_v46  ;;  %v17372_v33 = vshrl.u32 %v15788_v8, 16  ;;  %v15946_v24 = vsel %vm9130_vm13, %v9177_v54, %v9181_v47 }
 0x3ac   : > { %12509 = vmatprep.mubr.bf16.mxu1 %v17369_v63  ;;  %v9192_v39 = vrot.slane %v17371_v27, 2  ;;  %17373 = vst [vmem:[#allocation47_spill] sm:$0xff] %v15946_v24  ;;  %v17374_v25 = vshll.u32 %v15788_v8, 16  ;;  %v17375_v40 = vshrl.u32 %v15795_v52, 16  ;;  %v15953_v53 = vsel %vm9130_vm13, %v9181_v47, %v9185_v49  ;;  %v5324_v24 = vld [vmem:[%s13383_s7 + $0x6b] sm:$0xff] }
 0x3ad   : > { %v9195_v3 = vrot.slane %v17372_v33, 1  ;;  %v9189_v60 = vor.u32 %v9188_v34, %v9187_v50  ;;  %17376 = vst [vmem:[#allocation48_spill] sm:$0xff] %v15953_v53  ;;  %v17377_v14 = vshll.u32 %v15795_v52, 16  ;;  %v9203_v33 = vrot.slane %v17127_v48, 1 }
 0x3ae   : > { %v9196_v43 = vrot.slane %v17374_v25, 2  ;;  %v9199_v63 = vrot.slane %v17375_v40, 1  ;;  %v9193_v61 = vor.u32 %v9192_v39, %v9191_v45  ;;  %v7914_v54 = vshll.u32 %v13019_v0, 16  ;;  %v12340_v45 = vpop.f32.mrf.mxu0  ;;  %v13052_v53 = vld [vmem:[#allocation2 + $0xa8] ss:$0 sps:$4 sm:$0x33]  }
 0x3af   : > { %v9200_v27 = vrot.slane %v17377_v14, 2  ;;  %v15961_v50 = vsel %vm9130_vm13, %v9185_v49, %v9189_v60  ;;  %v17379_v25 = vshll.u32 %v15810_v10, 16  ;;  %v7901_v47 = vsel %vm7769_vm12, %v15706_v51, %v15695_v7 }
 0x3b0   : > { %17378 = vst [vmem:[#allocation49_spill] sm:$0xff] %v15961_v50  ;;  %v9197_v34 = vor.u32 %v9196_v43, %v9195_v3  ;;  %v5364_v39 = vadd.f32 %v15649_v44, %v5321_v22  ;;  %v15970_v14 = vsel %vm9130_vm13, %v9189_v60, %v9193_v61  ;;  %12566 = vmatmul.mubr.bf16.gmra.mxu0 %v7901_v47  ;;  %v7910_v49 = vshrl.u32 %v15670_v41, 16  ;;  %v12287_v3 = vpop.f32.mrf.mxu1  ;;  %v5322_v43 = vld [vmem:[%s13383_s7 + $0x5b] sm:$0xff]  ;;  %v6182_v47 = vpop.f32.mrf.mxu0 }
 0x3b1   : > { %v9204_v40 = vrot.slane %v17379_v25, 2  ;;  %17380 = vst [vmem:[#allocation50_spill] sm:$0xff] %v15970_v14  ;;  %v9201_v48 = vor.u32 %v9200_v27, %v9199_v63  ;;  %v7909_v0 = vsel %vm7769_vm12, %v15741_v29, %v15743_v18  ;;  %v5962_v51 = vadd.f32 %v12287_v3, %v15749_v6  ;;  %v8197_v22 = vld [vmem:[#allocation2 + $0x18] sm:$0xf] }
 0x3b2   : > { %v15978_v25 = vsel %vm9130_vm13, %v9193_v61, %v9197_v34  ;;  %12569 = vmatprep.mubr.bf16.mxu0 %v7909_v0  ;;  %v5367_v60 = vadd.f32 %v15649_v44, %v5324_v24  ;;  %v17383_v29 = vcombine.low %v15463_v9, %v15491_v55  ;;  %v7912_v41 = vor.u32 %v7910_v49, %v15743_v18  ;;  %v5841_v27 = vpop.f32.mrf.mxu1  ;;  %v17387_v9 = vld [vmem:[#allocation35_spill] sm:$0xff]  ;;  %v17388_v18 = vld [vmem:[#allocation34_spill] sm:$0xff] }
 0x3b3   : > { %17381 = vst [vmem:[#allocation51_spill] sm:$0xff] %v15978_v25  ;;  %v15980_v7 = vor.u32 %v9204_v40, %v9203_v33  ;;  %v15985_v63 = vsel %vm9130_vm13, %v9197_v34, %v9201_v48  ;;  %v17385_v33 = vld [vmem:[#allocation25_spill] sm:$0xff]  ;;  %v7916_v40 = vrot.slane %v7914_v54, 1  ;;  %v5960_v24 = vadd.f32 %v5841_v27, %v5364_v39  ;;  %v12343_v39 = vpop.f32.mrf.mxu0 }
 0x3b4   : > { %17382 = vst [vmem:[#allocation52_spill] sm:$0xff] %v15985_v63  ;;  %12510 = vmatmul.mubr.bf16.gmra.mxu1 %v17383_v29  ;;  %v17386_v6 = vcombine.low %v15483_v37, %v17385_v33  ;;  %v5365_v34 = vadd.f32 %v15649_v44, %v5322_v43  ;;  %v16000_v0 = vadd.f32 %v15900_v15, %v5962_v51  ;;  %v8794_v55 = vrot.slane %v17387_v9, 1  ;;  %v12288_v3 = vpop.f32.mrf.mxu1 }
 0x3b5   : > { %v15993_v61 = vsel %vm9130_vm13, %v9201_v48, %v15980_v7  ;;  %v11130_v49 = vcombine.low %v8197_v22, %v17388_v18  ;;  %v5963_v48 = vadd.f32 %v12288_v3, %v5367_v60  ;;  %v16004_v29 = vadd.f32 %v6179_v36, %v5960_v24  ;;  %v17390_v60 = vld [vmem:[#allocation26_spill] sm:$0xff]  ;;  %v17391_v36 = vld [vmem:[#allocation31_spill] sm:$0xff] }
 0x3b6   : > { %17384 = vst [vmem:[#allocation53_spill] sm:$0xff] %v15993_v61  ;;  %12513 = vmatprep.mubr.bf16.mxu1 %v17386_v6  ;;  %v17389_v61 = vld [vmem:[#allocation36_spill] sm:$0xff]  ;;  %v5844_v33 = vpop.f32.mrf.mxu1  ;;  %v7917_v54 = vsel %vm7769_vm12, %v7912_v41, %v7916_v40  ;;  %v17392_v6 = vcombine.low %v17390_v60, %v17391_v36  ;;  %v17394_v24 = vld [vmem:[#allocation30_spill] sm:$0xff]  ;;  %v6195_v41 = vpop.f32.mrf.mxu0  ;;  %v8798_v40 = vrot.slane %v15701_v19, 1  ;;  %v9208_v46 = vshrl.u32 %v13052_v53, 16 }
 0x3b7   : > { %v8793_v37 = vrot.slane %v17389_v61, 1  ;;  %v5961_v27 = vadd.f32 %v5844_v33, %v5365_v34  ;;  %v16008_v43 = vadd.f32 %v12340_v45, %v5963_v48  ;;  %v8347_v51 = vshll.u32 %v11130_v49, 16  ;;  %v17393_v61 = vld [vmem:[#allocation29_spill] sm:$0xff]  ;;  %v17399_v36 = vld [vmem:[#allocation32_spill] sm:$0xff] }
 0x3b8   : > { %12570 = vmatmul.mubr.bf16.gmra.mxu0 %v7917_v54  ;;  %v17395_v18 = vcombine.low %v17393_v61, %v17394_v24  ;;  %v17396_v34 = vld [vmem:[#allocation33_spill] sm:$0xff]  ;;  %v8345_v48 = vshrl.u32 %v11130_v49, 16  ;;  %v12344_v54 = vpop.f32.mrf.mxu0  ;;  %v9211_v62 = vshll.u32 %v13052_v53, 16 }
 0x3b9   : > { %v8795_v15 = vsel %vm8792_vm14, %v8793_v37, %v8794_v55  ;;  %v16011_v22 = vadd.f32 %v6182_v47, %v5961_v27  ;;  %v8349_v45 = vrot.slane %v8347_v51, 1  ;;  %v8796_v3 = vrot.slane %v17396_v34, 1  ;;  %v5327_v60 = vld [vmem:[%s13383_s7 + $0x83] sm:$0xff]  ;;  %v5325_v61 = vld [vmem:[%s13383_s7 + $0x73] sm:$0xff] }
 0x3ba   : > { %12641 = vmatprep.mubr.bf16.mxu0 %v8795_v15  ;;  %v17397_v37 = vshll.u32 %v17387_v9, 16  ;;  %v17398_v51 = vld [vmem:[#allocation27_spill] sm:$0xff]  ;;  %v5370_v24 = vadd.f32 %v15649_v44, %v5327_v60  ;;  %v17404_v14 = vshrl.u32 %v17396_v34, 16 }
 0x3bb   : > { %v8797_v33 = vsel %vm8792_vm14, %v8794_v55, %v8796_v3  ;;  %v8350_v27 = vor.u32 %v8349_v45, %v8345_v48  ;;  %v8799_v15 = vsel %vm8792_vm14, %v8796_v3, %v8798_v40  ;;  %v17401_v55 = vshll.u32 %v17396_v34, 16  ;;  %v5328_v48 = vld [vmem:[%s13383_s7 + $0x8b] sm:$0xff] }
 0x3bc   : > { %12514 = vmatmul.mubr.bf16.gmra.mxu1 %v17392_v6  ;;  %v8354_v47 = vrot.slane %v17397_v37, 1  ;;  %v17400_v6 = vcombine.low %v17398_v51, %v17399_v36  ;;  %v8802_v3 = vrot.slane %v15728_v38, 1  ;;  %v17402_v37 = vshrl.u32 %v17387_v9, 16 }
 0x3bd   : > { %12517 = vmatprep.mubr.bf16.mxu1 %v17395_v18  ;;  %v6198_v18 = vpop.f32.mrf.mxu0  ;;  %v8362_v45 = vrot.slane %v17401_v55, 1  ;;  %v8800_v51 = vrot.slane %v15717_v17, 1  ;;  %v5371_v63 = vadd.f32 %v15649_v44, %v5328_v48 }
 0x3be   : > { %v8355_v49 = vsel %vm7769_vm12, %v8350_v27, %v8354_v47  ;;  %v17403_v27 = vshll.u32 %v15701_v19, 16 }
 0x3bf   : > { %v8801_v55 = vsel %vm8792_vm14, %v8798_v40, %v8800_v51  ;;  %v8366_v9 = vor.u32 %v17404_v14, %v8362_v45 }
 0x3c0   : > { %12642 = vmatmul.mubr.bf16.vlgmr.msra.gmra.mxu0 %v8797_v33  ;;  %v8358_v33 = vor.u32 %v17402_v37, %v8354_v47  ;;  %v13032_v37 = vld [vmem:[#allocation8 + $0x230] sm:$0xff]  }
 0x3c1   : > { %12645 = vmatprep.mubr.bf16.mxu0 %v8799_v15  ;;  %v5368_v15 = vadd.f32 %v15649_v44, %v5325_v61  ;;  %v8803_v61 = vsel %vm8792_vm14, %v8800_v51, %v8802_v3 }
 0x3c2   : > { %v12291_v36 = vpop.f32.mrf.mxu1  ;;  %v16044_v25 = vpop.f32.mrf.mxu0  ;;  %v8363_v50 = vsel %vm7769_vm12, %v8358_v33, %v8362_v45 }
 0x3c3   : > { %v5966_v60 = vadd.f32 %v12291_v36, %v5370_v24 }
 0x3c4   : > { %12518 = vmatmul.mubr.bf16.gmra.mxu1 %v17400_v6  ;;  %v8370_v6 = vrot.slane %v17403_v27, 1  ;;  %v5857_v47 = vpop.f32.mrf.mxu1  ;;  %v16052_v48 = vpop.f32.mrf.mxu0 }
 0x3c5   : > { %12589 = vmatprep.mubr.bf16.mxu1 %v8355_v49  ;;  %v5326_v49 = vld [vmem:[%s13383_s7 + $0x7b] sm:$0xff]  ;;  %v5964_v27 = vadd.f32 %v5857_v47, %v5368_v15  ;;  %v16054_v36 = vadd.f32 %v12343_v39, %v5966_v60  ;;  %v5331_v15 = vld [vmem:[%s13383_s7 + $0xa3] sm:$0xff] }
 0x3c6   : > { %v5369_v24 = vadd.f32 %v15649_v44, %v5326_v49  ;;  %v8371_v40 = vsel %vm7769_vm12, %v8366_v9, %v8370_v6  ;;  %v12292_v14 = vpop.f32.mrf.mxu1  ;;  %v16058_v51 = vpop.f32.mrf.mxu0  ;;  %v17405_v49 = vshll.u32 %v15717_v17, 16  ;;  %v13035_v39 = vld [vmem:[#allocation8 + $0x228] sm:$0xff]   ;;  %v17406_v9 = vshrl.u32 %v15701_v19, 16 }
 0x3c7   : > { %v5967_v34 = vadd.f32 %v12292_v14, %v5371_v63  ;;  %v16060_v45 = vadd.f32 %v6195_v41, %v5964_v27  ;;  %v8804_v41 = vrot.slane %v15730_v26, 1  ;;  %v5374_v14 = vadd.f32 %v15649_v44, %v5331_v15 }
 0x3c8   : > { %12646 = vmatmul.mubr.bf16.gmra.mxu0 %v8801_v55  ;;  %v5860_v33 = vpop.f32.mrf.mxu1  ;;  %v8378_v55 = vrot.slane %v17405_v49, 1  ;;  %v16068_v63 = vpop.f32.mrf.mxu0  ;;  %v17408_v19 = vshrl.u32 %v15717_v17, 16 }
 0x3c9   : > { %12649 = vmatprep.mubr.bf16.mxu0 %v8803_v61  ;;  %v5965_v60 = vadd.f32 %v5860_v33, %v5369_v24  ;;  %v16071_v47 = vadd.f32 %v12344_v54, %v5967_v34  ;;  %v17407_v61 = vshll.u32 %v15728_v38, 16  ;;  %v8805_v49 = vsel %vm8792_vm14, %v8802_v3, %v8804_v41  ;;  %v5332_v33 = vld [vmem:[%s13383_s7 + $0xab] sm:$0xff]  ;;  %v5330_v34 = vld [vmem:[%s13383_s7 + $0x9b] sm:$0xff] }
 0x3cb   : > { %v8386_v27 = vrot.slane %v17407_v61, 1  ;;  %v16078_v24 = vadd.f32 %v6198_v18, %v5965_v60  ;;  %v13038_v61 = vld [vmem:[#allocation8 + $0x220] sm:$0xff]  }
 0x3cc   : > { %12590 = vmatmul.mubr.bf16.vlgmr.msra.gmra.mxu1 %v8363_v50  ;;  %v8806_v50 = vrot.slane %v15751_v59, 1 }
 0x3cd   : > { %12593 = vmatprep.mubr.bf16.mxu1 %v8371_v40  ;;  %12678 = vmatpush3.bf16.msra.mxu1 %v15821_v20  ;;  %v8374_v20 = vor.u32 %v17406_v9, %v8370_v6  ;;  %v5329_v40 = vld [vmem:[%s13383_s7 + $0x93] sm:$0xff]  ;;  %v8382_v6 = vor.u32 %v17408_v19, %v8378_v55  ;;  %v16083_v9 = vpop.f32.mrf.mxu0  ;;  %v5335_v19 = vld [vmem:[%s13383_s7 + $0xc3] sm:$0xff] }
 0x3ce   : > { %12679 = vmatprep.subr.bf16.mxu1 %v13032_v37  ;;  %v8807_v54 = vsel %vm8792_vm14, %v8804_v41, %v8806_v50  ;;  %v12295_v18 = vpop.f32.mrf.mxu1  ;;  %v5373_v41 = vadd.f32 %v15649_v44, %v5330_v34 }
 0x3cf   : > { %v8379_v15 = vsel %vm7769_vm12, %v8374_v20, %v8378_v55  ;;  %v8387_v17 = vsel %vm7769_vm12, %v8382_v6, %v8386_v27  ;;  %v16090_v3 = vpop.f32.mrf.mxu0  ;;  %v5970_v60 = vadd.f32 %v12295_v18, %v5374_v14  ;;  %v17410_v6 = vshll.u32 %v15730_v26, 16 }
 0x3d0   : > { %12650 = vmatmul.mubr.bf16.gmra.mxu0 %v8805_v49  ;;  %v5375_v49 = vadd.f32 %v15649_v44, %v5332_v33  ;;  %v5873_v55 = vpop.f32.mrf.mxu1  ;;  %v8808_v14 = vrot.slane %v15753_v58, 1  ;;  %v8810_v18 = vrot.slane %v15758_v56, 1  ;;  %v13042_v33 = vld [vmem:[#allocation8 + $0x218] sm:$0xff]  }
 0x3d1   : > { %12680 = vmatpush3.bf16.msra.mxu1 %v13032_v37  ;;  %v5372_v37 = vadd.f32 %v15649_v44, %v5329_v40  ;;  %12653 = vmatprep.mubr.bf16.mxu0 %v8807_v54  ;;  %v16095_v20 = vpop.f32.mrf.mxu0  ;;  %v17409_v40 = vshrl.u32 %v15728_v38, 16  ;;  %v5378_v38 = vadd.f32 %v15649_v44, %v5335_v19 }
 0x3d2   : > { %12681 = vmatprep.subr.bf16.mxu1 %v13035_v39  ;;  %v12296_v28 = vpop.f32.mrf.mxu1  ;;  %v8809_v42 = vsel %vm8792_vm14, %v8806_v50, %v8808_v14  ;;  %v8811_v50 = vsel %vm8792_vm14, %v8808_v14, %v8810_v18 }
 0x3d3   : > { %v8390_v54 = vor.u32 %v17409_v40, %v8386_v27  ;;  %v5968_v34 = vadd.f32 %v5873_v55, %v5372_v37  ;;  %v17412_v27 = vshll.u32 %v15751_v59, 16  ;;  %v5971_v35 = vadd.f32 %v12296_v28, %v5375_v49  ;;  %v13046_v28 = vld [vmem:[#allocation8 + $0x210] sm:$0xff]  }
 0x3d4   : > { %12594 = vmatmul.mubr.bf16.gmra.mxu1 %v8379_v15  ;;  %v8394_v15 = vrot.slane %v17410_v6, 1  ;;  %v16110_v6 = vpop.f32.mrf.mxu0  ;;  %v5876_v53 = vpop.f32.mrf.mxu1  ;;  %v17413_v55 = vshrl.u32 %v15730_v26, 16 }
 0x3d5   : > { %12597 = vmatprep.mubr.bf16.mxu1 %v8387_v17  ;;  %12682 = vmatpush3.bf16.msra.mxu1 %v13035_v39  ;;  %v5333_v17 = vld [vmem:[%s13383_s7 + $0xb3] sm:$0xff]  ;;  %v16105_v39 = vadd.f32 %v16044_v25, %v5970_v60  ;;  %v8402_v40 = vrot.slane %v17412_v27, 1  ;;  %v16115_v37 = vadd.f32 %v16052_v48, %v5968_v34  ;;  %v9210_v25 = vrot.slane %v9208_v46, 1  ;;  %v5334_v46 = vld [vmem:[%s13383_s7 + $0xbb] sm:$0xff] }
 0x3d6   : > { %12683 = vmatprep.subr.bf16.mxu1 %v13038_v61  ;;  %v9213_v60 = vrot.slane %v9211_v62, 2  ;;  %v8398_v19 = vor.u32 %v17413_v55, %v8394_v15  ;;  %v16120_v27 = vpop.f32.mrf.mxu0  ;;  %v5969_v49 = vadd.f32 %v5876_v53, %v5373_v41  ;;  %v16126_v62 = vadd.f32 %v16058_v51, %v5971_v35  ;;  %v12299_v48 = vpop.f32.mrf.mxu1 }
 0x3d7   : > { %17411 = vst [vmem:[#allocation54_spill] sm:$0xff] %v16105_v39  ;;  %v5376_v39 = vadd.f32 %v15649_v44, %v5333_v17  ;;  %v5974_v14 = vadd.f32 %v12299_v48, %v5378_v38  ;;  %v8814_v38 = vrot.slane %v15768_v30, 1  ;;  %v17416_v53 = vshrl.u32 %v15751_v59, 16 }
 0x3d8   : > { %12654 = vmatmul.mubr.bf16.gmra.mxu0 %v8809_v42  ;;  %v9214_v26 = vor.u32 %v9213_v60, %v9210_v25  ;;  %v8403_v34 = vsel %vm7769_vm12, %v8398_v19, %v8402_v40  ;;  %v5379_v42 = vadd.f32 %v15649_v44, %v5336_v13  ;;  %v16130_v17 = vpop.f32.mrf.mxu0  ;;  %v16133_v41 = vadd.f32 %v16068_v63, %v5969_v49  ;;  %v5889_v51 = vpop.f32.mrf.mxu1 }
 0x3d9   : > { %12684 = vmatpush3.bf16.msra.mxu1 %v13038_v61  ;;  %v8395_v61 = vsel %vm7769_vm12, %v8390_v54, %v8394_v15  ;;  %12657 = vmatprep.mubr.bf16.mxu0 %v8811_v50  ;;  %v5377_v54 = vadd.f32 %v15649_v44, %v5334_v46  ;;  %v5339_v15 = vld [vmem:[%s13383_s7 + $0xe3] sm:$0xff]  ;;  %v17415_v13 = vshll.u32 %v15753_v58, 16  ;;  %v5972_v63 = vadd.f32 %v5889_v51, %v5376_v39  ;;  %v5337_v46 = vld [vmem:[%s13383_s7 + $0xd3] sm:$0xff]  ;;  %v5340_v51 = vld [vmem:[%s13383_s7 + $0xeb] sm:$0xff] }
 0x3da   : > { %12685 = vmatprep.subr.bf16.mxu1 %v13042_v33  ;;  %v16137_v35 = vsel %vm9130_vm13, %v15980_v7, %v9214_v26  ;;  %v16141_v25 = vpop.f32.mrf.mxu0  ;;  %v8406_v55 = vor.u32 %v17416_v53, %v8402_v40  ;;  %v8812_v7 = vrot.slane %v15760_v1, 1  ;;  %v16150_v19 = vadd.f32 %v16083_v9, %v5974_v14  ;;  %v12300_v50 = vpop.f32.mrf.mxu1 }
 0x3db   : > { %17414 = vst [vmem:[#allocation55_spill] sm:$0xff] %v16137_v35  ;;  %v8410_v60 = vrot.slane %v17415_v13, 1  ;;  %v17417_v49 = vshll.u32 %v15758_v56, 16  ;;  %v5975_v48 = vadd.f32 %v12300_v50, %v5379_v42  ;;  %v16160_v59 = vadd.f32 %v16090_v3, %v5972_v63  ;;  %v13050_v42 = vld [vmem:[#allocation8 + $0x200] sm:$0xff]   ;;  %v5338_v3 = vld [vmem:[%s13383_s7 + $0xdb] sm:$0xff] }
 0x3dc   : > { %12598 = vmatmul.mubr.bf16.gmra.mxu1 %v8395_v61  ;;  %v16155_v26 = vpop.f32.mrf.mxu0  ;;  %v8813_v39 = vsel %vm8792_vm14, %v8810_v18, %v8812_v7  ;;  %v5892_v40 = vpop.f32.mrf.mxu1  ;;  %v17418_v9 = vshrl.u32 %v15753_v58, 16  ;;  %v8815_v53 = vsel %vm8792_vm14, %v8812_v7, %v8814_v38  ;;  %v5380_v18 = vadd.f32 %v15649_v44, %v5337_v46 }
 0x3dd   : > { %12601 = vmatprep.mubr.bf16.mxu1 %v8403_v34  ;;  %12686 = vmatpush3.bf16.msra.mxu1 %v13042_v33  ;;  %v13049_v33 = vld [vmem:[#allocation8 + $0x208] sm:$0xff]   ;;  %v8418_v61 = vrot.slane %v17417_v49, 1  ;;  %v5382_v34 = vadd.f32 %v15649_v44, %v5339_v15  ;;  %v5973_v15 = vadd.f32 %v5892_v40, %v5377_v54  ;;  %v8411_v50 = vsel %vm7769_vm12, %v8406_v55, %v8410_v60 }
 0x3de   : > { %12687 = vmatprep.subr.bf16.mxu1 %v13046_v28  ;;  %v8414_v14 = vor.u32 %v17418_v9, %v8410_v60  ;;  %v16165_v13 = vpop.f32.mrf.mxu0  ;;  %v12303_v58 = vpop.f32.mrf.mxu1  ;;  %v5383_v54 = vadd.f32 %v15649_v44, %v5340_v51  ;;  %v5381_v46 = vadd.f32 %v15649_v44, %v5338_v3  ;;  %v8818_v9 = vrot.slane %v15778_v5, 1  ;;  %v5341_v3 = vld [vmem:[%s13383_s7 + $0xf3] sm:$0xff] }
 0x3df   : > { %v5978_v7 = vadd.f32 %v12303_v58, %v5382_v34  ;;  %v16179_v60 = vadd.f32 %v16110_v6, %v5973_v15  ;;  %v8816_v6 = vrot.slane %v15770_v12, 1  ;;  %v17421_v15 = vshll.u32 %v15768_v30, 16 }
 0x3e0   : > { %12658 = vmatmul.mubr.bf16.gmra.mxu0 %v8813_v39  ;;  %v8419_v63 = vsel %vm7769_vm12, %v8414_v14, %v8418_v61  ;;  %v16175_v49 = vpop.f32.mrf.mxu0  ;;  %v5905_v55 = vpop.f32.mrf.mxu1  ;;  %v17419_v39 = vshll.u32 %v15760_v1, 16  ;;  %v17420_v14 = vshrl.u32 %v15758_v56, 16 }
 0x3e1   : > { %12688 = vmatpush3.bf16.msra.mxu1 %v13046_v28  ;;  %12661 = vmatprep.mubr.bf16.mxu0 %v8815_v53  ;;  %v16172_v28 = vadd.f32 %v16095_v20, %v5975_v48  ;;  %v5343_v20 = vld [vmem:[%s13383_s7 + $0x103] sm:$0xff]  ;;  %v5976_v34 = vadd.f32 %v5905_v55, %v5380_v18  ;;  %v16192_v51 = vadd.f32 %v16120_v27, %v5978_v7  ;;  %v17422_v27 = vshrl.u32 %v15760_v1, 16  ;;  %v5344_v55 = vld [vmem:[%s13383_s7 + $0x10b] sm:$0xff] }
 0x3e2   : > { %12689 = vmatprep.subr.bf16.mxu1 %v13049_v33  ;;  %v16183_v48 = vpop.f32.mrf.mxu0  ;;  %v8426_v40 = vrot.slane %v17419_v39, 1  ;;  %v12304_v53 = vpop.f32.mrf.mxu1  ;;  %v5386_v39 = vadd.f32 %v15649_v44, %v5343_v20  ;;  %v8817_v18 = vsel %vm8792_vm14, %v8814_v38, %v8816_v6  ;;  %v5384_v38 = vadd.f32 %v15649_v44, %v5341_v3 }
 0x3e3   : > { %v16202_v56 = vadd.f32 %v16130_v17, %v5976_v34 }
 0x3e4   : > { %12602 = vmatmul.mubr.bf16.gmra.mxu1 %v8411_v50  ;;  %v8434_v50 = vrot.slane %v17421_v15, 1  ;;  %v16197_v58 = vpop.f32.mrf.mxu0  ;;  %v8430_v7 = vor.u32 %v17422_v27, %v8426_v40  ;;  %v8819_v15 = vsel %vm8792_vm14, %v8816_v6, %v8818_v9  ;;  %v17425_v27 = vshrl.u32 %v15768_v30, 16 }
 0x3e5   : > { %12605 = vmatprep.mubr.bf16.mxu1 %v8419_v63  ;;  %12690 = vmatpush3.bf16.msra.mxu1 %v13049_v33  ;;  %v8422_v33 = vor.u32 %v17420_v14, %v8418_v61  ;;  %v5979_v63 = vadd.f32 %v12304_v53, %v5383_v54  ;;  %v5908_v61 = vpop.f32.mrf.mxu1 }
 0x3e6   : > { %12691 = vmatprep.subr.bf16.mxu1 %v13050_v42  ;;  %v16207_v14 = vpop.f32.mrf.mxu0  ;;  %v5977_v35 = vadd.f32 %v5908_v61, %v5381_v46  ;;  %v8435_v1 = vsel %vm7769_vm12, %v8430_v7, %v8434_v50  ;;  %v13055_v46 = vld [vmem:[%s17072_s4] ss:$0 sm:$0xff]  ;;  %v8438_v7 = vor.u32 %v17425_v27, %v8434_v50  ;;  %v17429_v50 = vshrl.u32 %v15770_v12, 16 }
 0x3e7   : > { %v8427_v54 = vsel %vm7769_vm12, %v8422_v33, %v8426_v40  ;;  %v16214_v17 = vadd.f32 %v16141_v25, %v5979_v63  ;;  %v12307_v20 = vpop.f32.mrf.mxu1  ;;  %v5387_v40 = vadd.f32 %v13055_v46, %v5344_v55  ;;  %v5347_v25 = vld [vmem:[%s13383_s7 + $0x123] sm:$0xff]  ;;  %v17424_v63 = vshll.u32 %v15770_v12, 16  ;;  %v5346_v12 = vld [vmem:[%s13383_s7 + $0x11b] sm:$0xff] }
 0x3e8   : > { %12662 = vmatmul.mubr.bf16.gmra.mxu0 %v8817_v18  ;;  %v6275_v34 = vpop.f32.mrf.mxu0  ;;  %v5982_v53 = vadd.f32 %v12307_v20, %v5386_v39  ;;  %v16221_v44 = vadd.f32 %v16155_v26, %v5977_v35  ;;  %v8822_v39 = vrot.slane %v15788_v8, 1  ;;  %v17427_v26 = vshll.u32 %v15778_v5, 16 }
 0x3e9   : > { %12692 = vmatpush3.bf16.msra.mxu1 %v13050_v42  ;;  %12665 = vmatprep.mubr.bf16.mxu0 %v8819_v15  ;;  %v5342_v42 = vld [vmem:[%s13383_s7 + $0xfb] sm:$0xff]  ;;  %v5921_v33 = vpop.f32.mrf.mxu1  ;;  %v8442_v18 = vrot.slane %v17424_v63, 1  ;;  %v8820_v15 = vrot.slane %v15780_v11, 1  ;;  %v5390_v63 = vadd.f32 %v13055_v46, %v5347_v25 }
 0x3ea   : > { %17423 = vst [vmem:[#allocation56_spill] sm:$0xff] %v16221_v44  ;;  %v5385_v6 = vadd.f32 %v13055_v46, %v5342_v42  ;;  %v12364_v3 = vpop.f32.mrf.mxu0  ;;  %v5980_v61 = vadd.f32 %v5921_v33, %v5384_v38  ;;  %v16231_v55 = vadd.f32 %v16165_v13, %v5982_v53  ;;  %v5345_v42 = vld [vmem:[%s13383_s7 + $0x113] sm:$0xff]  ;;  %v5348_v13 = vld [vmem:[%s13383_s7 + $0x12b] sm:$0xff] }
 0x3eb   : > { %v12308_v35 = vpop.f32.mrf.mxu1  ;;  %v8821_v44 = vsel %vm8792_vm14, %v8818_v9, %v8820_v15  ;;  %v8446_v33 = vor.u32 %v17429_v50, %v8442_v18  ;;  %v8823_v27 = vsel %vm8792_vm14, %v8820_v15, %v8822_v39  ;;  %v5388_v25 = vadd.f32 %v13055_v46, %v5345_v42 }
 0x3ec   : > { %12606 = vmatmul.mubr.bf16.gmra.mxu1 %v8427_v54  ;;  %17426 = vst [vmem:[#allocation57_spill] sm:$0xff] %v16231_v55  ;;  %v8450_v54 = vrot.slane %v17427_v26, 1  ;;  %v6278_v20 = vpop.f32.mrf.mxu0  ;;  %v16238_v38 = vadd.f32 %v16175_v49, %v5980_v61 }
 0x3ed   : > { %12609 = vmatprep.mubr.bf16.mxu1 %v8435_v1  ;;  %v5983_v1 = vadd.f32 %v12308_v35, %v5387_v40  ;;  %v5924_v30 = vpop.f32.mrf.mxu1  ;;  %v8443_v40 = vsel %vm7769_vm12, %v8438_v7, %v8442_v18  ;;  %v17432_v7 = vshll.u32 %v15780_v11, 16 }
 0x3ee   : > { %17428 = vst [vmem:[#allocation58_spill] sm:$0xff] %v16238_v38  ;;  %v12435_v53 = vpop.f32.mrf.mxu0  ;;  %v5981_v26 = vadd.f32 %v5924_v30, %v5385_v6  ;;  %v8451_v61 = vsel %vm7769_vm12, %v8446_v33, %v8450_v54  ;;  %v5314_v6 = vld [vmem:[%s13383_s7 + $0x1b] sm:$0xff]  ;;  %v5389_v33 = vadd.f32 %v13055_v46, %v5346_v12  ;;  %v17435_v12 = vshrl.u32 %v15780_v11, 16  ;;  %s17021_s7 = scalar_lea.hbm %s17073_s5, %s11216_s13 }
 0x3ef   : > { %v16246_v9 = vadd.f32 %v16183_v48, %v5983_v1  ;;  %v12311_v49 = vpop.f32.mrf.mxu1  ;;  %v8458_v42 = vrot.slane %v17432_v7, 1  ;;  %v8824_v48 = vrot.slane %v15795_v52, 1  ;;  %v8826_v1 = vrot.slane %v15810_v10, 1 }
 0x3f0   : > { %12666 = vmatmul.mubr.bf16.gmra.mxu0 %v8821_v44  ;;  %v7129_v35 = vpop.f32.mrf.mxu0  ;;  %v5986_v50 = vadd.f32 %v12311_v49, %v5390_v63  ;;  %v5391_v44 = vadd.f32 %v13055_v46, %v5348_v13  ;;  %v16251_v38 = vadd.f32 %v16197_v58, %v5981_v26  ;;  %v17434_v26 = vshll.u32 %v15788_v8, 16 }
 0x3f1   : > { %12669 = vmatprep.mubr.bf16.mxu0 %v8823_v27  ;;  %17430 = vst [vmem:[#allocation59_spill] sm:$0xff] %v16246_v9  ;;  %v5937_v15 = vpop.f32.mrf.mxu1  ;;  %v17433_v27 = vshrl.u32 %v15778_v5, 16  ;;  %v8825_v7 = vsel %vm8792_vm14, %v8822_v39, %v8824_v48  ;;  %v13051_v9 = vld [vmem:[#allocation2 + $0xa8] ss:$0 sps:$4 sm:$0x11]   ;;  %v8462_v5 = vor.u32 %v17435_v12, %v8458_v42 }
 0x3f2   : > { %17431 = vst [vmem:[#allocation60_spill] sm:$0xff] %v16251_v38  ;;  %v12436_v18 = vpop.f32.mrf.mxu0  ;;  %v5984_v30 = vadd.f32 %v5937_v15, %v5388_v25  ;;  %v16261_v13 = vadd.f32 %v16207_v14, %v5986_v50  ;;  %v8827_v14 = vsel %vm8792_vm14, %v8824_v48, %v8826_v1 }
 0x3f3   : > { %v8454_v63 = vor.u32 %v17433_v27, %v8450_v54  ;;  %v12312_v58 = vpop.f32.mrf.mxu1  ;;  %v8828_v27 = vrot.slane %v13051_v9, 1 }
 0x3f4   : > { %12610 = vmatmul.mubr.bf16.gmra.mxu1 %v8443_v40  ;;  %v8466_v40 = vrot.slane %v17434_v26, 1  ;;  %v7132_v49 = vpop.f32.mrf.mxu0  ;;  %v5987_v38 = vadd.f32 %v12312_v58, %v5391_v44  ;;  %v16266_v55 = vadd.f32 %v6275_v34, %v5984_v30  ;;  %v17437_v30 = vld [vmem:[#allocation40_spill] sm:$0xff]  ;;  %v17438_v26 = vld [vmem:[#allocation37_spill] sm:$0xff] }
 0x3f5   : > { %12613 = vmatprep.mubr.bf16.mxu1 %v8451_v61  ;;  %v5357_v61 = vadd.f32 %v13055_v46, %v5314_v6  ;;  %v5940_v25 = vpop.f32.mrf.mxu1  ;;  %v8459_v15 = vsel %vm7769_vm12, %v8454_v63, %v8458_v42  ;;  %v17436_v6 = vshll.u32 %v15795_v52, 16  ;;  %v17439_v63 = vld [vmem:[#allocation28_spill] sm:$0xff]  ;;  %v8829_v12 = vsel %vm8792_vm14, %v8826_v1, %v8828_v27 }
 0x3f6   : > { %v12439_v54 = vpop.f32.mrf.mxu0  ;;  %v5985_v50 = vadd.f32 %v5940_v25, %v5389_v33  ;;  %v16272_v46 = vadd.f32 %v12364_v3, %v5987_v38  ;;  %v8467_v34 = vsel %vm7769_vm12, %v8462_v5, %v8466_v40  ;;  %v17440_v38 = vshrl.u32 %v15788_v8, 16 }
 0x3f7   : > { %v12383_v44 = vpop.f32.mrf.mxu1  ;;  %v8474_v11 = vrot.slane %v17436_v6, 1  ;;  %v5953_v58 = vadd.f32 %v17437_v30, %v5357_v61  ;;  %v17444_v30 = vld [vmem:[#allocation38_spill] sm:$0xff] }
 0x3f8   : > { %12670 = vmatmul.mubr.bf16.gmra.mxu0 %v8825_v7  ;;  %v7145_v39 = vpop.f32.mrf.mxu0  ;;  %v6678_v7 = vadd.f32 %v12383_v44, %v17438_v26  ;;  %v16279_v48 = vadd.f32 %v6278_v20, %v5985_v50  ;;  %v8470_v25 = vor.u32 %v17440_v38, %v8466_v40  ;;  %v17442_v44 = vshll.u32 %v15810_v10, 16  ;;  %v17443_v50 = vld [vmem:[#allocation39_spill] sm:$0xff] }
 0x3f9   : > { %12673 = vmatprep.mubr.bf16.mxu0 %v8827_v14  ;;  %v6533_v42 = vpop.f32.mrf.mxu1  ;;  %v6291_v26 = vadd.f32 %v17444_v30, %v5953_v58 }
 0x3fa   : > { %v12440_v33 = vpop.f32.mrf.mxu0  ;;  %v6676_v3 = vadd.f32 %v6533_v42, %v17439_v63  ;;  %v16285_v5 = vadd.f32 %v12435_v53, %v6678_v7  ;;  %v8488_v42 = vshll.u32 %v13051_v9, 16  ;;  %v8475_v1 = vsel %vm7769_vm12, %v8470_v25, %v8474_v11 }
 0x3fb   : > { %v12384_v14 = vpop.f32.mrf.mxu1  ;;  %v17445_v9 = vshrl.u32 %v15810_v10, 16 }
 0x3fc   : > { %12614 = vmatmul.mubr.bf16.gmra.mxu1 %v8459_v15  ;;  %v17441_v15 = vshrl.u32 %v15795_v52, 16  ;;  %v7148_v20 = vpop.f32.mrf.mxu0  ;;  %v6679_v6 = vadd.f32 %v12384_v14, %v17443_v50  ;;  %v16293_v63 = vadd.f32 %v7129_v35, %v6676_v3  ;;  %v8490_v58 = vrot.slane %v8488_v42, 1 }
 0x3fd   : > { %12617 = vmatprep.mubr.bf16.mxu1 %v8467_v34  ;;  %v8482_v34 = vrot.slane %v17442_v44, 1  ;;  %v6536_v8 = vpop.f32.mrf.mxu1 }
 0x3fe   : > { %v8478_v61 = vor.u32 %v17441_v15, %v8474_v11  ;;  %v12443_v40 = vpop.f32.mrf.mxu0  ;;  %v6677_v53 = vadd.f32 %v6536_v8, %v6291_v26  ;;  %v16296_v27 = vadd.f32 %v12436_v18, %v6679_v6 }
 0x3ff   : > { %v12387_v52 = vpop.f32.mrf.mxu1  ;;  %v8486_v35 = vor.u32 %v17445_v9, %v8482_v34 }
 0x400   : > { %12674 = vmatmul.mubr.bf16.gmra.mxu0 %v8829_v12  ;;  %v8483_v7 = vsel %vm7769_vm12, %v8478_v61, %v8482_v34  ;;  %v7161_v38 = vpop.f32.mrf.mxu0  ;;  %v6682_v14 = vadd.f32 %v12387_v52, %v15852_v16  ;;  %v16302_v3 = vadd.f32 %v7132_v49, %v6677_v53 }
 0x401   : > { %v6549_v12 = vpop.f32.mrf.mxu1  ;;  %v8491_v50 = vsel %vm7769_vm12, %v8486_v35, %v8490_v58 }
 0x402   : > { %v12444_v15 = vpop.f32.mrf.mxu0  ;;  %v6680_v11 = vadd.f32 %v6549_v12, %v15872_v31  ;;  %v16305_v18 = vadd.f32 %v12439_v54, %v6682_v14 }
 0x403   : > { %v12388_v25 = vpop.f32.mrf.mxu1 }
 0x404   : > { %12618 = vmatmul.mubr.bf16.gmra.mxu1 %v8475_v1  ;;  %v7164_v44 = vpop.f32.mrf.mxu0  ;;  %v6683_v61 = vadd.f32 %v12388_v25, %v15887_v23  ;;  %v16309_v16 = vadd.f32 %v7145_v39, %v6680_v11 }
 0x405   : > { %12621 = vmatprep.mubr.bf16.mxu1 %v8483_v7  ;;  %v6552_v6 = vpop.f32.mrf.mxu1 }
 0x406   : > { %v12447_v10 = vpop.f32.mrf.mxu0  ;;  %v6681_v34 = vadd.f32 %v6552_v6, %v15902_v2  ;;  %v16312_v49 = vadd.f32 %v12440_v33, %v6683_v61  ;;  %v17446_v61 = vld [vmem:[#allocation54_spill] sm:$0xff] }
 0x407   : > { %v12391_v30 = vpop.f32.mrf.mxu1 }
 0x408   : > { %v7177_v26 = vpop.f32.mrf.mxu0  ;;  %v6686_v31 = vadd.f32 %v12391_v30, %v16000_v0  ;;  %v16316_v54 = vadd.f32 %v7148_v20, %v6681_v34 }
 0x409   : > { %v6565_v23 = vpop.f32.mrf.mxu1 }
 0x40a   : > { %v12448_v42 = vpop.f32.mrf.mxu0  ;;  %v6684_v39 = vadd.f32 %v6565_v23, %v16004_v29  ;;  %v16319_v8 = vadd.f32 %v12443_v40, %v6686_v31 }
 0x40b   : > { %v12392_v53 = vpop.f32.mrf.mxu1 }
 0x40c   : > { %12622 = vmatmul.mubr.bf16.gmra.mxu1 %v8491_v50  ;;  %v7180_v1 = vpop.f32.mrf.mxu0  ;;  %v6687_v2 = vadd.f32 %v12392_v53, %v16008_v43  ;;  %v16322_v33 = vadd.f32 %v7161_v38, %v6684_v39  ;;  %v17447_v50 = vld [vmem:[#allocation41_spill] sm:$0xff] }
 0x40d   : > { %12693 = vmatprep.mubr.bf16.mxu1 %v15855_v32  ;;  %v6568_v52 = vpop.f32.mrf.mxu1 }
 0x40e   : > { %v12451_v7 = vpop.f32.mrf.mxu0  ;;  %v6685_v0 = vadd.f32 %v6568_v52, %v16011_v22  ;;  %v16325_v14 = vadd.f32 %v12444_v15, %v6687_v2  ;;  %v17448_v2 = vld [vmem:[#allocation42_spill] sm:$0xff] }
 0x40f   : > { %v12395_v32 = vpop.f32.mrf.mxu1 }
 0x410   : > { %v7193_v20 = vpop.f32.mrf.mxu0  ;;  %v6690_v29 = vadd.f32 %v12395_v32, %v16054_v36  ;;  %v16330_v40 = vadd.f32 %v7164_v44, %v6685_v0 }
 0x411   : > { %v6581_v9 = vpop.f32.mrf.mxu1 }
 0x412   : > { %v12452_v43 = vpop.f32.mrf.mxu0  ;;  %v6688_v38 = vadd.f32 %v6581_v9, %v16060_v45  ;;  %v16333_v35 = vadd.f32 %v12447_v10, %v6690_v29 }
 0x413   : > { %v12396_v58 = vpop.f32.mrf.mxu1 }
 0x414   : > { %12694 = vmatmul.mubr.bf16.vlgmr.msra.gmra.mxu1 %v15843_v4  ;;  %v7196_v22 = vpop.f32.mrf.mxu0  ;;  %v6691_v12 = vadd.f32 %v12396_v58, %v16071_v47  ;;  %v16336_v15 = vadd.f32 %v7177_v26, %v6688_v38 }
 0x415   : > { %12697 = vmatprep.mubr.bf16.mxu1 %v15862_v57  ;;  %v6584_v4 = vpop.f32.mrf.mxu1 }
 0x416   : > { %v12455_v11 = vpop.f32.mrf.mxu0  ;;  %v6689_v36 = vadd.f32 %v6584_v4, %v16078_v24  ;;  %v16339_v25 = vadd.f32 %v12448_v42, %v6691_v12 }
 0x417   : > { %v12399_v57 = vpop.f32.mrf.mxu1 }
 0x418   : > { %v7209_v44 = vpop.f32.mrf.mxu0  ;;  %v6694_v45 = vadd.f32 %v12399_v57, %v17446_v61  ;;  %v16344_v6 = vadd.f32 %v7180_v1, %v6689_v36  ;;  %v17450_v36 = vld [vmem:[#allocation44_spill] sm:$0xff] }
 0x419   : > { %v6597_v10 = vpop.f32.mrf.mxu1 }
 0x41a   : > { %v12456_v47 = vpop.f32.mrf.mxu0  ;;  %v6692_v34 = vadd.f32 %v6597_v10, %v16115_v37  ;;  %v16347_v30 = vadd.f32 %v12451_v7, %v6694_v45  ;;  %v17449_v7 = vld [vmem:[#allocation43_spill] sm:$0xff] }
 0x41b   : > { %v12400_v26 = vpop.f32.mrf.mxu1 }
 0x41c   : > { %12698 = vmatmul.mubr.bf16.gmra.mxu1 %v15875_v21  ;;  %v7212_v24 = vpop.f32.mrf.mxu0  ;;  %v6695_v31 = vadd.f32 %v12400_v26, %v16126_v62  ;;  %v16350_v23 = vadd.f32 %v7193_v20, %v6692_v34 }
 0x41d   : > { %12701 = vmatprep.mubr.bf16.mxu1 %v17447_v50  ;;  %v6600_v21 = vpop.f32.mrf.mxu1 }
 0x41e   : > { %v12459_v42 = vpop.f32.mrf.mxu0  ;;  %v6693_v39 = vadd.f32 %v6600_v21, %v16133_v41  ;;  %v16353_v53 = vadd.f32 %v12452_v43, %v6695_v31  ;;  %v17452_v21 = vld [vmem:[#allocation56_spill] sm:$0xff] }
 0x41f   : > { %v12403_v1 = vpop.f32.mrf.mxu1 }
 0x420   : > { %v7225_v52 = vpop.f32.mrf.mxu0  ;;  %v6698_v37 = vadd.f32 %v12403_v1, %v16150_v19  ;;  %v16358_v0 = vadd.f32 %v7196_v22, %v6693_v39  ;;  %v17453_v1 = vld [vmem:[#allocation46_spill] sm:$0xff] }
 0x421   : > { %v6613_v32 = vpop.f32.mrf.mxu1 }
 0x422   : > { %v12460_v62 = vpop.f32.mrf.mxu0  ;;  %v6696_v20 = vadd.f32 %v6613_v32, %v16160_v59  ;;  %v16361_v29 = vadd.f32 %v12455_v11, %v6698_v37  ;;  %v17451_v11 = vld [vmem:[#allocation45_spill] sm:$0xff] }
 0x423   : > { %v12404_v9 = vpop.f32.mrf.mxu1  ;;  %v17454_v37 = vld [vmem:[#allocation57_spill] sm:$0xff] }
 0x424   : > { %12702 = vmatmul.mubr.bf16.gmra.mxu1 %v17448_v2  ;;  %v7228_v41 = vpop.f32.mrf.mxu0  ;;  %v6699_v43 = vadd.f32 %v12404_v9, %v16172_v28  ;;  %v16364_v38 = vadd.f32 %v7209_v44, %v6696_v20 }
 0x425   : > { %12705 = vmatprep.mubr.bf16.mxu1 %v17449_v7  ;;  %v6616_v58 = vpop.f32.mrf.mxu1 }
 0x426   : > { %v12463_v12 = vpop.f32.mrf.mxu0  ;;  %v6697_v19 = vadd.f32 %v6616_v58, %v16179_v60  ;;  %v16367_v4 = vadd.f32 %v12456_v47, %v6699_v43 }
 0x427   : > { %v12407_v22 = vpop.f32.mrf.mxu1 }
 0x428   : > { %v7241_v57 = vpop.f32.mrf.mxu0  ;;  %v6702_v59 = vadd.f32 %v12407_v22, %v16192_v51  ;;  %v16372_v61 = vadd.f32 %v7212_v24, %v6697_v19 }
 0x429   : > { %v6629_v45 = vpop.f32.mrf.mxu1 }
 0x42a   : > { %v12464_v28 = vpop.f32.mrf.mxu0  ;;  %v6700_v44 = vadd.f32 %v6629_v45, %v16202_v56  ;;  %v16375_v50 = vadd.f32 %v12459_v42, %v6702_v59  ;;  %v17455_v42 = vld [vmem:[#allocation47_spill] sm:$0xff] }
 0x42b   : > { %v12408_v10 = vpop.f32.mrf.mxu1 }
 0x42c   : > { %12706 = vmatmul.mubr.bf16.gmra.mxu1 %v17450_v36  ;;  %v7244_v60 = vpop.f32.mrf.mxu0  ;;  %v6703_v47 = vadd.f32 %v12408_v10, %v16214_v17  ;;  %v16378_v34 = vadd.f32 %v7225_v52, %v6700_v44  ;;  %v17456_v52 = vld [vmem:[#allocation58_spill] sm:$0xff]  ;;  %v17459_v10 = vld [vmem:[#allocation48_spill] sm:$0xff] }
 0x42d   : > { %12709 = vmatprep.mubr.bf16.mxu1 %v17451_v11  ;;  %v6632_v26 = vpop.f32.mrf.mxu1  ;;  %v17458_v11 = vld [vmem:[#allocation60_spill] sm:$0xff] }
 0x42e   : > { %v12467_v31 = vpop.f32.mrf.mxu0  ;;  %v6701_v51 = vadd.f32 %v6632_v26, %v17452_v21  ;;  %v16381_v39 = vadd.f32 %v12460_v62, %v6703_v47  ;;  %v17457_v62 = vld [vmem:[#allocation59_spill] sm:$0xff] }
 0x42f   : > { %v12411_v24 = vpop.f32.mrf.mxu1 }
 0x430   : > { %v7257_v2 = vpop.f32.mrf.mxu0  ;;  %v6706_v56 = vadd.f32 %v12411_v24, %v17454_v37  ;;  %v16386_v7 = vadd.f32 %v7228_v41, %v6701_v51 }
 0x431   : > { %v6645_v32 = vpop.f32.mrf.mxu1 }
 0x432   : > { %v12468_v17 = vpop.f32.mrf.mxu0  ;;  %v6704_v20 = vadd.f32 %v6645_v32, %v17456_v52  ;;  %v16389_v9 = vadd.f32 %v12463_v12, %v6706_v56  ;;  %v17460_v12 = vld [vmem:[#allocation49_spill] sm:$0xff] }
 0x433   : > { %v12412_v43 = vpop.f32.mrf.mxu1 }
 0x434   : > { %12710 = vmatmul.mubr.bf16.gmra.mxu1 %v17453_v1  ;;  %v7260_v58 = vpop.f32.mrf.mxu0  ;;  %v6707_v19 = vadd.f32 %v12412_v43, %v17457_v62  ;;  %v16392_v22 = vadd.f32 %v7241_v57, %v6704_v20  ;;  %v17461_v43 = vld [vmem:[#allocation50_spill] sm:$0xff] }
 0x435   : > { %12713 = vmatprep.mubr.bf16.mxu1 %v17455_v42  ;;  %v6648_v36 = vpop.f32.mrf.mxu1 }
 0x436   : > { %v12539_v59 = vpop.f32.mrf.mxu0  ;;  %v6705_v45 = vadd.f32 %v6648_v36, %v17458_v11  ;;  %v16395_v44 = vadd.f32 %v12464_v28, %v6707_v19 }
 0x437   : > { %v12415_v41 = vpop.f32.mrf.mxu1 }
 0x438   : > { %v8018_v47 = vpop.f32.mrf.mxu0  ;;  %v6710_v26 = vadd.f32 %v12415_v41, %v16261_v13  ;;  %v16400_v21 = vadd.f32 %v7244_v60, %v6705_v45 }
 0x439   : > { %v6661_v51 = vpop.f32.mrf.mxu1 }
 0x43a   : > { %v12540_v24 = vpop.f32.mrf.mxu0  ;;  %v6708_v57 = vadd.f32 %v6661_v51, %v16266_v55  ;;  %v16403_v1 = vadd.f32 %v12467_v31, %v6710_v26  ;;  %v17462_v31 = vld [vmem:[#allocation51_spill] sm:$0xff]  ;;  %v17463_v51 = vld [vmem:[#allocation52_spill] sm:$0xff] }
 0x43b   : > { %v12416_v37 = vpop.f32.mrf.mxu1 }
 0x43c   : > { %12714 = vmatmul.mubr.bf16.gmra.mxu1 %v17459_v10  ;;  %v8021_v56 = vpop.f32.mrf.mxu0  ;;  %v6711_v28 = vadd.f32 %v12416_v37, %v16272_v46  ;;  %v16406_v42 = vadd.f32 %v7257_v2, %v6708_v57 }
 0x43d   : > { %12717 = vmatprep.mubr.bf16.mxu1 %v17460_v12  ;;  %v6664_v32 = vpop.f32.mrf.mxu1 }
 0x43e   : > { %v12543_v52 = vpop.f32.mrf.mxu0  ;;  %v6709_v13 = vadd.f32 %v6664_v32, %v16279_v48  ;;  %v16409_v20 = vadd.f32 %v12468_v17, %v6711_v28 }
 0x43f   : > { %v12487_v60 = vpop.f32.mrf.mxu1 }
 0x440   : > { %v8034_v62 = vpop.f32.mrf.mxu0  ;;  %v7588_v55 = vadd.f32 %v12487_v60, %v16285_v5  ;;  %v16414_v19 = vadd.f32 %v7260_v58, %v6709_v13 }
 0x441   : > { %v7443_v36 = vpop.f32.mrf.mxu1 }
 0x442   : > { %v12544_v46 = vpop.f32.mrf.mxu0  ;;  %v7586_v2 = vadd.f32 %v7443_v36, %v16293_v63  ;;  %v16417_v11 = vadd.f32 %v12539_v59, %v7588_v55  ;;  %v17464_v59 = vld [vmem:[#allocation53_spill] sm:$0xff]  ;;  %v17465_v36 = vld [vmem:[#allocation55_spill] sm:$0xff] }
 0x443   : > { %v12488_v45 = vpop.f32.mrf.mxu1 }
 0x444   : > { %12718 = vmatmul.mubr.bf16.gmra.mxu1 %v17461_v43  ;;  %v8037_v48 = vpop.f32.mrf.mxu0  ;;  %v7589_v17 = vadd.f32 %v12488_v45, %v16296_v27  ;;  %v16420_v41 = vadd.f32 %v8018_v47, %v7586_v2 }
 0x445   : > { %12721 = vmatprep.mubr.bf16.mxu1 %v17462_v31  ;;  %v7446_v10 = vpop.f32.mrf.mxu1 }
 0x446   : > { %v12547_v26 = vpop.f32.mrf.mxu0  ;;  %v7587_v5 = vadd.f32 %v7446_v10, %v16302_v3  ;;  %v16423_v12 = vadd.f32 %v12540_v24, %v7589_v17 }
 0x447   : > { %v12491_v58 = vpop.f32.mrf.mxu1 }
 0x448   : > { %v8050_v57 = vpop.f32.mrf.mxu0  ;;  %v7592_v63 = vadd.f32 %v12491_v58, %v16305_v18  ;;  %v16428_v37 = vadd.f32 %v8021_v56, %v7587_v5 }
 0x449   : > { %v7459_v28 = vpop.f32.mrf.mxu1 }
 0x44a   : > { %v12548_v27 = vpop.f32.mrf.mxu0  ;;  %v7590_v47 = vadd.f32 %v7459_v28, %v16309_v16  ;;  %v16431_v32 = vadd.f32 %v12543_v52, %v7592_v63 }
 0x44b   : > { %v12492_v13 = vpop.f32.mrf.mxu1 }
 0x44c   : > { %12722 = vmatmul.mubr.bf16.gmra.mxu1 %v17463_v51  ;;  %v8053_v3 = vpop.f32.mrf.mxu0  ;;  %v7593_v24 = vadd.f32 %v12492_v13, %v16312_v49  ;;  %v16434_v60 = vadd.f32 %v8034_v62, %v7590_v47 }
 0x44d   : > { %12725 = vmatprep.mubr.bf16.mxu1 %v17464_v59  ;;  %v7462_v43 = vpop.f32.mrf.mxu1 }
 0x44e   : > { %v12551_v55 = vpop.f32.mrf.mxu0  ;;  %v7591_v18 = vadd.f32 %v7462_v43, %v16316_v54  ;;  %v16437_v31 = vadd.f32 %v12544_v46, %v7593_v24 }
 0x44f   : > { %v12495_v56 = vpop.f32.mrf.mxu1 }
 0x450   : > { %v8066_v2 = vpop.f32.mrf.mxu0  ;;  %v7596_v16 = vadd.f32 %v12495_v56, %v16319_v8  ;;  %v16441_v52 = vadd.f32 %v8037_v48, %v7591_v18 }
 0x451   : > { %v7475_v45 = vpop.f32.mrf.mxu1 }
 0x452   : > { %v12552_v17 = vpop.f32.mrf.mxu0  ;;  %v7594_v49 = vadd.f32 %v7475_v45, %v16322_v33  ;;  %v16444_v62 = vadd.f32 %v12547_v26, %v7596_v16 }
 0x453   : > { %v12496_v10 = vpop.f32.mrf.mxu1 }
 0x454   : > { %12726 = vmatmul.mubr.bf16.gmra.mxu1 %v17465_v36  ;;  %v8069_v5 = vpop.f32.mrf.mxu0  ;;  %v7597_v54 = vadd.f32 %v12496_v10, %v16325_v14  ;;  %v16447_v46 = vadd.f32 %v8050_v57, %v7594_v49 }
 0x455   : > { %v7478_v58 = vpop.f32.mrf.mxu1 }
 0x456   : > { %v12555_v51 = vpop.f32.mrf.mxu0  ;;  %v7595_v63 = vadd.f32 %v7478_v58, %v16330_v40  ;;  %v16450_v59 = vadd.f32 %v12548_v27, %v7597_v54 }
 0x457   : > { %v12499_v8 = vpop.f32.mrf.mxu1 }
 0x458   : > { %v8082_v48 = vpop.f32.mrf.mxu0  ;;  %v7600_v28 = vadd.f32 %v12499_v8, %v16333_v35  ;;  %v16453_v47 = vadd.f32 %v8053_v3, %v7595_v63 }
 0x459   : > { %v7491_v33 = vpop.f32.mrf.mxu1 }
 0x45a   : > { %v12556_v26 = vpop.f32.mrf.mxu0  ;;  %v7598_v13 = vadd.f32 %v7491_v33, %v16336_v15  ;;  %v16456_v24 = vadd.f32 %v12551_v55, %v7600_v28 }
 0x45b   : > { %v12500_v14 = vpop.f32.mrf.mxu1 }
 0x45c   : > { %v8085_v57 = vpop.f32.mrf.mxu0  ;;  %v7601_v43 = vadd.f32 %v12500_v14, %v16339_v25  ;;  %v16459_v18 = vadd.f32 %v8066_v2, %v7598_v13 }
 0x45d   : > { %v7494_v40 = vpop.f32.mrf.mxu1 }
 0x45e   : > { %v12559_v27 = vpop.f32.mrf.mxu0  ;;  %v7599_v56 = vadd.f32 %v7494_v40, %v16344_v6  ;;  %v16462_v36 = vadd.f32 %v12552_v17, %v7601_v43 }
 0x45f   : > { %v12503_v35 = vpop.f32.mrf.mxu1 }
 0x460   : > { %v8098_v3 = vpop.f32.mrf.mxu0  ;;  %v7604_v16 = vadd.f32 %v12503_v35, %v16347_v30  ;;  %v16465_v45 = vadd.f32 %v8069_v5, %v7599_v56 }
 0x461   : > { %v7507_v15 = vpop.f32.mrf.mxu1 }
 0x462   : > { %v12560_v55 = vpop.f32.mrf.mxu0  ;;  %v7602_v49 = vadd.f32 %v7507_v15, %v16350_v23  ;;  %v16468_v10 = vadd.f32 %v12555_v51, %v7604_v16 }
 0x463   : > { %v12504_v25 = vpop.f32.mrf.mxu1 }
 0x464   : > { %v8101_v2 = vpop.f32.mrf.mxu0  ;;  %v7605_v54 = vadd.f32 %v12504_v25, %v16353_v53  ;;  %v16471_v58 = vadd.f32 %v8082_v48, %v7602_v49 }
 0x465   : > { %v7510_v6 = vpop.f32.mrf.mxu1 }
 0x466   : > { %v12563_v17 = vpop.f32.mrf.mxu0  ;;  %v7603_v63 = vadd.f32 %v7510_v6, %v16358_v0  ;;  %v16474_v8 = vadd.f32 %v12556_v26, %v7605_v54 }
 0x468   : > { %v8114_v5 = vpop.f32.mrf.mxu0  ;;  %v16477_v33 = vadd.f32 %v8085_v57, %v7603_v63 }
 0x46a   : > { %v12507_v30 = vpop.f32.mrf.mxu1  ;;  %v12564_v51 = vpop.f32.mrf.mxu0 }
 0x46b   : > { %v7608_v28 = vadd.f32 %v12507_v30, %v16361_v29 }
 0x46c   : > { %v7523_v23 = vpop.f32.mrf.mxu1  ;;  %v8117_v48 = vpop.f32.mrf.mxu0 }
 0x46d   : > { %v7606_v13 = vadd.f32 %v7523_v23, %v16364_v38  ;;  %v16480_v14 = vadd.f32 %v12559_v27, %v7608_v28 }
 0x46e   : > { %v12508_v53 = vpop.f32.mrf.mxu1 }
 0x46f   : > { %v7609_v43 = vadd.f32 %v12508_v53, %v16367_v4  ;;  %v16483_v40 = vadd.f32 %v8098_v3, %v7606_v13 }
 0x470   : > { %v7526_v0 = vpop.f32.mrf.mxu1  ;;  %v12567_v26 = vpop.f32.mrf.mxu0 }
 0x471   : > { %v7607_v56 = vadd.f32 %v7526_v0, %v16372_v61  ;;  %v16486_v35 = vadd.f32 %v12560_v55, %v7609_v43 }
 0x472   : > { %v8130_v57 = vpop.f32.mrf.mxu0 }
 0x473   : > { %v16489_v15 = vadd.f32 %v8101_v2, %v7607_v56 }
 0x474   : > { %v12511_v29 = vpop.f32.mrf.mxu1  ;;  %v12568_v27 = vpop.f32.mrf.mxu0 }
 0x475   : > { %v7612_v16 = vadd.f32 %v12511_v29, %v16375_v50 }
 0x476   : > { %v7539_v38 = vpop.f32.mrf.mxu1  ;;  %v8133_v3 = vpop.f32.mrf.mxu0 }
 0x477   : > { %v7610_v49 = vadd.f32 %v7539_v38, %v16378_v34  ;;  %v16492_v25 = vadd.f32 %v12563_v17, %v7612_v16 }
 0x478   : > { %v12512_v4 = vpop.f32.mrf.mxu1  ;;  %v12571_v55 = vpop.f32.mrf.mxu0 }
 0x479   : > { %v7613_v54 = vadd.f32 %v12512_v4, %v16381_v39  ;;  %v16495_v6 = vadd.f32 %v8114_v5, %v7610_v49 }
 0x47a   : > { %v7542_v61 = vpop.f32.mrf.mxu1  ;;  %v8146_v2 = vpop.f32.mrf.mxu0 }
 0x47b   : > { %v7611_v63 = vadd.f32 %v7542_v61, %v16386_v7  ;;  %v16498_v30 = vadd.f32 %v12564_v51, %v7613_v54 }
 0x47c   : > { %v12515_v50 = vpop.f32.mrf.mxu1  ;;  %v12572_v17 = vpop.f32.mrf.mxu0 }
 0x47d   : > { %v7616_v28 = vadd.f32 %v12515_v50, %v16389_v9  ;;  %v16501_v23 = vadd.f32 %v8117_v48, %v7611_v63 }
 0x47e   : > { %v7555_v34 = vpop.f32.mrf.mxu1  ;;  %v8149_v5 = vpop.f32.mrf.mxu0 }
 0x47f   : > { %v7614_v13 = vadd.f32 %v7555_v34, %v16392_v22  ;;  %v16504_v53 = vadd.f32 %v12567_v26, %v7616_v28 }
 0x480   : > { %v12516_v39 = vpop.f32.mrf.mxu1  ;;  %v16509_v51 = vpop.f32.mrf.mxu0 }
 0x481   : > { %v7617_v43 = vadd.f32 %v12516_v39, %v16395_v44  ;;  %v16507_v0 = vadd.f32 %v8130_v57, %v7614_v13 }
 0x482   : > { %v7558_v7 = vpop.f32.mrf.mxu1  ;;  %v16514_v29 = vpop.f32.mrf.mxu0 }
 0x483   : > { %v7615_v56 = vadd.f32 %v7558_v7, %v16400_v21  ;;  %v16512_v9 = vadd.f32 %v12568_v27, %v7617_v43 }
 0x484   : > { %v12519_v48 = vpop.f32.mrf.mxu1  ;;  %v16519_v38 = vpop.f32.mrf.mxu0 }
 0x485   : > { %v7620_v22 = vadd.f32 %v12519_v48, %v16403_v1  ;;  %v16517_v26 = vadd.f32 %v8133_v3, %v7615_v56 }
 0x486   : > { %v7571_v16 = vpop.f32.mrf.mxu1  ;;  %v16524_v4 = vpop.f32.mrf.mxu0 }
 0x487   : > { %v7618_v44 = vadd.f32 %v7571_v16, %v16406_v42  ;;  %v16522_v57 = vadd.f32 %v12571_v55, %v7620_v22 }
 0x488   : > { %v12520_v49 = vpop.f32.mrf.mxu1  ;;  %v16529_v61 = vpop.f32.mrf.mxu0 }
 0x489   : > { %v7621_v21 = vadd.f32 %v12520_v49, %v16409_v20  ;;  %v16527_v27 = vadd.f32 %v8146_v2, %v7618_v44 }
 0x48a   : > { %v7574_v54 = vpop.f32.mrf.mxu1  ;;  %v16534_v50 = vpop.f32.mrf.mxu0 }
 0x48b   : > { %v7619_v1 = vadd.f32 %v7574_v54, %v16414_v19  ;;  %v16532_v3 = vadd.f32 %v12572_v17, %v7621_v21 }
 0x48c   : > { %v12591_v63 = vpop.f32.mrf.mxu1  ;;  %v16541_v34 = vpop.f32.mrf.mxu0 }
 0x48d   : > { %v16537_v42 = vadd.f32 %v12591_v63, %v16417_v11  ;;  %v16539_v55 = vadd.f32 %v8149_v5, %v7619_v1 }
 0x48e   : > { %v8592_v28 = vpop.f32.mrf.mxu1  ;;  %v16546_v13 = vpop.f32.mrf.mxu0 }
 0x48f   : > { %v16544_v20 = vadd.f32 %v8592_v28, %v16420_v41 }
 0x490   : > { %v12592_v2 = vpop.f32.mrf.mxu1  ;;  %v16551_v39 = vpop.f32.mrf.mxu0 }
 0x491   : > { %v16549_v19 = vadd.f32 %v12592_v2, %v16423_v12 }
 0x492   : > { %v8595_v17 = vpop.f32.mrf.mxu1  ;;  %v16556_v43 = vpop.f32.mrf.mxu0 }
 0x493   : > { %v16554_v11 = vadd.f32 %v8595_v17, %v16428_v37 }
 0x494   : > { %v12595_v5 = vpop.f32.mrf.mxu1  ;;  %v16561_v56 = vpop.f32.mrf.mxu0 }
 0x495   : > { %v16559_v7 = vadd.f32 %v12595_v5, %v16431_v32 }
 0x496   : > { %v8608_v41 = vpop.f32.mrf.mxu1  ;;  %v16566_v22 = vpop.f32.mrf.mxu0 }
 0x497   : > { %v16564_v48 = vadd.f32 %v8608_v41, %v16434_v60 }
 0x498   : > { %v12596_v12 = vpop.f32.mrf.mxu1  ;;  %v16571_v44 = vpop.f32.mrf.mxu0 }
 0x499   : > { %v16569_v16 = vadd.f32 %v12596_v12, %v16437_v31 }
 0x49a   : > { %v8611_v37 = vpop.f32.mrf.mxu1  ;;  %v16576_v21 = vpop.f32.mrf.mxu0 }
 0x49b   : > { %v16574_v49 = vadd.f32 %v8611_v37, %v16441_v52 }
 0x49c   : > { %v12599_v32 = vpop.f32.mrf.mxu1  ;;  %v16581_v1 = vpop.f32.mrf.mxu0 }
 0x49d   : > { %v16579_v54 = vadd.f32 %v12599_v32, %v16444_v62 }
 0x49e   : > { %v8624_v60 = vpop.f32.mrf.mxu1  ;;  %v16586_v28 = vpop.f32.mrf.mxu0 }
 0x49f   : > { %v16584_v63 = vadd.f32 %v8624_v60, %v16447_v46  ;;  %17466 = vst [vmem:[#allocation14_spill] sm:$0xff] %v16586_v28 }
 0x4a0   : > { %v12600_v31 = vpop.f32.mrf.mxu1  ;;  %v16591_v17 = vpop.f32.mrf.mxu0 }
 0x4a1   : > { %v16589_v2 = vadd.f32 %v12600_v31, %v16450_v59  ;;  %17467 = vst [vmem:[#allocation15_spill] sm:$0xff] %v16591_v17 }
 0x4a2   : > { %v8627_v52 = vpop.f32.mrf.mxu1  ;;  %v16596_v41 = vpop.f32.mrf.mxu0 }
 0x4a3   : > { %v16594_v5 = vadd.f32 %v8627_v52, %v16453_v47  ;;  %17468 = vst [vmem:[#allocation22_spill] sm:$0xff] %v16596_v41 }
 0x4a4   : > { %v12603_v62 = vpop.f32.mrf.mxu1  ;;  %v16601_v37 = vpop.f32.mrf.mxu0 }
 0x4a5   : > { %v16599_v12 = vadd.f32 %v12603_v62, %v16456_v24  ;;  %17469 = vst [vmem:[#allocation24_spill] sm:$0xff] %v16601_v37 }
 0x4a6   : > { %v8640_v46 = vpop.f32.mrf.mxu1  ;;  %v16606_v60 = vpop.f32.mrf.mxu0 }
 0x4a7   : > { %v16604_v32 = vadd.f32 %v8640_v46, %v16459_v18  ;;  %17470 = vst [vmem:[#allocation17_spill] sm:$0xff] %v16606_v60 }
 0x4a8   : > { %v12604_v59 = vpop.f32.mrf.mxu1  ;;  %v16611_v52 = vpop.f32.mrf.mxu0 }
 0x4a9   : > { %v16609_v31 = vadd.f32 %v12604_v59, %v16462_v36  ;;  %17471 = vst [vmem:[#allocation19_spill] sm:$0xff] %v16611_v52 }
 0x4aa   : > { %v8643_v47 = vpop.f32.mrf.mxu1  ;;  %v16616_v62 = vpop.f32.mrf.mxu0 }
 0x4ab   : > { %v16614_v41 = vadd.f32 %v8643_v47, %v16465_v45  ;;  %17472 = vst [vmem:[#allocation16_spill] sm:$0xff] %v16616_v62 }
 0x4ac   : > { %v12607_v24 = vpop.f32.mrf.mxu1  ;;  %v16621_v46 = vpop.f32.mrf.mxu0 }
 0x4ad   : > { %v16619_v37 = vadd.f32 %v12607_v24, %v16468_v10  ;;  %17474 = vst [vmem:[#allocation18_spill] sm:$0xff] %v16621_v46 }
 0x4ae   : > { %v8656_v18 = vpop.f32.mrf.mxu1  ;;  %v16626_v59 = vpop.f32.mrf.mxu0 }
 0x4af   : > { %17473 = vst [vmem:[#allocation20_spill] sm:$0xff] %v16619_v37  ;;  %v16624_v60 = vadd.f32 %v8656_v18, %v16471_v58  ;;  %17476 = vst [vmem:[#allocation23_spill] sm:$0xff] %v16626_v59 }
 0x4b0   : > { %v12608_v36 = vpop.f32.mrf.mxu1  ;;  %v16634_v62 = vpop.f32.mrf.mxu0 }
 0x4b1   : > { %17475 = vst [vmem:[#allocation21_spill] sm:$0xff] %v16624_v60  ;;  %v16629_v52 = vadd.f32 %v12608_v36, %v16474_v8  ;;  %17479 = vst [vmem:[#allocation34_spill] sm:$0xff] %v16634_v62 }
 0x4b2   : > { %v8659_v45 = vpop.f32.mrf.mxu1  ;;  %v16640_v18 = vpop.f32.mrf.mxu0 }
 0x4b3   : > { %17477 = vst [vmem:[#allocation25_spill] sm:$0xff] %v16629_v52  ;;  %v16632_v47 = vadd.f32 %v8659_v45, %v16477_v33  ;;  %17481 = vst [vmem:[#allocation26_spill] sm:$0xff] %v16640_v18 }
 0x4b4   : > { %v12611_v10 = vpop.f32.mrf.mxu1  ;;  %v16644_v52 = vpop.f32.mrf.mxu0 }
 0x4b5   : > { %17478 = vst [vmem:[#allocation35_spill] sm:$0xff] %v16632_v47  ;;  %v16637_v24 = vadd.f32 %v12611_v10, %v16480_v14  ;;  %17482 = vst [vmem:[#allocation31_spill] sm:$0xff] %v16644_v52 }
 0x4b6   : > { %v8672_v46 = vpop.f32.mrf.mxu1  ;;  %v9029_v10 = vpop.f32.mrf.mxu0 }
 0x4b7   : > { %17480 = vst [vmem:[#allocation36_spill] sm:$0xff] %v16637_v24  ;;  %v8755_v58 = vadd.f32 %v8672_v46, %v16483_v40 }
 0x4b8   : > { %v12612_v60 = vpop.f32.mrf.mxu1  ;;  %v12671_v18 = vpop.f32.mrf.mxu0 }
 0x4b9   : > { %v8758_v59 = vadd.f32 %v12612_v60, %v16486_v35 }
 0x4ba   : > { %v8675_v8 = vpop.f32.mrf.mxu1 }
 0x4bb   : > { %v8756_v36 = vadd.f32 %v8675_v8, %v16489_v15  ;;  %v9042_v8 = vpop.f32.mrf.mxu0 }
 0x4bc   : > { %v12615_v33 = vpop.f32.mrf.mxu1 }
 0x4bd   : > { %v8761_v45 = vadd.f32 %v12615_v33, %v16492_v25 }
 0x4be   : > { %v8688_v62 = vpop.f32.mrf.mxu1 }
 0x4bf   : > { %v8759_v14 = vadd.f32 %v8688_v62, %v16495_v6  ;;  %v12672_v6 = vpop.f32.mrf.mxu0 }
 0x4c0   : > { %v12616_v24 = vpop.f32.mrf.mxu1 }
 0x4c1   : > { %v8762_v40 = vadd.f32 %v12616_v24, %v16498_v30  ;;  %v9045_v28 = vpop.f32.mrf.mxu0 }
 0x4c2   : > { %v8691_v46 = vpop.f32.mrf.mxu1 }
 0x4c3   : > { %v8760_v47 = vadd.f32 %v8691_v46, %v16501_v23 }
 0x4c4   : > { %v12619_v35 = vpop.f32.mrf.mxu1 }
 0x4c5   : > { %v8765_v60 = vadd.f32 %v12619_v35, %v16504_v53  ;;  %v9075_v53 = vadd.f32 %v16509_v51, %v16537_v42  ;;  %v12675_v35 = vpop.f32.mrf.mxu0  ;;  %v16673_v51 = vadd.f32 %v16541_v34, %v16569_v16  ;;  %v16700_v34 = vadd.f32 %v16571_v44, %v16599_v12  ;;  %v17488_v44 = vld [vmem:[#allocation25_spill] sm:$0xff] }
 0x4c6   : > { %v8704_v15 = vpop.f32.mrf.mxu1 }
 0x4c7   : > { %v8763_v52 = vadd.f32 %v8704_v15, %v16507_v0  ;;  %v9073_v0 = vadd.f32 %v16514_v29, %v16544_v20  ;;  %v16677_v29 = vadd.f32 %v16546_v13, %v16574_v49  ;;  %v16708_v20 = vadd.f32 %v16581_v1, %v16609_v31  ;;  %v17483_v13 = vld [vmem:[#allocation14_spill] sm:$0xff]  ;;  %v17489_v49 = vld [vmem:[#allocation24_spill] sm:$0xff]  ;;  %v17490_v1 = vld [vmem:[#allocation35_spill] sm:$0xff] }
 0x4c8   : > { %v12620_v17 = vpop.f32.mrf.mxu1  ;;  %v17495_v15 = vld [vmem:[#allocation18_spill] sm:$0xff] }
 0x4c9   : > { %v8766_v25 = vadd.f32 %v12620_v17, %v16512_v9  ;;  %v9079_v17 = vadd.f32 %v16529_v61, %v16559_v7  ;;  %v16688_v61 = vadd.f32 %v16556_v43, %v16584_v63  ;;  %v17484_v43 = vld [vmem:[#allocation20_spill] sm:$0xff]  ;;  %v17485_v7 = vld [vmem:[#allocation15_spill] sm:$0xff]  ;;  %v17491_v63 = vld [vmem:[#allocation17_spill] sm:$0xff] }
 0x4ca   : > { %v8707_v33 = vpop.f32.mrf.mxu1 }
 0x4cb   : > { %v8764_v62 = vadd.f32 %v8707_v33, %v16517_v26  ;;  %v9076_v26 = vadd.f32 %v16519_v38, %v16549_v19  ;;  %v16681_v38 = vadd.f32 %v16551_v39, %v16579_v54  ;;  %v16712_v19 = vadd.f32 %v17483_v13, %v16614_v41  ;;  %v9058_v39 = vpop.f32.mrf.mxu0  ;;  %v17493_v41 = vld [vmem:[#allocation19_spill] sm:$0xff] }
 0x4cc   : > { %v12623_v37 = vpop.f32.mrf.mxu1  ;;  %v16738_v33 = vadd.f32 %v17495_v15, %v8758_v59 }
 0x4cd   : > { %v8769_v30 = vadd.f32 %v12623_v37, %v16522_v57  ;;  %v9074_v57 = vadd.f32 %v16524_v4, %v16554_v11  ;;  %v16669_v37 = vadd.f32 %v16534_v50, %v16564_v48  ;;  %v16696_v50 = vadd.f32 %v16566_v22, %v16594_v5  ;;  %v17486_v48 = vld [vmem:[#allocation21_spill] sm:$0xff]  ;;  %v17487_v22 = vld [vmem:[#allocation22_spill] sm:$0xff]  ;;  %v17492_v5 = vld [vmem:[#allocation36_spill] sm:$0xff]  ;;  %v12676_v59 = vpop.f32.mrf.mxu0 }
 0x4ce   : > { %v8720_v24 = vpop.f32.mrf.mxu1  ;;  %v16720_v16 = vadd.f32 %v17487_v22, %v17486_v48  ;;  %v16732_v12 = vadd.f32 %v17493_v41, %v17492_v5  ;;  %v17499_v22 = vld [vmem:[#allocation31_spill] sm:$0xff]  ;;  %v16759_v5 = vadd.f32 %v9042_v8, %v8763_v52  ;;  %v16763_v41 = vadd.f32 %v9045_v28, %v8764_v62 }
 0x4cf   : > { %v8767_v23 = vadd.f32 %v8720_v24, %v16527_v27 }
 0x4d0   : > { %v12624_v46 = vpop.f32.mrf.mxu1 }
 0x4d1   : > { %v8770_v9 = vadd.f32 %v12624_v46, %v16532_v3  ;;  %v16692_v3 = vadd.f32 %v16561_v56, %v16589_v2  ;;  %v16716_v56 = vadd.f32 %v17485_v7, %v17484_v43  ;;  %v16728_v2 = vadd.f32 %v17491_v63, %v17490_v1  ;;  %v17498_v7 = vld [vmem:[#allocation26_spill] sm:$0xff] }
 0x4d2   : > { %v8723_v27 = vpop.f32.mrf.mxu1  ;;  %v16747_v48 = vadd.f32 %v17498_v7, %v8759_v14  ;;  %v16757_v63 = vadd.f32 %v12675_v35, %v8769_v30  ;;  %v16761_v14 = vadd.f32 %v12672_v6, %v8766_v25 }
 0x4d3   : > { %v16684_v4 = vadd.f32 %v8723_v27, %v16539_v55  ;;  %v16704_v55 = vadd.f32 %v16576_v21, %v16604_v32  ;;  %v16724_v21 = vadd.f32 %v17489_v49, %v17488_v44  ;;  %v17494_v32 = vld [vmem:[#allocation16_spill] sm:$0xff]  ;;  %v16750_v44 = vadd.f32 %v17499_v22, %v8762_v40 }
 0x4d4   : > { %v12695_v42 = vpop.f32.mrf.mxu1  ;;  %v16735_v31 = vadd.f32 %v17494_v32, %v8755_v58  ;;  %v16752_v58 = vadd.f32 %v9029_v10, %v8760_v47  ;;  %v16754_v49 = vadd.f32 %v12671_v18, %v8765_v60  ;;  %v16767_v60 = vadd.f32 %v9058_v39, %v8767_v23 }
 0x4d5   : > { %v9461_v11 = vadd.f32 %v12695_v42, %v9075_v53  ;;  %v17496_v53 = vld [vmem:[#allocation23_spill] sm:$0xff]  ;;  %v17497_v42 = vld [vmem:[#allocation34_spill] sm:$0xff]  ;;  %v16769_v32 = vadd.f32 %v12676_v59, %v8770_v9 }
 0x4d6   : > { %v9316_v54 = vpop.f32.mrf.mxu1  ;;  %v16741_v27 = vadd.f32 %v17496_v53, %v8756_v36  ;;  %v16744_v13 = vadd.f32 %v17497_v42, %v8761_v45 }
 0x4d7   : > { %v9497_v24 = vmax.f32 %v9461_v11, 0.0  ;;  %v9459_v46 = vadd.f32 %v9316_v54, %v9073_v0  ;;  %v17500_v0 = vld [vmem:[#allocation13_spill] sm:$0xff] }
 0x4d8   : > { %v12696_v43 = vpop.f32.mrf.mxu1 }
 0x4d9   : > { %v9601_v11 = vcombine.high %v9497_v24, %v9497_v24  ;;  %v9608_v54 = vrot.slane %v9497_v24, %v17500_v0  ;;  %v9495_v36 = vmax.f32 %v9459_v46, 0.0  ;;  %v9462_v1 = vadd.f32 %v12696_v43, %v9076_v26 }
 0x4da   : > { %v9319_v45 = vpop.f32.mrf.mxu1 }
 0x4db   : > { %v9615_v47 = vrot.slane %v9601_v11, %v17500_v0  ;;  %v9616_v10 = vcombine.high %v9608_v54, %v9608_v54  ;;  %v9567_v18 = vcombine.high %v9495_v36, %v9495_v36  ;;  %v9574_v40 = vrot.slane %v9495_v36, %v17500_v0 }
 0x4dc   : > { %v9498_v26 = vmax.f32 %v9462_v1, 0.0  ;;  %v9460_v30 = vadd.f32 %v9319_v45, %v9074_v57  ;;  %v12699_v35 = vpop.f32.mrf.mxu1 }
 0x4dd   : > { %v10205_v52 = vcombine.low %v9616_v10, %v9615_v47  ;;  %v9581_v8 = vrot.slane %v9567_v18, %v17500_v0  ;;  %v9582_v25 = vcombine.high %v9574_v40, %v9574_v40  ;;  %v9617_v28 = vcombine.high %v9615_v47, %v9615_v47 }
 0x4de   : > { %v9618_v6 = vcombine.high %v9498_v26, %v9498_v26  ;;  %v9625_v62 = vrot.slane %v9498_v26, %v17500_v0  ;;  %v9496_v15 = vmax.f32 %v9460_v30, 0.0  ;;  %v9465_v24 = vadd.f32 %v12699_v35, %v9079_v17  ;;  %v9332_v46 = vpop.f32.mrf.mxu1 }
 0x4df   : > { %v10213_v23 = vrot.slane %v10205_v52, %v17500_v0  ;;  %v9583_v39 = vcombine.high %v9581_v8, %v9581_v8  ;;  %v10171_v9 = vcombine.low %v9574_v40, %v9582_v25  ;;  %v9463_v53 = vadd.f32 %v9332_v46, %v16669_v37 }
 0x4e0   : > { %v9632_v57 = vrot.slane %v9618_v6, %v17500_v0  ;;  %v9633_v42 = vcombine.high %v9625_v62, %v9625_v62  ;;  %v10206_v43 = vcombine.low %v9617_v28, %v9625_v62  ;;  %v9584_v7 = vcombine.high %v9496_v15, %v9496_v15  ;;  %v12700_v22 = vpop.f32.mrf.mxu1 }
 0x4e1   : > { %v10172_v59 = vcombine.low %v9581_v8, %v9583_v39  ;;  %v10179_v11 = vrot.slane %v10171_v9, %v17500_v0  ;;  %v9591_v54 = vrot.slane %v9496_v15, %v17500_v0  ;;  %v9501_v17 = vmax.f32 %v9465_v24, 0.0 }
 0x4e2   : > { %v10220_v36 = vrot.slane %v10206_v43, %v17500_v0  ;;  %v10222_v1 = vcombine.low %v9633_v42, %v9632_v57  ;;  %v9598_v45 = vrot.slane %v9584_v7, %v17500_v0  ;;  %v9499_v47 = vmax.f32 %v9463_v53, 0.0  ;;  %v9335_v37 = vpop.f32.mrf.mxu1 }
 0x4e3   : > { %v10186_v10 = vrot.slane %v10172_v59, %v17500_v0  ;;  %v9599_v18 = vcombine.high %v9591_v54, %v9591_v54  ;;  %v9668_v40 = vcombine.high %v9501_v17, %v9501_v17  ;;  %v9675_v26 = vrot.slane %v9501_v17, %v17500_v0 }
 0x4e4   : > { %v10221_v30 = vcombine.low %v10213_v23, %v10220_v36  ;;  %v10230_v35 = vrot.slane %v10222_v1, %v17500_v0  ;;  %v9600_v52 = vcombine.high %v9598_v45, %v9598_v45  ;;  %v9634_v8 = vcombine.high %v9632_v57, %v9632_v57  ;;  %v12703_v25 = vpop.f32.mrf.mxu1 }
 0x4e5   : > { %v10187_v28 = vcombine.low %v10179_v11, %v10186_v10  ;;  %v10188_v6 = vcombine.low %v9591_v54, %v9599_v18  ;;  %v9682_v62 = vrot.slane %v9668_v40, %v17500_v0  ;;  %v9683_v15 = vcombine.high %v9675_v26, %v9675_v26 }
 0x4e6   : > { %10749 = vst [vmem:[%s16785_s10 + $0x10] sm:$0xff] %v10221_v30  ;;  %v10189_v24 = vcombine.low %v9598_v45, %v9600_v52  ;;  %v9635_v46 = vcombine.high %v9499_v47, %v9499_v47  ;;  %v9642_v39 = vrot.slane %v9499_v47, %v17500_v0  ;;  %v9466_v23 = vadd.f32 %v12700_v22, %v16673_v51  ;;  %v9348_v9 = vpop.f32.mrf.mxu1 }
 0x4e7   : > { %10747 = vst [vmem:[%s16785_s10] sm:$0xff] %v10187_v28  ;;  %v10196_v53 = vrot.slane %v10188_v6, %v17500_v0  ;;  %v9684_v57 = vcombine.high %v9682_v62, %v9682_v62  ;;  %v16792_v42 = vcombine.low %v9675_v26, %v9683_v15  ;;  %v9464_v43 = vadd.f32 %v9335_v37, %v16677_v29 }
 0x4e8   : > { %v10203_v7 = vrot.slane %v10189_v24, %v17500_v0  ;;  %v9649_v59 = vrot.slane %v9635_v46, %v17500_v0  ;;  %v10223_v11 = vcombine.low %v9634_v8, %v9642_v39  ;;  %v9502_v54 = vmax.f32 %v9466_v23, 0.0  ;;  %v12704_v17 = vpop.f32.mrf.mxu1 }
 0x4e9   : > { %v10271_v51 = vrot.slane %v16792_v42, %v17500_v0  ;;  %v9500_v22 = vmax.f32 %v9464_v43, 0.0  ;;  %v9469_v36 = vadd.f32 %v12703_v25, %v16681_v38  ;;  %v9467_v1 = vadd.f32 %v9348_v9, %v16688_v61 }
 0x4ea   : > { %v10204_v45 = vcombine.low %v10196_v53, %v10203_v7  ;;  %v9650_v47 = vcombine.high %v9649_v59, %v9649_v59  ;;  %v10237_v29 = vrot.slane %v10223_v11, %v17500_v0  ;;  %v9685_v37 = vcombine.high %v9502_v54, %v9502_v54  ;;  %v9351_v10 = vpop.f32.mrf.mxu1 }
 0x4eb   : > { %v9692_v18 = vrot.slane %v9502_v54, %v17500_v0  ;;  %v9651_v40 = vcombine.high %v9500_v22, %v9500_v22  ;;  %v9658_v26 = vrot.slane %v9500_v22, %v17500_v0  ;;  %v9505_v30 = vmax.f32 %v9469_v36, 0.0 }
 0x4ec   : > { %10748 = vst [vmem:[%s16785_s10 + $0x8] sm:$0xff] %v10204_v45  ;;  %v10238_v52 = vcombine.low %v10230_v35, %v10237_v29  ;;  %v10239_v8 = vcombine.low %v9649_v59, %v9650_v47  ;;  %v9699_v38 = vrot.slane %v9685_v37, %v17500_v0  ;;  %v9503_v25 = vmax.f32 %v9467_v1, 0.0  ;;  %v12707_v61 = vpop.f32.mrf.mxu1 }
 0x4ed   : > { %v9700_v28 = vcombine.high %v9692_v18, %v9692_v18  ;;  %v10273_v6 = vcombine.low %v9684_v57, %v9692_v18  ;;  %v9665_v62 = vrot.slane %v9651_v40, %v17500_v0  ;;  %v9666_v15 = vcombine.high %v9658_v26, %v9658_v26 }
 0x4ee   : > { %v10247_v24 = vrot.slane %v10239_v8, %v17500_v0  ;;  %10750 = vst [vmem:[%s16785_s10 + $0x18] sm:$0xff] %v10238_v52  ;;  %v9735_v46 = vcombine.high %v9505_v30, %v9505_v30  ;;  %v9742_v39 = vrot.slane %v9505_v30, %v17500_v0  ;;  %v9701_v23 = vcombine.high %v9699_v38, %v9699_v38  ;;  %v9364_v9 = vpop.f32.mrf.mxu1 }
 0x4ef   : > { %v10274_v53 = vcombine.low %v9700_v28, %v9699_v38  ;;  %v10281_v35 = vrot.slane %v10273_v6, %v17500_v0  ;;  %v9667_v42 = vcombine.high %v9665_v62, %v9665_v62  ;;  %v10240_v43 = vcombine.low %v9658_v26, %v9666_v15 }
 0x4f0   : > { %v9749_v7 = vrot.slane %v9735_v46, %v17500_v0  ;;  %v9750_v59 = vcombine.high %v9742_v39, %v9742_v39  ;;  %v9702_v57 = vcombine.high %v9503_v25, %v9503_v25  ;;  %v9709_v11 = vrot.slane %v9503_v25, %v17500_v0  ;;  %v12708_v54 = vpop.f32.mrf.mxu1 }
 0x4f1   : > { %v10288_v22 = vrot.slane %v10274_v53, %v17500_v0  ;;  %v10254_v36 = vrot.slane %v10240_v43, %v17500_v0  ;;  %v10256_v1 = vcombine.low %v9665_v62, %v9667_v42  ;;  %v9470_v45 = vadd.f32 %v12704_v17, %v16692_v3 }
 0x4f2   : > { %v9751_v47 = vcombine.high %v9749_v7, %v9749_v7  ;;  %v10324_v29 = vcombine.low %v9742_v39, %v9750_v59  ;;  %v9716_v37 = vrot.slane %v9702_v57, %v17500_v0  ;;  %v9717_v18 = vcombine.high %v9709_v11, %v9709_v11  ;;  %v16817_v40 = vpop.f32.mrf.mxu1 }
 0x4f3   : > { %v10289_v26 = vcombine.low %v10281_v35, %v10288_v22  ;;  %v10255_v30 = vcombine.low %v10247_v24, %v10254_v36  ;;  %v10264_v52 = vrot.slane %v10256_v1, %v17500_v0  ;;  %v10290_v8 = vcombine.low %v9701_v23, %v9709_v11 }
 0x4f4   : > { %v10325_v38 = vcombine.low %v9749_v7, %v9751_v47  ;;  %v10332_v25 = vrot.slane %v10324_v29, %v17500_v0  ;;  %v10291_v28 = vcombine.low %v9717_v18, %v9716_v37  ;;  %v9506_v6 = vmax.f32 %v9470_v45, 0.0  ;;  %v16821_v3 = vpop.f32.mrf.mxu1 }
 0x4f5   : > { %10753 = vst [vmem:[%s16785_s10 + $0x30] sm:$0xff] %v10289_v26  ;;  %v10272_v17 = vcombine.low %v10264_v52, %v10271_v51  ;;  %10751 = vst [vmem:[%s16785_s10 + $0x20] sm:$0xff] %v10255_v30  ;;  %v10298_v62 = vrot.slane %v10290_v8, %v17500_v0  ;;  %v9468_v15 = vadd.f32 %v9351_v10, %v16696_v50 }
 0x4f6   : > { %v9473_v24 = vadd.f32 %v12707_v61, %v16700_v34  ;;  %v10339_v46 = vrot.slane %v10325_v38, %v17500_v0  ;;  %v10305_v39 = vrot.slane %v10291_v28, %v17500_v0  ;;  %v9752_v23 = vcombine.high %v9506_v6, %v9506_v6  ;;  %v9380_v35 = vpop.f32.mrf.mxu1 }
 0x4f7   : > { %v9759_v53 = vrot.slane %v9506_v6, %v17500_v0  ;;  %10752 = vst [vmem:[%s16785_s10 + $0x28] sm:$0xff] %v10272_v17  ;;  %v9504_v42 = vmax.f32 %v9468_v15, 0.0  ;;  %v9471_v43 = vadd.f32 %v9364_v9, %v16704_v55  ;;  %v9474_v7 = vadd.f32 %v12708_v54, %v16708_v20 }
 0x4f8   : > { %v9509_v51 = vmax.f32 %v9473_v24, 0.0  ;;  %v10340_v50 = vcombine.low %v10332_v25, %v10339_v46  ;;  %v10306_v10 = vcombine.low %v10298_v62, %v10305_v39  ;;  %v9766_v34 = vrot.slane %v9752_v23, %v17500_v0  ;;  %v12712_v59 = vpop.f32.mrf.mxu1 }
 0x4f9   : > { %v9767_v61 = vcombine.high %v9759_v53, %v9759_v53  ;;  %v9718_v57 = vcombine.high %v9504_v42, %v9504_v42  ;;  %v9725_v11 = vrot.slane %v9504_v42, %v17500_v0  ;;  %v9507_v45 = vmax.f32 %v9471_v43, 0.0 }
 0x4fa   : > { %v9802_v22 = vcombine.high %v9509_v51, %v9509_v51  ;;  %v9809_v36 = vrot.slane %v9509_v51, %v17500_v0  ;;  %10756 = vst [vmem:[%s16785_s10 + $0x48] sm:$0xff] %v10340_v50  ;;  %10754 = vst [vmem:[%s16785_s10 + $0x38] sm:$0xff] %v10306_v10  ;;  %v9768_v47 = vcombine.high %v9766_v34, %v9766_v34  ;;  %v9510_v55 = vmax.f32 %v9474_v7, 0.0  ;;  %v9383_v9 = vpop.f32.mrf.mxu1 }
 0x4fb   : > { %v10341_v1 = vcombine.low %v9767_v61, %v9766_v34  ;;  %v9732_v20 = vrot.slane %v9718_v57, %v17500_v0  ;;  %v9733_v54 = vcombine.high %v9725_v11, %v9725_v11  ;;  %v9769_v26 = vcombine.high %v9507_v45, %v9507_v45 }
 0x4fc   : > { %v9816_v29 = vrot.slane %v9802_v22, %v17500_v0  ;;  %v9817_v37 = vcombine.high %v9809_v36, %v9809_v36  ;;  %v9776_v30 = vrot.slane %v9507_v45, %v17500_v0  ;;  %v9819_v52 = vcombine.high %v9510_v55, %v9510_v55  ;;  %v12715_v8 = vpop.f32.mrf.mxu1 }
 0x4fd   : > { %v10349_v18 = vrot.slane %v10341_v1, %v17500_v0  ;;  %v9734_v38 = vcombine.high %v9732_v20, %v9732_v20  ;;  %v10307_v25 = vcombine.low %v9725_v11, %v9733_v54  ;;  %v9783_v17 = vrot.slane %v9769_v26, %v17500_v0 }
 0x4fe   : > { %v9818_v28 = vcombine.high %v9816_v29, %v9816_v29  ;;  %v16843_v6 = vcombine.low %v9809_v36, %v9817_v37  ;;  %v9784_v62 = vcombine.high %v9776_v30, %v9776_v30  ;;  %v10342_v15 = vcombine.low %v9768_v47, %v9776_v30  ;;  %v16847_v46 = vpop.f32.mrf.mxu1 }
 0x4ff   : > { %v9826_v24 = vrot.slane %v9510_v55, %v17500_v0  ;;  %v10308_v39 = vcombine.low %v9732_v20, %v9734_v38  ;;  %v10315_v23 = vrot.slane %v10307_v25, %v17500_v0  ;;  %v9833_v7 = vrot.slane %v9819_v52, %v17500_v0 }
 0x500   : > { %v10390_v53 = vrot.slane %v16843_v6, %v17500_v0  ;;  %v10392_v42 = vcombine.low %v9816_v29, %v9818_v28  ;;  %v10356_v51 = vrot.slane %v10342_v15, %v17500_v0  ;;  %v10358_v43 = vcombine.low %v9784_v62, %v9783_v17  ;;  %v16854_v10 = vpop.f32.mrf.mxu1 }
 0x501   : > { %v9834_v50 = vcombine.high %v9826_v24, %v9826_v24  ;;  %v10322_v34 = vrot.slane %v10308_v39, %v17500_v0  ;;  %v9472_v57 = vadd.f32 %v16817_v40, %v16712_v19  ;;  %v9785_v11 = vcombine.high %v9783_v17, %v9783_v17 }
 0x502   : > { %v10400_v61 = vrot.slane %v10392_v42, %v17500_v0  ;;  %v10357_v22 = vcombine.low %v10349_v18, %v10356_v51  ;;  %v10366_v36 = vrot.slane %v10358_v43, %v17500_v0  ;;  %v9835_v1 = vcombine.high %v9833_v7, %v9833_v7  ;;  %v16861_v47 = vpop.f32.mrf.mxu1 }
 0x503   : > { %v10393_v45 = vcombine.low %v9826_v24, %v9834_v50  ;;  %v10323_v55 = vcombine.low %v10315_v23, %v10322_v34  ;;  %v9508_v20 = vmax.f32 %v9472_v57, 0.0  ;;  %v9477_v54 = vadd.f32 %v16821_v3, %v16716_v56 }
 0x504   : > { %v9475_v29 = vadd.f32 %v9380_v35, %v16720_v16  ;;  %10757 = vst [vmem:[%s16785_s10 + $0x50] sm:$0xff] %v10357_v22  ;;  %v9478_v19 = vadd.f32 %v12712_v59, %v16724_v21  ;;  %v9476_v40 = vadd.f32 %v9383_v9, %v16728_v2  ;;  %v9481_v18 = vadd.f32 %v12715_v8, %v16732_v12  ;;  %v12719_v35 = vpop.f32.mrf.mxu1 }
 0x505   : > { %v10407_v37 = vrot.slane %v10393_v45, %v17500_v0  ;;  %10755 = vst [vmem:[%s16785_s10 + $0x40] sm:$0xff] %v10323_v55  ;;  %v9786_v26 = vcombine.high %v9508_v20, %v9508_v20  ;;  %v9793_v30 = vrot.slane %v9508_v20, %v17500_v0  ;;  %v9513_v52 = vmax.f32 %v9477_v54, 0.0 }
 0x506   : > { %v9511_v38 = vmax.f32 %v9475_v29, 0.0  ;;  %v9514_v56 = vmax.f32 %v9478_v19, 0.0  ;;  %v9512_v3 = vmax.f32 %v9476_v40, 0.0  ;;  %v16873_v16 = vmax.f32 %v9481_v18, 0.0  ;;  %v9412_v7 = vpop.f32.mrf.mxu1 }
 0x507   : > { %v10408_v25 = vcombine.low %v10400_v61, %v10407_v37  ;;  %v9800_v28 = vrot.slane %v9786_v26, %v17500_v0  ;;  %v10359_v21 = vcombine.low %v9785_v11, %v9793_v30  ;;  %v9869_v59 = vcombine.high %v9513_v52, %v9513_v52 }
 0x508   : > { %v9876_v2 = vrot.slane %v9513_v52, %v17500_v0  ;;  %v9836_v12 = vcombine.high %v9511_v38, %v9511_v38  ;;  %v9843_v9 = vrot.slane %v9511_v38, %v17500_v0  ;;  %v9886_v8 = vcombine.high %v9514_v56, %v9514_v56  ;;  %v12720_v18 = vpop.f32.mrf.mxu1 }
 0x509   : > { %10760 = vst [vmem:[%s16785_s10 + $0x68] sm:$0xff] %v10408_v25  ;;  %v9893_v17 = vrot.slane %v9514_v56, %v17500_v0  ;;  %v9801_v62 = vcombine.high %v9800_v28, %v9800_v28  ;;  %v10373_v15 = vrot.slane %v10359_v21, %v17500_v0  ;;  %v9883_v24 = vrot.slane %v9869_v59, %v17500_v0 }
 0x50a   : > { %v9884_v39 = vcombine.high %v9876_v2, %v9876_v2  ;;  %v9850_v23 = vrot.slane %v9836_v12, %v17500_v0  ;;  %v9851_v42 = vcombine.high %v9843_v9, %v9843_v9  ;;  %v10409_v51 = vcombine.low %v9835_v1, %v9843_v9 }
 0x50b   : > { %v9900_v43 = vrot.slane %v9886_v8, %v17500_v0  ;;  %v10374_v50 = vcombine.low %v10366_v36, %v10373_v15  ;;  %v10375_v34 = vcombine.low %v9800_v28, %v9801_v62  ;;  %v9885_v61 = vcombine.high %v9883_v24, %v9883_v24 }
 0x50c   : > { %v10443_v57 = vcombine.low %v9876_v2, %v9884_v39  ;;  %v10410_v11 = vcombine.low %v9851_v42, %v9850_v23  ;;  %v10417_v22 = vrot.slane %v10409_v51, %v17500_v0  ;;  %v9901_v45 = vcombine.high %v9893_v17, %v9893_v17 }
 0x50d   : > { %v9902_v55 = vcombine.high %v9900_v43, %v9900_v43  ;;  %v10383_v20 = vrot.slane %v10375_v34, %v17500_v0  ;;  %10758 = vst [vmem:[%s16785_s10 + $0x58] sm:$0xff] %v10374_v50  ;;  %v10444_v54 = vcombine.low %v9883_v24, %v9885_v61  ;;  %v9852_v1 = vcombine.high %v9850_v23, %v9850_v23 }
 0x50e   : > { %v10451_v29 = vrot.slane %v10443_v57, %v17500_v0  ;;  %v10424_v37 = vrot.slane %v10410_v11, %v17500_v0  ;;  %v10460_v19 = vcombine.low %v9893_v17, %v9901_v45  ;;  %v9853_v40 = vcombine.high %v9512_v3, %v9512_v3  ;;  %v16908_v17 = vpop.f32.mrf.mxu1 }
 0x50f   : > { %v10461_v36 = vcombine.low %v9900_v43, %v9902_v55  ;;  %v10391_v26 = vcombine.low %v10383_v20, %v10390_v53  ;;  %v10458_v30 = vrot.slane %v10444_v54, %v17500_v0  ;;  %v9860_v52 = vrot.slane %v9512_v3, %v17500_v0 }
 0x510   : > { %v9937_v38 = vcombine.high %v16873_v16, %v16873_v16  ;;  %v10425_v25 = vcombine.low %v10417_v22, %v10424_v37  ;;  %v10468_v56 = vrot.slane %v10460_v19, %v17500_v0  ;;  %v9867_v21 = vrot.slane %v9853_v40, %v17500_v0 }
 0x511   : > { %v10475_v28 = vrot.slane %v10461_v36, %v17500_v0  ;;  %10759 = vst [vmem:[%s16785_s10 + $0x60] sm:$0xff] %v10391_v26  ;;  %v10459_v59 = vcombine.low %v10451_v29, %v10458_v30  ;;  %v9868_v6 = vcombine.high %v9860_v52, %v9860_v52  ;;  %v10426_v53 = vcombine.low %v9852_v1, %v9860_v52 }
 0x512   : > { %v9944_v2 = vrot.slane %v16873_v16, %v17500_v0  ;;  %10761 = vst [vmem:[%s16785_s10 + $0x70] sm:$0xff] %v10425_v25  ;;  %v9951_v12 = vrot.slane %v9937_v38, %v17500_v0  ;;  %v9479_v9 = vadd.f32 %v16847_v46, %v16735_v31  ;;  %v9482_v8 = vadd.f32 %v16854_v10, %v16738_v33 }
 0x513   : > { %v10476_v3 = vcombine.low %v10468_v56, %v10475_v28  ;;  %10763 = vst [vmem:[%s16785_s10 + $0x80] sm:$0xff] %v10459_v59  ;;  %v10427_v62 = vcombine.low %v9868_v6, %v9867_v21  ;;  %v10434_v15 = vrot.slane %v10426_v53, %v17500_v0  ;;  %v9480_v24 = vadd.f32 %v16861_v47, %v16741_v27  ;;  %v12723_v47 = vpop.f32.mrf.mxu1 }
 0x514   : > { %v9485_v16 = vadd.f32 %v12719_v35, %v16744_v13  ;;  %v9952_v39 = vcombine.high %v9951_v12, %v9951_v12  ;;  %v9515_v23 = vmax.f32 %v9479_v9, 0.0  ;;  %v9518_v42 = vmax.f32 %v9482_v8, 0.0 }
 0x515   : > { %10764 = vst [vmem:[%s16785_s10 + $0x88] sm:$0xff] %v10476_v3  ;;  %v9483_v31 = vadd.f32 %v9412_v7, %v16747_v48  ;;  %v10441_v46 = vrot.slane %v10427_v62, %v17500_v0  ;;  %v9516_v33 = vmax.f32 %v9480_v24, 0.0  ;;  %v9486_v51 = vadd.f32 %v12720_v18, %v16750_v44  ;;  %v9428_v19 = vpop.f32.mrf.mxu1 }
 0x516   : > { %v9521_v10 = vmax.f32 %v9485_v16, 0.0  ;;  %v10511_v43 = vcombine.low %v9951_v12, %v9952_v39  ;;  %v9903_v50 = vcombine.high %v9515_v23, %v9515_v23  ;;  %v9910_v34 = vrot.slane %v9515_v23, %v17500_v0 }
 0x517   : > { %v9953_v27 = vcombine.high %v9518_v42, %v9518_v42  ;;  %v10442_v13 = vcombine.low %v10434_v15, %v10441_v46  ;;  %v9960_v35 = vrot.slane %v9518_v42, %v17500_v0  ;;  %v9920_v61 = vcombine.high %v9516_v33, %v9516_v33  ;;  %v12724_v9 = vpop.f32.mrf.mxu1 }
 0x518   : > { %v9927_v57 = vrot.slane %v9516_v33, %v17500_v0  ;;  %v10519_v48 = vrot.slane %v10511_v43, %v17500_v0  ;;  %v9917_v7 = vrot.slane %v9903_v50, %v17500_v0  ;;  %v9918_v11 = vcombine.high %v9910_v34, %v9910_v34 }
 0x519   : > { %v9967_v22 = vrot.slane %v9953_v27, %v17500_v0  ;;  %10762 = vst [vmem:[%s16785_s10 + $0x78] sm:$0xff] %v10442_v13  ;;  %v9968_v44 = vcombine.high %v9960_v35, %v9960_v35  ;;  %v9934_v45 = vrot.slane %v9920_v61, %v17500_v0  ;;  %v10004_v20 = vcombine.high %v9521_v10, %v9521_v10  ;;  %v9431_v34 = vpop.f32.mrf.mxu1 }
 0x51a   : > { %v9935_v55 = vcombine.high %v9927_v57, %v9927_v57  ;;  %v10477_v54 = vcombine.low %v9918_v11, %v9917_v7  ;;  %v9919_v1 = vcombine.high %v9917_v7, %v9917_v7  ;;  %v16928_v37 = vrot.slane %v9521_v10, %v17500_v0 }
 0x51b   : > { %v9969_v29 = vcombine.high %v9967_v22, %v9967_v22  ;;  %v10512_v36 = vcombine.low %v9960_v35, %v9968_v44  ;;  %v9936_v40 = vcombine.high %v9934_v45, %v9934_v45  ;;  %v10018_v26 = vrot.slane %v10004_v20, %v17500_v0 }
 0x51c   : > { %v10494_v18 = vcombine.low %v9935_v55, %v9934_v45  ;;  %v10485_v30 = vrot.slane %v10477_v54, %v17500_v0  ;;  %v10478_v38 = vcombine.low %v9919_v1, %v9927_v57  ;;  %v10019_v25 = vcombine.high %v16928_v37, %v16928_v37  ;;  %v12727_v55 = vpop.f32.mrf.mxu1 }
 0x51d   : > { %v10528_v52 = vcombine.low %v9967_v22, %v9969_v29  ;;  %v10526_v56 = vrot.slane %v10512_v36, %v17500_v0  ;;  %v10495_v28 = vcombine.low %v9936_v40, %v9944_v2  ;;  %v9519_v59 = vmax.f32 %v9483_v31, 0.0 }
 0x51e   : > { %v10502_v21 = vrot.slane %v10494_v18, %v17500_v0  ;;  %v10492_v53 = vrot.slane %v10478_v38, %v17500_v0  ;;  %v16938_v3 = vcombine.low %v10019_v25, %v10018_v26  ;;  %v9522_v12 = vmax.f32 %v9486_v51, 0.0 }
 0x51f   : > { %v10536_v6 = vrot.slane %v10528_v52, %v17500_v0  ;;  %v10527_v8 = vcombine.low %v10519_v48, %v10526_v56  ;;  %v10509_v62 = vrot.slane %v10495_v28, %v17500_v0  ;;  %v9970_v15 = vcombine.high %v9519_v59, %v9519_v59 }
 0x520   : > { %v9977_v24 = vrot.slane %v9519_v59, %v17500_v0  ;;  %v10493_v2 = vcombine.low %v10485_v30, %v10492_v53  ;;  %v10577_v16 = vrot.slane %v16938_v3, %v17500_v0  ;;  %v10020_v39 = vcombine.high %v9522_v12, %v9522_v12 }
 0x521   : > { %v10027_v23 = vrot.slane %v9522_v12, %v17500_v0  ;;  %10767 = vst [vmem:[%s16785_s10 + $0xa0] sm:$0xff] %v10527_v8  ;;  %v10510_v42 = vcombine.low %v10502_v21, %v10509_v62  ;;  %v9984_v31 = vrot.slane %v9970_v15, %v17500_v0  ;;  %v9484_v33 = vadd.f32 %v16908_v17, %v16752_v58  ;;  %v9444_v21 = vpop.f32.mrf.mxu1 }
 0x522   : > { %v9985_v46 = vcombine.high %v9977_v24, %v9977_v24  ;;  %10765 = vst [vmem:[%s16785_s10 + $0x90] sm:$0xff] %v10493_v2  ;;  %v10034_v10 = vrot.slane %v10020_v39, %v17500_v0  ;;  %v9489_v43 = vadd.f32 %v12723_v47, %v16754_v49  ;;  %v9487_v50 = vadd.f32 %v9428_v19, %v16759_v5 }
 0x523   : > { %v10035_v51 = vcombine.high %v10027_v23, %v10027_v23  ;;  %10766 = vst [vmem:[%s16785_s10 + $0x98] sm:$0xff] %v10510_v42  ;;  %v9986_v27 = vcombine.high %v9984_v31, %v9984_v31  ;;  %v9520_v35 = vmax.f32 %v9484_v33, 0.0  ;;  %v9490_v61 = vadd.f32 %v12724_v9, %v16761_v14  ;;  %v12728_v33 = vpop.f32.mrf.mxu1 }
 0x524   : > { %v10529_v13 = vcombine.low %v9977_v24, %v9985_v46  ;;  %v10036_v57 = vcombine.high %v10034_v10, %v10034_v10  ;;  %v9525_v7 = vmax.f32 %v9489_v43, 0.0  ;;  %v9523_v11 = vmax.f32 %v9487_v50, 0.0  ;;  %v9061_v50 = vpop.f32.mrf.mxu0 }
 0x525   : > { %v10579_v48 = vcombine.low %v10027_v23, %v10035_v51  ;;  %v9987_v17 = vcombine.high %v9520_v35, %v9520_v35  ;;  %v9994_v22 = vrot.slane %v9520_v35, %v17500_v0  ;;  %v9526_v49 = vmax.f32 %v9490_v61, 0.0 }
 0x526   : > { %v10543_v58 = vrot.slane %v10529_v13, %v17500_v0  ;;  %v10580_v47 = vcombine.low %v10034_v10, %v10036_v57  ;;  %v10071_v44 = vcombine.high %v9525_v7, %v9525_v7  ;;  %v16959_v45 = vrot.slane %v9525_v7, %v17500_v0  ;;  %v9447_v7 = vpop.f32.mrf.mxu1 }
 0x527   : > { %v10587_v5 = vrot.slane %v10579_v48, %v17500_v0  ;;  %v10001_v20 = vrot.slane %v9987_v17, %v17500_v0  ;;  %v10002_v54 = vcombine.high %v9994_v22, %v9994_v22  ;;  %v10545_v29 = vcombine.low %v9986_v27, %v9994_v22 }
 0x528   : > { %v10544_v14 = vcombine.low %v10536_v6, %v10543_v58  ;;  %v10594_v1 = vrot.slane %v10580_v47, %v17500_v0  ;;  %v10085_v19 = vrot.slane %v10071_v44, %v17500_v0  ;;  %v10086_v36 = vcombine.high %v16959_v45, %v16959_v45 }
 0x529   : > { %v10037_v40 = vcombine.high %v9523_v11, %v9523_v11  ;;  %v10003_v18 = vcombine.high %v10001_v20, %v10001_v20  ;;  %v10546_v26 = vcombine.low %v10002_v54, %v10001_v20  ;;  %v10553_v30 = vrot.slane %v10545_v29, %v17500_v0 }
 0x52a   : > { %10768 = vst [vmem:[%s16785_s10 + $0xa8] sm:$0xff] %v10544_v14  ;;  %v10044_v52 = vrot.slane %v9523_v11, %v17500_v0  ;;  %v10595_v38 = vcombine.low %v10587_v5, %v10594_v1  ;;  %v10630_v25 = vcombine.low %v10086_v36, %v10085_v19  ;;  %v10087_v28 = vcombine.high %v10085_v19, %v10085_v19 }
 0x52b   : > { %v10051_v56 = vrot.slane %v10037_v40, %v17500_v0  ;;  %v10560_v59 = vrot.slane %v10546_v26, %v17500_v0  ;;  %v10562_v6 = vcombine.low %v10003_v18, %v16928_v37  ;;  %v10088_v12 = vcombine.high %v9526_v49, %v9526_v49 }
 0x52c   : > { %v10052_v53 = vcombine.high %v10044_v52, %v10044_v52  ;;  %10771 = vst [vmem:[%s16785_s10 + $0xc0] sm:$0xff] %v10595_v38  ;;  %v10638_v9 = vrot.slane %v10630_v25, %v17500_v0  ;;  %v10095_v62 = vrot.slane %v9526_v49, %v17500_v0  ;;  %v9488_v15 = vadd.f32 %v9431_v34, %v16763_v41 }
 0x52d   : > { %v10053_v8 = vcombine.high %v10051_v56, %v10051_v56  ;;  %v10561_v24 = vcombine.low %v10553_v30, %v10560_v59  ;;  %v10570_v2 = vrot.slane %v10562_v6, %v17500_v0  ;;  %v10102_v23 = vrot.slane %v10088_v12, %v17500_v0 }
 0x52e   : > { %v10596_v39 = vcombine.low %v10044_v52, %v10052_v53  ;;  %v10631_v37 = vcombine.low %v10087_v28, %v10095_v62  ;;  %v9524_v31 = vmax.f32 %v9488_v15, 0.0  ;;  %v9493_v46 = vadd.f32 %v12727_v55, %v16757_v63 }
 0x52f   : > { %v10597_v42 = vcombine.low %v10051_v56, %v10053_v8  ;;  %v10578_v10 = vcombine.low %v10570_v2, %v10577_v16  ;;  %10769 = vst [vmem:[%s16785_s10 + $0xb0] sm:$0xff] %v10561_v24  ;;  %v10103_v51 = vcombine.high %v10102_v23, %v10102_v23  ;;  %v9491_v43 = vadd.f32 %v9444_v21, %v16767_v60 }
 0x530   : > { %v10604_v41 = vrot.slane %v10596_v39, %v17500_v0  ;;  %v10645_v27 = vrot.slane %v10631_v37, %v17500_v0  ;;  %v10054_v13 = vcombine.high %v9524_v31, %v9524_v31  ;;  %v10061_v63 = vrot.slane %v9524_v31, %v17500_v0 }
 0x531   : > { %v10611_v34 = vrot.slane %v10597_v42, %v17500_v0  ;;  %10770 = vst [vmem:[%s16785_s10 + $0xb8] sm:$0xff] %v10578_v10  ;;  %v9529_v35 = vmax.f32 %v9493_v46, 0.0  ;;  %v9527_v3 = vmax.f32 %v9491_v43, 0.0  ;;  %v9494_v16 = vadd.f32 %v12728_v33, %v16769_v32 }
 0x532   : > { %v10646_v57 = vcombine.low %v10638_v9, %v10645_v27  ;;  %v10068_v48 = vrot.slane %v10054_v13, %v17500_v0  ;;  %v10069_v60 = vcombine.high %v10061_v63, %v10061_v63  ;;  %v9106_v11 = vadd.f32 %v9061_v50, %v16684_v4 }
 0x533   : > { %v10612_v61 = vcombine.low %v10604_v41, %v10611_v34  ;;  %v10647_v58 = vcombine.low %v10102_v23, %v10103_v51  ;;  %v10138_v17 = vcombine.high %v9529_v35, %v9529_v35  ;;  %v10104_v22 = vcombine.high %v9527_v3, %v9527_v3 }
 0x534   : > { %10774 = vst [vmem:[%s16785_s10 + $0xd8] sm:$0xff] %v10646_v57  ;;  %v10070_v49 = vcombine.high %v10068_v48, %v10068_v48  ;;  %v10613_v47 = vcombine.low %v10069_v60, %v10068_v48  ;;  %v10111_v5 = vrot.slane %v9527_v3, %v17500_v0  ;;  %v9530_v44 = vmax.f32 %v9494_v16, 0.0 }
 0x535   : > { %10772 = vst [vmem:[%s16785_s10 + $0xc8] sm:$0xff] %v10612_v61  ;;  %v10145_v32 = vrot.slane %v9529_v35, %v17500_v0  ;;  %v10152_v55 = vrot.slane %v10138_v17, %v17500_v0  ;;  %v10118_v14 = vrot.slane %v10104_v22, %v17500_v0  ;;  %v9492_v20 = vadd.f32 %v9447_v7, %v9106_v11 }
 0x536   : > { %v10614_v54 = vcombine.low %v10070_v49, %v16959_v45  ;;  %v10119_v4 = vcombine.high %v10111_v5, %v10111_v5  ;;  %v10155_v29 = vcombine.high %v9530_v44, %v9530_v44  ;;  %v10621_v1 = vrot.slane %v10613_v47, %v17500_v0 }
 0x537   : > { %v10120_v19 = vcombine.high %v10118_v14, %v10118_v14  ;;  %v10154_v36 = vcombine.high %v10152_v55, %v10152_v55  ;;  %v10162_v40 = vrot.slane %v9530_v44, %v17500_v0  ;;  %v9528_v52 = vmax.f32 %v9492_v20, 0.0 }
 0x538   : > { %v10628_v18 = vrot.slane %v10614_v54, %v17500_v0  ;;  %v10648_v26 = vcombine.low %v10111_v5, %v10119_v4  ;;  %v10169_v30 = vrot.slane %v10155_v29, %v17500_v0  ;;  %v10655_v38 = vrot.slane %v10647_v58, %v17500_v0 }
 0x539   : > { %v10153_v25 = vcombine.high %v10145_v32, %v10145_v32  ;;  %v10170_v45 = vcombine.high %v10162_v40, %v10162_v40  ;;  %v10698_v56 = vcombine.low %v10154_v36, %v10162_v40  ;;  %v10121_v59 = vcombine.high %v9528_v52, %v9528_v52 }
 0x53a   : > { %v10629_v28 = vcombine.low %v10621_v1, %v10628_v18  ;;  %v10662_v21 = vrot.slane %v10648_v26, %v17500_v0  ;;  %v10128_v6 = vrot.slane %v9528_v52, %v17500_v0  ;;  %v10664_v9 = vcombine.low %v10118_v14, %v10120_v19 }
 0x53b   : > { %v10699_v53 = vcombine.low %v10170_v45, %v10169_v30  ;;  %v10135_v8 = vrot.slane %v10121_v59, %v17500_v0  ;;  %v10706_v15 = vrot.slane %v10698_v56, %v17500_v0  ;;  %v10682_v2 = vcombine.low %v10153_v25, %v10152_v55 }
 0x53c   : > { %10773 = vst [vmem:[%s16785_s10 + $0xd0] sm:$0xff] %v10629_v28  ;;  %v10663_v12 = vcombine.low %v10655_v38, %v10662_v21  ;;  %v10136_v62 = vcombine.high %v10128_v6, %v10128_v6  ;;  %v10672_v37 = vrot.slane %v10664_v9, %v17500_v0 }
 0x53d   : > { %v10713_v24 = vrot.slane %v10699_v53, %v17500_v0  ;;  %v10137_v39 = vcombine.high %v10135_v8, %v10135_v8  ;;  %v10696_v33 = vrot.slane %v10682_v2, %v17500_v0 }
 0x53e   : > { %10775 = vst [vmem:[%s16785_s10 + $0xe0] sm:$0xff] %v10663_v12  ;;  %v10665_v23 = vcombine.low %v10128_v6, %v10136_v62 }
 0x53f   : > { %v10714_v42 = vcombine.low %v10706_v15, %v10713_v24  ;;  %v10681_v46 = vcombine.low %v10137_v39, %v10145_v32 }
 0x540   : > { %v10679_v31 = vrot.slane %v10665_v23, %v17500_v0 }
 0x541   : > { %10778 = vst [vmem:[%s16785_s10 + $0xf8] sm:$0xff] %v10714_v42  ;;  %v10689_v41 = vrot.slane %v10681_v46, %v17500_v0 }
 0x542   : > { %v10680_v10 = vcombine.low %v10672_v37, %v10679_v31 }
 0x543   : > { %v10697_v51 = vcombine.low %v10689_v41, %v10696_v33 }
 0x544   : > { %10776 = vst [vmem:[%s16785_s10 + $0xe8] sm:$0xff] %v10680_v10 }
 0x545   : > { %10777 = vst [vmem:[%s16785_s10 + $0xf0] sm:$0xff] %v10697_v51 }
 0x546   : > { %13149 = shalt.err (!%p13146_p9)
}
 0x547   : > { %s13150_s11 = scalar_lea.hbm %s17021_s7, 4096  ;;  %s13154_s29 = scalar_lea.hbm %s17073_s5, 8192 }
 0x548   : > { %p13151_p13 = scmp.ne.s32.totalorder %s17021_s7, %s13150_s11  ;;  %p13155_p4 = scmp.lt.s32.totalorder %s17021_s7, %s17073_s5 }
 0x549   : > { %p13156_p8 = scmp.lt.s32.totalorder %s13154_s29, %s13150_s11 }
 0x54a   : > { %p13152_p5 = pnand %p13151_p13, %p17501_p10 }
 0x54b   : > { %p13157_p3 = por %p13156_p8, %p13155_p4 }
 0x54c   : > { %p13153_p0 = pneg %p13152_p5 }
 0x54e   : > { %p13158_p11 = pnand %p13157_p3, %p13153_p0 }
 0x550   : > { %13161 = shalt.err (!%p13158_p11)
}
 0x551   : > { %s13220_s13 = smov 128   ;;  %s13221_s17 = smov 8  }
 0x552   : > { %12742 = dma.vmem_to_hbm [thread:$0]  (%p17501_p10), %s17023_s14, 4096, %s17021_s7, %s10780_s22, %s13220_s13, %s13220_s13, %s13221_s17  }
 0x553 PF: > { %s10808_s30 = sand.u32 1, %s13192_s18   ;;  %p17502_p1 = scmp.ne.s32.totalorder %s17129_s25, 0 }
 0x554   : > { %p17503_p2 = scmp.ge.s32.totalorder %s13204_s21, 2  ;;  %s10809_s24 = scalar_lea.sflag [#allocation5], %s10808_s30 }
 0x556   : > { %p12756_p6 = pnand %p17503_p2, %p17502_p1 }
 0x558   : > { %p12757_p12 = pneg %p12756_p6 }
 0x55a   : > { %13187 = dma.done.wait (%p12757_p12), %s10809_s24, 4096  }
 0x55b   : > { %13189 = vsyncadd (%p12757_p12), %s10809_s24, 4294963200  ;;  %p19_p7 = scmp.ge.s32.totalorder %s13324_s15, 4   ;;  %s17504_s18 = smov %s13196_s19 }
 0x55c   : > { %s17505_s19 = smov %s13200_s20  ;;  %s17506_s20 = smov %s13340_s27 }
 0x55d   : > { %s17507_s21 = smov %s13324_s15  ;;  %21 = sbr.rel (!%p19_p7) target bundleno = 6 (0x6), region = 109 }
 0x562   :  { %10814 = vsyncpa [#allocation4], 1 }
 0x563   :  { %10816 = vsyncpa [#allocation4 + $0x1], 1 }
 0x564   :  { %10817 = vsyncpa [#allocation7], 1 }
 0x565   :  { %10818 = vsyncpa [#allocation5], 1 }
 0x566   :  { %10820 = vsyncpa [#allocation5 + $0x1], 1 }

</bundles_post_ra>
